<compile_context>
chip_gen: v7x
topology: tpu7x:2x2x1
jax: 0.10.0
libtpu: 0.0.40
codegen_flags: <defaults>
</compile_context>

<pallas_src>
import jax
import jax.numpy as jnp
from jax.experimental import pallas as pl
from jax.experimental.pallas import tpu as pltpu

# ----------------------------- configuration -----------------------------
B, F = 2, 2                        # batch, num_frames
C, H, W = 3, 16, 16                # frame is NCHW
PATCH = 8
P = (H // PATCH) * (W // PATCH)    # 4 patches per frame
PD = C * PATCH * PATCH             # 192 = patch vector length
D = 32                             # hidden size (small synthetic ViT)
HEADS = 4
DH = D // HEADS                    # 8
MLP = 64                           # intermediate size
L = 2                              # transformer layers
S = P + 1                          # 5 real tokens (CLS + patches)
S_PAD = 8                          # sequence padded to a full sublane tile
EPS = 1e-6
NEG_INF = -1e9


def _layernorm(x, g, b):
    mu = jnp.mean(x, axis=-1, keepdims=True)
    var = jnp.mean((x - mu) ** 2, axis=-1, keepdims=True)
    return (x - mu) * jax.lax.rsqrt(var + EPS) * g + b


# ------------------------------- kernel ----------------------------------
def vit_kernel(patch_ref, pw_ref, tmpl_ref, bias_ref,
               ln1g_ref, ln1b_ref,
               wq_ref, bq_ref, wk_ref, bk_ref, wv_ref, bv_ref,
               wo_ref, bo_ref,
               ln2g_ref, ln2b_ref,
               wm1_ref, bm1_ref, wm2_ref, bm2_ref,
               lnfg_ref, lnfb_ref, pool_ref,
               out_ref):
    # ---- patch embedding for every (batch, frame) token row at once ----
    tokens = (jnp.dot(patch_ref[0], pw_ref[...],
                      preferred_element_type=jnp.float32)
              + tmpl_ref[...])                                  # (RT, D) f32

    attn_bias = bias_ref[...]      # hoisted: loaded once, reused L*HEADS times

    for l in range(L):             # static layer loop (L = 2)
        h = tokens
        # --- attention block (pre-LN); full-width Q/K/V projections (bf16) ---
        hn = _layernorm(h, ln1g_ref[l], ln1b_ref[l]).astype(jnp.bfloat16)
        q = jnp.dot(hn, wq_ref[l], preferred_element_type=jnp.float32) + bq_ref[l]
        k = jnp.dot(hn, wk_ref[l], preferred_element_type=jnp.float32) + bk_ref[l]
        v = jnp.dot(hn, wv_ref[l], preferred_element_type=jnp.float32) + bv_ref[l]
        qb = q.astype(jnp.bfloat16)
        kb = k.astype(jnp.bfloat16)
        vb = v.astype(jnp.bfloat16)
        ctx_heads = []
        for hd in range(HEADS):    # static head loop: only tiny score/ctx dots
            sl = slice(hd * DH, (hd + 1) * DH)
            # q_h @ k_h^T (scale already folded into Wq/bq in the wrapper)
            s = jax.lax.dot_general(
                qb[:, sl], kb[:, sl], (((1,), (1,)), ((), ())),
                preferred_element_type=jnp.float32) + attn_bias
            s = s - jnp.max(s, axis=-1, keepdims=True)
            p = jnp.exp(s)
            p = p * pl.reciprocal(jnp.sum(p, axis=-1, keepdims=True), approx=True)
            ctx_heads.append(jnp.dot(p.astype(jnp.bfloat16), vb[:, sl],
                                     preferred_element_type=jnp.float32))
        ctx = jnp.concatenate(ctx_heads, axis=-1).astype(jnp.bfloat16)  # (RT, D)
        attn = (jnp.dot(ctx, wo_ref[l], preferred_element_type=jnp.float32)
                + bo_ref[l])
        h = h + attn
        # --- MLP block (pre-LN) ---
        hn2 = _layernorm(h, ln2g_ref[l], ln2b_ref[l]).astype(jnp.bfloat16)
        m = jnp.dot(hn2, wm1_ref[l], preferred_element_type=jnp.float32) + bm1_ref[l]
        m = jax.nn.gelu(m).astype(jnp.bfloat16)
        m = jnp.dot(m, wm2_ref[l], preferred_element_type=jnp.float32) + bm2_ref[l]
        tokens = h + m

    # ---- final LN over the whole slab, then CLS-select + 1/F frame mean ----
    lnf = _layernorm(tokens, lnfg_ref[...], lnfb_ref[...])
    out_ref[...] = jnp.dot(pool_ref[...], lnf, preferred_element_type=jnp.float32)


# ------------------------------ wrapper -----------------------------------
def visual_encoder(x, params, batch_block=None):
    """x: (B, F, C, H, W) f32 -> (B, D) features.

    batch_block = batch elements per grid step.  Default (=B, grid of one step)
    is best for single-TensorCore chips (v5e/v6e).  On v7x pass batch_block=B//2
    so the "parallel" batch-block axis feeds both TensorCores.
    """
    (pw, pb, cls, pos, ln1g, ln1b, wqkv, bqkv, wo, bo,
     ln2g, ln2b, wm1, bm1, wm2, bm2, lnfg, lnfb) = params

    G = B if batch_block is None else batch_block
    assert B % G == 0
    NB = B // G                   # grid steps
    RT = G * F * S_PAD            # token rows per grid step

    # --- patch vectors -> (NB, RT, PD) token slab (CLS slot + pad rows = 0) ---
    xr = x.reshape(B * F, C, H // PATCH, PATCH, W // PATCH, PATCH)
    xr = xr.transpose(0, 2, 4, 1, 3, 5).reshape(B, F, P, PD)   # channel-major
    slab = jnp.zeros((B, F, S_PAD, PD), jnp.float32)
    slab = slab.at[:, :, 1:1 + P, :].set(xr)
    patch_slab = slab.reshape(NB, RT, PD).astype(jnp.bfloat16)

    # --- additive token template: CLS+pos[0], pb+pos[1:], zeros at pad rows ---
    frame_tmpl = jnp.zeros((S_PAD, D), jnp.float32)
    frame_tmpl = frame_tmpl.at[0].set(cls[0] + pos[0])
    frame_tmpl = frame_tmpl.at[1:1 + P].set(pos[1:S] + pb)
    template = jnp.tile(frame_tmpl, (G * F, 1))                 # (RT, D)

    # --- additive attention bias: same-frame AND real-key -> 0, else -1e9 ---
    tok_frame = jnp.arange(RT) // S_PAD
    tok_valid = (jnp.arange(RT) % S_PAD) < S
    allowed = (tok_frame[:, None] == tok_frame[None, :]) & tok_valid[None, :]
    attn_bias = jnp.where(allowed, 0.0, NEG_INF).astype(jnp.float32)

    # --- CLS-row selection + 1/F frame-mean pooling matrix ---
    pool = jnp.zeros((G, RT), jnp.float32)
    for g in range(G):
        for f in range(F):
            pool = pool.at[g, (g * F + f) * S_PAD].set(1.0 / F)

    # --- full-width Q/K/V weights, 1/sqrt(DH) folded into Wq/bq, bf16 MXU ---
    scale = 1.0 / (DH ** 0.5)
    wq = (wqkv[:, :, :D] * scale).astype(jnp.bfloat16)
    wk = wqkv[:, :, D:2 * D].astype(jnp.bfloat16)
    wv = wqkv[:, :, 2 * D:].astype(jnp.bfloat16)
    bq = bqkv[:, :, :D] * scale
    bk = bqkv[:, :, D:2 * D]
    bv = bqkv[:, :, 2 * D:]
    pw_b = pw.astype(jnp.bfloat16)
    wo_b = wo.astype(jnp.bfloat16)
    wm1_b = wm1.astype(jnp.bfloat16)
    wm2_b = wm2.astype(jnp.bfloat16)

    args = (patch_slab, pw_b, template, attn_bias,
            ln1g, ln1b, wq, bq, wk, bk, wv, bv, wo_b, bo,
            ln2g, ln2b, wm1_b, bm1, wm2_b, bm2, lnfg, lnfb, pool)

    def build(single_buffer_weights):
        def wspec(shape):
            nd = len(shape)
            idx = lambda i: (0,) * nd
            if single_buffer_weights:
                # constant block index -> no double buffering needed
                return pl.BlockSpec(shape, idx, pipeline_mode=pl.Buffered(1))
            return pl.BlockSpec(shape, idx)

        grid_spec = pltpu.PrefetchScalarGridSpec(
            num_scalar_prefetch=0,
            grid=(NB,),
            in_specs=[
                pl.BlockSpec((1, RT, PD), lambda i: (i, 0, 0)),  # patch slab
                wspec((PD, D)),                                  # patch embed W
                wspec((RT, D)),                                  # token template
                wspec((RT, RT)),                                 # attention bias
                wspec((L, 1, D)), wspec((L, 1, D)),              # ln1 g, b
                wspec((L, D, D)), wspec((L, 1, D)),              # Wq (scaled), bq
                wspec((L, D, D)), wspec((L, 1, D)),              # Wk, bk
                wspec((L, D, D)), wspec((L, 1, D)),              # Wv, bv
                wspec((L, D, D)), wspec((L, 1, D)),              # Wo, bo
                wspec((L, 1, D)), wspec((L, 1, D)),              # ln2 g, b
                wspec((L, D, MLP)), wspec((L, 1, MLP)),          # mlp fc1 W, b
                wspec((L, MLP, D)), wspec((L, 1, D)),            # mlp fc2 W, b
                wspec((1, D)), wspec((1, D)),                    # final ln g, b
                wspec((G, RT)),                                  # CLS/mean pool
            ],
            out_specs=pl.BlockSpec((G, D), lambda i: (i, 0)),
        )
        return pl.pallas_call(
            vit_kernel,
            out_shape=jax.ShapeDtypeStruct((B, D), jnp.float32),
            grid_spec=grid_spec,
            compiler_params=pltpu.CompilerParams(
                dimension_semantics=("parallel",)),   # batch-block axis (v7x TCs)
        )

    try:
        return build(True)(*args)
    except Exception:
        # pipeline_mode=pl.Buffered(1) unsupported on this JAX version:
        # fall back to default double-buffered weight specs.
        return build(False)(*args)


# --------------------------- pure-JAX reference ---------------------------
def reference(x, params):
    (pw, pb, cls, pos, ln1g, ln1b, wqkv, bqkv, wo, bo,
     ln2g, ln2b, wm1, bm1, wm2, bm2, lnfg, lnfb) = params
    n = B * F
    xr = x.reshape(n, C, H // PATCH, PATCH, W // PATCH, PATCH)
    xr = xr.transpose(0, 2, 4, 1, 3, 5).reshape(n, P, PD)
    emb = xr @ pw + pb
    cls_b = jnp.broadcast_to(cls[None], (n, 1, D))
    tok = jnp.concatenate([cls_b, emb], axis=1) + pos[None]
    scale = 1.0 / (DH ** 0.5)
    for l in range(L):
        h = tok
        hn = _layernorm(h, ln1g[l], ln1b[l])
        qkv = hn @ wqkv[l] + bqkv[l]
        q, k, v = qkv[..., :D], qkv[..., D:2 * D], qkv[..., 2 * D:]
        heads = []
        for hd in range(HEADS):
            sl = slice(hd * DH, (hd + 1) * DH)
            qh, kh, vh = q[..., sl], k[..., sl], v[..., sl]
            s = jnp.einsum('nqd,nkd->nqk', qh, kh) * scale
            s = s - jnp.max(s, axis=-1, keepdims=True)
            p = jnp.exp(s)
            p = p / jnp.sum(p, axis=-1, keepdims=True)
            heads.append(jnp.einsum('nqk,nkd->nqd', p, vh))
        attn = jnp.concatenate(heads, axis=-1) @ wo[l] + bo[l]
        h = h + attn
        m = jax.nn.gelu(_layernorm(h, ln2g[l], ln2b[l]) @ wm1[l] + bm1[l]) @ wm2[l] + bm2[l]
        tok = h + m
    tok = _layernorm(tok, lnfg, lnfb)
    feats = tok[:, 0]                          # CLS == last_hidden_state[:, 0]
    return feats.reshape(B, F, D).mean(axis=1)


# -------------------------------- main ------------------------------------
if __name__ == "__main__":
    # Deterministic synthetic parameters.
    # TODO(synk): real ViTModel.from_pretrained checkpoint weights not loadable in-script.
    keys = jax.random.split(jax.random.PRNGKey(0), 16)

    def n(k, shape, scale=0.05):
        return (scale * jax.random.normal(k, shape)).astype(jnp.float32)

    params = [
        n(keys[0], (PD, D)),                       # patch embed weight
        n(keys[1], (1, D)),                        # patch embed bias
        n(keys[2], (1, D)),                        # CLS token
        n(keys[3], (S, D)),                        # position embeddings
        jnp.ones((L, 1, D), jnp.float32),          # ln1 gamma
        jnp.zeros((L, 1, D), jnp.float32),         # ln1 beta
        n(keys[4], (L, D, 3 * D)),                 # fused qkv weight
        n(keys[5], (L, 1, 3 * D)),                 # fused qkv bias
        n(keys[6], (L, D, D)),                     # attn out weight
        n(keys[7], (L, 1, D)),                     # attn out bias
        jnp.ones((L, 1, D), jnp.float32),          # ln2 gamma
        jnp.zeros((L, 1, D), jnp.float32),         # ln2 beta
        n(keys[8], (L, D, MLP)),                   # mlp fc1 weight
        n(keys[9], (L, 1, MLP)),                   # mlp fc1 bias
        n(keys[10], (L, MLP, D)),                  # mlp fc2 weight
        n(keys[11], (L, 1, D)),                    # mlp fc2 bias
        jnp.ones((1, D), jnp.float32),             # final ln gamma
        jnp.zeros((1, D), jnp.float32),            # final ln beta
    ]

    x = jax.random.normal(keys[12], (B, F, C, H, W), jnp.float32)

    out = visual_encoder(x, params)
    out = jax.block_until_ready(out)

    ref = jax.block_until_ready(reference(x, params))
    assert out.shape == (B, D), out.shape
    err = jnp.max(jnp.abs(out - ref))
    # tolerance covers bf16 MXU operands (f32 accumulation) and the approximate
    # (EUP) softmax reciprocal; reference is pure f32.
    assert jnp.allclose(out, ref, atol=5e-2, rtol=5e-2), f"max abs err {err}"

    print("KERNEL_OK")
</pallas_src>

<mosaic_0001>
module attributes {stable_mosaic.version = 11 : i64} {
  func.func @vit_kernel(%arg0: i32, %arg1: memref<1x32x192xbf16, #tpu.memory_space<vmem>>, %arg2: memref<192x32xbf16, #tpu.memory_space<vmem>>, %arg3: memref<32x32xf32, #tpu.memory_space<vmem>>, %arg4: memref<32x32xf32, #tpu.memory_space<vmem>>, %arg5: memref<2x1x32xf32, #tpu.memory_space<vmem>>, %arg6: memref<2x1x32xf32, #tpu.memory_space<vmem>>, %arg7: memref<2x32x32xbf16, #tpu.memory_space<vmem>>, %arg8: memref<2x1x32xf32, #tpu.memory_space<vmem>>, %arg9: memref<2x32x32xbf16, #tpu.memory_space<vmem>>, %arg10: memref<2x1x32xf32, #tpu.memory_space<vmem>>, %arg11: memref<2x32x32xbf16, #tpu.memory_space<vmem>>, %arg12: memref<2x1x32xf32, #tpu.memory_space<vmem>>, %arg13: memref<2x32x32xbf16, #tpu.memory_space<vmem>>, %arg14: memref<2x1x32xf32, #tpu.memory_space<vmem>>, %arg15: memref<2x1x32xf32, #tpu.memory_space<vmem>>, %arg16: memref<2x1x32xf32, #tpu.memory_space<vmem>>, %arg17: memref<2x32x64xbf16, #tpu.memory_space<vmem>>, %arg18: memref<2x1x64xf32, #tpu.memory_space<vmem>>, %arg19: memref<2x64x32xbf16, #tpu.memory_space<vmem>>, %arg20: memref<2x1x32xf32, #tpu.memory_space<vmem>>, %arg21: memref<1x32xf32, #tpu.memory_space<vmem>>, %arg22: memref<1x32xf32, #tpu.memory_space<vmem>>, %arg23: memref<2x32xf32, #tpu.memory_space<vmem>>, %arg24: memref<2x32xf32, #tpu.memory_space<vmem>>) attributes {dimension_semantics = [#tpu.dimension_semantics<parallel>], iteration_bounds = array<i64: 1>, scalar_prefetch = 0 : i64, scratch_operands = 0 : i64, tpu.core_type = #tpu.core_type<tc>, window_params = [{transform_indices = @transform_0, window_bounds = array<i64: 1, 32, 192>}, {pipeline_mode = #tpu.pipeline_mode<synchronous>, transform_indices = @transform_1, window_bounds = array<i64: 192, 32>}, {pipeline_mode = #tpu.pipeline_mode<synchronous>, transform_indices = @transform_2, window_bounds = array<i64: 32, 32>}, {pipeline_mode = #tpu.pipeline_mode<synchronous>, transform_indices = @transform_3, window_bounds = array<i64: 32, 32>}, {pipeline_mode = #tpu.pipeline_mode<synchronous>, transform_indices = @transform_4, window_bounds = array<i64: 2, 1, 32>}, {pipeline_mode = #tpu.pipeline_mode<synchronous>, transform_indices = @transform_5, window_bounds = array<i64: 2, 1, 32>}, {pipeline_mode = #tpu.pipeline_mode<synchronous>, transform_indices = @transform_6, window_bounds = array<i64: 2, 32, 32>}, {pipeline_mode = #tpu.pipeline_mode<synchronous>, transform_indices = @transform_7, window_bounds = array<i64: 2, 1, 32>}, {pipeline_mode = #tpu.pipeline_mode<synchronous>, transform_indices = @transform_8, window_bounds = array<i64: 2, 32, 32>}, {pipeline_mode = #tpu.pipeline_mode<synchronous>, transform_indices = @transform_9, window_bounds = array<i64: 2, 1, 32>}, {pipeline_mode = #tpu.pipeline_mode<synchronous>, transform_indices = @transform_10, window_bounds = array<i64: 2, 32, 32>}, {pipeline_mode = #tpu.pipeline_mode<synchronous>, transform_indices = @transform_11, window_bounds = array<i64: 2, 1, 32>}, {pipeline_mode = #tpu.pipeline_mode<synchronous>, transform_indices = @transform_12, window_bounds = array<i64: 2, 32, 32>}, {pipeline_mode = #tpu.pipeline_mode<synchronous>, transform_indices = @transform_13, window_bounds = array<i64: 2, 1, 32>}, {pipeline_mode = #tpu.pipeline_mode<synchronous>, transform_indices = @transform_14, window_bounds = array<i64: 2, 1, 32>}, {pipeline_mode = #tpu.pipeline_mode<synchronous>, transform_indices = @transform_15, window_bounds = array<i64: 2, 1, 32>}, {pipeline_mode = #tpu.pipeline_mode<synchronous>, transform_indices = @transform_16, window_bounds = array<i64: 2, 32, 64>}, {pipeline_mode = #tpu.pipeline_mode<synchronous>, transform_indices = @transform_17, window_bounds = array<i64: 2, 1, 64>}, {pipeline_mode = #tpu.pipeline_mode<synchronous>, transform_indices = @transform_18, window_bounds = array<i64: 2, 64, 32>}, {pipeline_mode = #tpu.pipeline_mode<synchronous>, transform_indices = @transform_19, window_bounds = array<i64: 2, 1, 32>}, {pipeline_mode = #tpu.pipeline_mode<synchronous>, transform_indices = @transform_20, window_bounds = array<i64: 1, 32>}, {pipeline_mode = #tpu.pipeline_mode<synchronous>, transform_indices = @transform_21, window_bounds = array<i64: 1, 32>}, {pipeline_mode = #tpu.pipeline_mode<synchronous>, transform_indices = @transform_22, window_bounds = array<i64: 2, 32>}, {transform_indices = @transform_23, window_bounds = array<i64: 2, 32>}]} {
    %c0 = arith.constant 0 : index
    %c0_0 = arith.constant 0 : index
    %c0_1 = arith.constant 0 : index
    %0 = vector.load %arg1[%c0, %c0_0, %c0_1] : memref<1x32x192xbf16, #tpu.memory_space<vmem>>, vector<1x32x192xbf16>
    %1 = vector.shape_cast %0 : vector<1x32x192xbf16> to vector<32x192xbf16>
    %c0_2 = arith.constant 0 : index
    %c0_3 = arith.constant 0 : index
    %2 = vector.load %arg2[%c0_2, %c0_3] : memref<192x32xbf16, #tpu.memory_space<vmem>>, vector<192x32xbf16>
    %cst = arith.constant dense<0.000000e+00> : vector<32x32xf32>
    %3 = tpu.matmul %1, %2, %cst {dimension_numbers = #tpu.dot_dimension_numbers<[1], [0], [0], [1], [0, 0, 1, 1], [], []>} : vector<32x192xbf16>, vector<192x32xbf16>, vector<32x32xf32> -> vector<32x32xf32>
    %c0_4 = arith.constant 0 : index
    %c0_5 = arith.constant 0 : index
    %4 = vector.load %arg3[%c0_4, %c0_5] : memref<32x32xf32, #tpu.memory_space<vmem>>, vector<32x32xf32>
    %5 = arith.addf %3, %4 : vector<32x32xf32>
    %c0_6 = arith.constant 0 : index
    %c0_7 = arith.constant 0 : index
    %6 = vector.load %arg4[%c0_6, %c0_7] : memref<32x32xf32, #tpu.memory_space<vmem>>, vector<32x32xf32>
    %c0_8 = arith.constant 0 : index
    %c0_9 = arith.constant 0 : index
    %c0_10 = arith.constant 0 : index
    %7 = vector.load %arg5[%c0_8, %c0_9, %c0_10] : memref<2x1x32xf32, #tpu.memory_space<vmem>>, vector<1x1x32xf32>
    %8 = vector.shape_cast %7 : vector<1x1x32xf32> to vector<1x32xf32>
    %c0_11 = arith.constant 0 : index
    %c0_12 = arith.constant 0 : index
    %c0_13 = arith.constant 0 : index
    %9 = vector.load %arg6[%c0_11, %c0_12, %c0_13] : memref<2x1x32xf32, #tpu.memory_space<vmem>>, vector<1x1x32xf32>
    %10 = vector.shape_cast %9 : vector<1x1x32xf32> to vector<1x32xf32>
    %cst_14 = arith.constant dense<0.000000e+00> : vector<32xf32>
    %11 = vector.multi_reduction <add>, %5, %cst_14 [1] : vector<32x32xf32> to vector<32xf32>
    %12 = vector.shape_cast %11 : vector<32xf32> to vector<32x1xf32>
    %cst_15 = arith.constant 3.200000e+01 : f32
    %13 = vector.broadcast %cst_15 : f32 to vector<32x1xf32>
    %14 = arith.divf %12, %13 : vector<32x1xf32>
    %15 = vector.broadcast %14 : vector<32x1xf32> to vector<32x32xf32>
    %16 = arith.subf %5, %15 : vector<32x32xf32>
    %17 = arith.mulf %16, %16 : vector<32x32xf32>
    %cst_16 = arith.constant dense<0.000000e+00> : vector<32xf32>
    %18 = vector.multi_reduction <add>, %17, %cst_16 [1] : vector<32x32xf32> to vector<32xf32>
    %19 = vector.shape_cast %18 : vector<32xf32> to vector<32x1xf32>
    %cst_17 = arith.constant 3.200000e+01 : f32
    %20 = vector.broadcast %cst_17 : f32 to vector<32x1xf32>
    %21 = arith.divf %19, %20 : vector<32x1xf32>
    %22 = vector.broadcast %14 : vector<32x1xf32> to vector<32x32xf32>
    %23 = arith.subf %5, %22 : vector<32x32xf32>
    %cst_18 = arith.constant 9.99999997E-7 : f32
    %24 = vector.broadcast %cst_18 : f32 to vector<32x1xf32>
    %25 = arith.addf %21, %24 : vector<32x1xf32>
    %26 = math.rsqrt %25 : vector<32x1xf32>
    %27 = vector.broadcast %26 : vector<32x1xf32> to vector<32x32xf32>
    %28 = arith.mulf %23, %27 : vector<32x32xf32>
    %29 = vector.broadcast %8 : vector<1x32xf32> to vector<32x32xf32>
    %30 = arith.mulf %28, %29 : vector<32x32xf32>
    %31 = vector.broadcast %10 : vector<1x32xf32> to vector<32x32xf32>
    %32 = arith.addf %30, %31 : vector<32x32xf32>
    %33 = arith.truncf %32 : vector<32x32xf32> to vector<32x32xbf16>
    %c0_19 = arith.constant 0 : index
    %c0_20 = arith.constant 0 : index
    %c0_21 = arith.constant 0 : index
    %34 = vector.load %arg7[%c0_19, %c0_20, %c0_21] : memref<2x32x32xbf16, #tpu.memory_space<vmem>>, vector<1x32x32xbf16>
    %35 = vector.shape_cast %34 : vector<1x32x32xbf16> to vector<32x32xbf16>
    %cst_22 = arith.constant dense<0.000000e+00> : vector<32x32xf32>
    %36 = tpu.matmul %33, %35, %cst_22 {dimension_numbers = #tpu.dot_dimension_numbers<[1], [0], [0], [1], [0, 0, 1, 1], [], []>} : vector<32x32xbf16>, vector<32x32xbf16>, vector<32x32xf32> -> vector<32x32xf32>
    %c0_23 = arith.constant 0 : index
    %c0_24 = arith.constant 0 : index
    %c0_25 = arith.constant 0 : index
    %37 = vector.load %arg8[%c0_23, %c0_24, %c0_25] : memref<2x1x32xf32, #tpu.memory_space<vmem>>, vector<1x1x32xf32>
    %38 = vector.shape_cast %37 : vector<1x1x32xf32> to vector<1x32xf32>
    %39 = vector.broadcast %38 : vector<1x32xf32> to vector<32x32xf32>
    %40 = arith.addf %36, %39 : vector<32x32xf32>
    %c0_26 = arith.constant 0 : index
    %c0_27 = arith.constant 0 : index
    %c0_28 = arith.constant 0 : index
    %41 = vector.load %arg9[%c0_26, %c0_27, %c0_28] : memref<2x32x32xbf16, #tpu.memory_space<vmem>>, vector<1x32x32xbf16>
    %42 = vector.shape_cast %41 : vector<1x32x32xbf16> to vector<32x32xbf16>
    %cst_29 = arith.constant dense<0.000000e+00> : vector<32x32xf32>
    %43 = tpu.matmul %33, %42, %cst_29 {dimension_numbers = #tpu.dot_dimension_numbers<[1], [0], [0], [1], [0, 0, 1, 1], [], []>} : vector<32x32xbf16>, vector<32x32xbf16>, vector<32x32xf32> -> vector<32x32xf32>
    %c0_30 = arith.constant 0 : index
    %c0_31 = arith.constant 0 : index
    %c0_32 = arith.constant 0 : index
    %44 = vector.load %arg10[%c0_30, %c0_31, %c0_32] : memref<2x1x32xf32, #tpu.memory_space<vmem>>, vector<1x1x32xf32>
    %45 = vector.shape_cast %44 : vector<1x1x32xf32> to vector<1x32xf32>
    %46 = vector.broadcast %45 : vector<1x32xf32> to vector<32x32xf32>
    %47 = arith.addf %43, %46 : vector<32x32xf32>
    %c0_33 = arith.constant 0 : index
    %c0_34 = arith.constant 0 : index
    %c0_35 = arith.constant 0 : index
    %48 = vector.load %arg11[%c0_33, %c0_34, %c0_35] : memref<2x32x32xbf16, #tpu.memory_space<vmem>>, vector<1x32x32xbf16>
    %49 = vector.shape_cast %48 : vector<1x32x32xbf16> to vector<32x32xbf16>
    %cst_36 = arith.constant dense<0.000000e+00> : vector<32x32xf32>
    %50 = tpu.matmul %33, %49, %cst_36 {dimension_numbers = #tpu.dot_dimension_numbers<[1], [0], [0], [1], [0, 0, 1, 1], [], []>} : vector<32x32xbf16>, vector<32x32xbf16>, vector<32x32xf32> -> vector<32x32xf32>
    %c0_37 = arith.constant 0 : index
    %c0_38 = arith.constant 0 : index
    %c0_39 = arith.constant 0 : index
    %51 = vector.load %arg12[%c0_37, %c0_38, %c0_39] : memref<2x1x32xf32, #tpu.memory_space<vmem>>, vector<1x1x32xf32>
    %52 = vector.shape_cast %51 : vector<1x1x32xf32> to vector<1x32xf32>
    %53 = vector.broadcast %52 : vector<1x32xf32> to vector<32x32xf32>
    %54 = arith.addf %50, %53 : vector<32x32xf32>
    %55 = arith.truncf %40 : vector<32x32xf32> to vector<32x32xbf16>
    %56 = arith.truncf %47 : vector<32x32xf32> to vector<32x32xbf16>
    %57 = arith.truncf %54 : vector<32x32xf32> to vector<32x32xbf16>
    %58 = vector.extract_strided_slice %55 {offsets = [0, 0], sizes = [32, 8], strides = [1, 1]} : vector<32x32xbf16> to vector<32x8xbf16>
    %59 = vector.extract_strided_slice %56 {offsets = [0, 0], sizes = [32, 8], strides = [1, 1]} : vector<32x32xbf16> to vector<32x8xbf16>
    %cst_40 = arith.constant dense<0.000000e+00> : vector<32x32xf32>
    %60 = tpu.matmul %58, %59, %cst_40 {dimension_numbers = #tpu.dot_dimension_numbers<[1], [1], [0], [0], [0, 0, 1, 0], [], []>} : vector<32x8xbf16>, vector<32x8xbf16>, vector<32x32xf32> -> vector<32x32xf32>
    %61 = arith.addf %60, %6 : vector<32x32xf32>
    %cst_41 = arith.constant dense<0xFF800000> : vector<32xf32>
    %62 = vector.multi_reduction <maximumf>, %61, %cst_41 [1] : vector<32x32xf32> to vector<32xf32>
    %63 = vector.shape_cast %62 : vector<32xf32> to vector<32x1xf32>
    %64 = vector.broadcast %63 : vector<32x1xf32> to vector<32x32xf32>
    %65 = arith.subf %61, %64 : vector<32x32xf32>
    %66 = math.exp %65 : vector<32x32xf32>
    %cst_42 = arith.constant dense<0.000000e+00> : vector<32xf32>
    %67 = vector.multi_reduction <add>, %66, %cst_42 [1] : vector<32x32xf32> to vector<32xf32>
    %68 = vector.shape_cast %67 : vector<32xf32> to vector<32x1xf32>
    %69 = tpu.reciprocal %68 {approx = true} : vector<32x1xf32> -> vector<32x1xf32>
    %70 = vector.broadcast %69 : vector<32x1xf32> to vector<32x32xf32>
    %71 = arith.mulf %66, %70 : vector<32x32xf32>
    %72 = arith.truncf %71 : vector<32x32xf32> to vector<32x32xbf16>
    %73 = vector.extract_strided_slice %57 {offsets = [0, 0], sizes = [32, 8], strides = [1, 1]} : vector<32x32xbf16> to vector<32x8xbf16>
    %cst_43 = arith.constant dense<0.000000e+00> : vector<32x8xf32>
    %74 = tpu.matmul %72, %73, %cst_43 {dimension_numbers = #tpu.dot_dimension_numbers<[1], [0], [0], [1], [0, 0, 1, 1], [], []>} : vector<32x32xbf16>, vector<32x8xbf16>, vector<32x8xf32> -> vector<32x8xf32>
    %75 = vector.extract_strided_slice %55 {offsets = [0, 8], sizes = [32, 8], strides = [1, 1]} : vector<32x32xbf16> to vector<32x8xbf16>
    %76 = vector.extract_strided_slice %56 {offsets = [0, 8], sizes = [32, 8], strides = [1, 1]} : vector<32x32xbf16> to vector<32x8xbf16>
    %cst_44 = arith.constant dense<0.000000e+00> : vector<32x32xf32>
    %77 = tpu.matmul %75, %76, %cst_44 {dimension_numbers = #tpu.dot_dimension_numbers<[1], [1], [0], [0], [0, 0, 1, 0], [], []>} : vector<32x8xbf16>, vector<32x8xbf16>, vector<32x32xf32> -> vector<32x32xf32>
    %78 = arith.addf %77, %6 : vector<32x32xf32>
    %cst_45 = arith.constant dense<0xFF800000> : vector<32xf32>
    %79 = vector.multi_reduction <maximumf>, %78, %cst_45 [1] : vector<32x32xf32> to vector<32xf32>
    %80 = vector.shape_cast %79 : vector<32xf32> to vector<32x1xf32>
    %81 = vector.broadcast %80 : vector<32x1xf32> to vector<32x32xf32>
    %82 = arith.subf %78, %81 : vector<32x32xf32>
    %83 = math.exp %82 : vector<32x32xf32>
    %cst_46 = arith.constant dense<0.000000e+00> : vector<32xf32>
    %84 = vector.multi_reduction <add>, %83, %cst_46 [1] : vector<32x32xf32> to vector<32xf32>
    %85 = vector.shape_cast %84 : vector<32xf32> to vector<32x1xf32>
    %86 = tpu.reciprocal %85 {approx = true} : vector<32x1xf32> -> vector<32x1xf32>
    %87 = vector.broadcast %86 : vector<32x1xf32> to vector<32x32xf32>
    %88 = arith.mulf %83, %87 : vector<32x32xf32>
    %89 = arith.truncf %88 : vector<32x32xf32> to vector<32x32xbf16>
    %90 = vector.extract_strided_slice %57 {offsets = [0, 8], sizes = [32, 8], strides = [1, 1]} : vector<32x32xbf16> to vector<32x8xbf16>
    %cst_47 = arith.constant dense<0.000000e+00> : vector<32x8xf32>
    %91 = tpu.matmul %89, %90, %cst_47 {dimension_numbers = #tpu.dot_dimension_numbers<[1], [0], [0], [1], [0, 0, 1, 1], [], []>} : vector<32x32xbf16>, vector<32x8xbf16>, vector<32x8xf32> -> vector<32x8xf32>
    %92 = vector.extract_strided_slice %55 {offsets = [0, 16], sizes = [32, 8], strides = [1, 1]} : vector<32x32xbf16> to vector<32x8xbf16>
    %93 = vector.extract_strided_slice %56 {offsets = [0, 16], sizes = [32, 8], strides = [1, 1]} : vector<32x32xbf16> to vector<32x8xbf16>
    %cst_48 = arith.constant dense<0.000000e+00> : vector<32x32xf32>
    %94 = tpu.matmul %92, %93, %cst_48 {dimension_numbers = #tpu.dot_dimension_numbers<[1], [1], [0], [0], [0, 0, 1, 0], [], []>} : vector<32x8xbf16>, vector<32x8xbf16>, vector<32x32xf32> -> vector<32x32xf32>
    %95 = arith.addf %94, %6 : vector<32x32xf32>
    %cst_49 = arith.constant dense<0xFF800000> : vector<32xf32>
    %96 = vector.multi_reduction <maximumf>, %95, %cst_49 [1] : vector<32x32xf32> to vector<32xf32>
    %97 = vector.shape_cast %96 : vector<32xf32> to vector<32x1xf32>
    %98 = vector.broadcast %97 : vector<32x1xf32> to vector<32x32xf32>
    %99 = arith.subf %95, %98 : vector<32x32xf32>
    %100 = math.exp %99 : vector<32x32xf32>
    %cst_50 = arith.constant dense<0.000000e+00> : vector<32xf32>
    %101 = vector.multi_reduction <add>, %100, %cst_50 [1] : vector<32x32xf32> to vector<32xf32>
    %102 = vector.shape_cast %101 : vector<32xf32> to vector<32x1xf32>
    %103 = tpu.reciprocal %102 {approx = true} : vector<32x1xf32> -> vector<32x1xf32>
    %104 = vector.broadcast %103 : vector<32x1xf32> to vector<32x32xf32>
    %105 = arith.mulf %100, %104 : vector<32x32xf32>
    %106 = arith.truncf %105 : vector<32x32xf32> to vector<32x32xbf16>
    %107 = vector.extract_strided_slice %57 {offsets = [0, 16], sizes = [32, 8], strides = [1, 1]} : vector<32x32xbf16> to vector<32x8xbf16>
    %cst_51 = arith.constant dense<0.000000e+00> : vector<32x8xf32>
    %108 = tpu.matmul %106, %107, %cst_51 {dimension_numbers = #tpu.dot_dimension_numbers<[1], [0], [0], [1], [0, 0, 1, 1], [], []>} : vector<32x32xbf16>, vector<32x8xbf16>, vector<32x8xf32> -> vector<32x8xf32>
    %109 = vector.extract_strided_slice %55 {offsets = [0, 24], sizes = [32, 8], strides = [1, 1]} : vector<32x32xbf16> to vector<32x8xbf16>
    %110 = vector.extract_strided_slice %56 {offsets = [0, 24], sizes = [32, 8], strides = [1, 1]} : vector<32x32xbf16> to vector<32x8xbf16>
    %cst_52 = arith.constant dense<0.000000e+00> : vector<32x32xf32>
    %111 = tpu.matmul %109, %110, %cst_52 {dimension_numbers = #tpu.dot_dimension_numbers<[1], [1], [0], [0], [0, 0, 1, 0], [], []>} : vector<32x8xbf16>, vector<32x8xbf16>, vector<32x32xf32> -> vector<32x32xf32>
    %112 = arith.addf %111, %6 : vector<32x32xf32>
    %cst_53 = arith.constant dense<0xFF800000> : vector<32xf32>
    %113 = vector.multi_reduction <maximumf>, %112, %cst_53 [1] : vector<32x32xf32> to vector<32xf32>
    %114 = vector.shape_cast %113 : vector<32xf32> to vector<32x1xf32>
    %115 = vector.broadcast %114 : vector<32x1xf32> to vector<32x32xf32>
    %116 = arith.subf %112, %115 : vector<32x32xf32>
    %117 = math.exp %116 : vector<32x32xf32>
    %cst_54 = arith.constant dense<0.000000e+00> : vector<32xf32>
    %118 = vector.multi_reduction <add>, %117, %cst_54 [1] : vector<32x32xf32> to vector<32xf32>
    %119 = vector.shape_cast %118 : vector<32xf32> to vector<32x1xf32>
    %120 = tpu.reciprocal %119 {approx = true} : vector<32x1xf32> -> vector<32x1xf32>
    %121 = vector.broadcast %120 : vector<32x1xf32> to vector<32x32xf32>
    %122 = arith.mulf %117, %121 : vector<32x32xf32>
    %123 = arith.truncf %122 : vector<32x32xf32> to vector<32x32xbf16>
    %124 = vector.extract_strided_slice %57 {offsets = [0, 24], sizes = [32, 8], strides = [1, 1]} : vector<32x32xbf16> to vector<32x8xbf16>
    %cst_55 = arith.constant dense<0.000000e+00> : vector<32x8xf32>
    %125 = tpu.matmul %123, %124, %cst_55 {dimension_numbers = #tpu.dot_dimension_numbers<[1], [0], [0], [1], [0, 0, 1, 1], [], []>} : vector<32x32xbf16>, vector<32x8xbf16>, vector<32x8xf32> -> vector<32x8xf32>
    %126 = tpu.concatenate %74, %91, %108, %125 in 1 : vector<32x8xf32>, vector<32x8xf32>, vector<32x8xf32>, vector<32x8xf32> -> vector<32x32xf32>
    %127 = arith.truncf %126 : vector<32x32xf32> to vector<32x32xbf16>
    %c0_56 = arith.constant 0 : index
    %c0_57 = arith.constant 0 : index
    %c0_58 = arith.constant 0 : index
    %128 = vector.load %arg13[%c0_56, %c0_57, %c0_58] : memref<2x32x32xbf16, #tpu.memory_space<vmem>>, vector<1x32x32xbf16>
    %129 = vector.shape_cast %128 : vector<1x32x32xbf16> to vector<32x32xbf16>
    %cst_59 = arith.constant dense<0.000000e+00> : vector<32x32xf32>
    %130 = tpu.matmul %127, %129, %cst_59 {dimension_numbers = #tpu.dot_dimension_numbers<[1], [0], [0], [1], [0, 0, 1, 1], [], []>} : vector<32x32xbf16>, vector<32x32xbf16>, vector<32x32xf32> -> vector<32x32xf32>
    %c0_60 = arith.constant 0 : index
    %c0_61 = arith.constant 0 : index
    %c0_62 = arith.constant 0 : index
    %131 = vector.load %arg14[%c0_60, %c0_61, %c0_62] : memref<2x1x32xf32, #tpu.memory_space<vmem>>, vector<1x1x32xf32>
    %132 = vector.shape_cast %131 : vector<1x1x32xf32> to vector<1x32xf32>
    %133 = vector.broadcast %132 : vector<1x32xf32> to vector<32x32xf32>
    %134 = arith.addf %130, %133 : vector<32x32xf32>
    %135 = arith.addf %5, %134 : vector<32x32xf32>
    %c0_63 = arith.constant 0 : index
    %c0_64 = arith.constant 0 : index
    %c0_65 = arith.constant 0 : index
    %136 = vector.load %arg15[%c0_63, %c0_64, %c0_65] : memref<2x1x32xf32, #tpu.memory_space<vmem>>, vector<1x1x32xf32>
    %137 = vector.shape_cast %136 : vector<1x1x32xf32> to vector<1x32xf32>
    %c0_66 = arith.constant 0 : index
    %c0_67 = arith.constant 0 : index
    %c0_68 = arith.constant 0 : index
    %138 = vector.load %arg16[%c0_66, %c0_67, %c0_68] : memref<2x1x32xf32, #tpu.memory_space<vmem>>, vector<1x1x32xf32>
    %139 = vector.shape_cast %138 : vector<1x1x32xf32> to vector<1x32xf32>
    %cst_69 = arith.constant dense<0.000000e+00> : vector<32xf32>
    %140 = vector.multi_reduction <add>, %135, %cst_69 [1] : vector<32x32xf32> to vector<32xf32>
    %141 = vector.shape_cast %140 : vector<32xf32> to vector<32x1xf32>
    %cst_70 = arith.constant 3.200000e+01 : f32
    %142 = vector.broadcast %cst_70 : f32 to vector<32x1xf32>
    %143 = arith.divf %141, %142 : vector<32x1xf32>
    %144 = vector.broadcast %143 : vector<32x1xf32> to vector<32x32xf32>
    %145 = arith.subf %135, %144 : vector<32x32xf32>
    %146 = arith.mulf %145, %145 : vector<32x32xf32>
    %cst_71 = arith.constant dense<0.000000e+00> : vector<32xf32>
    %147 = vector.multi_reduction <add>, %146, %cst_71 [1] : vector<32x32xf32> to vector<32xf32>
    %148 = vector.shape_cast %147 : vector<32xf32> to vector<32x1xf32>
    %cst_72 = arith.constant 3.200000e+01 : f32
    %149 = vector.broadcast %cst_72 : f32 to vector<32x1xf32>
    %150 = arith.divf %148, %149 : vector<32x1xf32>
    %151 = vector.broadcast %143 : vector<32x1xf32> to vector<32x32xf32>
    %152 = arith.subf %135, %151 : vector<32x32xf32>
    %cst_73 = arith.constant 9.99999997E-7 : f32
    %153 = vector.broadcast %cst_73 : f32 to vector<32x1xf32>
    %154 = arith.addf %150, %153 : vector<32x1xf32>
    %155 = math.rsqrt %154 : vector<32x1xf32>
    %156 = vector.broadcast %155 : vector<32x1xf32> to vector<32x32xf32>
    %157 = arith.mulf %152, %156 : vector<32x32xf32>
    %158 = vector.broadcast %137 : vector<1x32xf32> to vector<32x32xf32>
    %159 = arith.mulf %157, %158 : vector<32x32xf32>
    %160 = vector.broadcast %139 : vector<1x32xf32> to vector<32x32xf32>
    %161 = arith.addf %159, %160 : vector<32x32xf32>
    %162 = arith.truncf %161 : vector<32x32xf32> to vector<32x32xbf16>
    %c0_74 = arith.constant 0 : index
    %c0_75 = arith.constant 0 : index
    %c0_76 = arith.constant 0 : index
    %163 = vector.load %arg17[%c0_74, %c0_75, %c0_76] : memref<2x32x64xbf16, #tpu.memory_space<vmem>>, vector<1x32x64xbf16>
    %164 = vector.shape_cast %163 : vector<1x32x64xbf16> to vector<32x64xbf16>
    %cst_77 = arith.constant dense<0.000000e+00> : vector<32x64xf32>
    %165 = tpu.matmul %162, %164, %cst_77 {dimension_numbers = #tpu.dot_dimension_numbers<[1], [0], [0], [1], [0, 0, 1, 1], [], []>} : vector<32x32xbf16>, vector<32x64xbf16>, vector<32x64xf32> -> vector<32x64xf32>
    %c0_78 = arith.constant 0 : index
    %c0_79 = arith.constant 0 : index
    %c0_80 = arith.constant 0 : index
    %166 = vector.load %arg18[%c0_78, %c0_79, %c0_80] : memref<2x1x64xf32, #tpu.memory_space<vmem>>, vector<1x1x64xf32>
    %167 = vector.shape_cast %166 : vector<1x1x64xf32> to vector<1x64xf32>
    %168 = vector.broadcast %167 : vector<1x64xf32> to vector<32x64xf32>
    %169 = arith.addf %165, %168 : vector<32x64xf32>
    %170 = arith.mulf %169, %169 : vector<32x64xf32>
    %171 = arith.mulf %169, %170 : vector<32x64xf32>
    %cst_81 = arith.constant 4.471500e-02 : f32
    %172 = vector.broadcast %cst_81 : f32 to vector<32x64xf32>
    %173 = arith.mulf %172, %171 : vector<32x64xf32>
    %174 = arith.addf %169, %173 : vector<32x64xf32>
    %cst_82 = arith.constant 0.797884583 : f32
    %175 = vector.broadcast %cst_82 : f32 to vector<32x64xf32>
    %176 = arith.mulf %175, %174 : vector<32x64xf32>
    %177 = math.tanh %176 : vector<32x64xf32>
    %cst_83 = arith.constant 1.000000e+00 : f32
    %178 = vector.broadcast %cst_83 : f32 to vector<32x64xf32>
    %179 = arith.addf %178, %177 : vector<32x64xf32>
    %cst_84 = arith.constant 5.000000e-01 : f32
    %180 = vector.broadcast %cst_84 : f32 to vector<32x64xf32>
    %181 = arith.mulf %180, %179 : vector<32x64xf32>
    %182 = arith.mulf %169, %181 : vector<32x64xf32>
    %183 = arith.truncf %182 : vector<32x64xf32> to vector<32x64xbf16>
    %c0_85 = arith.constant 0 : index
    %c0_86 = arith.constant 0 : index
    %c0_87 = arith.constant 0 : index
    %184 = vector.load %arg19[%c0_85, %c0_86, %c0_87] : memref<2x64x32xbf16, #tpu.memory_space<vmem>>, vector<1x64x32xbf16>
    %185 = vector.shape_cast %184 : vector<1x64x32xbf16> to vector<64x32xbf16>
    %cst_88 = arith.constant dense<0.000000e+00> : vector<32x32xf32>
    %186 = tpu.matmul %183, %185, %cst_88 {dimension_numbers = #tpu.dot_dimension_numbers<[1], [0], [0], [1], [0, 0, 1, 1], [], []>} : vector<32x64xbf16>, vector<64x32xbf16>, vector<32x32xf32> -> vector<32x32xf32>
    %c0_89 = arith.constant 0 : index
    %c0_90 = arith.constant 0 : index
    %c0_91 = arith.constant 0 : index
    %187 = vector.load %arg20[%c0_89, %c0_90, %c0_91] : memref<2x1x32xf32, #tpu.memory_space<vmem>>, vector<1x1x32xf32>
    %188 = vector.shape_cast %187 : vector<1x1x32xf32> to vector<1x32xf32>
    %189 = vector.broadcast %188 : vector<1x32xf32> to vector<32x32xf32>
    %190 = arith.addf %186, %189 : vector<32x32xf32>
    %191 = arith.addf %135, %190 : vector<32x32xf32>
    %c1 = arith.constant 1 : index
    %c0_92 = arith.constant 0 : index
    %c0_93 = arith.constant 0 : index
    %192 = vector.load %arg5[%c1, %c0_92, %c0_93] : memref<2x1x32xf32, #tpu.memory_space<vmem>>, vector<1x1x32xf32>
    %193 = vector.shape_cast %192 : vector<1x1x32xf32> to vector<1x32xf32>
    %c1_94 = arith.constant 1 : index
    %c0_95 = arith.constant 0 : index
    %c0_96 = arith.constant 0 : index
    %194 = vector.load %arg6[%c1_94, %c0_95, %c0_96] : memref<2x1x32xf32, #tpu.memory_space<vmem>>, vector<1x1x32xf32>
    %195 = vector.shape_cast %194 : vector<1x1x32xf32> to vector<1x32xf32>
    %cst_97 = arith.constant dense<0.000000e+00> : vector<32xf32>
    %196 = vector.multi_reduction <add>, %191, %cst_97 [1] : vector<32x32xf32> to vector<32xf32>
    %197 = vector.shape_cast %196 : vector<32xf32> to vector<32x1xf32>
    %cst_98 = arith.constant 3.200000e+01 : f32
    %198 = vector.broadcast %cst_98 : f32 to vector<32x1xf32>
    %199 = arith.divf %197, %198 : vector<32x1xf32>
    %200 = vector.broadcast %199 : vector<32x1xf32> to vector<32x32xf32>
    %201 = arith.subf %191, %200 : vector<32x32xf32>
    %202 = arith.mulf %201, %201 : vector<32x32xf32>
    %cst_99 = arith.constant dense<0.000000e+00> : vector<32xf32>
    %203 = vector.multi_reduction <add>, %202, %cst_99 [1] : vector<32x32xf32> to vector<32xf32>
    %204 = vector.shape_cast %203 : vector<32xf32> to vector<32x1xf32>
    %cst_100 = arith.constant 3.200000e+01 : f32
    %205 = vector.broadcast %cst_100 : f32 to vector<32x1xf32>
    %206 = arith.divf %204, %205 : vector<32x1xf32>
    %207 = vector.broadcast %199 : vector<32x1xf32> to vector<32x32xf32>
    %208 = arith.subf %191, %207 : vector<32x32xf32>
    %cst_101 = arith.constant 9.99999997E-7 : f32
    %209 = vector.broadcast %cst_101 : f32 to vector<32x1xf32>
    %210 = arith.addf %206, %209 : vector<32x1xf32>
    %211 = math.rsqrt %210 : vector<32x1xf32>
    %212 = vector.broadcast %211 : vector<32x1xf32> to vector<32x32xf32>
    %213 = arith.mulf %208, %212 : vector<32x32xf32>
    %214 = vector.broadcast %193 : vector<1x32xf32> to vector<32x32xf32>
    %215 = arith.mulf %213, %214 : vector<32x32xf32>
    %216 = vector.broadcast %195 : vector<1x32xf32> to vector<32x32xf32>
    %217 = arith.addf %215, %216 : vector<32x32xf32>
    %218 = arith.truncf %217 : vector<32x32xf32> to vector<32x32xbf16>
    %c1_102 = arith.constant 1 : index
    %c0_103 = arith.constant 0 : index
    %c0_104 = arith.constant 0 : index
    %219 = vector.load %arg7[%c1_102, %c0_103, %c0_104] : memref<2x32x32xbf16, #tpu.memory_space<vmem>>, vector<1x32x32xbf16>
    %220 = vector.shape_cast %219 : vector<1x32x32xbf16> to vector<32x32xbf16>
    %cst_105 = arith.constant dense<0.000000e+00> : vector<32x32xf32>
    %221 = tpu.matmul %218, %220, %cst_105 {dimension_numbers = #tpu.dot_dimension_numbers<[1], [0], [0], [1], [0, 0, 1, 1], [], []>} : vector<32x32xbf16>, vector<32x32xbf16>, vector<32x32xf32> -> vector<32x32xf32>
    %c1_106 = arith.constant 1 : index
    %c0_107 = arith.constant 0 : index
    %c0_108 = arith.constant 0 : index
    %222 = vector.load %arg8[%c1_106, %c0_107, %c0_108] : memref<2x1x32xf32, #tpu.memory_space<vmem>>, vector<1x1x32xf32>
    %223 = vector.shape_cast %222 : vector<1x1x32xf32> to vector<1x32xf32>
    %224 = vector.broadcast %223 : vector<1x32xf32> to vector<32x32xf32>
    %225 = arith.addf %221, %224 : vector<32x32xf32>
    %c1_109 = arith.constant 1 : index
    %c0_110 = arith.constant 0 : index
    %c0_111 = arith.constant 0 : index
    %226 = vector.load %arg9[%c1_109, %c0_110, %c0_111] : memref<2x32x32xbf16, #tpu.memory_space<vmem>>, vector<1x32x32xbf16>
    %227 = vector.shape_cast %226 : vector<1x32x32xbf16> to vector<32x32xbf16>
    %cst_112 = arith.constant dense<0.000000e+00> : vector<32x32xf32>
    %228 = tpu.matmul %218, %227, %cst_112 {dimension_numbers = #tpu.dot_dimension_numbers<[1], [0], [0], [1], [0, 0, 1, 1], [], []>} : vector<32x32xbf16>, vector<32x32xbf16>, vector<32x32xf32> -> vector<32x32xf32>
    %c1_113 = arith.constant 1 : index
    %c0_114 = arith.constant 0 : index
    %c0_115 = arith.constant 0 : index
    %229 = vector.load %arg10[%c1_113, %c0_114, %c0_115] : memref<2x1x32xf32, #tpu.memory_space<vmem>>, vector<1x1x32xf32>
    %230 = vector.shape_cast %229 : vector<1x1x32xf32> to vector<1x32xf32>
    %231 = vector.broadcast %230 : vector<1x32xf32> to vector<32x32xf32>
    %232 = arith.addf %228, %231 : vector<32x32xf32>
    %c1_116 = arith.constant 1 : index
    %c0_117 = arith.constant 0 : index
    %c0_118 = arith.constant 0 : index
    %233 = vector.load %arg11[%c1_116, %c0_117, %c0_118] : memref<2x32x32xbf16, #tpu.memory_space<vmem>>, vector<1x32x32xbf16>
    %234 = vector.shape_cast %233 : vector<1x32x32xbf16> to vector<32x32xbf16>
    %cst_119 = arith.constant dense<0.000000e+00> : vector<32x32xf32>
    %235 = tpu.matmul %218, %234, %cst_119 {dimension_numbers = #tpu.dot_dimension_numbers<[1], [0], [0], [1], [0, 0, 1, 1], [], []>} : vector<32x32xbf16>, vector<32x32xbf16>, vector<32x32xf32> -> vector<32x32xf32>
    %c1_120 = arith.constant 1 : index
    %c0_121 = arith.constant 0 : index
    %c0_122 = arith.constant 0 : index
    %236 = vector.load %arg12[%c1_120, %c0_121, %c0_122] : memref<2x1x32xf32, #tpu.memory_space<vmem>>, vector<1x1x32xf32>
    %237 = vector.shape_cast %236 : vector<1x1x32xf32> to vector<1x32xf32>
    %238 = vector.broadcast %237 : vector<1x32xf32> to vector<32x32xf32>
    %239 = arith.addf %235, %238 : vector<32x32xf32>
    %240 = arith.truncf %225 : vector<32x32xf32> to vector<32x32xbf16>
    %241 = arith.truncf %232 : vector<32x32xf32> to vector<32x32xbf16>
    %242 = arith.truncf %239 : vector<32x32xf32> to vector<32x32xbf16>
    %243 = vector.extract_strided_slice %240 {offsets = [0, 0], sizes = [32, 8], strides = [1, 1]} : vector<32x32xbf16> to vector<32x8xbf16>
    %244 = vector.extract_strided_slice %241 {offsets = [0, 0], sizes = [32, 8], strides = [1, 1]} : vector<32x32xbf16> to vector<32x8xbf16>
    %cst_123 = arith.constant dense<0.000000e+00> : vector<32x32xf32>
    %245 = tpu.matmul %243, %244, %cst_123 {dimension_numbers = #tpu.dot_dimension_numbers<[1], [1], [0], [0], [0, 0, 1, 0], [], []>} : vector<32x8xbf16>, vector<32x8xbf16>, vector<32x32xf32> -> vector<32x32xf32>
    %246 = arith.addf %245, %6 : vector<32x32xf32>
    %cst_124 = arith.constant dense<0xFF800000> : vector<32xf32>
    %247 = vector.multi_reduction <maximumf>, %246, %cst_124 [1] : vector<32x32xf32> to vector<32xf32>
    %248 = vector.shape_cast %247 : vector<32xf32> to vector<32x1xf32>
    %249 = vector.broadcast %248 : vector<32x1xf32> to vector<32x32xf32>
    %250 = arith.subf %246, %249 : vector<32x32xf32>
    %251 = math.exp %250 : vector<32x32xf32>
    %cst_125 = arith.constant dense<0.000000e+00> : vector<32xf32>
    %252 = vector.multi_reduction <add>, %251, %cst_125 [1] : vector<32x32xf32> to vector<32xf32>
    %253 = vector.shape_cast %252 : vector<32xf32> to vector<32x1xf32>
    %254 = tpu.reciprocal %253 {approx = true} : vector<32x1xf32> -> vector<32x1xf32>
    %255 = vector.broadcast %254 : vector<32x1xf32> to vector<32x32xf32>
    %256 = arith.mulf %251, %255 : vector<32x32xf32>
    %257 = arith.truncf %256 : vector<32x32xf32> to vector<32x32xbf16>
    %258 = vector.extract_strided_slice %242 {offsets = [0, 0], sizes = [32, 8], strides = [1, 1]} : vector<32x32xbf16> to vector<32x8xbf16>
    %cst_126 = arith.constant dense<0.000000e+00> : vector<32x8xf32>
    %259 = tpu.matmul %257, %258, %cst_126 {dimension_numbers = #tpu.dot_dimension_numbers<[1], [0], [0], [1], [0, 0, 1, 1], [], []>} : vector<32x32xbf16>, vector<32x8xbf16>, vector<32x8xf32> -> vector<32x8xf32>
    %260 = vector.extract_strided_slice %240 {offsets = [0, 8], sizes = [32, 8], strides = [1, 1]} : vector<32x32xbf16> to vector<32x8xbf16>
    %261 = vector.extract_strided_slice %241 {offsets = [0, 8], sizes = [32, 8], strides = [1, 1]} : vector<32x32xbf16> to vector<32x8xbf16>
    %cst_127 = arith.constant dense<0.000000e+00> : vector<32x32xf32>
    %262 = tpu.matmul %260, %261, %cst_127 {dimension_numbers = #tpu.dot_dimension_numbers<[1], [1], [0], [0], [0, 0, 1, 0], [], []>} : vector<32x8xbf16>, vector<32x8xbf16>, vector<32x32xf32> -> vector<32x32xf32>
    %263 = arith.addf %262, %6 : vector<32x32xf32>
    %cst_128 = arith.constant dense<0xFF800000> : vector<32xf32>
    %264 = vector.multi_reduction <maximumf>, %263, %cst_128 [1] : vector<32x32xf32> to vector<32xf32>
    %265 = vector.shape_cast %264 : vector<32xf32> to vector<32x1xf32>
    %266 = vector.broadcast %265 : vector<32x1xf32> to vector<32x32xf32>
    %267 = arith.subf %263, %266 : vector<32x32xf32>
    %268 = math.exp %267 : vector<32x32xf32>
    %cst_129 = arith.constant dense<0.000000e+00> : vector<32xf32>
    %269 = vector.multi_reduction <add>, %268, %cst_129 [1] : vector<32x32xf32> to vector<32xf32>
    %270 = vector.shape_cast %269 : vector<32xf32> to vector<32x1xf32>
    %271 = tpu.reciprocal %270 {approx = true} : vector<32x1xf32> -> vector<32x1xf32>
    %272 = vector.broadcast %271 : vector<32x1xf32> to vector<32x32xf32>
    %273 = arith.mulf %268, %272 : vector<32x32xf32>
    %274 = arith.truncf %273 : vector<32x32xf32> to vector<32x32xbf16>
    %275 = vector.extract_strided_slice %242 {offsets = [0, 8], sizes = [32, 8], strides = [1, 1]} : vector<32x32xbf16> to vector<32x8xbf16>
    %cst_130 = arith.constant dense<0.000000e+00> : vector<32x8xf32>
    %276 = tpu.matmul %274, %275, %cst_130 {dimension_numbers = #tpu.dot_dimension_numbers<[1], [0], [0], [1], [0, 0, 1, 1], [], []>} : vector<32x32xbf16>, vector<32x8xbf16>, vector<32x8xf32> -> vector<32x8xf32>
    %277 = vector.extract_strided_slice %240 {offsets = [0, 16], sizes = [32, 8], strides = [1, 1]} : vector<32x32xbf16> to vector<32x8xbf16>
    %278 = vector.extract_strided_slice %241 {offsets = [0, 16], sizes = [32, 8], strides = [1, 1]} : vector<32x32xbf16> to vector<32x8xbf16>
    %cst_131 = arith.constant dense<0.000000e+00> : vector<32x32xf32>
    %279 = tpu.matmul %277, %278, %cst_131 {dimension_numbers = #tpu.dot_dimension_numbers<[1], [1], [0], [0], [0, 0, 1, 0], [], []>} : vector<32x8xbf16>, vector<32x8xbf16>, vector<32x32xf32> -> vector<32x32xf32>
    %280 = arith.addf %279, %6 : vector<32x32xf32>
    %cst_132 = arith.constant dense<0xFF800000> : vector<32xf32>
    %281 = vector.multi_reduction <maximumf>, %280, %cst_132 [1] : vector<32x32xf32> to vector<32xf32>
    %282 = vector.shape_cast %281 : vector<32xf32> to vector<32x1xf32>
    %283 = vector.broadcast %282 : vector<32x1xf32> to vector<32x32xf32>
    %284 = arith.subf %280, %283 : vector<32x32xf32>
    %285 = math.exp %284 : vector<32x32xf32>
    %cst_133 = arith.constant dense<0.000000e+00> : vector<32xf32>
    %286 = vector.multi_reduction <add>, %285, %cst_133 [1] : vector<32x32xf32> to vector<32xf32>
    %287 = vector.shape_cast %286 : vector<32xf32> to vector<32x1xf32>
    %288 = tpu.reciprocal %287 {approx = true} : vector<32x1xf32> -> vector<32x1xf32>
    %289 = vector.broadcast %288 : vector<32x1xf32> to vector<32x32xf32>
    %290 = arith.mulf %285, %289 : vector<32x32xf32>
    %291 = arith.truncf %290 : vector<32x32xf32> to vector<32x32xbf16>
    %292 = vector.extract_strided_slice %242 {offsets = [0, 16], sizes = [32, 8], strides = [1, 1]} : vector<32x32xbf16> to vector<32x8xbf16>
    %cst_134 = arith.constant dense<0.000000e+00> : vector<32x8xf32>
    %293 = tpu.matmul %291, %292, %cst_134 {dimension_numbers = #tpu.dot_dimension_numbers<[1], [0], [0], [1], [0, 0, 1, 1], [], []>} : vector<32x32xbf16>, vector<32x8xbf16>, vector<32x8xf32> -> vector<32x8xf32>
    %294 = vector.extract_strided_slice %240 {offsets = [0, 24], sizes = [32, 8], strides = [1, 1]} : vector<32x32xbf16> to vector<32x8xbf16>
    %295 = vector.extract_strided_slice %241 {offsets = [0, 24], sizes = [32, 8], strides = [1, 1]} : vector<32x32xbf16> to vector<32x8xbf16>
    %cst_135 = arith.constant dense<0.000000e+00> : vector<32x32xf32>
    %296 = tpu.matmul %294, %295, %cst_135 {dimension_numbers = #tpu.dot_dimension_numbers<[1], [1], [0], [0], [0, 0, 1, 0], [], []>} : vector<32x8xbf16>, vector<32x8xbf16>, vector<32x32xf32> -> vector<32x32xf32>
    %297 = arith.addf %296, %6 : vector<32x32xf32>
    %cst_136 = arith.constant dense<0xFF800000> : vector<32xf32>
    %298 = vector.multi_reduction <maximumf>, %297, %cst_136 [1] : vector<32x32xf32> to vector<32xf32>
    %299 = vector.shape_cast %298 : vector<32xf32> to vector<32x1xf32>
    %300 = vector.broadcast %299 : vector<32x1xf32> to vector<32x32xf32>
    %301 = arith.subf %297, %300 : vector<32x32xf32>
    %302 = math.exp %301 : vector<32x32xf32>
    %cst_137 = arith.constant dense<0.000000e+00> : vector<32xf32>
    %303 = vector.multi_reduction <add>, %302, %cst_137 [1] : vector<32x32xf32> to vector<32xf32>
    %304 = vector.shape_cast %303 : vector<32xf32> to vector<32x1xf32>
    %305 = tpu.reciprocal %304 {approx = true} : vector<32x1xf32> -> vector<32x1xf32>
    %306 = vector.broadcast %305 : vector<32x1xf32> to vector<32x32xf32>
    %307 = arith.mulf %302, %306 : vector<32x32xf32>
    %308 = arith.truncf %307 : vector<32x32xf32> to vector<32x32xbf16>
    %309 = vector.extract_strided_slice %242 {offsets = [0, 24], sizes = [32, 8], strides = [1, 1]} : vector<32x32xbf16> to vector<32x8xbf16>
    %cst_138 = arith.constant dense<0.000000e+00> : vector<32x8xf32>
    %310 = tpu.matmul %308, %309, %cst_138 {dimension_numbers = #tpu.dot_dimension_numbers<[1], [0], [0], [1], [0, 0, 1, 1], [], []>} : vector<32x32xbf16>, vector<32x8xbf16>, vector<32x8xf32> -> vector<32x8xf32>
    %311 = tpu.concatenate %259, %276, %293, %310 in 1 : vector<32x8xf32>, vector<32x8xf32>, vector<32x8xf32>, vector<32x8xf32> -> vector<32x32xf32>
    %312 = arith.truncf %311 : vector<32x32xf32> to vector<32x32xbf16>
    %c1_139 = arith.constant 1 : index
    %c0_140 = arith.constant 0 : index
    %c0_141 = arith.constant 0 : index
    %313 = vector.load %arg13[%c1_139, %c0_140, %c0_141] : memref<2x32x32xbf16, #tpu.memory_space<vmem>>, vector<1x32x32xbf16>
    %314 = vector.shape_cast %313 : vector<1x32x32xbf16> to vector<32x32xbf16>
    %cst_142 = arith.constant dense<0.000000e+00> : vector<32x32xf32>
    %315 = tpu.matmul %312, %314, %cst_142 {dimension_numbers = #tpu.dot_dimension_numbers<[1], [0], [0], [1], [0, 0, 1, 1], [], []>} : vector<32x32xbf16>, vector<32x32xbf16>, vector<32x32xf32> -> vector<32x32xf32>
    %c1_143 = arith.constant 1 : index
    %c0_144 = arith.constant 0 : index
    %c0_145 = arith.constant 0 : index
    %316 = vector.load %arg14[%c1_143, %c0_144, %c0_145] : memref<2x1x32xf32, #tpu.memory_space<vmem>>, vector<1x1x32xf32>
    %317 = vector.shape_cast %316 : vector<1x1x32xf32> to vector<1x32xf32>
    %318 = vector.broadcast %317 : vector<1x32xf32> to vector<32x32xf32>
    %319 = arith.addf %315, %318 : vector<32x32xf32>
    %320 = arith.addf %191, %319 : vector<32x32xf32>
    %c1_146 = arith.constant 1 : index
    %c0_147 = arith.constant 0 : index
    %c0_148 = arith.constant 0 : index
    %321 = vector.load %arg15[%c1_146, %c0_147, %c0_148] : memref<2x1x32xf32, #tpu.memory_space<vmem>>, vector<1x1x32xf32>
    %322 = vector.shape_cast %321 : vector<1x1x32xf32> to vector<1x32xf32>
    %c1_149 = arith.constant 1 : index
    %c0_150 = arith.constant 0 : index
    %c0_151 = arith.constant 0 : index
    %323 = vector.load %arg16[%c1_149, %c0_150, %c0_151] : memref<2x1x32xf32, #tpu.memory_space<vmem>>, vector<1x1x32xf32>
    %324 = vector.shape_cast %323 : vector<1x1x32xf32> to vector<1x32xf32>
    %cst_152 = arith.constant dense<0.000000e+00> : vector<32xf32>
    %325 = vector.multi_reduction <add>, %320, %cst_152 [1] : vector<32x32xf32> to vector<32xf32>
    %326 = vector.shape_cast %325 : vector<32xf32> to vector<32x1xf32>
    %cst_153 = arith.constant 3.200000e+01 : f32
    %327 = vector.broadcast %cst_153 : f32 to vector<32x1xf32>
    %328 = arith.divf %326, %327 : vector<32x1xf32>
    %329 = vector.broadcast %328 : vector<32x1xf32> to vector<32x32xf32>
    %330 = arith.subf %320, %329 : vector<32x32xf32>
    %331 = arith.mulf %330, %330 : vector<32x32xf32>
    %cst_154 = arith.constant dense<0.000000e+00> : vector<32xf32>
    %332 = vector.multi_reduction <add>, %331, %cst_154 [1] : vector<32x32xf32> to vector<32xf32>
    %333 = vector.shape_cast %332 : vector<32xf32> to vector<32x1xf32>
    %cst_155 = arith.constant 3.200000e+01 : f32
    %334 = vector.broadcast %cst_155 : f32 to vector<32x1xf32>
    %335 = arith.divf %333, %334 : vector<32x1xf32>
    %336 = vector.broadcast %328 : vector<32x1xf32> to vector<32x32xf32>
    %337 = arith.subf %320, %336 : vector<32x32xf32>
    %cst_156 = arith.constant 9.99999997E-7 : f32
    %338 = vector.broadcast %cst_156 : f32 to vector<32x1xf32>
    %339 = arith.addf %335, %338 : vector<32x1xf32>
    %340 = math.rsqrt %339 : vector<32x1xf32>
    %341 = vector.broadcast %340 : vector<32x1xf32> to vector<32x32xf32>
    %342 = arith.mulf %337, %341 : vector<32x32xf32>
    %343 = vector.broadcast %322 : vector<1x32xf32> to vector<32x32xf32>
    %344 = arith.mulf %342, %343 : vector<32x32xf32>
    %345 = vector.broadcast %324 : vector<1x32xf32> to vector<32x32xf32>
    %346 = arith.addf %344, %345 : vector<32x32xf32>
    %347 = arith.truncf %346 : vector<32x32xf32> to vector<32x32xbf16>
    %c1_157 = arith.constant 1 : index
    %c0_158 = arith.constant 0 : index
    %c0_159 = arith.constant 0 : index
    %348 = vector.load %arg17[%c1_157, %c0_158, %c0_159] : memref<2x32x64xbf16, #tpu.memory_space<vmem>>, vector<1x32x64xbf16>
    %349 = vector.shape_cast %348 : vector<1x32x64xbf16> to vector<32x64xbf16>
    %cst_160 = arith.constant dense<0.000000e+00> : vector<32x64xf32>
    %350 = tpu.matmul %347, %349, %cst_160 {dimension_numbers = #tpu.dot_dimension_numbers<[1], [0], [0], [1], [0, 0, 1, 1], [], []>} : vector<32x32xbf16>, vector<32x64xbf16>, vector<32x64xf32> -> vector<32x64xf32>
    %c1_161 = arith.constant 1 : index
    %c0_162 = arith.constant 0 : index
    %c0_163 = arith.constant 0 : index
    %351 = vector.load %arg18[%c1_161, %c0_162, %c0_163] : memref<2x1x64xf32, #tpu.memory_space<vmem>>, vector<1x1x64xf32>
    %352 = vector.shape_cast %351 : vector<1x1x64xf32> to vector<1x64xf32>
    %353 = vector.broadcast %352 : vector<1x64xf32> to vector<32x64xf32>
    %354 = arith.addf %350, %353 : vector<32x64xf32>
    %355 = arith.mulf %354, %354 : vector<32x64xf32>
    %356 = arith.mulf %354, %355 : vector<32x64xf32>
    %cst_164 = arith.constant 4.471500e-02 : f32
    %357 = vector.broadcast %cst_164 : f32 to vector<32x64xf32>
    %358 = arith.mulf %357, %356 : vector<32x64xf32>
    %359 = arith.addf %354, %358 : vector<32x64xf32>
    %cst_165 = arith.constant 0.797884583 : f32
    %360 = vector.broadcast %cst_165 : f32 to vector<32x64xf32>
    %361 = arith.mulf %360, %359 : vector<32x64xf32>
    %362 = math.tanh %361 : vector<32x64xf32>
    %cst_166 = arith.constant 1.000000e+00 : f32
    %363 = vector.broadcast %cst_166 : f32 to vector<32x64xf32>
    %364 = arith.addf %363, %362 : vector<32x64xf32>
    %cst_167 = arith.constant 5.000000e-01 : f32
    %365 = vector.broadcast %cst_167 : f32 to vector<32x64xf32>
    %366 = arith.mulf %365, %364 : vector<32x64xf32>
    %367 = arith.mulf %354, %366 : vector<32x64xf32>
    %368 = arith.truncf %367 : vector<32x64xf32> to vector<32x64xbf16>
    %c1_168 = arith.constant 1 : index
    %c0_169 = arith.constant 0 : index
    %c0_170 = arith.constant 0 : index
    %369 = vector.load %arg19[%c1_168, %c0_169, %c0_170] : memref<2x64x32xbf16, #tpu.memory_space<vmem>>, vector<1x64x32xbf16>
    %370 = vector.shape_cast %369 : vector<1x64x32xbf16> to vector<64x32xbf16>
    %cst_171 = arith.constant dense<0.000000e+00> : vector<32x32xf32>
    %371 = tpu.matmul %368, %370, %cst_171 {dimension_numbers = #tpu.dot_dimension_numbers<[1], [0], [0], [1], [0, 0, 1, 1], [], []>} : vector<32x64xbf16>, vector<64x32xbf16>, vector<32x32xf32> -> vector<32x32xf32>
    %c1_172 = arith.constant 1 : index
    %c0_173 = arith.constant 0 : index
    %c0_174 = arith.constant 0 : index
    %372 = vector.load %arg20[%c1_172, %c0_173, %c0_174] : memref<2x1x32xf32, #tpu.memory_space<vmem>>, vector<1x1x32xf32>
    %373 = vector.shape_cast %372 : vector<1x1x32xf32> to vector<1x32xf32>
    %374 = vector.broadcast %373 : vector<1x32xf32> to vector<32x32xf32>
    %375 = arith.addf %371, %374 : vector<32x32xf32>
    %376 = arith.addf %320, %375 : vector<32x32xf32>
    %c0_175 = arith.constant 0 : index
    %c0_176 = arith.constant 0 : index
    %377 = vector.load %arg21[%c0_175, %c0_176] : memref<1x32xf32, #tpu.memory_space<vmem>>, vector<1x32xf32>
    %c0_177 = arith.constant 0 : index
    %c0_178 = arith.constant 0 : index
    %378 = vector.load %arg22[%c0_177, %c0_178] : memref<1x32xf32, #tpu.memory_space<vmem>>, vector<1x32xf32>
    %cst_179 = arith.constant dense<0.000000e+00> : vector<32xf32>
    %379 = vector.multi_reduction <add>, %376, %cst_179 [1] : vector<32x32xf32> to vector<32xf32>
    %380 = vector.shape_cast %379 : vector<32xf32> to vector<32x1xf32>
    %cst_180 = arith.constant 3.200000e+01 : f32
    %381 = vector.broadcast %cst_180 : f32 to vector<32x1xf32>
    %382 = arith.divf %380, %381 : vector<32x1xf32>
    %383 = vector.broadcast %382 : vector<32x1xf32> to vector<32x32xf32>
    %384 = arith.subf %376, %383 : vector<32x32xf32>
    %385 = arith.mulf %384, %384 : vector<32x32xf32>
    %cst_181 = arith.constant dense<0.000000e+00> : vector<32xf32>
    %386 = vector.multi_reduction <add>, %385, %cst_181 [1] : vector<32x32xf32> to vector<32xf32>
    %387 = vector.shape_cast %386 : vector<32xf32> to vector<32x1xf32>
    %cst_182 = arith.constant 3.200000e+01 : f32
    %388 = vector.broadcast %cst_182 : f32 to vector<32x1xf32>
    %389 = arith.divf %387, %388 : vector<32x1xf32>
    %390 = vector.broadcast %382 : vector<32x1xf32> to vector<32x32xf32>
    %391 = arith.subf %376, %390 : vector<32x32xf32>
    %cst_183 = arith.constant 9.99999997E-7 : f32
    %392 = vector.broadcast %cst_183 : f32 to vector<32x1xf32>
    %393 = arith.addf %389, %392 : vector<32x1xf32>
    %394 = math.rsqrt %393 : vector<32x1xf32>
    %395 = vector.broadcast %394 : vector<32x1xf32> to vector<32x32xf32>
    %396 = arith.mulf %391, %395 : vector<32x32xf32>
    %397 = vector.broadcast %377 : vector<1x32xf32> to vector<32x32xf32>
    %398 = arith.mulf %396, %397 : vector<32x32xf32>
    %399 = vector.broadcast %378 : vector<1x32xf32> to vector<32x32xf32>
    %400 = arith.addf %398, %399 : vector<32x32xf32>
    %c0_184 = arith.constant 0 : index
    %c0_185 = arith.constant 0 : index
    %401 = vector.load %arg23[%c0_184, %c0_185] : memref<2x32xf32, #tpu.memory_space<vmem>>, vector<2x32xf32>
    %cst_186 = arith.constant dense<0.000000e+00> : vector<2x32xf32>
    %402 = tpu.matmul %401, %400, %cst_186 {dimension_numbers = #tpu.dot_dimension_numbers<[1], [0], [0], [1], [0, 0, 1, 1], [], []>} : vector<2x32xf32>, vector<32x32xf32>, vector<2x32xf32> -> vector<2x32xf32>
    %c0_187 = arith.constant 0 : index
    %c0_188 = arith.constant 0 : index
    %403 = vector.load %arg24[%c0_187, %c0_188] : memref<2x32xf32, #tpu.memory_space<vmem>>, vector<2x32xf32>
    tpu.vector_store %arg24[%c0_187, %c0_188], %402 {strides = array<i32>} : memref<2x32xf32, #tpu.memory_space<vmem>>, vector<2x32xf32>,
    return
  }
  func.func @transform_0(%arg0: i32) -> (i32, i32, i32) {
    %c0_i32 = arith.constant 0 : i32
    %c0_i32_0 = arith.constant 0 : i32
    %c0_i32_1 = arith.constant 0 : i32
    return %arg0, %c0_i32, %c0_i32_0 : i32, i32, i32
  }
  func.func @transform_1(%arg0: i32) -> (i32, i32) {
    %c0_i32 = arith.constant 0 : i32
    %c0_i32_0 = arith.constant 0 : i32
    %c0_i32_1 = arith.constant 0 : i32
    return %c0_i32, %c0_i32_0 : i32, i32
  }
  func.func @transform_2(%arg0: i32) -> (i32, i32) {
    %c0_i32 = arith.constant 0 : i32
    %c0_i32_0 = arith.constant 0 : i32
    %c0_i32_1 = arith.constant 0 : i32
    return %c0_i32, %c0_i32_0 : i32, i32
  }
  func.func @transform_3(%arg0: i32) -> (i32, i32) {
    %c0_i32 = arith.constant 0 : i32
    %c0_i32_0 = arith.constant 0 : i32
    %c0_i32_1 = arith.constant 0 : i32
    return %c0_i32, %c0_i32_0 : i32, i32
  }
  func.func @transform_4(%arg0: i32) -> (i32, i32, i32) {
    %c0_i32 = arith.constant 0 : i32
    %c0_i32_0 = arith.constant 0 : i32
    %c0_i32_1 = arith.constant 0 : i32
    %c0_i32_2 = arith.constant 0 : i32
    return %c0_i32, %c0_i32_0, %c0_i32_1 : i32, i32, i32
  }
  func.func @transform_5(%arg0: i32) -> (i32, i32, i32) {
    %c0_i32 = arith.constant 0 : i32
    %c0_i32_0 = arith.constant 0 : i32
    %c0_i32_1 = arith.constant 0 : i32
    %c0_i32_2 = arith.constant 0 : i32
    return %c0_i32, %c0_i32_0, %c0_i32_1 : i32, i32, i32
  }
  func.func @transform_6(%arg0: i32) -> (i32, i32, i32) {
    %c0_i32 = arith.constant 0 : i32
    %c0_i32_0 = arith.constant 0 : i32
    %c0_i32_1 = arith.constant 0 : i32
    %c0_i32_2 = arith.constant 0 : i32
    return %c0_i32, %c0_i32_0, %c0_i32_1 : i32, i32, i32
  }
  func.func @transform_7(%arg0: i32) -> (i32, i32, i32) {
    %c0_i32 = arith.constant 0 : i32
    %c0_i32_0 = arith.constant 0 : i32
    %c0_i32_1 = arith.constant 0 : i32
    %c0_i32_2 = arith.constant 0 : i32
    return %c0_i32, %c0_i32_0, %c0_i32_1 : i32, i32, i32
  }
  func.func @transform_8(%arg0: i32) -> (i32, i32, i32) {
    %c0_i32 = arith.constant 0 : i32
    %c0_i32_0 = arith.constant 0 : i32
    %c0_i32_1 = arith.constant 0 : i32
    %c0_i32_2 = arith.constant 0 : i32
    return %c0_i32, %c0_i32_0, %c0_i32_1 : i32, i32, i32
  }
  func.func @transform_9(%arg0: i32) -> (i32, i32, i32) {
    %c0_i32 = arith.constant 0 : i32
    %c0_i32_0 = arith.constant 0 : i32
    %c0_i32_1 = arith.constant 0 : i32
    %c0_i32_2 = arith.constant 0 : i32
    return %c0_i32, %c0_i32_0, %c0_i32_1 : i32, i32, i32
  }
  func.func @transform_10(%arg0: i32) -> (i32, i32, i32) {
    %c0_i32 = arith.constant 0 : i32
    %c0_i32_0 = arith.constant 0 : i32
    %c0_i32_1 = arith.constant 0 : i32
    %c0_i32_2 = arith.constant 0 : i32
    return %c0_i32, %c0_i32_0, %c0_i32_1 : i32, i32, i32
  }
  func.func @transform_11(%arg0: i32) -> (i32, i32, i32) {
    %c0_i32 = arith.constant 0 : i32
    %c0_i32_0 = arith.constant 0 : i32
    %c0_i32_1 = arith.constant 0 : i32
    %c0_i32_2 = arith.constant 0 : i32
    return %c0_i32, %c0_i32_0, %c0_i32_1 : i32, i32, i32
  }
  func.func @transform_12(%arg0: i32) -> (i32, i32, i32) {
    %c0_i32 = arith.constant 0 : i32
    %c0_i32_0 = arith.constant 0 : i32
    %c0_i32_1 = arith.constant 0 : i32
    %c0_i32_2 = arith.constant 0 : i32
    return %c0_i32, %c0_i32_0, %c0_i32_1 : i32, i32, i32
  }
  func.func @transform_13(%arg0: i32) -> (i32, i32, i32) {
    %c0_i32 = arith.constant 0 : i32
    %c0_i32_0 = arith.constant 0 : i32
    %c0_i32_1 = arith.constant 0 : i32
    %c0_i32_2 = arith.constant 0 : i32
    return %c0_i32, %c0_i32_0, %c0_i32_1 : i32, i32, i32
  }
  func.func @transform_14(%arg0: i32) -> (i32, i32, i32) {
    %c0_i32 = arith.constant 0 : i32
    %c0_i32_0 = arith.constant 0 : i32
    %c0_i32_1 = arith.constant 0 : i32
    %c0_i32_2 = arith.constant 0 : i32
    return %c0_i32, %c0_i32_0, %c0_i32_1 : i32, i32, i32
  }
  func.func @transform_15(%arg0: i32) -> (i32, i32, i32) {
    %c0_i32 = arith.constant 0 : i32
    %c0_i32_0 = arith.constant 0 : i32
    %c0_i32_1 = arith.constant 0 : i32
    %c0_i32_2 = arith.constant 0 : i32
    return %c0_i32, %c0_i32_0, %c0_i32_1 : i32, i32, i32
  }
  func.func @transform_16(%arg0: i32) -> (i32, i32, i32) {
    %c0_i32 = arith.constant 0 : i32
    %c0_i32_0 = arith.constant 0 : i32
    %c0_i32_1 = arith.constant 0 : i32
    %c0_i32_2 = arith.constant 0 : i32
    return %c0_i32, %c0_i32_0, %c0_i32_1 : i32, i32, i32
  }
  func.func @transform_17(%arg0: i32) -> (i32, i32, i32) {
    %c0_i32 = arith.constant 0 : i32
    %c0_i32_0 = arith.constant 0 : i32
    %c0_i32_1 = arith.constant 0 : i32
    %c0_i32_2 = arith.constant 0 : i32
    return %c0_i32, %c0_i32_0, %c0_i32_1 : i32, i32, i32
  }
  func.func @transform_18(%arg0: i32) -> (i32, i32, i32) {
    %c0_i32 = arith.constant 0 : i32
    %c0_i32_0 = arith.constant 0 : i32
    %c0_i32_1 = arith.constant 0 : i32
    %c0_i32_2 = arith.constant 0 : i32
    return %c0_i32, %c0_i32_0, %c0_i32_1 : i32, i32, i32
  }
  func.func @transform_19(%arg0: i32) -> (i32, i32, i32) {
    %c0_i32 = arith.constant 0 : i32
    %c0_i32_0 = arith.constant 0 : i32
    %c0_i32_1 = arith.constant 0 : i32
    %c0_i32_2 = arith.constant 0 : i32
    return %c0_i32, %c0_i32_0, %c0_i32_1 : i32, i32, i32
  }
  func.func @transform_20(%arg0: i32) -> (i32, i32) {
    %c0_i32 = arith.constant 0 : i32
    %c0_i32_0 = arith.constant 0 : i32
    %c0_i32_1 = arith.constant 0 : i32
    return %c0_i32, %c0_i32_0 : i32, i32
  }
  func.func @transform_21(%arg0: i32) -> (i32, i32) {
    %c0_i32 = arith.constant 0 : i32
    %c0_i32_0 = arith.constant 0 : i32
    %c0_i32_1 = arith.constant 0 : i32
    return %c0_i32, %c0_i32_0 : i32, i32
  }
  func.func @transform_22(%arg0: i32) -> (i32, i32) {
    %c0_i32 = arith.constant 0 : i32
    %c0_i32_0 = arith.constant 0 : i32
    %c0_i32_1 = arith.constant 0 : i32
    return %c0_i32, %c0_i32_0 : i32, i32
  }
  func.func @transform_23(%arg0: i32) -> (i32, i32) {
    %c0_i32 = arith.constant 0 : i32
    %c0_i32_0 = arith.constant 0 : i32
    return %arg0, %c0_i32 : i32, i32
  }
}

module attributes {stable_mosaic.version = 11 : i64} {
  func.func @vit_kernel(%arg0: i32, %arg1: memref<1x32x192xbf16, #tpu.memory_space<vmem>>, %arg2: memref<192x32xbf16, #tpu.memory_space<vmem>>, %arg3: memref<32x32xf32, #tpu.memory_space<vmem>>, %arg4: memref<32x32xf32, #tpu.memory_space<vmem>>, %arg5: memref<2x1x32xf32, #tpu.memory_space<vmem>>, %arg6: memref<2x1x32xf32, #tpu.memory_space<vmem>>, %arg7: memref<2x32x32xbf16, #tpu.memory_space<vmem>>, %arg8: memref<2x1x32xf32, #tpu.memory_space<vmem>>, %arg9: memref<2x32x32xbf16, #tpu.memory_space<vmem>>, %arg10: memref<2x1x32xf32, #tpu.memory_space<vmem>>, %arg11: memref<2x32x32xbf16, #tpu.memory_space<vmem>>, %arg12: memref<2x1x32xf32, #tpu.memory_space<vmem>>, %arg13: memref<2x32x32xbf16, #tpu.memory_space<vmem>>, %arg14: memref<2x1x32xf32, #tpu.memory_space<vmem>>, %arg15: memref<2x1x32xf32, #tpu.memory_space<vmem>>, %arg16: memref<2x1x32xf32, #tpu.memory_space<vmem>>, %arg17: memref<2x32x64xbf16, #tpu.memory_space<vmem>>, %arg18: memref<2x1x64xf32, #tpu.memory_space<vmem>>, %arg19: memref<2x64x32xbf16, #tpu.memory_space<vmem>>, %arg20: memref<2x1x32xf32, #tpu.memory_space<vmem>>, %arg21: memref<1x32xf32, #tpu.memory_space<vmem>>, %arg22: memref<1x32xf32, #tpu.memory_space<vmem>>, %arg23: memref<2x32xf32, #tpu.memory_space<vmem>>, %arg24: memref<2x32xf32, #tpu.memory_space<vmem>>) attributes {dimension_semantics = [#tpu.dimension_semantics<parallel>], iteration_bounds = array<i64: 1>, scalar_prefetch = 0 : i64, scratch_operands = 0 : i64, tpu.core_type = #tpu.core_type<tc>, window_params = [{transform_indices = @transform_0, window_bounds = array<i64: 1, 32, 192>}, {pipeline_mode = #tpu.pipeline_mode<synchronous>, transform_indices = @transform_1, window_bounds = array<i64: 192, 32>}, {pipeline_mode = #tpu.pipeline_mode<synchronous>, transform_indices = @transform_2, window_bounds = array<i64: 32, 32>}, {pipeline_mode = #tpu.pipeline_mode<synchronous>, transform_indices = @transform_3, window_bounds = array<i64: 32, 32>}, {pipeline_mode = #tpu.pipeline_mode<synchronous>, transform_indices = @transform_4, window_bounds = array<i64: 2, 1, 32>}, {pipeline_mode = #tpu.pipeline_mode<synchronous>, transform_indices = @transform_5, window_bounds = array<i64: 2, 1, 32>}, {pipeline_mode = #tpu.pipeline_mode<synchronous>, transform_indices = @transform_6, window_bounds = array<i64: 2, 32, 32>}, {pipeline_mode = #tpu.pipeline_mode<synchronous>, transform_indices = @transform_7, window_bounds = array<i64: 2, 1, 32>}, {pipeline_mode = #tpu.pipeline_mode<synchronous>, transform_indices = @transform_8, window_bounds = array<i64: 2, 32, 32>}, {pipeline_mode = #tpu.pipeline_mode<synchronous>, transform_indices = @transform_9, window_bounds = array<i64: 2, 1, 32>}, {pipeline_mode = #tpu.pipeline_mode<synchronous>, transform_indices = @transform_10, window_bounds = array<i64: 2, 32, 32>}, {pipeline_mode = #tpu.pipeline_mode<synchronous>, transform_indices = @transform_11, window_bounds = array<i64: 2, 1, 32>}, {pipeline_mode = #tpu.pipeline_mode<synchronous>, transform_indices = @transform_12, window_bounds = array<i64: 2, 32, 32>}, {pipeline_mode = #tpu.pipeline_mode<synchronous>, transform_indices = @transform_13, window_bounds = array<i64: 2, 1, 32>}, {pipeline_mode = #tpu.pipeline_mode<synchronous>, transform_indices = @transform_14, window_bounds = array<i64: 2, 1, 32>}, {pipeline_mode = #tpu.pipeline_mode<synchronous>, transform_indices = @transform_15, window_bounds = array<i64: 2, 1, 32>}, {pipeline_mode = #tpu.pipeline_mode<synchronous>, transform_indices = @transform_16, window_bounds = array<i64: 2, 32, 64>}, {pipeline_mode = #tpu.pipeline_mode<synchronous>, transform_indices = @transform_17, window_bounds = array<i64: 2, 1, 64>}, {pipeline_mode = #tpu.pipeline_mode<synchronous>, transform_indices = @transform_18, window_bounds = array<i64: 2, 64, 32>}, {pipeline_mode = #tpu.pipeline_mode<synchronous>, transform_indices = @transform_19, window_bounds = array<i64: 2, 1, 32>}, {pipeline_mode = #tpu.pipeline_mode<synchronous>, transform_indices = @transform_20, window_bounds = array<i64: 1, 32>}, {pipeline_mode = #tpu.pipeline_mode<synchronous>, transform_indices = @transform_21, window_bounds = array<i64: 1, 32>}, {pipeline_mode = #tpu.pipeline_mode<synchronous>, transform_indices = @transform_22, window_bounds = array<i64: 2, 32>}, {transform_indices = @transform_23, window_bounds = array<i64: 2, 32>}]} {
    %c0 = arith.constant 0 : index
    %c0_0 = arith.constant 0 : index
    %c0_1 = arith.constant 0 : index
    %0 = vector.load %arg1[%c0, %c0_0, %c0_1] : memref<1x32x192xbf16, #tpu.memory_space<vmem>>, vector<1x32x192xbf16>
    %1 = vector.shape_cast %0 : vector<1x32x192xbf16> to vector<32x192xbf16>
    %c0_2 = arith.constant 0 : index
    %c0_3 = arith.constant 0 : index
    %2 = vector.load %arg2[%c0_2, %c0_3] : memref<192x32xbf16, #tpu.memory_space<vmem>>, vector<192x32xbf16>
    %cst = arith.constant dense<0.000000e+00> : vector<32x32xf32>
    %3 = tpu.matmul %1, %2, %cst {dimension_numbers = #tpu.dot_dimension_numbers<[1], [0], [0], [1], [0, 0, 1, 1], [], []>} : vector<32x192xbf16>, vector<192x32xbf16>, vector<32x32xf32> -> vector<32x32xf32>
    %c0_4 = arith.constant 0 : index
    %c0_5 = arith.constant 0 : index
    %4 = vector.load %arg3[%c0_4, %c0_5] : memref<32x32xf32, #tpu.memory_space<vmem>>, vector<32x32xf32>
    %5 = arith.addf %3, %4 : vector<32x32xf32>
    %c0_6 = arith.constant 0 : index
    %c0_7 = arith.constant 0 : index
    %6 = vector.load %arg4[%c0_6, %c0_7] : memref<32x32xf32, #tpu.memory_space<vmem>>, vector<32x32xf32>
    %c0_8 = arith.constant 0 : index
    %c0_9 = arith.constant 0 : index
    %c0_10 = arith.constant 0 : index
    %7 = vector.load %arg5[%c0_8, %c0_9, %c0_10] : memref<2x1x32xf32, #tpu.memory_space<vmem>>, vector<1x1x32xf32>
    %8 = vector.shape_cast %7 : vector<1x1x32xf32> to vector<1x32xf32>
    %c0_11 = arith.constant 0 : index
    %c0_12 = arith.constant 0 : index
    %c0_13 = arith.constant 0 : index
    %9 = vector.load %arg6[%c0_11, %c0_12, %c0_13] : memref<2x1x32xf32, #tpu.memory_space<vmem>>, vector<1x1x32xf32>
    %10 = vector.shape_cast %9 : vector<1x1x32xf32> to vector<1x32xf32>
    %cst_14 = arith.constant dense<0.000000e+00> : vector<32xf32>
    %11 = vector.multi_reduction <add>, %5, %cst_14 [1] : vector<32x32xf32> to vector<32xf32>
    %12 = vector.shape_cast %11 : vector<32xf32> to vector<32x1xf32>
    %cst_15 = arith.constant 3.200000e+01 : f32
    %13 = vector.broadcast %cst_15 : f32 to vector<32x1xf32>
    %14 = arith.divf %12, %13 : vector<32x1xf32>
    %15 = vector.broadcast %14 : vector<32x1xf32> to vector<32x32xf32>
    %16 = arith.subf %5, %15 : vector<32x32xf32>
    %17 = arith.mulf %16, %16 : vector<32x32xf32>
    %cst_16 = arith.constant dense<0.000000e+00> : vector<32xf32>
    %18 = vector.multi_reduction <add>, %17, %cst_16 [1] : vector<32x32xf32> to vector<32xf32>
    %19 = vector.shape_cast %18 : vector<32xf32> to vector<32x1xf32>
    %cst_17 = arith.constant 3.200000e+01 : f32
    %20 = vector.broadcast %cst_17 : f32 to vector<32x1xf32>
    %21 = arith.divf %19, %20 : vector<32x1xf32>
    %22 = vector.broadcast %14 : vector<32x1xf32> to vector<32x32xf32>
    %23 = arith.subf %5, %22 : vector<32x32xf32>
    %cst_18 = arith.constant 9.99999997E-7 : f32
    %24 = vector.broadcast %cst_18 : f32 to vector<32x1xf32>
    %25 = arith.addf %21, %24 : vector<32x1xf32>
    %26 = math.rsqrt %25 : vector<32x1xf32>
    %27 = vector.broadcast %26 : vector<32x1xf32> to vector<32x32xf32>
    %28 = arith.mulf %23, %27 : vector<32x32xf32>
    %29 = vector.broadcast %8 : vector<1x32xf32> to vector<32x32xf32>
    %30 = arith.mulf %28, %29 : vector<32x32xf32>
    %31 = vector.broadcast %10 : vector<1x32xf32> to vector<32x32xf32>
    %32 = arith.addf %30, %31 : vector<32x32xf32>
    %33 = arith.truncf %32 : vector<32x32xf32> to vector<32x32xbf16>
    %c0_19 = arith.constant 0 : index
    %c0_20 = arith.constant 0 : index
    %c0_21 = arith.constant 0 : index
    %34 = vector.load %arg7[%c0_19, %c0_20, %c0_21] : memref<2x32x32xbf16, #tpu.memory_space<vmem>>, vector<1x32x32xbf16>
    %35 = vector.shape_cast %34 : vector<1x32x32xbf16> to vector<32x32xbf16>
    %cst_22 = arith.constant dense<0.000000e+00> : vector<32x32xf32>
    %36 = tpu.matmul %33, %35, %cst_22 {dimension_numbers = #tpu.dot_dimension_numbers<[1], [0], [0], [1], [0, 0, 1, 1], [], []>} : vector<32x32xbf16>, vector<32x32xbf16>, vector<32x32xf32> -> vector<32x32xf32>
    %c0_23 = arith.constant 0 : index
    %c0_24 = arith.constant 0 : index
    %c0_25 = arith.constant 0 : index
    %37 = vector.load %arg8[%c0_23, %c0_24, %c0_25] : memref<2x1x32xf32, #tpu.memory_space<vmem>>, vector<1x1x32xf32>
    %38 = vector.shape_cast %37 : vector<1x1x32xf32> to vector<1x32xf32>
    %39 = vector.broadcast %38 : vector<1x32xf32> to vector<32x32xf32>
    %40 = arith.addf %36, %39 : vector<32x32xf32>
    %c0_26 = arith.constant 0 : index
    %c0_27 = arith.constant 0 : index
    %c0_28 = arith.constant 0 : index
    %41 = vector.load %arg9[%c0_26, %c0_27, %c0_28] : memref<2x32x32xbf16, #tpu.memory_space<vmem>>, vector<1x32x32xbf16>
    %42 = vector.shape_cast %41 : vector<1x32x32xbf16> to vector<32x32xbf16>
    %cst_29 = arith.constant dense<0.000000e+00> : vector<32x32xf32>
    %43 = tpu.matmul %33, %42, %cst_29 {dimension_numbers = #tpu.dot_dimension_numbers<[1], [0], [0], [1], [0, 0, 1, 1], [], []>} : vector<32x32xbf16>, vector<32x32xbf16>, vector<32x32xf32> -> vector<32x32xf32>
    %c0_30 = arith.constant 0 : index
    %c0_31 = arith.constant 0 : index
    %c0_32 = arith.constant 0 : index
    %44 = vector.load %arg10[%c0_30, %c0_31, %c0_32] : memref<2x1x32xf32, #tpu.memory_space<vmem>>, vector<1x1x32xf32>
    %45 = vector.shape_cast %44 : vector<1x1x32xf32> to vector<1x32xf32>
    %46 = vector.broadcast %45 : vector<1x32xf32> to vector<32x32xf32>
    %47 = arith.addf %43, %46 : vector<32x32xf32>
    %c0_33 = arith.constant 0 : index
    %c0_34 = arith.constant 0 : index
    %c0_35 = arith.constant 0 : index
    %48 = vector.load %arg11[%c0_33, %c0_34, %c0_35] : memref<2x32x32xbf16, #tpu.memory_space<vmem>>, vector<1x32x32xbf16>
    %49 = vector.shape_cast %48 : vector<1x32x32xbf16> to vector<32x32xbf16>
    %cst_36 = arith.constant dense<0.000000e+00> : vector<32x32xf32>
    %50 = tpu.matmul %33, %49, %cst_36 {dimension_numbers = #tpu.dot_dimension_numbers<[1], [0], [0], [1], [0, 0, 1, 1], [], []>} : vector<32x32xbf16>, vector<32x32xbf16>, vector<32x32xf32> -> vector<32x32xf32>
    %c0_37 = arith.constant 0 : index
    %c0_38 = arith.constant 0 : index
    %c0_39 = arith.constant 0 : index
    %51 = vector.load %arg12[%c0_37, %c0_38, %c0_39] : memref<2x1x32xf32, #tpu.memory_space<vmem>>, vector<1x1x32xf32>
    %52 = vector.shape_cast %51 : vector<1x1x32xf32> to vector<1x32xf32>
    %53 = vector.broadcast %52 : vector<1x32xf32> to vector<32x32xf32>
    %54 = arith.addf %50, %53 : vector<32x32xf32>
    %55 = arith.truncf %40 : vector<32x32xf32> to vector<32x32xbf16>
    %56 = arith.truncf %47 : vector<32x32xf32> to vector<32x32xbf16>
    %57 = arith.truncf %54 : vector<32x32xf32> to vector<32x32xbf16>
    %58 = vector.extract_strided_slice %55 {offsets = [0, 0], sizes = [32, 8], strides = [1, 1]} : vector<32x32xbf16> to vector<32x8xbf16>
    %59 = vector.extract_strided_slice %56 {offsets = [0, 0], sizes = [32, 8], strides = [1, 1]} : vector<32x32xbf16> to vector<32x8xbf16>
    %cst_40 = arith.constant dense<0.000000e+00> : vector<32x32xf32>
    %60 = tpu.matmul %58, %59, %cst_40 {dimension_numbers = #tpu.dot_dimension_numbers<[1], [1], [0], [0], [0, 0, 1, 0], [], []>} : vector<32x8xbf16>, vector<32x8xbf16>, vector<32x32xf32> -> vector<32x32xf32>
    %61 = arith.addf %60, %6 : vector<32x32xf32>
    %cst_41 = arith.constant dense<0xFF800000> : vector<32xf32>
    %62 = vector.multi_reduction <maximumf>, %61, %cst_41 [1] : vector<32x32xf32> to vector<32xf32>
    %63 = vector.shape_cast %62 : vector<32xf32> to vector<32x1xf32>
    %64 = vector.broadcast %63 : vector<32x1xf32> to vector<32x32xf32>
    %65 = arith.subf %61, %64 : vector<32x32xf32>
    %66 = math.exp %65 : vector<32x32xf32>
    %cst_42 = arith.constant dense<0.000000e+00> : vector<32xf32>
    %67 = vector.multi_reduction <add>, %66, %cst_42 [1] : vector<32x32xf32> to vector<32xf32>
    %68 = vector.shape_cast %67 : vector<32xf32> to vector<32x1xf32>
    %69 = tpu.reciprocal %68 {approx = true} : vector<32x1xf32> -> vector<32x1xf32>
    %70 = vector.broadcast %69 : vector<32x1xf32> to vector<32x32xf32>
    %71 = arith.mulf %66, %70 : vector<32x32xf32>
    %72 = arith.truncf %71 : vector<32x32xf32> to vector<32x32xbf16>
    %73 = vector.extract_strided_slice %57 {offsets = [0, 0], sizes = [32, 8], strides = [1, 1]} : vector<32x32xbf16> to vector<32x8xbf16>
    %cst_43 = arith.constant dense<0.000000e+00> : vector<32x8xf32>
    %74 = tpu.matmul %72, %73, %cst_43 {dimension_numbers = #tpu.dot_dimension_numbers<[1], [0], [0], [1], [0, 0, 1, 1], [], []>} : vector<32x32xbf16>, vector<32x8xbf16>, vector<32x8xf32> -> vector<32x8xf32>
    %75 = vector.extract_strided_slice %55 {offsets = [0, 8], sizes = [32, 8], strides = [1, 1]} : vector<32x32xbf16> to vector<32x8xbf16>
    %76 = vector.extract_strided_slice %56 {offsets = [0, 8], sizes = [32, 8], strides = [1, 1]} : vector<32x32xbf16> to vector<32x8xbf16>
    %cst_44 = arith.constant dense<0.000000e+00> : vector<32x32xf32>
    %77 = tpu.matmul %75, %76, %cst_44 {dimension_numbers = #tpu.dot_dimension_numbers<[1], [1], [0], [0], [0, 0, 1, 0], [], []>} : vector<32x8xbf16>, vector<32x8xbf16>, vector<32x32xf32> -> vector<32x32xf32>
    %78 = arith.addf %77, %6 : vector<32x32xf32>
    %cst_45 = arith.constant dense<0xFF800000> : vector<32xf32>
    %79 = vector.multi_reduction <maximumf>, %78, %cst_45 [1] : vector<32x32xf32> to vector<32xf32>
    %80 = vector.shape_cast %79 : vector<32xf32> to vector<32x1xf32>
    %81 = vector.broadcast %80 : vector<32x1xf32> to vector<32x32xf32>
    %82 = arith.subf %78, %81 : vector<32x32xf32>
    %83 = math.exp %82 : vector<32x32xf32>
    %cst_46 = arith.constant dense<0.000000e+00> : vector<32xf32>
    %84 = vector.multi_reduction <add>, %83, %cst_46 [1] : vector<32x32xf32> to vector<32xf32>
    %85 = vector.shape_cast %84 : vector<32xf32> to vector<32x1xf32>
    %86 = tpu.reciprocal %85 {approx = true} : vector<32x1xf32> -> vector<32x1xf32>
    %87 = vector.broadcast %86 : vector<32x1xf32> to vector<32x32xf32>
    %88 = arith.mulf %83, %87 : vector<32x32xf32>
    %89 = arith.truncf %88 : vector<32x32xf32> to vector<32x32xbf16>
    %90 = vector.extract_strided_slice %57 {offsets = [0, 8], sizes = [32, 8], strides = [1, 1]} : vector<32x32xbf16> to vector<32x8xbf16>
    %cst_47 = arith.constant dense<0.000000e+00> : vector<32x8xf32>
    %91 = tpu.matmul %89, %90, %cst_47 {dimension_numbers = #tpu.dot_dimension_numbers<[1], [0], [0], [1], [0, 0, 1, 1], [], []>} : vector<32x32xbf16>, vector<32x8xbf16>, vector<32x8xf32> -> vector<32x8xf32>
    %92 = vector.extract_strided_slice %55 {offsets = [0, 16], sizes = [32, 8], strides = [1, 1]} : vector<32x32xbf16> to vector<32x8xbf16>
    %93 = vector.extract_strided_slice %56 {offsets = [0, 16], sizes = [32, 8], strides = [1, 1]} : vector<32x32xbf16> to vector<32x8xbf16>
    %cst_48 = arith.constant dense<0.000000e+00> : vector<32x32xf32>
    %94 = tpu.matmul %92, %93, %cst_48 {dimension_numbers = #tpu.dot_dimension_numbers<[1], [1], [0], [0], [0, 0, 1, 0], [], []>} : vector<32x8xbf16>, vector<32x8xbf16>, vector<32x32xf32> -> vector<32x32xf32>
    %95 = arith.addf %94, %6 : vector<32x32xf32>
    %cst_49 = arith.constant dense<0xFF800000> : vector<32xf32>
    %96 = vector.multi_reduction <maximumf>, %95, %cst_49 [1] : vector<32x32xf32> to vector<32xf32>
    %97 = vector.shape_cast %96 : vector<32xf32> to vector<32x1xf32>
    %98 = vector.broadcast %97 : vector<32x1xf32> to vector<32x32xf32>
    %99 = arith.subf %95, %98 : vector<32x32xf32>
    %100 = math.exp %99 : vector<32x32xf32>
    %cst_50 = arith.constant dense<0.000000e+00> : vector<32xf32>
    %101 = vector.multi_reduction <add>, %100, %cst_50 [1] : vector<32x32xf32> to vector<32xf32>
    %102 = vector.shape_cast %101 : vector<32xf32> to vector<32x1xf32>
    %103 = tpu.reciprocal %102 {approx = true} : vector<32x1xf32> -> vector<32x1xf32>
    %104 = vector.broadcast %103 : vector<32x1xf32> to vector<32x32xf32>
    %105 = arith.mulf %100, %104 : vector<32x32xf32>
    %106 = arith.truncf %105 : vector<32x32xf32> to vector<32x32xbf16>
    %107 = vector.extract_strided_slice %57 {offsets = [0, 16], sizes = [32, 8], strides = [1, 1]} : vector<32x32xbf16> to vector<32x8xbf16>
    %cst_51 = arith.constant dense<0.000000e+00> : vector<32x8xf32>
    %108 = tpu.matmul %106, %107, %cst_51 {dimension_numbers = #tpu.dot_dimension_numbers<[1], [0], [0], [1], [0, 0, 1, 1], [], []>} : vector<32x32xbf16>, vector<32x8xbf16>, vector<32x8xf32> -> vector<32x8xf32>
    %109 = vector.extract_strided_slice %55 {offsets = [0, 24], sizes = [32, 8], strides = [1, 1]} : vector<32x32xbf16> to vector<32x8xbf16>
    %110 = vector.extract_strided_slice %56 {offsets = [0, 24], sizes = [32, 8], strides = [1, 1]} : vector<32x32xbf16> to vector<32x8xbf16>
    %cst_52 = arith.constant dense<0.000000e+00> : vector<32x32xf32>
    %111 = tpu.matmul %109, %110, %cst_52 {dimension_numbers = #tpu.dot_dimension_numbers<[1], [1], [0], [0], [0, 0, 1, 0], [], []>} : vector<32x8xbf16>, vector<32x8xbf16>, vector<32x32xf32> -> vector<32x32xf32>
    %112 = arith.addf %111, %6 : vector<32x32xf32>
    %cst_53 = arith.constant dense<0xFF800000> : vector<32xf32>
    %113 = vector.multi_reduction <maximumf>, %112, %cst_53 [1] : vector<32x32xf32> to vector<32xf32>
    %114 = vector.shape_cast %113 : vector<32xf32> to vector<32x1xf32>
    %115 = vector.broadcast %114 : vector<32x1xf32> to vector<32x32xf32>
    %116 = arith.subf %112, %115 : vector<32x32xf32>
    %117 = math.exp %116 : vector<32x32xf32>
    %cst_54 = arith.constant dense<0.000000e+00> : vector<32xf32>
    %118 = vector.multi_reduction <add>, %117, %cst_54 [1] : vector<32x32xf32> to vector<32xf32>
    %119 = vector.shape_cast %118 : vector<32xf32> to vector<32x1xf32>
    %120 = tpu.reciprocal %119 {approx = true} : vector<32x1xf32> -> vector<32x1xf32>
    %121 = vector.broadcast %120 : vector<32x1xf32> to vector<32x32xf32>
    %122 = arith.mulf %117, %121 : vector<32x32xf32>
    %123 = arith.truncf %122 : vector<32x32xf32> to vector<32x32xbf16>
    %124 = vector.extract_strided_slice %57 {offsets = [0, 24], sizes = [32, 8], strides = [1, 1]} : vector<32x32xbf16> to vector<32x8xbf16>
    %cst_55 = arith.constant dense<0.000000e+00> : vector<32x8xf32>
    %125 = tpu.matmul %123, %124, %cst_55 {dimension_numbers = #tpu.dot_dimension_numbers<[1], [0], [0], [1], [0, 0, 1, 1], [], []>} : vector<32x32xbf16>, vector<32x8xbf16>, vector<32x8xf32> -> vector<32x8xf32>
    %126 = tpu.concatenate %74, %91, %108, %125 in 1 : vector<32x8xf32>, vector<32x8xf32>, vector<32x8xf32>, vector<32x8xf32> -> vector<32x32xf32>
    %127 = arith.truncf %126 : vector<32x32xf32> to vector<32x32xbf16>
    %c0_56 = arith.constant 0 : index
    %c0_57 = arith.constant 0 : index
    %c0_58 = arith.constant 0 : index
    %128 = vector.load %arg13[%c0_56, %c0_57, %c0_58] : memref<2x32x32xbf16, #tpu.memory_space<vmem>>, vector<1x32x32xbf16>
    %129 = vector.shape_cast %128 : vector<1x32x32xbf16> to vector<32x32xbf16>
    %cst_59 = arith.constant dense<0.000000e+00> : vector<32x32xf32>
    %130 = tpu.matmul %127, %129, %cst_59 {dimension_numbers = #tpu.dot_dimension_numbers<[1], [0], [0], [1], [0, 0, 1, 1], [], []>} : vector<32x32xbf16>, vector<32x32xbf16>, vector<32x32xf32> -> vector<32x32xf32>
    %c0_60 = arith.constant 0 : index
    %c0_61 = arith.constant 0 : index
    %c0_62 = arith.constant 0 : index
    %131 = vector.load %arg14[%c0_60, %c0_61, %c0_62] : memref<2x1x32xf32, #tpu.memory_space<vmem>>, vector<1x1x32xf32>
    %132 = vector.shape_cast %131 : vector<1x1x32xf32> to vector<1x32xf32>
    %133 = vector.broadcast %132 : vector<1x32xf32> to vector<32x32xf32>
    %134 = arith.addf %130, %133 : vector<32x32xf32>
    %135 = arith.addf %5, %134 : vector<32x32xf32>
    %c0_63 = arith.constant 0 : index
    %c0_64 = arith.constant 0 : index
    %c0_65 = arith.constant 0 : index
    %136 = vector.load %arg15[%c0_63, %c0_64, %c0_65] : memref<2x1x32xf32, #tpu.memory_space<vmem>>, vector<1x1x32xf32>
    %137 = vector.shape_cast %136 : vector<1x1x32xf32> to vector<1x32xf32>
    %c0_66 = arith.constant 0 : index
    %c0_67 = arith.constant 0 : index
    %c0_68 = arith.constant 0 : index
    %138 = vector.load %arg16[%c0_66, %c0_67, %c0_68] : memref<2x1x32xf32, #tpu.memory_space<vmem>>, vector<1x1x32xf32>
    %139 = vector.shape_cast %138 : vector<1x1x32xf32> to vector<1x32xf32>
    %cst_69 = arith.constant dense<0.000000e+00> : vector<32xf32>
    %140 = vector.multi_reduction <add>, %135, %cst_69 [1] : vector<32x32xf32> to vector<32xf32>
    %141 = vector.shape_cast %140 : vector<32xf32> to vector<32x1xf32>
    %cst_70 = arith.constant 3.200000e+01 : f32
    %142 = vector.broadcast %cst_70 : f32 to vector<32x1xf32>
    %143 = arith.divf %141, %142 : vector<32x1xf32>
    %144 = vector.broadcast %143 : vector<32x1xf32> to vector<32x32xf32>
    %145 = arith.subf %135, %144 : vector<32x32xf32>
    %146 = arith.mulf %145, %145 : vector<32x32xf32>
    %cst_71 = arith.constant dense<0.000000e+00> : vector<32xf32>
    %147 = vector.multi_reduction <add>, %146, %cst_71 [1] : vector<32x32xf32> to vector<32xf32>
    %148 = vector.shape_cast %147 : vector<32xf32> to vector<32x1xf32>
    %cst_72 = arith.constant 3.200000e+01 : f32
    %149 = vector.broadcast %cst_72 : f32 to vector<32x1xf32>
    %150 = arith.divf %148, %149 : vector<32x1xf32>
    %151 = vector.broadcast %143 : vector<32x1xf32> to vector<32x32xf32>
    %152 = arith.subf %135, %151 : vector<32x32xf32>
    %cst_73 = arith.constant 9.99999997E-7 : f32
    %153 = vector.broadcast %cst_73 : f32 to vector<32x1xf32>
    %154 = arith.addf %150, %153 : vector<32x1xf32>
    %155 = math.rsqrt %154 : vector<32x1xf32>
    %156 = vector.broadcast %155 : vector<32x1xf32> to vector<32x32xf32>
    %157 = arith.mulf %152, %156 : vector<32x32xf32>
    %158 = vector.broadcast %137 : vector<1x32xf32> to vector<32x32xf32>
    %159 = arith.mulf %157, %158 : vector<32x32xf32>
    %160 = vector.broadcast %139 : vector<1x32xf32> to vector<32x32xf32>
    %161 = arith.addf %159, %160 : vector<32x32xf32>
    %162 = arith.truncf %161 : vector<32x32xf32> to vector<32x32xbf16>
    %c0_74 = arith.constant 0 : index
    %c0_75 = arith.constant 0 : index
    %c0_76 = arith.constant 0 : index
    %163 = vector.load %arg17[%c0_74, %c0_75, %c0_76] : memref<2x32x64xbf16, #tpu.memory_space<vmem>>, vector<1x32x64xbf16>
    %164 = vector.shape_cast %163 : vector<1x32x64xbf16> to vector<32x64xbf16>
    %cst_77 = arith.constant dense<0.000000e+00> : vector<32x64xf32>
    %165 = tpu.matmul %162, %164, %cst_77 {dimension_numbers = #tpu.dot_dimension_numbers<[1], [0], [0], [1], [0, 0, 1, 1], [], []>} : vector<32x32xbf16>, vector<32x64xbf16>, vector<32x64xf32> -> vector<32x64xf32>
    %c0_78 = arith.constant 0 : index
    %c0_79 = arith.constant 0 : index
    %c0_80 = arith.constant 0 : index
    %166 = vector.load %arg18[%c0_78, %c0_79, %c0_80] : memref<2x1x64xf32, #tpu.memory_space<vmem>>, vector<1x1x64xf32>
    %167 = vector.shape_cast %166 : vector<1x1x64xf32> to vector<1x64xf32>
    %168 = vector.broadcast %167 : vector<1x64xf32> to vector<32x64xf32>
    %169 = arith.addf %165, %168 : vector<32x64xf32>
    %170 = arith.mulf %169, %169 : vector<32x64xf32>
    %171 = arith.mulf %169, %170 : vector<32x64xf32>
    %cst_81 = arith.constant 4.471500e-02 : f32
    %172 = vector.broadcast %cst_81 : f32 to vector<32x64xf32>
    %173 = arith.mulf %172, %171 : vector<32x64xf32>
    %174 = arith.addf %169, %173 : vector<32x64xf32>
    %cst_82 = arith.constant 0.797884583 : f32
    %175 = vector.broadcast %cst_82 : f32 to vector<32x64xf32>
    %176 = arith.mulf %175, %174 : vector<32x64xf32>
    %177 = math.tanh %176 : vector<32x64xf32>
    %cst_83 = arith.constant 1.000000e+00 : f32
    %178 = vector.broadcast %cst_83 : f32 to vector<32x64xf32>
    %179 = arith.addf %178, %177 : vector<32x64xf32>
    %cst_84 = arith.constant 5.000000e-01 : f32
    %180 = vector.broadcast %cst_84 : f32 to vector<32x64xf32>
    %181 = arith.mulf %180, %179 : vector<32x64xf32>
    %182 = arith.mulf %169, %181 : vector<32x64xf32>
    %183 = arith.truncf %182 : vector<32x64xf32> to vector<32x64xbf16>
    %c0_85 = arith.constant 0 : index
    %c0_86 = arith.constant 0 : index
    %c0_87 = arith.constant 0 : index
    %184 = vector.load %arg19[%c0_85, %c0_86, %c0_87] : memref<2x64x32xbf16, #tpu.memory_space<vmem>>, vector<1x64x32xbf16>
    %185 = vector.shape_cast %184 : vector<1x64x32xbf16> to vector<64x32xbf16>
    %cst_88 = arith.constant dense<0.000000e+00> : vector<32x32xf32>
    %186 = tpu.matmul %183, %185, %cst_88 {dimension_numbers = #tpu.dot_dimension_numbers<[1], [0], [0], [1], [0, 0, 1, 1], [], []>} : vector<32x64xbf16>, vector<64x32xbf16>, vector<32x32xf32> -> vector<32x32xf32>
    %c0_89 = arith.constant 0 : index
    %c0_90 = arith.constant 0 : index
    %c0_91 = arith.constant 0 : index
    %187 = vector.load %arg20[%c0_89, %c0_90, %c0_91] : memref<2x1x32xf32, #tpu.memory_space<vmem>>, vector<1x1x32xf32>
    %188 = vector.shape_cast %187 : vector<1x1x32xf32> to vector<1x32xf32>
    %189 = vector.broadcast %188 : vector<1x32xf32> to vector<32x32xf32>
    %190 = arith.addf %186, %189 : vector<32x32xf32>
    %191 = arith.addf %135, %190 : vector<32x32xf32>
    %c1 = arith.constant 1 : index
    %c0_92 = arith.constant 0 : index
    %c0_93 = arith.constant 0 : index
    %192 = vector.load %arg5[%c1, %c0_92, %c0_93] : memref<2x1x32xf32, #tpu.memory_space<vmem>>, vector<1x1x32xf32>
    %193 = vector.shape_cast %192 : vector<1x1x32xf32> to vector<1x32xf32>
    %c1_94 = arith.constant 1 : index
    %c0_95 = arith.constant 0 : index
    %c0_96 = arith.constant 0 : index
    %194 = vector.load %arg6[%c1_94, %c0_95, %c0_96] : memref<2x1x32xf32, #tpu.memory_space<vmem>>, vector<1x1x32xf32>
    %195 = vector.shape_cast %194 : vector<1x1x32xf32> to vector<1x32xf32>
    %cst_97 = arith.constant dense<0.000000e+00> : vector<32xf32>
    %196 = vector.multi_reduction <add>, %191, %cst_97 [1] : vector<32x32xf32> to vector<32xf32>
    %197 = vector.shape_cast %196 : vector<32xf32> to vector<32x1xf32>
    %cst_98 = arith.constant 3.200000e+01 : f32
    %198 = vector.broadcast %cst_98 : f32 to vector<32x1xf32>
    %199 = arith.divf %197, %198 : vector<32x1xf32>
    %200 = vector.broadcast %199 : vector<32x1xf32> to vector<32x32xf32>
    %201 = arith.subf %191, %200 : vector<32x32xf32>
    %202 = arith.mulf %201, %201 : vector<32x32xf32>
    %cst_99 = arith.constant dense<0.000000e+00> : vector<32xf32>
    %203 = vector.multi_reduction <add>, %202, %cst_99 [1] : vector<32x32xf32> to vector<32xf32>
    %204 = vector.shape_cast %203 : vector<32xf32> to vector<32x1xf32>
    %cst_100 = arith.constant 3.200000e+01 : f32
    %205 = vector.broadcast %cst_100 : f32 to vector<32x1xf32>
    %206 = arith.divf %204, %205 : vector<32x1xf32>
    %207 = vector.broadcast %199 : vector<32x1xf32> to vector<32x32xf32>
    %208 = arith.subf %191, %207 : vector<32x32xf32>
    %cst_101 = arith.constant 9.99999997E-7 : f32
    %209 = vector.broadcast %cst_101 : f32 to vector<32x1xf32>
    %210 = arith.addf %206, %209 : vector<32x1xf32>
    %211 = math.rsqrt %210 : vector<32x1xf32>
    %212 = vector.broadcast %211 : vector<32x1xf32> to vector<32x32xf32>
    %213 = arith.mulf %208, %212 : vector<32x32xf32>
    %214 = vector.broadcast %193 : vector<1x32xf32> to vector<32x32xf32>
    %215 = arith.mulf %213, %214 : vector<32x32xf32>
    %216 = vector.broadcast %195 : vector<1x32xf32> to vector<32x32xf32>
    %217 = arith.addf %215, %216 : vector<32x32xf32>
    %218 = arith.truncf %217 : vector<32x32xf32> to vector<32x32xbf16>
    %c1_102 = arith.constant 1 : index
    %c0_103 = arith.constant 0 : index
    %c0_104 = arith.constant 0 : index
    %219 = vector.load %arg7[%c1_102, %c0_103, %c0_104] : memref<2x32x32xbf16, #tpu.memory_space<vmem>>, vector<1x32x32xbf16>
    %220 = vector.shape_cast %219 : vector<1x32x32xbf16> to vector<32x32xbf16>
    %cst_105 = arith.constant dense<0.000000e+00> : vector<32x32xf32>
    %221 = tpu.matmul %218, %220, %cst_105 {dimension_numbers = #tpu.dot_dimension_numbers<[1], [0], [0], [1], [0, 0, 1, 1], [], []>} : vector<32x32xbf16>, vector<32x32xbf16>, vector<32x32xf32> -> vector<32x32xf32>
    %c1_106 = arith.constant 1 : index
    %c0_107 = arith.constant 0 : index
    %c0_108 = arith.constant 0 : index
    %222 = vector.load %arg8[%c1_106, %c0_107, %c0_108] : memref<2x1x32xf32, #tpu.memory_space<vmem>>, vector<1x1x32xf32>
    %223 = vector.shape_cast %222 : vector<1x1x32xf32> to vector<1x32xf32>
    %224 = vector.broadcast %223 : vector<1x32xf32> to vector<32x32xf32>
    %225 = arith.addf %221, %224 : vector<32x32xf32>
    %c1_109 = arith.constant 1 : index
    %c0_110 = arith.constant 0 : index
    %c0_111 = arith.constant 0 : index
    %226 = vector.load %arg9[%c1_109, %c0_110, %c0_111] : memref<2x32x32xbf16, #tpu.memory_space<vmem>>, vector<1x32x32xbf16>
    %227 = vector.shape_cast %226 : vector<1x32x32xbf16> to vector<32x32xbf16>
    %cst_112 = arith.constant dense<0.000000e+00> : vector<32x32xf32>
    %228 = tpu.matmul %218, %227, %cst_112 {dimension_numbers = #tpu.dot_dimension_numbers<[1], [0], [0], [1], [0, 0, 1, 1], [], []>} : vector<32x32xbf16>, vector<32x32xbf16>, vector<32x32xf32> -> vector<32x32xf32>
    %c1_113 = arith.constant 1 : index
    %c0_114 = arith.constant 0 : index
    %c0_115 = arith.constant 0 : index
    %229 = vector.load %arg10[%c1_113, %c0_114, %c0_115] : memref<2x1x32xf32, #tpu.memory_space<vmem>>, vector<1x1x32xf32>
    %230 = vector.shape_cast %229 : vector<1x1x32xf32> to vector<1x32xf32>
    %231 = vector.broadcast %230 : vector<1x32xf32> to vector<32x32xf32>
    %232 = arith.addf %228, %231 : vector<32x32xf32>
    %c1_116 = arith.constant 1 : index
    %c0_117 = arith.constant 0 : index
    %c0_118 = arith.constant 0 : index
    %233 = vector.load %arg11[%c1_116, %c0_117, %c0_118] : memref<2x32x32xbf16, #tpu.memory_space<vmem>>, vector<1x32x32xbf16>
    %234 = vector.shape_cast %233 : vector<1x32x32xbf16> to vector<32x32xbf16>
    %cst_119 = arith.constant dense<0.000000e+00> : vector<32x32xf32>
    %235 = tpu.matmul %218, %234, %cst_119 {dimension_numbers = #tpu.dot_dimension_numbers<[1], [0], [0], [1], [0, 0, 1, 1], [], []>} : vector<32x32xbf16>, vector<32x32xbf16>, vector<32x32xf32> -> vector<32x32xf32>
    %c1_120 = arith.constant 1 : index
    %c0_121 = arith.constant 0 : index
    %c0_122 = arith.constant 0 : index
    %236 = vector.load %arg12[%c1_120, %c0_121, %c0_122] : memref<2x1x32xf32, #tpu.memory_space<vmem>>, vector<1x1x32xf32>
    %237 = vector.shape_cast %236 : vector<1x1x32xf32> to vector<1x32xf32>
    %238 = vector.broadcast %237 : vector<1x32xf32> to vector<32x32xf32>
    %239 = arith.addf %235, %238 : vector<32x32xf32>
    %240 = arith.truncf %225 : vector<32x32xf32> to vector<32x32xbf16>
    %241 = arith.truncf %232 : vector<32x32xf32> to vector<32x32xbf16>
    %242 = arith.truncf %239 : vector<32x32xf32> to vector<32x32xbf16>
    %243 = vector.extract_strided_slice %240 {offsets = [0, 0], sizes = [32, 8], strides = [1, 1]} : vector<32x32xbf16> to vector<32x8xbf16>
    %244 = vector.extract_strided_slice %241 {offsets = [0, 0], sizes = [32, 8], strides = [1, 1]} : vector<32x32xbf16> to vector<32x8xbf16>
    %cst_123 = arith.constant dense<0.000000e+00> : vector<32x32xf32>
    %245 = tpu.matmul %243, %244, %cst_123 {dimension_numbers = #tpu.dot_dimension_numbers<[1], [1], [0], [0], [0, 0, 1, 0], [], []>} : vector<32x8xbf16>, vector<32x8xbf16>, vector<32x32xf32> -> vector<32x32xf32>
    %246 = arith.addf %245, %6 : vector<32x32xf32>
    %cst_124 = arith.constant dense<0xFF800000> : vector<32xf32>
    %247 = vector.multi_reduction <maximumf>, %246, %cst_124 [1] : vector<32x32xf32> to vector<32xf32>
    %248 = vector.shape_cast %247 : vector<32xf32> to vector<32x1xf32>
    %249 = vector.broadcast %248 : vector<32x1xf32> to vector<32x32xf32>
    %250 = arith.subf %246, %249 : vector<32x32xf32>
    %251 = math.exp %250 : vector<32x32xf32>
    %cst_125 = arith.constant dense<0.000000e+00> : vector<32xf32>
    %252 = vector.multi_reduction <add>, %251, %cst_125 [1] : vector<32x32xf32> to vector<32xf32>
    %253 = vector.shape_cast %252 : vector<32xf32> to vector<32x1xf32>
    %254 = tpu.reciprocal %253 {approx = true} : vector<32x1xf32> -> vector<32x1xf32>
    %255 = vector.broadcast %254 : vector<32x1xf32> to vector<32x32xf32>
    %256 = arith.mulf %251, %255 : vector<32x32xf32>
    %257 = arith.truncf %256 : vector<32x32xf32> to vector<32x32xbf16>
    %258 = vector.extract_strided_slice %242 {offsets = [0, 0], sizes = [32, 8], strides = [1, 1]} : vector<32x32xbf16> to vector<32x8xbf16>
    %cst_126 = arith.constant dense<0.000000e+00> : vector<32x8xf32>
    %259 = tpu.matmul %257, %258, %cst_126 {dimension_numbers = #tpu.dot_dimension_numbers<[1], [0], [0], [1], [0, 0, 1, 1], [], []>} : vector<32x32xbf16>, vector<32x8xbf16>, vector<32x8xf32> -> vector<32x8xf32>
    %260 = vector.extract_strided_slice %240 {offsets = [0, 8], sizes = [32, 8], strides = [1, 1]} : vector<32x32xbf16> to vector<32x8xbf16>
    %261 = vector.extract_strided_slice %241 {offsets = [0, 8], sizes = [32, 8], strides = [1, 1]} : vector<32x32xbf16> to vector<32x8xbf16>
    %cst_127 = arith.constant dense<0.000000e+00> : vector<32x32xf32>
    %262 = tpu.matmul %260, %261, %cst_127 {dimension_numbers = #tpu.dot_dimension_numbers<[1], [1], [0], [0], [0, 0, 1, 0], [], []>} : vector<32x8xbf16>, vector<32x8xbf16>, vector<32x32xf32> -> vector<32x32xf32>
    %263 = arith.addf %262, %6 : vector<32x32xf32>
    %cst_128 = arith.constant dense<0xFF800000> : vector<32xf32>
    %264 = vector.multi_reduction <maximumf>, %263, %cst_128 [1] : vector<32x32xf32> to vector<32xf32>
    %265 = vector.shape_cast %264 : vector<32xf32> to vector<32x1xf32>
    %266 = vector.broadcast %265 : vector<32x1xf32> to vector<32x32xf32>
    %267 = arith.subf %263, %266 : vector<32x32xf32>
    %268 = math.exp %267 : vector<32x32xf32>
    %cst_129 = arith.constant dense<0.000000e+00> : vector<32xf32>
    %269 = vector.multi_reduction <add>, %268, %cst_129 [1] : vector<32x32xf32> to vector<32xf32>
    %270 = vector.shape_cast %269 : vector<32xf32> to vector<32x1xf32>
    %271 = tpu.reciprocal %270 {approx = true} : vector<32x1xf32> -> vector<32x1xf32>
    %272 = vector.broadcast %271 : vector<32x1xf32> to vector<32x32xf32>
    %273 = arith.mulf %268, %272 : vector<32x32xf32>
    %274 = arith.truncf %273 : vector<32x32xf32> to vector<32x32xbf16>
    %275 = vector.extract_strided_slice %242 {offsets = [0, 8], sizes = [32, 8], strides = [1, 1]} : vector<32x32xbf16> to vector<32x8xbf16>
    %cst_130 = arith.constant dense<0.000000e+00> : vector<32x8xf32>
    %276 = tpu.matmul %274, %275, %cst_130 {dimension_numbers = #tpu.dot_dimension_numbers<[1], [0], [0], [1], [0, 0, 1, 1], [], []>} : vector<32x32xbf16>, vector<32x8xbf16>, vector<32x8xf32> -> vector<32x8xf32>
    %277 = vector.extract_strided_slice %240 {offsets = [0, 16], sizes = [32, 8], strides = [1, 1]} : vector<32x32xbf16> to vector<32x8xbf16>
    %278 = vector.extract_strided_slice %241 {offsets = [0, 16], sizes = [32, 8], strides = [1, 1]} : vector<32x32xbf16> to vector<32x8xbf16>
    %cst_131 = arith.constant dense<0.000000e+00> : vector<32x32xf32>
    %279 = tpu.matmul %277, %278, %cst_131 {dimension_numbers = #tpu.dot_dimension_numbers<[1], [1], [0], [0], [0, 0, 1, 0], [], []>} : vector<32x8xbf16>, vector<32x8xbf16>, vector<32x32xf32> -> vector<32x32xf32>
    %280 = arith.addf %279, %6 : vector<32x32xf32>
    %cst_132 = arith.constant dense<0xFF800000> : vector<32xf32>
    %281 = vector.multi_reduction <maximumf>, %280, %cst_132 [1] : vector<32x32xf32> to vector<32xf32>
    %282 = vector.shape_cast %281 : vector<32xf32> to vector<32x1xf32>
    %283 = vector.broadcast %282 : vector<32x1xf32> to vector<32x32xf32>
    %284 = arith.subf %280, %283 : vector<32x32xf32>
    %285 = math.exp %284 : vector<32x32xf32>
    %cst_133 = arith.constant dense<0.000000e+00> : vector<32xf32>
    %286 = vector.multi_reduction <add>, %285, %cst_133 [1] : vector<32x32xf32> to vector<32xf32>
    %287 = vector.shape_cast %286 : vector<32xf32> to vector<32x1xf32>
    %288 = tpu.reciprocal %287 {approx = true} : vector<32x1xf32> -> vector<32x1xf32>
    %289 = vector.broadcast %288 : vector<32x1xf32> to vector<32x32xf32>
    %290 = arith.mulf %285, %289 : vector<32x32xf32>
    %291 = arith.truncf %290 : vector<32x32xf32> to vector<32x32xbf16>
    %292 = vector.extract_strided_slice %242 {offsets = [0, 16], sizes = [32, 8], strides = [1, 1]} : vector<32x32xbf16> to vector<32x8xbf16>
    %cst_134 = arith.constant dense<0.000000e+00> : vector<32x8xf32>
    %293 = tpu.matmul %291, %292, %cst_134 {dimension_numbers = #tpu.dot_dimension_numbers<[1], [0], [0], [1], [0, 0, 1, 1], [], []>} : vector<32x32xbf16>, vector<32x8xbf16>, vector<32x8xf32> -> vector<32x8xf32>
    %294 = vector.extract_strided_slice %240 {offsets = [0, 24], sizes = [32, 8], strides = [1, 1]} : vector<32x32xbf16> to vector<32x8xbf16>
    %295 = vector.extract_strided_slice %241 {offsets = [0, 24], sizes = [32, 8], strides = [1, 1]} : vector<32x32xbf16> to vector<32x8xbf16>
    %cst_135 = arith.constant dense<0.000000e+00> : vector<32x32xf32>
    %296 = tpu.matmul %294, %295, %cst_135 {dimension_numbers = #tpu.dot_dimension_numbers<[1], [1], [0], [0], [0, 0, 1, 0], [], []>} : vector<32x8xbf16>, vector<32x8xbf16>, vector<32x32xf32> -> vector<32x32xf32>
    %297 = arith.addf %296, %6 : vector<32x32xf32>
    %cst_136 = arith.constant dense<0xFF800000> : vector<32xf32>
    %298 = vector.multi_reduction <maximumf>, %297, %cst_136 [1] : vector<32x32xf32> to vector<32xf32>
    %299 = vector.shape_cast %298 : vector<32xf32> to vector<32x1xf32>
    %300 = vector.broadcast %299 : vector<32x1xf32> to vector<32x32xf32>
    %301 = arith.subf %297, %300 : vector<32x32xf32>
    %302 = math.exp %301 : vector<32x32xf32>
    %cst_137 = arith.constant dense<0.000000e+00> : vector<32xf32>
    %303 = vector.multi_reduction <add>, %302, %cst_137 [1] : vector<32x32xf32> to vector<32xf32>
    %304 = vector.shape_cast %303 : vector<32xf32> to vector<32x1xf32>
    %305 = tpu.reciprocal %304 {approx = true} : vector<32x1xf32> -> vector<32x1xf32>
    %306 = vector.broadcast %305 : vector<32x1xf32> to vector<32x32xf32>
    %307 = arith.mulf %302, %306 : vector<32x32xf32>
    %308 = arith.truncf %307 : vector<32x32xf32> to vector<32x32xbf16>
    %309 = vector.extract_strided_slice %242 {offsets = [0, 24], sizes = [32, 8], strides = [1, 1]} : vector<32x32xbf16> to vector<32x8xbf16>
    %cst_138 = arith.constant dense<0.000000e+00> : vector<32x8xf32>
    %310 = tpu.matmul %308, %309, %cst_138 {dimension_numbers = #tpu.dot_dimension_numbers<[1], [0], [0], [1], [0, 0, 1, 1], [], []>} : vector<32x32xbf16>, vector<32x8xbf16>, vector<32x8xf32> -> vector<32x8xf32>
    %311 = tpu.concatenate %259, %276, %293, %310 in 1 : vector<32x8xf32>, vector<32x8xf32>, vector<32x8xf32>, vector<32x8xf32> -> vector<32x32xf32>
    %312 = arith.truncf %311 : vector<32x32xf32> to vector<32x32xbf16>
    %c1_139 = arith.constant 1 : index
    %c0_140 = arith.constant 0 : index
    %c0_141 = arith.constant 0 : index
    %313 = vector.load %arg13[%c1_139, %c0_140, %c0_141] : memref<2x32x32xbf16, #tpu.memory_space<vmem>>, vector<1x32x32xbf16>
    %314 = vector.shape_cast %313 : vector<1x32x32xbf16> to vector<32x32xbf16>
    %cst_142 = arith.constant dense<0.000000e+00> : vector<32x32xf32>
    %315 = tpu.matmul %312, %314, %cst_142 {dimension_numbers = #tpu.dot_dimension_numbers<[1], [0], [0], [1], [0, 0, 1, 1], [], []>} : vector<32x32xbf16>, vector<32x32xbf16>, vector<32x32xf32> -> vector<32x32xf32>
    %c1_143 = arith.constant 1 : index
    %c0_144 = arith.constant 0 : index
    %c0_145 = arith.constant 0 : index
    %316 = vector.load %arg14[%c1_143, %c0_144, %c0_145] : memref<2x1x32xf32, #tpu.memory_space<vmem>>, vector<1x1x32xf32>
    %317 = vector.shape_cast %316 : vector<1x1x32xf32> to vector<1x32xf32>
    %318 = vector.broadcast %317 : vector<1x32xf32> to vector<32x32xf32>
    %319 = arith.addf %315, %318 : vector<32x32xf32>
    %320 = arith.addf %191, %319 : vector<32x32xf32>
    %c1_146 = arith.constant 1 : index
    %c0_147 = arith.constant 0 : index
    %c0_148 = arith.constant 0 : index
    %321 = vector.load %arg15[%c1_146, %c0_147, %c0_148] : memref<2x1x32xf32, #tpu.memory_space<vmem>>, vector<1x1x32xf32>
    %322 = vector.shape_cast %321 : vector<1x1x32xf32> to vector<1x32xf32>
    %c1_149 = arith.constant 1 : index
    %c0_150 = arith.constant 0 : index
    %c0_151 = arith.constant 0 : index
    %323 = vector.load %arg16[%c1_149, %c0_150, %c0_151] : memref<2x1x32xf32, #tpu.memory_space<vmem>>, vector<1x1x32xf32>
    %324 = vector.shape_cast %323 : vector<1x1x32xf32> to vector<1x32xf32>
    %cst_152 = arith.constant dense<0.000000e+00> : vector<32xf32>
    %325 = vector.multi_reduction <add>, %320, %cst_152 [1] : vector<32x32xf32> to vector<32xf32>
    %326 = vector.shape_cast %325 : vector<32xf32> to vector<32x1xf32>
    %cst_153 = arith.constant 3.200000e+01 : f32
    %327 = vector.broadcast %cst_153 : f32 to vector<32x1xf32>
    %328 = arith.divf %326, %327 : vector<32x1xf32>
    %329 = vector.broadcast %328 : vector<32x1xf32> to vector<32x32xf32>
    %330 = arith.subf %320, %329 : vector<32x32xf32>
    %331 = arith.mulf %330, %330 : vector<32x32xf32>
    %cst_154 = arith.constant dense<0.000000e+00> : vector<32xf32>
    %332 = vector.multi_reduction <add>, %331, %cst_154 [1] : vector<32x32xf32> to vector<32xf32>
    %333 = vector.shape_cast %332 : vector<32xf32> to vector<32x1xf32>
    %cst_155 = arith.constant 3.200000e+01 : f32
    %334 = vector.broadcast %cst_155 : f32 to vector<32x1xf32>
    %335 = arith.divf %333, %334 : vector<32x1xf32>
    %336 = vector.broadcast %328 : vector<32x1xf32> to vector<32x32xf32>
    %337 = arith.subf %320, %336 : vector<32x32xf32>
    %cst_156 = arith.constant 9.99999997E-7 : f32
    %338 = vector.broadcast %cst_156 : f32 to vector<32x1xf32>
    %339 = arith.addf %335, %338 : vector<32x1xf32>
    %340 = math.rsqrt %339 : vector<32x1xf32>
    %341 = vector.broadcast %340 : vector<32x1xf32> to vector<32x32xf32>
    %342 = arith.mulf %337, %341 : vector<32x32xf32>
    %343 = vector.broadcast %322 : vector<1x32xf32> to vector<32x32xf32>
    %344 = arith.mulf %342, %343 : vector<32x32xf32>
    %345 = vector.broadcast %324 : vector<1x32xf32> to vector<32x32xf32>
    %346 = arith.addf %344, %345 : vector<32x32xf32>
    %347 = arith.truncf %346 : vector<32x32xf32> to vector<32x32xbf16>
    %c1_157 = arith.constant 1 : index
    %c0_158 = arith.constant 0 : index
    %c0_159 = arith.constant 0 : index
    %348 = vector.load %arg17[%c1_157, %c0_158, %c0_159] : memref<2x32x64xbf16, #tpu.memory_space<vmem>>, vector<1x32x64xbf16>
    %349 = vector.shape_cast %348 : vector<1x32x64xbf16> to vector<32x64xbf16>
    %cst_160 = arith.constant dense<0.000000e+00> : vector<32x64xf32>
    %350 = tpu.matmul %347, %349, %cst_160 {dimension_numbers = #tpu.dot_dimension_numbers<[1], [0], [0], [1], [0, 0, 1, 1], [], []>} : vector<32x32xbf16>, vector<32x64xbf16>, vector<32x64xf32> -> vector<32x64xf32>
    %c1_161 = arith.constant 1 : index
    %c0_162 = arith.constant 0 : index
    %c0_163 = arith.constant 0 : index
    %351 = vector.load %arg18[%c1_161, %c0_162, %c0_163] : memref<2x1x64xf32, #tpu.memory_space<vmem>>, vector<1x1x64xf32>
    %352 = vector.shape_cast %351 : vector<1x1x64xf32> to vector<1x64xf32>
    %353 = vector.broadcast %352 : vector<1x64xf32> to vector<32x64xf32>
    %354 = arith.addf %350, %353 : vector<32x64xf32>
    %355 = arith.mulf %354, %354 : vector<32x64xf32>
    %356 = arith.mulf %354, %355 : vector<32x64xf32>
    %cst_164 = arith.constant 4.471500e-02 : f32
    %357 = vector.broadcast %cst_164 : f32 to vector<32x64xf32>
    %358 = arith.mulf %357, %356 : vector<32x64xf32>
    %359 = arith.addf %354, %358 : vector<32x64xf32>
    %cst_165 = arith.constant 0.797884583 : f32
    %360 = vector.broadcast %cst_165 : f32 to vector<32x64xf32>
    %361 = arith.mulf %360, %359 : vector<32x64xf32>
    %362 = math.tanh %361 : vector<32x64xf32>
    %cst_166 = arith.constant 1.000000e+00 : f32
    %363 = vector.broadcast %cst_166 : f32 to vector<32x64xf32>
    %364 = arith.addf %363, %362 : vector<32x64xf32>
    %cst_167 = arith.constant 5.000000e-01 : f32
    %365 = vector.broadcast %cst_167 : f32 to vector<32x64xf32>
    %366 = arith.mulf %365, %364 : vector<32x64xf32>
    %367 = arith.mulf %354, %366 : vector<32x64xf32>
    %368 = arith.truncf %367 : vector<32x64xf32> to vector<32x64xbf16>
    %c1_168 = arith.constant 1 : index
    %c0_169 = arith.constant 0 : index
    %c0_170 = arith.constant 0 : index
    %369 = vector.load %arg19[%c1_168, %c0_169, %c0_170] : memref<2x64x32xbf16, #tpu.memory_space<vmem>>, vector<1x64x32xbf16>
    %370 = vector.shape_cast %369 : vector<1x64x32xbf16> to vector<64x32xbf16>
    %cst_171 = arith.constant dense<0.000000e+00> : vector<32x32xf32>
    %371 = tpu.matmul %368, %370, %cst_171 {dimension_numbers = #tpu.dot_dimension_numbers<[1], [0], [0], [1], [0, 0, 1, 1], [], []>} : vector<32x64xbf16>, vector<64x32xbf16>, vector<32x32xf32> -> vector<32x32xf32>
    %c1_172 = arith.constant 1 : index
    %c0_173 = arith.constant 0 : index
    %c0_174 = arith.constant 0 : index
    %372 = vector.load %arg20[%c1_172, %c0_173, %c0_174] : memref<2x1x32xf32, #tpu.memory_space<vmem>>, vector<1x1x32xf32>
    %373 = vector.shape_cast %372 : vector<1x1x32xf32> to vector<1x32xf32>
    %374 = vector.broadcast %373 : vector<1x32xf32> to vector<32x32xf32>
    %375 = arith.addf %371, %374 : vector<32x32xf32>
    %376 = arith.addf %320, %375 : vector<32x32xf32>
    %c0_175 = arith.constant 0 : index
    %c0_176 = arith.constant 0 : index
    %377 = vector.load %arg21[%c0_175, %c0_176] : memref<1x32xf32, #tpu.memory_space<vmem>>, vector<1x32xf32>
    %c0_177 = arith.constant 0 : index
    %c0_178 = arith.constant 0 : index
    %378 = vector.load %arg22[%c0_177, %c0_178] : memref<1x32xf32, #tpu.memory_space<vmem>>, vector<1x32xf32>
    %cst_179 = arith.constant dense<0.000000e+00> : vector<32xf32>
    %379 = vector.multi_reduction <add>, %376, %cst_179 [1] : vector<32x32xf32> to vector<32xf32>
    %380 = vector.shape_cast %379 : vector<32xf32> to vector<32x1xf32>
    %cst_180 = arith.constant 3.200000e+01 : f32
    %381 = vector.broadcast %cst_180 : f32 to vector<32x1xf32>
    %382 = arith.divf %380, %381 : vector<32x1xf32>
    %383 = vector.broadcast %382 : vector<32x1xf32> to vector<32x32xf32>
    %384 = arith.subf %376, %383 : vector<32x32xf32>
    %385 = arith.mulf %384, %384 : vector<32x32xf32>
    %cst_181 = arith.constant dense<0.000000e+00> : vector<32xf32>
    %386 = vector.multi_reduction <add>, %385, %cst_181 [1] : vector<32x32xf32> to vector<32xf32>
    %387 = vector.shape_cast %386 : vector<32xf32> to vector<32x1xf32>
    %cst_182 = arith.constant 3.200000e+01 : f32
    %388 = vector.broadcast %cst_182 : f32 to vector<32x1xf32>
    %389 = arith.divf %387, %388 : vector<32x1xf32>
    %390 = vector.broadcast %382 : vector<32x1xf32> to vector<32x32xf32>
    %391 = arith.subf %376, %390 : vector<32x32xf32>
    %cst_183 = arith.constant 9.99999997E-7 : f32
    %392 = vector.broadcast %cst_183 : f32 to vector<32x1xf32>
    %393 = arith.addf %389, %392 : vector<32x1xf32>
    %394 = math.rsqrt %393 : vector<32x1xf32>
    %395 = vector.broadcast %394 : vector<32x1xf32> to vector<32x32xf32>
    %396 = arith.mulf %391, %395 : vector<32x32xf32>
    %397 = vector.broadcast %377 : vector<1x32xf32> to vector<32x32xf32>
    %398 = arith.mulf %396, %397 : vector<32x32xf32>
    %399 = vector.broadcast %378 : vector<1x32xf32> to vector<32x32xf32>
    %400 = arith.addf %398, %399 : vector<32x32xf32>
    %c0_184 = arith.constant 0 : index
    %c0_185 = arith.constant 0 : index
    %401 = vector.load %arg23[%c0_184, %c0_185] : memref<2x32xf32, #tpu.memory_space<vmem>>, vector<2x32xf32>
    %cst_186 = arith.constant dense<0.000000e+00> : vector<2x32xf32>
    %402 = tpu.matmul %401, %400, %cst_186 {dimension_numbers = #tpu.dot_dimension_numbers<[1], [0], [0], [1], [0, 0, 1, 1], [], []>} : vector<2x32xf32>, vector<32x32xf32>, vector<2x32xf32> -> vector<2x32xf32>
    %c0_187 = arith.constant 0 : index
    %c0_188 = arith.constant 0 : index
    %403 = vector.load %arg24[%c0_187, %c0_188] : memref<2x32xf32, #tpu.memory_space<vmem>>, vector<2x32xf32>
    tpu.vector_store %arg24[%c0_187, %c0_188], %402 {strides = array<i32>} : memref<2x32xf32, #tpu.memory_space<vmem>>, vector<2x32xf32>,
    return
  }
  func.func @transform_0(%arg0: i32) -> (i32, i32, i32) {
    %c0_i32 = arith.constant 0 : i32
    %c0_i32_0 = arith.constant 0 : i32
    %c0_i32_1 = arith.constant 0 : i32
    return %arg0, %c0_i32, %c0_i32_0 : i32, i32, i32
  }
  func.func @transform_1(%arg0: i32) -> (i32, i32) {
    %c0_i32 = arith.constant 0 : i32
    %c0_i32_0 = arith.constant 0 : i32
    %c0_i32_1 = arith.constant 0 : i32
    return %c0_i32, %c0_i32_0 : i32, i32
  }
  func.func @transform_2(%arg0: i32) -> (i32, i32) {
    %c0_i32 = arith.constant 0 : i32
    %c0_i32_0 = arith.constant 0 : i32
    %c0_i32_1 = arith.constant 0 : i32
    return %c0_i32, %c0_i32_0 : i32, i32
  }
  func.func @transform_3(%arg0: i32) -> (i32, i32) {
    %c0_i32 = arith.constant 0 : i32
    %c0_i32_0 = arith.constant 0 : i32
    %c0_i32_1 = arith.constant 0 : i32
    return %c0_i32, %c0_i32_0 : i32, i32
  }
  func.func @transform_4(%arg0: i32) -> (i32, i32, i32) {
    %c0_i32 = arith.constant 0 : i32
    %c0_i32_0 = arith.constant 0 : i32
    %c0_i32_1 = arith.constant 0 : i32
    %c0_i32_2 = arith.constant 0 : i32
    return %c0_i32, %c0_i32_0, %c0_i32_1 : i32, i32, i32
  }
  func.func @transform_5(%arg0: i32) -> (i32, i32, i32) {
    %c0_i32 = arith.constant 0 : i32
    %c0_i32_0 = arith.constant 0 : i32
    %c0_i32_1 = arith.constant 0 : i32
    %c0_i32_2 = arith.constant 0 : i32
    return %c0_i32, %c0_i32_0, %c0_i32_1 : i32, i32, i32
  }
  func.func @transform_6(%arg0: i32) -> (i32, i32, i32) {
    %c0_i32 = arith.constant 0 : i32
    %c0_i32_0 = arith.constant 0 : i32
    %c0_i32_1 = arith.constant 0 : i32
    %c0_i32_2 = arith.constant 0 : i32
    return %c0_i32, %c0_i32_0, %c0_i32_1 : i32, i32, i32
  }
  func.func @transform_7(%arg0: i32) -> (i32, i32, i32) {
    %c0_i32 = arith.constant 0 : i32
    %c0_i32_0 = arith.constant 0 : i32
    %c0_i32_1 = arith.constant 0 : i32
    %c0_i32_2 = arith.constant 0 : i32
    return %c0_i32, %c0_i32_0, %c0_i32_1 : i32, i32, i32
  }
  func.func @transform_8(%arg0: i32) -> (i32, i32, i32) {
    %c0_i32 = arith.constant 0 : i32
    %c0_i32_0 = arith.constant 0 : i32
    %c0_i32_1 = arith.constant 0 : i32
    %c0_i32_2 = arith.constant 0 : i32
    return %c0_i32, %c0_i32_0, %c0_i32_1 : i32, i32, i32
  }
  func.func @transform_9(%arg0: i32) -> (i32, i32, i32) {
    %c0_i32 = arith.constant 0 : i32
    %c0_i32_0 = arith.constant 0 : i32
    %c0_i32_1 = arith.constant 0 : i32
    %c0_i32_2 = arith.constant 0 : i32
    return %c0_i32, %c0_i32_0, %c0_i32_1 : i32, i32, i32
  }
  func.func @transform_10(%arg0: i32) -> (i32, i32, i32) {
    %c0_i32 = arith.constant 0 : i32
    %c0_i32_0 = arith.constant 0 : i32
    %c0_i32_1 = arith.constant 0 : i32
    %c0_i32_2 = arith.constant 0 : i32
    return %c0_i32, %c0_i32_0, %c0_i32_1 : i32, i32, i32
  }
  func.func @transform_11(%arg0: i32) -> (i32, i32, i32) {
    %c0_i32 = arith.constant 0 : i32
    %c0_i32_0 = arith.constant 0 : i32
    %c0_i32_1 = arith.constant 0 : i32
    %c0_i32_2 = arith.constant 0 : i32
    return %c0_i32, %c0_i32_0, %c0_i32_1 : i32, i32, i32
  }
  func.func @transform_12(%arg0: i32) -> (i32, i32, i32) {
    %c0_i32 = arith.constant 0 : i32
    %c0_i32_0 = arith.constant 0 : i32
    %c0_i32_1 = arith.constant 0 : i32
    %c0_i32_2 = arith.constant 0 : i32
    return %c0_i32, %c0_i32_0, %c0_i32_1 : i32, i32, i32
  }
  func.func @transform_13(%arg0: i32) -> (i32, i32, i32) {
    %c0_i32 = arith.constant 0 : i32
    %c0_i32_0 = arith.constant 0 : i32
    %c0_i32_1 = arith.constant 0 : i32
    %c0_i32_2 = arith.constant 0 : i32
    return %c0_i32, %c0_i32_0, %c0_i32_1 : i32, i32, i32
  }
  func.func @transform_14(%arg0: i32) -> (i32, i32, i32) {
    %c0_i32 = arith.constant 0 : i32
    %c0_i32_0 = arith.constant 0 : i32
    %c0_i32_1 = arith.constant 0 : i32
    %c0_i32_2 = arith.constant 0 : i32
    return %c0_i32, %c0_i32_0, %c0_i32_1 : i32, i32, i32
  }
  func.func @transform_15(%arg0: i32) -> (i32, i32, i32) {
    %c0_i32 = arith.constant 0 : i32
    %c0_i32_0 = arith.constant 0 : i32
    %c0_i32_1 = arith.constant 0 : i32
    %c0_i32_2 = arith.constant 0 : i32
    return %c0_i32, %c0_i32_0, %c0_i32_1 : i32, i32, i32
  }
  func.func @transform_16(%arg0: i32) -> (i32, i32, i32) {
    %c0_i32 = arith.constant 0 : i32
    %c0_i32_0 = arith.constant 0 : i32
    %c0_i32_1 = arith.constant 0 : i32
    %c0_i32_2 = arith.constant 0 : i32
    return %c0_i32, %c0_i32_0, %c0_i32_1 : i32, i32, i32
  }
  func.func @transform_17(%arg0: i32) -> (i32, i32, i32) {
    %c0_i32 = arith.constant 0 : i32
    %c0_i32_0 = arith.constant 0 : i32
    %c0_i32_1 = arith.constant 0 : i32
    %c0_i32_2 = arith.constant 0 : i32
    return %c0_i32, %c0_i32_0, %c0_i32_1 : i32, i32, i32
  }
  func.func @transform_18(%arg0: i32) -> (i32, i32, i32) {
    %c0_i32 = arith.constant 0 : i32
    %c0_i32_0 = arith.constant 0 : i32
    %c0_i32_1 = arith.constant 0 : i32
    %c0_i32_2 = arith.constant 0 : i32
    return %c0_i32, %c0_i32_0, %c0_i32_1 : i32, i32, i32
  }
  func.func @transform_19(%arg0: i32) -> (i32, i32, i32) {
    %c0_i32 = arith.constant 0 : i32
    %c0_i32_0 = arith.constant 0 : i32
    %c0_i32_1 = arith.constant 0 : i32
    %c0_i32_2 = arith.constant 0 : i32
    return %c0_i32, %c0_i32_0, %c0_i32_1 : i32, i32, i32
  }
  func.func @transform_20(%arg0: i32) -> (i32, i32) {
    %c0_i32 = arith.constant 0 : i32
    %c0_i32_0 = arith.constant 0 : i32
    %c0_i32_1 = arith.constant 0 : i32
    return %c0_i32, %c0_i32_0 : i32, i32
  }
  func.func @transform_21(%arg0: i32) -> (i32, i32) {
    %c0_i32 = arith.constant 0 : i32
    %c0_i32_0 = arith.constant 0 : i32
    %c0_i32_1 = arith.constant 0 : i32
    return %c0_i32, %c0_i32_0 : i32, i32
  }
  func.func @transform_22(%arg0: i32) -> (i32, i32) {
    %c0_i32 = arith.constant 0 : i32
    %c0_i32_0 = arith.constant 0 : i32
    %c0_i32_1 = arith.constant 0 : i32
    return %c0_i32, %c0_i32_0 : i32, i32
  }
  func.func @transform_23(%arg0: i32) -> (i32, i32) {
    %c0_i32 = arith.constant 0 : i32
    %c0_i32_0 = arith.constant 0 : i32
    return %arg0, %c0_i32 : i32, i32
  }
}

</mosaic_0001>

<bundles_post_ra>
// kernel: tpu_custom_call.1
= control target key start
LH: loop header
LB: loop body
LE: loop exit
PB: predicated region body
PF: predicated region fallthrough
CT: control target
= control target key end

     0   :  { %s5607_s0 = inlined_call_operand.vmem [shape: bf16[1,32,192], index: 0, kind: input, shape index: {}]   ;;  %s5608_s1 = inlined_call_operand.vmem [shape: bf16[192,32], index: 1, kind: input, shape index: {}]   ;;  %s5609_s2 = inlined_call_operand.vmem [shape: f32[32,32], index: 2, kind: input, shape index: {}]   ;;  %s5610_s3 = inlined_call_operand.vmem [shape: f32[32,32], index: 3, kind: input, shape index: {}]   ;;  %s5611_s4 = inlined_call_operand.hbm [shape: f32[2,1,32], index: 4, kind: input, shape index: {}]   ;;  %s5612_s5 = inlined_call_operand.hbm [shape: f32[2,1,32], index: 5, kind: input, shape index: {}]   ;;  %s5613_s6 = inlined_call_operand.vmem [shape: bf16[2,32,32], index: 6, kind: input, shape index: {}]   ;;  %s5614_s7 = inlined_call_operand.hbm [shape: f32[2,1,32], index: 7, kind: input, shape index: {}]   ;;  %s5615_s8 = inlined_call_operand.vmem [shape: bf16[2,32,32], index: 8, kind: input, shape index: {}]   ;;  %s5616_s9 = inlined_call_operand.hbm [shape: f32[2,1,32], index: 9, kind: input, shape index: {}]   ;;  %s5617_s10 = inlined_call_operand.vmem [shape: bf16[2,32,32], index: 10, kind: input, shape index: {}]   ;;  %s5618_s11 = inlined_call_operand.hbm [shape: f32[2,1,32], index: 11, kind: input, shape index: {}]   ;;  %s5619_s12 = inlined_call_operand.vmem [shape: bf16[2,32,32], index: 12, kind: input, shape index: {}]   ;;  %s5620_s13 = inlined_call_operand.hbm [shape: f32[2,1,32], index: 13, kind: input, shape index: {}]   ;;  %s5621_s14 = inlined_call_operand.hbm [shape: f32[2,1,32], index: 14, kind: input, shape index: {}]   ;;  %s5622_s15 = inlined_call_operand.hbm [shape: f32[2,1,32], index: 15, kind: input, shape index: {}]   ;;  %s5623_s16 = inlined_call_operand.vmem [shape: bf16[2,32,64], index: 16, kind: input, shape index: {}]   ;;  %s5624_s17 = inlined_call_operand.hbm [shape: f32[2,1,64], index: 17, kind: input, shape index: {}]   ;;  %s5625_s18 = inlined_call_operand.vmem [shape: bf16[2,64,32], index: 18, kind: input, shape index: {}]   ;;  %s5626_s19 = inlined_call_operand.vmem [shape: f32[2,1,32], index: 19, kind: input, shape index: {}]   ;;  %s5627_s20 = inlined_call_operand.vmem [shape: f32[1,32], index: 20, kind: input, shape index: {}]   ;;  %s5628_s21 = inlined_call_operand.vmem [shape: f32[1,32], index: 21, kind: input, shape index: {}]   ;;  %s5629_s22 = inlined_call_operand.vmem [shape: f32[2,32], index: 22, kind: input, shape index: {}]   ;;  %s5630_s23 = inlined_call_operand.hbm [shape: f32[2,32], index: 23, kind: output, shape index: {}]  }
   0x1   :  { %5640 = sst [smem:[#allocation24_spill]] %s5607_s0 }
   0x2   :  { %5641 = sst [smem:[#allocation25_spill]] %s5608_s1 }
   0x3   :  { %5642 = sst [smem:[#allocation26_spill]] %s5609_s2 }
   0x4   :  { %5643 = sst [smem:[#allocation27_spill]] %s5610_s3 }
   0x5   :  { %5644 = sst [smem:[#allocation28_spill]] %s5611_s4 }
   0x6   :  { %5645 = sst [smem:[#allocation29_spill]] %s5612_s5 }
   0x7   :  { %5646 = sst [smem:[#allocation30_spill]] %s5613_s6 }
   0x8   :  { %5647 = sst [smem:[#allocation31_spill]] %s5614_s7 }
   0x9   :  { %5648 = sst [smem:[#allocation32_spill]] %s5630_s23 }
   0xa   :  { %28 = vsyncpa [#allocation3], 0 }
   0xb   :  { %29 = vsyncpa [#allocation6], 0 }
   0xc   :  { %30 = vsyncpa [#allocation9], 0 }
   0xd   :  { %31 = vsyncpa [#allocation12], 0 }
   0xe   :  { %32 = vsyncpa [#allocation15], 0 }
   0xf   :  { %33 = vsyncpa [#allocation4], 0  ;;  %s4525_s4 = smov [#allocation5]   ;;  %s4526_s24 = smov [#allocation8]  }
  0x10   :  { %s59_s30 = sshll.u32 %s4525_s4, 4  ;;  %s87_s25 = sshll.u32 %s4526_s24, 4  ;;  %s60_s30 = int_to_ptr.vmem [resolvable:$true] %s59_s30  ;;  %s4666_s25 = int_to_ptr.vmem [resolvable:$true] %s87_s25 }
  0x11   :  { %s5649_s26 = sld [smem:[#allocation29_spill]] }
  0x17   :  { %s4293_s2 = scalar_lea.hbm %s5649_s26, 32 }
  0x18   :  { %p4294_p0 = scmp.ne.s32.totalorder %s5649_s26, %s4293_s2  ;;  %p4297_p1 = scmp.lt.u32.totalorder %s4293_s2, %s5649_s26 }
  0x1a   :  { %p4299_p2 = pnand %p4297_p1, %p4294_p0 }
  0x1c   :  { %4302 = shalt.err (!%p4299_p2)
}
  0x1d   :  { %s4303_s29 = scalar_lea.vmem %s60_s30, 32  ;;  %p4308_p4 = scmp.lt.s32.totalorder %s60_s30, %s60_s30 }
  0x1e   :  { %p4304_p3 = scmp.ne.s32.totalorder %s60_s30, %s4303_s29  ;;  %p4309_p5 = scmp.lt.s32.totalorder %s4303_s29, %s4303_s29 }
  0x20   :  { %p4310_p6 = por %p4309_p5, %p4308_p4 }
  0x22   :  { %p4311_p7 = pnand %p4310_p6, %p4304_p3 }
  0x24   :  { %4314 = shalt.err (!%p4311_p7)
}
  0x25   :  { %s4527_s3 = smov 16   ;;  %s4528_s0 = smov 1  }
  0x26   :  { %65 = dma.hbm_to_vmem [thread:$0]  %s5649_s26, 32, %s60_s30, [#allocation6], %s4527_s3, %s4527_s3, %s4528_s0  }
  0x27   :  { %s4315_s2 = scalar_lea.hbm %s5616_s9, 32 }
  0x28   :  { %p4316_p8 = scmp.ne.s32.totalorder %s5616_s9, %s4315_s2  ;;  %p4319_p9 = scmp.lt.u32.totalorder %s4315_s2, %s5616_s9 }
  0x2a   :  { %p4321_p10 = pnand %p4319_p9, %p4316_p8 }
  0x2c   :  { %4324 = shalt.err (!%p4321_p10)
}
  0x2d   :  { %s4325_s29 = scalar_lea.vmem %s4666_s25, 32  ;;  %p4330_p12 = scmp.lt.s32.totalorder %s4666_s25, %s4666_s25 }
  0x2e   :  { %p4326_p11 = scmp.ne.s32.totalorder %s4666_s25, %s4325_s29  ;;  %p4331_p13 = scmp.lt.s32.totalorder %s4325_s29, %s4325_s29 }
  0x30   :  { %p4332_p0 = por %p4331_p13, %p4330_p12 }
  0x32   :  { %p4333_p1 = pnand %p4332_p0, %p4326_p11 }
  0x34   :  { %4336 = shalt.err (!%p4333_p1)
}
  0x35   :  { %93 = dma.hbm_to_vmem [thread:$0]  %s5616_s9, 32, %s4666_s25, [#allocation9], %s4527_s3, %s4527_s3, %s4528_s0  }
  0x36   :  { %s4529_s4 = smov [#allocation11]   ;;  %s4530_s5 = smov [#allocation14]  }
  0x37   :  { %s115_s24 = sshll.u32 %s4529_s4, 4  ;;  %s139_s1 = sshll.u32 %s4530_s5, 4  ;;  %s116_s24 = int_to_ptr.vmem [resolvable:$true] %s115_s24  ;;  %s4703_s1 = int_to_ptr.vmem [resolvable:$true] %s139_s1 }
  0x38   :  { %s4337_s27 = scalar_lea.hbm %s5620_s13, 32 }
  0x39   :  { %p4338_p2 = scmp.ne.s32.totalorder %s5620_s13, %s4337_s27  ;;  %p4341_p3 = scmp.lt.u32.totalorder %s4337_s27, %s5620_s13 }
  0x3b   :  { %p4343_p4 = pnand %p4341_p3, %p4338_p2 }
  0x3d   :  { %4346 = shalt.err (!%p4343_p4)
}
  0x3e   :  { %s4347_s9 = scalar_lea.vmem %s116_s24, 32  ;;  %p4352_p6 = scmp.lt.s32.totalorder %s116_s24, %s116_s24 }
  0x3f   :  { %p4348_p5 = scmp.ne.s32.totalorder %s116_s24, %s4347_s9  ;;  %p4353_p7 = scmp.lt.s32.totalorder %s4347_s9, %s4347_s9 }
  0x41   :  { %p4354_p8 = por %p4353_p7, %p4352_p6 }
  0x43   :  { %p4355_p9 = pnand %p4354_p8, %p4348_p5 }
  0x45   :  { %4358 = shalt.err (!%p4355_p9)
}
  0x46   :  { %121 = dma.hbm_to_vmem [thread:$0]  %s5620_s13, 32, %s116_s24, [#allocation12], %s4527_s3, %s4527_s3, %s4528_s0  }
  0x47   :  { %s4359_s23 = scalar_lea.hbm %s5622_s15, 32 }
  0x48   :  { %p4360_p10 = scmp.ne.s32.totalorder %s5622_s15, %s4359_s23  ;;  %p4363_p11 = scmp.lt.u32.totalorder %s4359_s23, %s5622_s15 }
  0x4a   :  { %p4365_p12 = pnand %p4363_p11, %p4360_p10 }
  0x4c   :  { %4368 = shalt.err (!%p4365_p12)
}
  0x4d   :  { %s4369_s7 = scalar_lea.vmem %s4703_s1, 32  ;;  %p4374_p0 = scmp.lt.s32.totalorder %s4703_s1, %s4703_s1 }
  0x4e   :  { %p4370_p13 = scmp.ne.s32.totalorder %s4703_s1, %s4369_s7  ;;  %p4375_p1 = scmp.lt.s32.totalorder %s4369_s7, %s4369_s7 }
  0x50   :  { %p4376_p2 = por %p4375_p1, %p4374_p0 }
  0x52   :  { %p4377_p3 = pnand %p4376_p2, %p4370_p13 }
  0x54   :  { %4380 = shalt.err (!%p4377_p3)
}
  0x55   :  { %145 = dma.hbm_to_vmem [thread:$0]  %s5622_s15, 32, %s4703_s1, [#allocation15], %s4527_s3, %s4527_s3, %s4528_s0  }
  0x56   :  { %s4531_s28 = smov [#allocation2]   ;;  %s4532_s9 = smov [#allocation7]  }
  0x57   :  { %s47_s29 = sshll.u32 %s4531_s28, 4  ;;  %s73_s25 = sshll.u32 %s4532_s9, 4  ;;  %s48_s29 = int_to_ptr.vmem [resolvable:$true] %s47_s29  ;;  %s4740_s25 = int_to_ptr.vmem [resolvable:$true] %s73_s25 }
  0x58   :  { %s5650_s4 = sld [smem:[#allocation28_spill]] }
  0x5e   :  { %s4381_s23 = scalar_lea.hbm %s5650_s4, 32 }
  0x5f   :  { %p4382_p4 = scmp.ne.s32.totalorder %s5650_s4, %s4381_s23  ;;  %p4385_p5 = scmp.lt.u32.totalorder %s4381_s23, %s5650_s4 }
  0x61   :  { %p4387_p6 = pnand %p4385_p5, %p4382_p4 }
  0x63   :  { %4390 = shalt.err (!%p4387_p6)
}
  0x64   :  { %s4391_s15 = scalar_lea.vmem %s48_s29, 32  ;;  %p4396_p8 = scmp.lt.s32.totalorder %s48_s29, %s48_s29 }
  0x65   :  { %p4392_p7 = scmp.ne.s32.totalorder %s48_s29, %s4391_s15  ;;  %p4397_p9 = scmp.lt.s32.totalorder %s4391_s15, %s4391_s15 }
  0x67   :  { %p4398_p10 = por %p4397_p9, %p4396_p8 }
  0x69   :  { %p4399_p11 = pnand %p4398_p10, %p4392_p7 }
  0x6b   :  { %4402 = shalt.err (!%p4399_p11)
}
  0x6c   :  { %53 = dma.hbm_to_vmem [thread:$0]  %s5650_s4, 32, %s48_s29, [#allocation3], %s4527_s3, %s4527_s3, %s4528_s0  }
  0x6d   :  { %s5651_s28 = sld [smem:[#allocation31_spill]] }
  0x73   :  { %s4403_s9 = scalar_lea.hbm %s5651_s28, 32 }
  0x74   :  { %p4404_p12 = scmp.ne.s32.totalorder %s5651_s28, %s4403_s9  ;;  %p4407_p13 = scmp.lt.u32.totalorder %s4403_s9, %s5651_s28 }
  0x76   :  { %p4409_p0 = pnand %p4407_p13, %p4404_p12 }
  0x78   :  { %4412 = shalt.err (!%p4409_p0)
}
  0x79   :  { %s4413_s2 = scalar_lea.vmem %s4740_s25, 32  ;;  %p4418_p2 = scmp.lt.s32.totalorder %s4740_s25, %s4740_s25 }
  0x7a   :  { %p4414_p1 = scmp.ne.s32.totalorder %s4740_s25, %s4413_s2  ;;  %p4419_p3 = scmp.lt.s32.totalorder %s4413_s2, %s4413_s2 }
  0x7c   :  { %p4420_p4 = por %p4419_p3, %p4418_p2 }
  0x7e   :  { %p4421_p5 = pnand %p4420_p4, %p4414_p1 }
  0x80   :  { %4424 = shalt.err (!%p4421_p5)
}
  0x81   :  { %79 = dma.hbm_to_vmem [thread:$0]  %s5651_s28, 32, %s4740_s25, [#allocation6], %s4527_s3, %s4527_s3, %s4528_s0  }
  0x82   :  { %s4533_s6 = smov [#allocation10]   ;;  %s4534_s15 = smov [#allocation13]  }
  0x83   :  { %s101_s27 = sshll.u32 %s4533_s6, 4  ;;  %s127_s1 = sshll.u32 %s4534_s15, 4  ;;  %s102_s27 = int_to_ptr.vmem [resolvable:$true] %s101_s27  ;;  %s4777_s1 = int_to_ptr.vmem [resolvable:$true] %s127_s1 }
  0x84   :  { %s4425_s24 = scalar_lea.hbm %s5618_s11, 32 }
  0x85   :  { %p4426_p6 = scmp.ne.s32.totalorder %s5618_s11, %s4425_s24  ;;  %p4429_p7 = scmp.lt.u32.totalorder %s4425_s24, %s5618_s11 }
  0x87   :  { %p4431_p8 = pnand %p4429_p7, %p4426_p6 }
  0x89   :  { %4434 = shalt.err (!%p4431_p8)
}
  0x8a   :  { %s4435_s25 = scalar_lea.vmem %s102_s27, 32  ;;  %p4440_p10 = scmp.lt.s32.totalorder %s102_s27, %s102_s27 }
  0x8b   :  { %p4436_p9 = scmp.ne.s32.totalorder %s102_s27, %s4435_s25  ;;  %p4441_p11 = scmp.lt.s32.totalorder %s4435_s25, %s4435_s25 }
  0x8d   :  { %p4442_p12 = por %p4441_p11, %p4440_p10 }
  0x8f   :  { %p4443_p13 = pnand %p4442_p12, %p4436_p9 }
  0x91   :  { %4446 = shalt.err (!%p4443_p13)
}
  0x92   :  { %107 = dma.hbm_to_vmem [thread:$0]  %s5618_s11, 32, %s102_s27, [#allocation9], %s4527_s3, %s4527_s3, %s4528_s0  }
  0x93   :  { %s4447_s4 = scalar_lea.hbm %s5621_s14, 32 }
  0x94   :  { %p4448_p0 = scmp.ne.s32.totalorder %s5621_s14, %s4447_s4  ;;  %p4451_p1 = scmp.lt.u32.totalorder %s4447_s4, %s5621_s14 }
  0x96   :  { %p4453_p2 = pnand %p4451_p1, %p4448_p0 }
  0x98   :  { %4456 = shalt.err (!%p4453_p2)
}
  0x99   :  { %s4457_s24 = scalar_lea.vmem %s4777_s1, 32  ;;  %p4462_p4 = scmp.lt.s32.totalorder %s4777_s1, %s4777_s1 }
  0x9a   :  { %p4458_p3 = scmp.ne.s32.totalorder %s4777_s1, %s4457_s24  ;;  %p4463_p5 = scmp.lt.s32.totalorder %s4457_s24, %s4457_s24 }
  0x9c   :  { %p4464_p6 = por %p4463_p5, %p4462_p4 }
  0x9e   :  { %p4465_p7 = pnand %p4464_p6, %p4458_p3 }
  0xa0   :  { %4468 = shalt.err (!%p4465_p7)
}
  0xa1   :  { %133 = dma.hbm_to_vmem [thread:$0]  %s5621_s14, 32, %s4777_s1, [#allocation12], %s4527_s3, %s4527_s3, %s4528_s0  }
  0xa2   :  { %s4535_s9 = smov [#allocation16]   ;;  %s4469_s25 = scalar_lea.hbm %s5624_s17, 32 }
  0xa3   :  { %s153_s30 = sshll.u32 %s4535_s9, 4  ;;  %p4470_p8 = scmp.ne.s32.totalorder %s5624_s17, %s4469_s25  ;;  %s154_s30 = int_to_ptr.vmem [resolvable:$true] %s153_s30 }
  0xa4   :  { %p4473_p9 = scmp.lt.u32.totalorder %s4469_s25, %s5624_s17 }
  0xa6   :  { %p4475_p10 = pnand %p4473_p9, %p4470_p8 }
  0xa8   :  { %4478 = shalt.err (!%p4475_p10)
}
  0xa9   :  { %s4479_s4 = scalar_lea.vmem %s154_s30, 32  ;;  %p4484_p12 = scmp.lt.s32.totalorder %s154_s30, %s154_s30 }
  0xaa   :  { %p4480_p11 = scmp.ne.s32.totalorder %s154_s30, %s4479_s4  ;;  %p4485_p13 = scmp.lt.s32.totalorder %s4479_s4, %s4479_s4 }
  0xac   :  { %p4486_p0 = por %p4485_p13, %p4484_p12 }
  0xae   :  { %p4487_p1 = pnand %p4486_p0, %p4480_p11 }
  0xb0   :  { %4490 = shalt.err (!%p4487_p1)
}
  0xb1   :  { %159 = dma.hbm_to_vmem [thread:$0]  %s5624_s17, 32, %s154_s30, [#allocation15], %s4527_s3, %s4527_s3, %s4528_s0  }
  0xb2   :  { %4513 = dma.done.wait [#allocation3], 32  }
  0xb3   :  { %4514 = vsyncadd [#allocation3], 4294967264 }
  0xb4   :  { %4515 = dma.done.wait [#allocation6], 64  }
  0xb5   :  { %4516 = vsyncadd [#allocation6], 4294967232 }
  0xb6   :  { %4517 = dma.done.wait [#allocation9], 64  }
  0xb7   :  { %4518 = vsyncadd [#allocation9], 4294967232 }
  0xb8   :  { %4519 = dma.done.wait [#allocation12], 64  }
  0xb9   :  { %4520 = vsyncadd [#allocation12], 4294967232 }
  0xba   :  { %4521 = dma.done.wait [#allocation15], 64  }
  0xbb   :  { %4522 = vsyncadd [#allocation15], 4294967232  ;;  %v4536_v0 = vmov 0   ;;  %s5652_s7 = sld [smem:[#allocation25_spill]]  ;;  %vm320_vm0 = vcmask 523264   ;;  %s5653_s26 = sld [smem:[#allocation24_spill]] }
  0xbc   :  { %327 = vmatprep.subr.bf16.mxu0 %v4536_v0  ;;  %s5654_s2 = sld [smem:[#allocation26_spill]]  ;;  %vm382_vm1 = vcmask 261120   ;;  %s5655_s24 = sld [smem:[#allocation30_spill]]  ;;  %v4079_v59 = vld [vmem:[%s5615_s8] sm:$0xff]   ;;  %vm686_vm2 = vcmask 64512   ;;  %vm1435_vm3 = vcmask 130048  }
  0xbd   :  { %s5656_s4 = sld [smem:[#allocation27_spill]]  ;;  %s4538_s17 = smov 112   ;;  %vm1440_vm4 = vcmask 195584   ;;  %vm4543_vm5 = vmmov 0   ;;  %vm3417_vm6 = vcmask 254976  }
  0xbe   :  { %s4539_s0 = smov 104   ;;  %s4540_s11 = smov 8  }
  0xbf   :  { %s4541_s25 = smov 24  }
  0xc1   :  { %v4059_v1 = vld [vmem:[%s5652_s7] sm:$0xff]   ;;  %v4060_v2 = vld [vmem:[%s5652_s7 + $0x8] sm:$0xff]   ;;  %v4061_v3 = vld [vmem:[%s5652_s7 + $0x10] sm:$0xff]  }
  0xc2   :  { %328 = vmatpush1.bf16.msra.mxu0 %v4059_v1  ;;  %v4062_v4 = vld [vmem:[%s5652_s7 + $0x18] sm:$0xff]   ;;  %v4073_v5 = vld [vmem:[%s5653_s26 + $0x4] ss:$8 sps:$4 sm:$0xff]   ;;  %v4065_v8 = vld [vmem:[%s5652_s7 + $0x30] sm:$0xff]  }
  0xc3   :  { %329 = vmatprep.subr.bf16.mxu0 %v4536_v0  ;;  %v4063_v6 = vld [vmem:[%s5652_s7 + $0x20] sm:$0xff]   ;;  %3454 = vmatprep.mubr.msk.bf16.mxu0 %vm320_vm0, %v4073_v5  ;;  %v4064_v7 = vld [vmem:[%s5652_s7 + $0x28] sm:$0xff]   ;;  %v4066_v9 = vld [vmem:[%s5652_s7 + $0x38] sm:$0xff]  }
  0xc4   :  { %v4067_v10 = vld [vmem:[%s5652_s7 + $0x40] sm:$0xff]   ;;  %v4068_v11 = vld [vmem:[%s5652_s7 + $0x48] sm:$0xff]   ;;  %v4069_v12 = vld [vmem:[%s5652_s7 + $0x50] sm:$0xff]  }
  0xc5   :  { %v4070_v13 = vld [vmem:[%s5652_s7 + $0x58] sm:$0xff]   ;;  %v4071_v14 = vld [vmem:[%s5653_s26] ss:$8 sps:$4 sm:$0xff]   ;;  %v228_v26 = vld [vmem:[%s5654_s2 + $0x10] sm:$0xff]  ;;  %s4537_s7 = smov 120  }
  0xc6   :  { %330 = vmatpush1.bf16.msra.mxu0 %v4060_v2  ;;  %v4074_v15 = vld [vmem:[%s5653_s26 + $0x14] ss:$8 sps:$4 sm:$0xff]   ;;  %v4076_v16 = vld [vmem:[%s5653_s26 + $0x10] ss:$8 sps:$4 sm:$0xff]   ;;  %v226_v17 = vld [vmem:[%s5654_s2] sm:$0xff] }
  0xc7   :  { %331 = vmatprep.subr.bf16.mxu0 %v4536_v0  ;;  %v227_v19 = vld [vmem:[%s5654_s2 + $0x8] sm:$0xff]  ;;  %v229_v29 = vld [vmem:[%s5654_s2 + $0x18] sm:$0xff]  ;;  %v4077_v57 = vld [vmem:[%s5655_s24] sm:$0xff]  }
  0xc8   :  { %3713 = vmatprep.subr.bf16.mxu1 %v4077_v57  ;;  %v4078_v58 = vld [vmem:[%s5655_s24 + $0x8] sm:$0xff]  }
  0xc9   :  { %3714 = vmatpush3.bf16.msra.mxu1 %v4077_v57 }
  0xca   :  { %332 = vmatpush1.bf16.msra.mxu0 %v4061_v3  ;;  %3715 = vmatprep.subr.bf16.mxu1 %v4078_v58 }
  0xcb   :  { %333 = vmatprep.subr.bf16.mxu0 %v4536_v0 }
  0xcd   :  { %3716 = vmatpush3.bf16.msra.mxu1 %v4078_v58  ;;  %v3468_v58 = vld [vmem:[#allocation10] ss:$0 sm:$0xff] }
  0xce   :  { %334 = vmatpush1.bf16.msra.mxu0 %v4062_v4  ;;  %3721 = vmatprep.subr.bf16.mxu1 %v4079_v59 }
  0xcf   :  { %335 = vmatprep.subr.bf16.mxu0 %v4536_v0 }
  0xd2   :  { %336 = vmatpush1.bf16.msra.mxu0 %v4063_v6 }
  0xd3   :  { %337 = vmatprep.subr.bf16.mxu0 %v4536_v0 }
  0xd6   :  { %338 = vmatpush1.bf16.msra.mxu0 %v4064_v7 }
  0xd7   :  { %339 = vmatprep.subr.bf16.mxu0 %v4536_v0 }
  0xda   :  { %340 = vmatpush1.bf16.msra.mxu0 %v4065_v8 }
  0xdb   :  { %341 = vmatprep.subr.bf16.mxu0 %v4536_v0 }
  0xde   :  { %342 = vmatpush1.bf16.msra.mxu0 %v4066_v9 }
  0xdf   :  { %343 = vmatprep.subr.bf16.mxu0 %v4536_v0 }
  0xe2   :  { %344 = vmatpush1.bf16.msra.mxu0 %v4067_v10  ;;  %v3456_v10 = vld [vmem:[#allocation2] ss:$0 sm:$0xff] }
  0xe3   :  { %345 = vmatprep.subr.bf16.mxu0 %v4536_v0 }
  0xe6   :  { %346 = vmatpush1.bf16.msra.mxu0 %v4068_v11 }
  0xe7   :  { %347 = vmatprep.subr.bf16.mxu0 %v4536_v0 }
  0xea   :  { %348 = vmatpush1.bf16.msra.mxu0 %v4069_v12 }
  0xeb   :  { %349 = vmatprep.subr.bf16.mxu0 %v4536_v0 }
  0xee   :  { %350 = vmatpush1.bf16.msra.mxu0 %v4070_v13 }
  0xf1   :  { %360 = vmatmul.mubr.bf16.vlgmr.msra.gmra.mrb[0].mxu0 %v4071_v14  ;;  %v3457_v14 = vld [vmem:[#allocation5] ss:$0 sm:$0xff] }
  0xf2   :  { %3455 = vmatprep.mubr.msk.bf16.mxu0 %vm320_vm0, %v4074_v15 }
  0xf9   :  { %368 = vmatmul.mubr.bf16.gmra.mrb[4].mxu0 %v4076_v16 }
 0x1c4   :  { %v361_v18 = vpop.f32.mrb[0].mxu0 }
 0x1c5   :  { %v4885_v20 = vadd.f32 %v361_v18, %v226_v17  ;;  %v363_v21 = vpop.f32.mrb[1].mxu0 }
 0x1c6   :  { %v364_v22 = vpop.f32.mrb[2].mxu0 }
 0x1c7   :  { %v4887_v23 = vadd.f32 %v364_v22, %v227_v19  ;;  %v366_v24 = vpop.f32.mrb[3].mxu0  ;;  %v383_v25 = vsel %vm382_vm1, %v4885_v20, 0.0 }
 0x1c8   :  { %384 = vadd.xlane.f32.xlu0 %v383_v25 }
 0x1c9   :  { %v386_v27 = vsel %vm382_vm1, %v4887_v23, 0.0 }
 0x1cc   :  { %v369_v28 = vpop.f32.mrb[4].mxu0  ;;  %387 = vadd.xlane.f32.xlu0 %v386_v27 }
 0x1cd   :  { %v4899_v30 = vadd.f32 %v369_v28, %v228_v26  ;;  %v371_v31 = vpop.f32.mrb[5].mxu0 }
 0x1ce   :  { %v372_v32 = vpop.f32.mrb[6].mxu0  ;;  %v4080_v31 = vld [vmem:[%s5615_s8 + $0x8] sm:$0xff]  }
 0x1cf   :  { %v4901_v33 = vadd.f32 %v372_v32, %v229_v29  ;;  %v374_v34 = vpop.f32.mrb[7].mxu0  ;;  %v389_v35 = vsel %vm382_vm1, %v4899_v30, 0.0  ;;  %v4081_v32 = vld [vmem:[%s5617_s10] sm:$0xff]  }
 0x1d0   :  { %390 = vadd.xlane.f32.xlu1 %v389_v35  ;;  %v4082_v34 = vld [vmem:[%s5617_s10 + $0x8] sm:$0xff]  }
 0x1d1   :  { %v392_v36 = vsel %vm382_vm1, %v4901_v33, 0.0 }
 0x1d4   :  { %393 = vadd.xlane.f32.xlu1 %v392_v36  ;;  %v3458_v36 = vld [vmem:[#allocation7] ss:$0 sm:$0xff] }
 0x255   :  { %v385_v37 = vpop.xlane.xlu0 %384 }
 0x256   :  { %v396_v38 = vmul.f32 0.03125, %v385_v37 }
 0x258   :  { %v400_v39 = vsub.f32 %v4885_v20, %v396_v38 }
 0x259   :  { %v388_v40 = vpop.xlane.xlu0 %387 }
 0x25a   :  { %v397_v41 = vmul.f32 0.03125, %v388_v40  ;;  %v404_v42 = vmul.f32 %v400_v39, %v400_v39 }
 0x25c   :  { %v401_v43 = vsub.f32 %v4887_v23, %v397_v41  ;;  %v408_v44 = vsel %vm382_vm1, %v404_v42, 0.0 }
 0x25d   :  { %v391_v45 = vpop.xlane.xlu1 %390  ;;  %409 = vadd.xlane.f32.xlu0 %v408_v44 }
 0x25e   :  { %v398_v46 = vmul.f32 0.03125, %v391_v45  ;;  %v405_v47 = vmul.f32 %v401_v43, %v401_v43 }
 0x260   :  { %v402_v48 = vsub.f32 %v4899_v30, %v398_v46  ;;  %v411_v49 = vsel %vm382_vm1, %v405_v47, 0.0  ;;  %v3463_v47 = vld [vmem:[#allocation8] ss:$0 sm:$0xff] }
 0x261   :  { %v394_v50 = vpop.xlane.xlu1 %393  ;;  %412 = vadd.xlane.f32.xlu1 %v411_v49 }
 0x262   :  { %v399_v51 = vmul.f32 0.03125, %v394_v50  ;;  %v406_v52 = vmul.f32 %v402_v48, %v402_v48 }
 0x264   :  { %v403_v53 = vsub.f32 %v4901_v33, %v399_v51  ;;  %v414_v54 = vsel %vm382_vm1, %v406_v52, 0.0 }
 0x265   :  { %415 = vadd.xlane.f32.xlu0 %v414_v54 }
 0x266   :  { %v407_v55 = vmul.f32 %v403_v53, %v403_v53 }
 0x268   :  { %v417_v56 = vsel %vm382_vm1, %v407_v55, 0.0 }
 0x269   :  { %418 = vadd.xlane.f32.xlu1 %v417_v56 }
 0x2ea   :  { %v410_v60 = vpop.xlane.xlu0 %409 }
 0x2eb   :  { %v420_v61 = vmul.f32 0.03125, %v410_v60 }
 0x2ed   :  { %v424_v62 = vadd.f32 1e-06, %v420_v61 }
 0x2ee   :  { %v413_v63 = vpop.xlane.xlu1 %412 }
 0x2ef   :  { %4105 = vrsqrt.f32 %v424_v62  ;;  %v421_v0 = vmul.f32 0.03125, %v413_v63 }
 0x2f1   :  { %v425_v1 = vadd.f32 1e-06, %v421_v0 }
 0x2f2   :  { %v416_v2 = vpop.xlane.xlu0 %415 }
 0x2f3   :  { %4107 = vrsqrt.f32 %v425_v1  ;;  %v422_v3 = vmul.f32 0.03125, %v416_v2 }
 0x2f5   :  { %v426_v4 = vadd.f32 1e-06, %v422_v3 }
 0x2f6   :  { %v419_v5 = vpop.xlane.xlu1 %418 }
 0x2f7   :  { %4109 = vrsqrt.f32 %v426_v4  ;;  %v423_v6 = vmul.f32 0.03125, %v419_v5 }
 0x2f9   :  { %v4106_v7 = vpop.eup %4105  ;;  %v427_v8 = vadd.f32 1e-06, %v423_v6 }
 0x2fa   :  { %v432_v9 = vmul.f32 %v4106_v7, %v400_v39 }
 0x2fb   :  { %4111 = vrsqrt.f32 %v427_v8 }
 0x2fc   :  { %v442_v13 = vmul.f32 %v3456_v10, %v432_v9 }
 0x2fd   :  { %v4108_v11 = vpop.eup %4107 }
 0x2fe   :  { %v433_v12 = vmul.f32 %v4108_v11, %v401_v43  ;;  %v452_v17 = vadd.f32 %v3457_v14, %v442_v13 }
 0x300   :  { %v443_v15 = vmul.f32 %v3456_v10, %v433_v12  ;;  %v4984_v12 = vld [vmem:[%s5656_s4] sm:$0xff] }
 0x301   :  { %v4110_v16 = vpop.eup %4109 }
 0x302   :  { %v453_v18 = vadd.f32 %v3457_v14, %v443_v15  ;;  %v434_v19 = vmul.f32 %v4110_v16, %v402_v48  ;;  %v4994_v16 = vld [vmem:[%s5656_s4 + $0x8] sm:$0xff] }
 0x304   :  { %v456_v21 = vpack.c.bf16 %v453_v18, %v452_v17  ;;  %v444_v25 = vmul.f32 %v3456_v10, %v434_v19 }
 0x305   :  { %v4112_v22 = vpop.eup %4111 }
 0x306   :  { %3717 = vmatprep.mubr.msk.bf16.mxu1 %vm382_vm1, %v456_v21  ;;  %v435_v24 = vmul.f32 %v4112_v22, %v403_v53  ;;  %v454_v27 = vadd.f32 %v3457_v14, %v444_v25  ;;  %v5003_v25 = vld [vmem:[%s5656_s4 + $0x18] sm:$0xff] }
 0x308   :  { %v445_v26 = vmul.f32 %v3456_v10, %v435_v24 }
 0x30a   :  { %v455_v28 = vadd.f32 %v3457_v14, %v445_v26  ;;  %v4989_v14 = vld [vmem:[%s5656_s4 + $0x10] sm:$0xff] }
 0x30c   :  { %v457_v29 = vpack.c.bf16 %v455_v28, %v454_v27 }
 0x30e   :  { %3718 = vmatmul.mubr.msk.bf16.vlgmr.msra.gmra.mrb[0].mxu1 %vm382_vm1, %v457_v29 }
 0x30f   :  { %3722 = vmatpush3.bf16.msra.mxu1 %v4079_v59  ;;  %3725 = vmatprep.mubr.msk.bf16.mxu1 %vm382_vm1, %v456_v21 }
 0x310   :  { %3723 = vmatprep.subr.bf16.mxu1 %v4080_v31 }
 0x313   :  { %3724 = vmatpush3.bf16.msra.mxu1 %v4080_v31 }
 0x314   :  { %3729 = vmatprep.subr.bf16.mxu1 %v4081_v32 }
 0x316   :  { %3726 = vmatmul.mubr.msk.bf16.vlgmr.msra.gmra.mrb[4].mxu1 %vm382_vm1, %v457_v29 }
 0x317   :  { %3730 = vmatpush3.bf16.msra.mxu1 %v4081_v32  ;;  %3733 = vmatprep.mubr.msk.bf16.mxu1 %vm382_vm1, %v456_v21 }
 0x318   :  { %3731 = vmatprep.subr.bf16.mxu1 %v4082_v34 }
 0x31b   :  { %3732 = vmatpush3.bf16.msra.mxu1 %v4082_v34 }
 0x31e   :  { %3734 = vmatmul.mubr.msk.bf16.vlgmr.msra.gmra.mrb[8].mxu1 %vm382_vm1, %v457_v29 }
 0x3e1   :  { %v3719_v35 = vpop.f32.mrb[0].mxu1 }
 0x3e2   :  { %v521_v37 = vpop.f32.mrb[1].mxu1  ;;  %v530_v39 = vadd.f32 %v3719_v35, %v3458_v36 }
 0x3e3   :  { %v3720_v38 = vpop.f32.mrb[2].mxu1  ;;  %v522_v42 = vadd.f32 %v3458_v36, %v521_v37 }
 0x3e4   :  { %v533_v40 = vadd.f32 %v3720_v38, %v3458_v36  ;;  %v524_v41 = vpop.f32.mrb[3].mxu1 }
 0x3e5   :  { %v525_v43 = vadd.f32 %v3458_v36, %v524_v41 }
 0x3e6   :  { %v4939_v44 = vpack.c.bf16 %v533_v40, %v530_v39 }
 0x3e7   :  { %v4941_v45 = vpack.c.bf16 %v525_v43, %v522_v42 }
 0x3e9   :  { %v3727_v46 = vpop.f32.mrb[4].mxu1  ;;  %3741 = vmatprep.mubr.msk.bf16.mxu1 %vm686_vm2, %v4941_v45 }
 0x3ea   :  { %v593_v48 = vpop.f32.mrb[5].mxu1  ;;  %v602_v50 = vadd.f32 %v3727_v46, %v3463_v47 }
 0x3eb   :  { %v3728_v49 = vpop.f32.mrb[6].mxu1  ;;  %v594_v53 = vadd.f32 %v3463_v47, %v593_v48 }
 0x3ec   :  { %v605_v51 = vadd.f32 %v3728_v49, %v3463_v47  ;;  %v596_v52 = vpop.f32.mrb[7].mxu1 }
 0x3ed   :  { %v597_v54 = vadd.f32 %v3463_v47, %v596_v52 }
 0x3ee   :  { %v4945_v55 = vpack.c.bf16 %v605_v51, %v602_v50 }
 0x3ef   :  { %v4947_v56 = vpack.c.bf16 %v597_v54, %v594_v53 }
 0x3f0   :  { %859 = vrot.lane.b32.xlu1 %v4945_v55, %s4537_s7  ;;  %v697_v5 = vsel %vm686_vm2, %v4945_v55, 0 }
 0x3f1   :  { %v3735_v57 = vpop.f32.mrb[8].mxu1  ;;  %857 = vrot.lane.b32.xlu0 %v4947_v56, %s4537_s7  ;;  %3962 = vmatprep.subr.msk.bf16.mxu1 %vm686_vm2, %v4947_v56  ;;  %v694_v59 = vsel %vm686_vm2, %v4947_v56, 0 }
 0x3f2   :  { %v665_v60 = vpop.f32.mrb[9].mxu1  ;;  %3738 = vmatpush3.bf16.xpose.msra.mxu1 %v694_v59  ;;  %v674_v62 = vadd.f32 %v3735_v57, %v3468_v58 }
 0x3f3   :  { %v3736_v61 = vpop.f32.mrb[10].mxu1  ;;  %3963 = vmatprep.subr.msk.bf16.mxu1 %vm686_vm2, %v4945_v55  ;;  %v666_v1 = vadd.f32 %v3468_v58, %v665_v60 }
 0x3f4   :  { %v677_v63 = vadd.f32 %v3736_v61, %v3468_v58  ;;  %v668_v0 = vpop.f32.mrb[11].mxu1  ;;  %851 = vrot.lane.b32.xlu1 %v4941_v45, %s4537_s7 }
 0x3f5   :  { %v669_v2 = vadd.f32 %v3468_v58, %v668_v0 }
 0x3f6   :  { %v4961_v3 = vpack.c.bf16 %v677_v63, %v674_v62 }
 0x3f7   :  { %v4963_v4 = vpack.c.bf16 %v669_v2, %v666_v1 }
 0x3f8   :  { %853 = vrot.lane.b32.xlu1 %v4939_v44, %s4537_s7 }
 0x3fa   :  { %3740 = vmatpush3.bf16.xpose.msra.mxu1 %v697_v5 }
 0x3fb   :  { %3745 = vmatprep.subr.bf16.mxu1 %v4963_v4 }
 0x401   :  { %3742 = vmatmul.mubr.msk.bf16.vlgmr.msra.gmra.mrb[12].mxu1 %vm686_vm2, %v4939_v44 }
 0x402   :  { %3746 = vmatpush3.bf16.msra.mxu1 %v4963_v4 }
 0x403   :  { %3747 = vmatprep.subr.bf16.mxu1 %v4961_v3 }
 0x406   :  { %3748 = vmatpush3.bf16.msra.mxu1 %v4961_v3 }
 0x462   :  { %v860_v6 = vpop.permute.xlu1 %859 }
 0x463   :  { %v858_v7 = vpop.permute.xlu0 %857  ;;  %v871_v10 = vsel %vm686_vm2, %v860_v6, 0 }
 0x464   :  { %3964 = vmatprep.subr.msk.bf16.mxu0 %vm686_vm2, %v858_v7  ;;  %v868_v8 = vsel %vm686_vm2, %v858_v7, 0 }
 0x465   :  { %3754 = vmatpush3.bf16.xpose.msra.mxu0 %v868_v8 }
 0x466   :  { %3965 = vmatprep.subr.msk.bf16.mxu0 %vm686_vm2, %v860_v6  ;;  %v852_v9 = vpop.permute.xlu1 %851 }
 0x467   :  { %3757 = vmatprep.mubr.msk.bf16.mxu0 %vm686_vm2, %v852_v9 }
 0x46a   :  { %v854_v11 = vpop.permute.xlu1 %853 }
 0x46d   :  { %3756 = vmatpush3.bf16.xpose.msra.mxu0 %v871_v10 }
 0x474   :  { %3758 = vmatmul.mubr.msk.bf16.vlgmr.msra.gmra.mrb[8].mxu0 %vm686_vm2, %v854_v11 }
 0x4d4   :  { %v3743_v13 = vpop.f32.mrb[12].mxu1 }
 0x4d5   :  { %v733_v15 = vpop.f32.mrb[13].mxu1  ;;  %v742_v21 = vadd.f32 %v3743_v13, %v4989_v14 }
 0x4d6   :  { %v734_v17 = vadd.f32 %v733_v15, %v4984_v12  ;;  %v3744_v18 = vpop.f32.mrb[14].mxu1 }
 0x4d7   :  { %v736_v19 = vpop.f32.mrb[15].mxu1  ;;  %v745_v27 = vadd.f32 %v3744_v18, %v5003_v25  ;;  %v754_v28 = vsel %vm382_vm1, %v742_v21, -inf }
 0x4d8   :  { %v737_v22 = vadd.f32 %v736_v19, %v4994_v16  ;;  %v748_v24 = vsel %vm382_vm1, %v734_v17, -inf }
 0x4d9   :  { %749 = vmax.xlane.f32.xlu0 %v748_v24  ;;  %v757_v29 = vsel %vm382_vm1, %v745_v27, -inf }
 0x4da   :  { %v751_v26 = vsel %vm382_vm1, %v737_v22, -inf }
 0x4db   :  { %752 = vmax.xlane.f32.xlu1 %v751_v26 }
 0x4dd   :  { %755 = vmax.xlane.f32.xlu0 %v754_v28 }
 0x4e1   :  { %758 = vmax.xlane.f32.xlu0 %v757_v29 }
 0x547   :  { %v3759_v31 = vpop.f32.mrb[8].mxu0 }
 0x548   :  { %v907_v32 = vpop.f32.mrb[9].mxu0  ;;  %v916_v37 = vadd.f32 %v3759_v31, %v4989_v14 }
 0x549   :  { %v908_v34 = vadd.f32 %v907_v32, %v4984_v12  ;;  %v3760_v35 = vpop.f32.mrb[10].mxu0 }
 0x54a   :  { %v910_v36 = vpop.f32.mrb[11].mxu0  ;;  %v919_v40 = vadd.f32 %v3760_v35, %v5003_v25  ;;  %v928_v42 = vsel %vm382_vm1, %v916_v37, -inf }
 0x54b   :  { %v911_v38 = vadd.f32 %v910_v36, %v4994_v16  ;;  %v922_v39 = vsel %vm382_vm1, %v908_v34, -inf }
 0x54c   :  { %923 = vmax.xlane.f32.xlu0 %v922_v39  ;;  %v931_v43 = vsel %vm382_vm1, %v919_v40, -inf }
 0x54d   :  { %v925_v41 = vsel %vm382_vm1, %v911_v38, -inf }
 0x54e   :  { %926 = vmax.xlane.f32.xlu1 %v925_v41 }
 0x550   :  { %929 = vmax.xlane.f32.xlu0 %v928_v42 }
 0x552   :  { %932 = vmax.xlane.f32.xlu1 %v931_v43 }
 0x566   :  { %v750_v46 = vpop.xlane.xlu0 %749 }
 0x567   :  { %v760_v47 = vsub.f32 %v734_v17, %v750_v46 }
 0x568   :  { %v753_v48 = vpop.xlane.xlu1 %752 }
 0x569   :  { %v764_v51 = vmul.f32 1.442695, %v760_v47  ;;  %v761_v52 = vsub.f32 %v737_v22, %v753_v48 }
 0x56a   :  { %v756_v49 = vpop.xlane.xlu0 %755 }
 0x56b   :  { %v762_v50 = vsub.f32 %v742_v21, %v756_v49  ;;  %v766_v58 = vmul.f32 1.442695, %v761_v52 }
 0x56d   :  { %v768_v53 = vmul.f32 1.442695, %v762_v50 }
 0x56e   :  { %v759_v54 = vpop.xlane.xlu0 %758 }
 0x56f   :  { %4113 = vpow2.f32 %v768_v53  ;;  %v763_v57 = vsub.f32 %v745_v27, %v759_v54 }
 0x570   :  { %4115 = vpow2.f32 %v764_v51 }
 0x571   :  { %v770_v59 = vmul.f32 1.442695, %v763_v57 }
 0x573   :  { %4117 = vpow2.f32 %v770_v59 }
 0x574   :  { %4119 = vpow2.f32 %v766_v58 }
 0x579   :  { %v5017_v60 = vpop.eup %4113 }
 0x57a   :  { %v778_v61 = vsel %vm382_vm1, %v5017_v60, 0.0  ;;  %v5021_v62 = vpop.eup %4115 }
 0x57b   :  { %779 = vadd.xlane.f32.xlu0 %v778_v61  ;;  %v772_v0 = vsel %vm382_vm1, %v5021_v62, 0.0 }
 0x57d   :  { %v4118_v63 = vpop.eup %4117 }
 0x57e   :  { %v781_v1 = vsel %vm382_vm1, %v4118_v63, 0.0  ;;  %v4120_v2 = vpop.eup %4119 }
 0x57f   :  { %773 = vadd.xlane.f32.xlu0 %v772_v0  ;;  %782 = vadd.xlane.f32.xlu1 %v781_v1  ;;  %v775_v5 = vsel %vm382_vm1, %v4120_v2, 0.0 }
 0x583   :  { %776 = vadd.xlane.f32.xlu1 %v775_v5 }
 0x594   :  { %972 = vrot.lane.b32.xlu1 %v4961_v3, %s4537_s7 }
 0x5d9   :  { %v924_v6 = vpop.xlane.xlu0 %923 }
 0x5da   :  { %v934_v7 = vsub.f32 %v908_v34, %v924_v6 }
 0x5db   :  { %v927_v8 = vpop.xlane.xlu1 %926 }
 0x5dc   :  { %v935_v10 = vsub.f32 %v911_v38, %v927_v8  ;;  %v938_v13 = vmul.f32 1.442695, %v934_v7 }
 0x5dd   :  { %v930_v9 = vpop.xlane.xlu0 %929 }
 0x5de   :  { %v936_v11 = vsub.f32 %v916_v37, %v930_v9  ;;  %v940_v19 = vmul.f32 1.442695, %v935_v10 }
 0x5df   :  { %v933_v15 = vpop.xlane.xlu1 %932 }
 0x5e0   :  { %v942_v17 = vmul.f32 1.442695, %v936_v11  ;;  %v937_v18 = vsub.f32 %v919_v40, %v933_v15 }
 0x5e2   :  { %4121 = vpow2.f32 %v942_v17  ;;  %v944_v21 = vmul.f32 1.442695, %v937_v18 }
 0x5e3   :  { %4123 = vpow2.f32 %v938_v13 }
 0x5e4   :  { %4125 = vpow2.f32 %v944_v21 }
 0x5e5   :  { %4127 = vpow2.f32 %v940_v19 }
 0x5ec   :  { %v5029_v22 = vpop.eup %4121 }
 0x5ed   :  { %v5031_v24 = vpop.eup %4123  ;;  %v952_v26 = vsel %vm382_vm1, %v5029_v22, 0.0 }
 0x5ee   :  { %v5035_v27 = vpop.eup %4125  ;;  %953 = vadd.xlane.f32.xlu0 %v952_v26  ;;  %v946_v31 = vsel %vm382_vm1, %v5031_v24, 0.0 }
 0x5ef   :  { %v955_v28 = vsel %vm382_vm1, %v5035_v27, 0.0  ;;  %v5039_v29 = vpop.eup %4127 }
 0x5f0   :  { %956 = vadd.xlane.f32.xlu1 %v955_v28  ;;  %v949_v32 = vsel %vm382_vm1, %v5039_v29, 0.0 }
 0x5f2   :  { %947 = vadd.xlane.f32.xlu0 %v946_v31 }
 0x5f4   :  { %950 = vadd.xlane.f32.xlu1 %v949_v32 }
 0x605   :  { %1035 = vrot.lane.b32.xlu1 %v4947_v56, %s4538_s17 }
 0x608   :  { %970 = vrot.lane.b32.xlu0 %v4963_v4, %s4537_s7  ;;  %v780_v34 = vpop.xlane.xlu0 %779 }
 0x609   :  { %1037 = vrot.lane.b32.xlu1 %v4945_v55, %s4538_s17 }
 0x60c   :  { %v783_v35 = vpop.xlane.xlu1 %782  ;;  %1211 = vrot.lane.b32.xlu0 %v4947_v56, %s4539_s0  ;;  %v774_v36 = vpop.xlane.xlu0 %773 }
 0x60d   :  { %1031 = vrot.lane.b32.xlu1 %v4941_v45, %s4538_s17  ;;  %4129 = vrcp.f32 %v783_v35 }
 0x60e   :  { %4131 = vrcp.f32 %v774_v36 }
 0x60f   :  { %4133 = vrcp.f32 %v780_v34 }
 0x610   :  { %v777_v37 = vpop.xlane.xlu1 %776  ;;  %1033 = vrot.lane.b32.xlu0 %v4939_v44, %s4538_s17 }
 0x611   :  { %4135 = vrcp.f32 %v777_v37  ;;  %1213 = vrot.lane.b32.xlu1 %v4945_v55, %s4539_s0 }
 0x614   :  { %1207 = vrot.lane.b32.xlu0 %v4941_v45, %s4539_s0  ;;  %v973_v45 = vpop.permute.xlu1 %972 }
 0x615   :  { %1209 = vrot.lane.b32.xlu1 %v4939_v44, %s4539_s0 }
 0x617   :  { %v4130_v56 = vpop.eup %4129 }
 0x618   :  { %v4132_v38 = vpop.eup %4131  ;;  %v791_v41 = vmul.f32 %v4130_v56, %v4118_v63 }
 0x619   :  { %v4134_v39 = vpop.eup %4133  ;;  %v788_v42 = vmul.f32 %v4132_v38, %v5021_v62 }
 0x61a   :  { %v790_v46 = vmul.f32 %v4134_v39, %v5017_v60 }
 0x61b   :  { %v4136_v40 = vpop.eup %4135 }
 0x61c   :  { %v789_v43 = vmul.f32 %v4136_v40, %v4120_v2  ;;  %v793_v48 = vpack.c.bf16 %v791_v41, %v790_v46 }
 0x61e   :  { %v792_v47 = vpack.c.bf16 %v789_v43, %v788_v42 }
 0x620   :  { %3749 = vmatprep.mubr.msk.bf16.mxu1 %vm382_vm1, %v792_v47 }
 0x621   :  { %3750 = vmatmul.mubr.msk.bf16.vlgmr.msra.gmra.mrb[16].mxu1 %vm382_vm1, %v793_v48 }
 0x67b   :  { %v954_v55 = vpop.xlane.xlu0 %953 }
 0x67d   :  { %v957_v49 = vpop.xlane.xlu1 %956 }
 0x67e   :  { %4137 = vrcp.f32 %v957_v49 }
 0x67f   :  { %v948_v44 = vpop.xlane.xlu0 %947 }
 0x680   :  { %4139 = vrcp.f32 %v948_v44 }
 0x681   :  { %4141 = vrcp.f32 %v954_v55  ;;  %v951_v50 = vpop.xlane.xlu1 %950 }
 0x682   :  { %4143 = vrcp.f32 %v951_v50 }
 0x683   :  { %v971_v51 = vpop.permute.xlu0 %970 }
 0x684   :  { %3761 = vmatprep.subr.bf16.mxu1 %v971_v51 }
 0x685   :  { %v1036_v52 = vpop.permute.xlu1 %1035  ;;  %3762 = vmatpush3.bf16.msra.mxu1 %v971_v51 }
 0x686   :  { %3763 = vmatprep.subr.bf16.mxu1 %v973_v45  ;;  %v1046_v10 = vsel %vm686_vm2, %v1036_v52, 0 }
 0x687   :  { %v1212_v53 = vpop.permute.xlu0 %1211 }
 0x688   :  { %3968 = vmatprep.subr.msk.bf16.mxu0 %vm686_vm2, %v1212_v53  ;;  %v1222_v54 = vsel %vm686_vm2, %v1212_v53, 0  ;;  %v4138_v57 = vpop.eup %4137 }
 0x689   :  { %v1038_v58 = vpop.permute.xlu1 %1037  ;;  %3764 = vmatpush3.bf16.msra.mxu1 %v973_v45  ;;  %3786 = vmatpush3.bf16.xpose.msra.mxu0 %v1222_v54  ;;  %v965_v63 = vmul.f32 %v4138_v57, %v5035_v27 }
 0x68a   :  { %v4140_v59 = vpop.eup %4139  ;;  %3966 = vmatprep.subr.msk.bf16.mxu1 %vm686_vm2, %v1036_v52  ;;  %v1049_v15 = vsel %vm686_vm2, %v1038_v58, 0 }
 0x68b   :  { %v4142_v60 = vpop.eup %4141  ;;  %v1034_v61 = vpop.permute.xlu0 %1033  ;;  %v962_v1 = vmul.f32 %v4140_v59, %v5031_v24 }
 0x68c   :  { %v4144_v62 = vpop.eup %4143  ;;  %v964_v5 = vmul.f32 %v4142_v60, %v5029_v22 }
 0x68d   :  { %v1032_v0 = vpop.permute.xlu1 %1031  ;;  %v963_v2 = vmul.f32 %v4144_v62, %v5039_v29 }
 0x68e   :  { %v967_v8 = vpack.c.bf16 %v965_v63, %v964_v5 }
 0x68f   :  { %v1208_v6 = vpop.permute.xlu0 %1207  ;;  %v966_v7 = vpack.c.bf16 %v963_v2, %v962_v1 }
 0x690   :  { %3789 = vmatprep.mubr.msk.bf16.mxu0 %vm686_vm2, %v1208_v6 }
 0x691   :  { %v1214_v9 = vpop.permute.xlu1 %1213  ;;  %3765 = vmatprep.mubr.msk.bf16.mxu1 %vm382_vm1, %v966_v7 }
 0x692   :  { %3766 = vmatmul.mubr.msk.bf16.vlgmr.msra.gmra.mrb[20].mxu1 %vm382_vm1, %v967_v8  ;;  %3969 = vmatprep.subr.msk.bf16.mxu0 %vm686_vm2, %v1214_v9  ;;  %v1225_v11 = vsel %vm686_vm2, %v1214_v9, 0 }
 0x693   :  { %3770 = vmatpush3.bf16.xpose.msra.mxu1 %v1046_v10  ;;  %3773 = vmatprep.mubr.msk.bf16.mxu1 %vm686_vm2, %v1032_v0 }
 0x694   :  { %3967 = vmatprep.subr.msk.bf16.mxu1 %vm686_vm2, %v1038_v58  ;;  %3788 = vmatpush3.bf16.xpose.msra.mxu0 %v1225_v11 }
 0x695   :  { %v1210_v13 = vpop.permute.xlu1 %1209 }
 0x69b   :  { %3772 = vmatpush3.bf16.xpose.msra.mxu1 %v1049_v15  ;;  %3790 = vmatmul.mubr.msk.bf16.vlgmr.msra.gmra.mrb[12].mxu0 %vm686_vm2, %v1210_v13 }
 0x6a2   :  { %3774 = vmatmul.mubr.msk.bf16.vlgmr.msra.gmra.mrb[24].mxu1 %vm686_vm2, %v1034_v61 }
 0x6f4   :  { %v5085_v17 = vpop.f32.mrb[16].mxu1 }
 0x6f5   :  { %v5087_v18 = vpop.f32.mrb[17].mxu1 }
 0x6f6   :  { %v5089_v19 = vpop.f32.mrb[18].mxu1 }
 0x6f7   :  { %v5091_v21 = vpop.f32.mrb[19].mxu1 }
 0x765   :  { %v5093_v22 = vpop.f32.mrb[20].mxu1 }
 0x766   :  { %v5095_v24 = vpop.f32.mrb[21].mxu1 }
 0x767   :  { %v5097_v26 = vpop.f32.mrb[22].mxu1 }
 0x768   :  { %v4004_v27 = vpack.i.bf16 %v5097_v26, %v5093_v22  ;;  %v5101_v28 = vpop.f32.mrb[23].mxu1 }
 0x769   :  { %v3999_v29 = vpack.i.bf16 %v5101_v28, %v5095_v24 }
 0x76e   :  { %v3791_v31 = vpop.f32.mrb[12].mxu0 }
 0x76f   :  { %v1261_v32 = vpop.f32.mrb[13].mxu0  ;;  %v1270_v50 = vadd.f32 %v3791_v31, %v4989_v14 }
 0x770   :  { %v3792_v34 = vpop.f32.mrb[14].mxu0  ;;  %v1262_v49 = vadd.f32 %v1261_v32, %v4984_v12 }
 0x771   :  { %v1264_v35 = vpop.f32.mrb[15].mxu0  ;;  %v1273_v45 = vadd.f32 %v3792_v34, %v5003_v25  ;;  %v1282_v52 = vsel %vm382_vm1, %v1270_v50, -inf }
 0x772   :  { %v1265_v43 = vadd.f32 %v1264_v35, %v4994_v16  ;;  %v1276_v51 = vsel %vm382_vm1, %v1262_v49, -inf }
 0x773   :  { %v1285_v44 = vsel %vm382_vm1, %v1273_v45, -inf }
 0x774   :  { %v1279_v55 = vsel %vm382_vm1, %v1265_v43, -inf }
 0x775   :  { %v3775_v36 = vpop.f32.mrb[24].mxu1 }
 0x776   :  { %v1085_v37 = vpop.f32.mrb[25].mxu1  ;;  %v1094_v40 = vadd.f32 %v3775_v36, %v4989_v14 }
 0x777   :  { %v1086_v56 = vadd.f32 %v1085_v37, %v4984_v12  ;;  %v3776_v38 = vpop.f32.mrb[26].mxu1 }
 0x778   :  { %v1088_v39 = vpop.f32.mrb[27].mxu1  ;;  %v5115_v47 = vadd.f32 %v3776_v38, %v5003_v25  ;;  %v1106_v48 = vsel %vm382_vm1, %v1094_v40, -inf }
 0x779   :  { %v5108_v41 = vadd.f32 %v1088_v39, %v4994_v16  ;;  %v1100_v42 = vsel %vm382_vm1, %v1086_v56, -inf }
 0x77a   :  { %1101 = vmax.xlane.f32.xlu0 %v1100_v42  ;;  %v1109_v16 = vsel %vm382_vm1, %v5115_v47, -inf }
 0x77b   :  { %v1103_v46 = vsel %vm382_vm1, %v5108_v41, -inf }
 0x77c   :  { %1104 = vmax.xlane.f32.xlu1 %v1103_v46 }
 0x77e   :  { %1107 = vmax.xlane.f32.xlu0 %v1106_v48 }
 0x780   :  { %1280 = vmax.xlane.f32.xlu1 %v1279_v55 }
 0x782   :  { %1110 = vmax.xlane.f32.xlu0 %v1109_v16 }
 0x784   :  { %1286 = vmax.xlane.f32.xlu1 %v1285_v44 }
 0x786   :  { %1277 = vmax.xlane.f32.xlu0 %v1276_v51 }
 0x78a   :  { %1283 = vmax.xlane.f32.xlu0 %v1282_v52 }
 0x807   :  { %v1102_v25 = vpop.xlane.xlu0 %1101 }
 0x808   :  { %v1112_v6 = vsub.f32 %v1086_v56, %v1102_v25 }
 0x809   :  { %v1105_v53 = vpop.xlane.xlu1 %1104 }
 0x80a   :  { %v1116_v11 = vmul.f32 1.442695, %v1112_v6  ;;  %v4083_v6 = vld [vmem:[%s5619_s12] sm:$0xff]  }
 0x80b   :  { %v1108_v54 = vpop.xlane.xlu0 %1107 }
 0x80c   :  { %v1114_v14 = vsub.f32 %v1094_v40, %v1108_v54  ;;  %v1113_v40 = vsub.f32 %v5108_v41, %v1105_v53 }
 0x80d   :  { %v1281_v57 = vpop.xlane.xlu1 %1280 }
 0x80e   :  { %v1289_v12 = vsub.f32 %v1265_v43, %v1281_v57  ;;  %v1120_v7 = vmul.f32 1.442695, %v1114_v14  ;;  %v1118_v43 = vmul.f32 1.442695, %v1113_v40 }
 0x80f   :  { %v1111_v58 = vpop.xlane.xlu0 %1110 }
 0x810   :  { %v1294_v59 = vmul.f32 1.442695, %v1289_v12  ;;  %v1115_v39 = vsub.f32 %v5115_v47, %v1111_v58 }
 0x811   :  { %v1287_v60 = vpop.xlane.xlu1 %1286 }
 0x812   :  { %4145 = vpow2.f32 %v1294_v59  ;;  %v1291_v61 = vsub.f32 %v1273_v45, %v1287_v60  ;;  %v1122_v42 = vmul.f32 1.442695, %v1115_v39 }
 0x813   :  { %v1278_v62 = vpop.xlane.xlu0 %1277 }
 0x814   :  { %v1298_v63 = vmul.f32 1.442695, %v1291_v61  ;;  %v1288_v0 = vsub.f32 %v1262_v49, %v1278_v62 }
 0x816   :  { %4147 = vpow2.f32 %v1298_v63  ;;  %v1292_v1 = vmul.f32 1.442695, %v1288_v0 }
 0x817   :  { %v1284_v2 = vpop.xlane.xlu0 %1283 }
 0x818   :  { %4149 = vpow2.f32 %v1292_v1  ;;  %v1290_v5 = vsub.f32 %v1270_v50, %v1284_v2 }
 0x81a   :  { %v1296_v8 = vmul.f32 1.442695, %v1290_v5 }
 0x81c   :  { %v5127_v9 = vpop.eup %4145  ;;  %4151 = vpow2.f32 %v1296_v8 }
 0x81d   :  { %v1303_v10 = vsel %vm382_vm1, %v5127_v9, 0.0  ;;  %4153 = vpow2.f32 %v1120_v7 }
 0x81e   :  { %1304 = vadd.xlane.f32.xlu1 %v1303_v10  ;;  %4155 = vpow2.f32 %v1116_v11  ;;  %v4084_v10 = vld [vmem:[%s5619_s12 + $0x8] sm:$0xff]  }
 0x81f   :  { %4157 = vpow2.f32 %v1122_v42 }
 0x820   :  { %v5131_v13 = vpop.eup %4147  ;;  %4159 = vpow2.f32 %v1118_v43 }
 0x821   :  { %v1309_v15 = vsel %vm382_vm1, %v5131_v13, 0.0 }
 0x822   :  { %v5135_v31 = vpop.eup %4149  ;;  %1310 = vadd.xlane.f32.xlu1 %v1309_v15 }
 0x823   :  { %v1300_v32 = vsel %vm382_vm1, %v5135_v31, 0.0 }
 0x824   :  { %1301 = vadd.xlane.f32.xlu0 %v1300_v32 }
 0x826   :  { %v5139_v34 = vpop.eup %4151 }
 0x827   :  { %v1306_v35 = vsel %vm382_vm1, %v5139_v34, 0.0  ;;  %v4154_v36 = vpop.eup %4153 }
 0x828   :  { %1307 = vadd.xlane.f32.xlu0 %v1306_v35  ;;  %v1130_v37 = vsel %vm382_vm1, %v4154_v36, 0.0  ;;  %v4156_v56 = vpop.eup %4155 }
 0x829   :  { %v1124_v38 = vsel %vm382_vm1, %v4156_v56, 0.0  ;;  %v4158_v46 = vpop.eup %4157 }
 0x82a   :  { %v1133_v48 = vsel %vm382_vm1, %v4158_v46, 0.0  ;;  %v4160_v45 = vpop.eup %4159 }
 0x82b   :  { %v1127_v47 = vsel %vm382_vm1, %v4160_v45, 0.0 }
 0x82c   :  { %1131 = vadd.xlane.f32.xlu0 %v1130_v37 }
 0x830   :  { %1125 = vadd.xlane.f32.xlu0 %v1124_v38 }
 0x833   :  { %1148 = vrot.lane.b32.xlu1 %v4961_v3, %s4538_s17 }
 0x837   :  { %1322 = vrot.lane.b32.xlu1 %v4963_v4, %s4539_s0 }
 0x846   :  { %1146 = vrot.lane.b32.xlu0 %v4963_v4, %s4538_s17 }
 0x84a   :  { %4000 = vrot.lane.b32.xlu0 %v3999_v29, %s4540_s11 }
 0x85b   :  { %1134 = vadd.xlane.f32.xlu1 %v1133_v48 }
 0x85f   :  { %1128 = vadd.xlane.f32.xlu1 %v1127_v47 }
 0x870   :  { %1324 = vrot.lane.b32.xlu1 %v4961_v3, %s4539_s0 }
 0x874   :  { %4005 = vrot.lane.b32.xlu1 %v4004_v27, %s4540_s11 }
 0x8ab   :  { %v1305_v24 = vpop.xlane.xlu1 %1304 }
 0x8ac   :  { %4161 = vrcp.f32 %v1305_v24 }
 0x8af   :  { %v1311_v41 = vpop.xlane.xlu1 %1310 }
 0x8b1   :  { %v1302_v4 = vpop.xlane.xlu0 %1301 }
 0x8b2   :  { %4163 = vrcp.f32 %v1302_v4 }
 0x8b3   :  { %v1149_v49 = vpop.permute.xlu1 %1148 }
 0x8b5   :  { %v1308_v28 = vpop.xlane.xlu0 %1307 }
 0x8b6   :  { %v4162_v26 = vpop.eup %4161 }
 0x8b7   :  { %v1323_v44 = vpop.permute.xlu1 %1322  ;;  %v1317_v60 = vmul.f32 %v4162_v26, %v5127_v9 }
 0x8b9   :  { %v1132_v29 = vpop.xlane.xlu0 %1131 }
 0x8bc   :  { %v4164_v27 = vpop.eup %4163 }
 0x8bd   :  { %v1126_v55 = vpop.xlane.xlu0 %1125  ;;  %v1316_v12 = vmul.f32 %v4164_v27, %v5135_v31 }
 0x8bf   :  { %v1320_v63 = vpack.c.bf16 %v1317_v60, %v1316_v12 }
 0x8c1   :  { %v1147_v16 = vpop.permute.xlu0 %1146 }
 0x8c2   :  { %3777 = vmatprep.subr.bf16.mxu1 %v1147_v16 }
 0x8c3   :  { %3778 = vmatpush3.bf16.msra.mxu1 %v1147_v16 }
 0x8c4   :  { %3779 = vmatprep.subr.bf16.mxu1 %v1149_v49 }
 0x8c5   :  { %v4001_v38 = vpop.permute.xlu0 %4000 }
 0x8c6   :  { %v4003_v40 = vunpack.i.h.bf16 %v4001_v38  ;;  %v4002_v42 = vunpack.i.l.bf16 %v4001_v38 }
 0x8c7   :  { %3780 = vmatpush3.bf16.msra.mxu1 %v1149_v49 }
 0x8c8   :  { %3793 = vmatprep.subr.bf16.mxu1 %v1323_v44 }
 0x8e8   :  { %v1135_v3 = vpop.xlane.xlu1 %1134 }
 0x8e9   :  { %4165 = vrcp.f32 %v1135_v3 }
 0x8ea   :  { %4167 = vrcp.f32 %v1126_v55 }
 0x8eb   :  { %4169 = vrcp.f32 %v1132_v29  ;;  %v1431_v29 = vsel %vm686_vm2, %v5087_v18, %v4002_v42 }
 0x8ec   :  { %v1129_v22 = vpop.xlane.xlu1 %1128 }
 0x8ed   :  { %4171 = vrcp.f32 %v1129_v22 }
 0x8ee   :  { %4173 = vrcp.f32 %v1308_v28  ;;  %v1432_v28 = vsel %vm686_vm2, %v5091_v21, %v4003_v40 }
 0x8ef   :  { %4175 = vrcp.f32 %v1311_v41 }
 0x8f0   :  { %v1325_v14 = vpop.permute.xlu1 %1324 }
 0x8f3   :  { %v4166_v50 = vpop.eup %4165 }
 0x8f4   :  { %v4168_v51 = vpop.eup %4167  ;;  %v1143_v53 = vmul.f32 %v4166_v50, %v4158_v46 }
 0x8f5   :  { %v4170_v52 = vpop.eup %4169  ;;  %v1140_v54 = vmul.f32 %v4168_v51, %v4156_v56  ;;  %v4006_v56 = vpop.permute.xlu1 %4005 }
 0x8f6   :  { %v1142_v58 = vmul.f32 %v4170_v52, %v4154_v36  ;;  %v4008_v46 = vunpack.i.h.bf16 %v4006_v56  ;;  %v4007_v48 = vunpack.i.l.bf16 %v4006_v56 }
 0x8f7   :  { %v4172_v25 = vpop.eup %4171 }
 0x8f8   :  { %v1141_v57 = vmul.f32 %v4172_v25, %v4160_v45  ;;  %v1145_v61 = vpack.c.bf16 %v1143_v53, %v1142_v58  ;;  %v4174_v62 = vpop.eup %4173  ;;  %v1434_v55 = vsel %vm686_vm2, %v5089_v19, %v4008_v46  ;;  %v1433_v49 = vsel %vm686_vm2, %v5085_v17, %v4007_v48  ;;  %v4086_v46 = vld [vmem:[%s5623_s16 + $0x8] sm:$0xff]  }
 0x8f9   :  { %v4176_v0 = vpop.eup %4175  ;;  %v1318_v1 = vmul.f32 %v4174_v62, %v5139_v34 }
 0x8fa   :  { %v1144_v59 = vpack.c.bf16 %v1141_v57, %v1140_v54  ;;  %v1319_v2 = vmul.f32 %v4176_v0, %v5131_v13  ;;  %v3489_v54 = vld [vmem:[#allocation11] ss:$0 sm:$0xff] }
 0x8fc   :  { %3781 = vmatprep.mubr.msk.bf16.mxu1 %vm382_vm1, %v1144_v59  ;;  %v1321_v5 = vpack.c.bf16 %v1319_v2, %v1318_v1 }
 0x8fd   :  { %3782 = vmatmul.mubr.msk.bf16.vlgmr.msra.gmra.mrb[28].mxu1 %vm382_vm1, %v1145_v61 }
 0x8fe   :  { %3794 = vmatpush3.bf16.msra.mxu1 %v1323_v44  ;;  %3797 = vmatprep.mubr.msk.bf16.mxu1 %vm382_vm1, %v1320_v63 }
 0x8ff   :  { %3795 = vmatprep.subr.bf16.mxu1 %v1325_v14 }
 0x902   :  { %3796 = vmatpush3.bf16.msra.mxu1 %v1325_v14 }
 0x903   :  { %3801 = vmatprep.subr.bf16.mxu1 %v4083_v6 }
 0x905   :  { %3798 = vmatmul.mubr.msk.bf16.vlgmr.msra.gmra.mrb[32].mxu1 %vm382_vm1, %v1321_v5 }
 0x906   :  { %3802 = vmatpush3.bf16.msra.mxu1 %v4083_v6 }
 0x907   :  { %3803 = vmatprep.subr.bf16.mxu1 %v4084_v10 }
 0x90a   :  { %3804 = vmatpush3.bf16.msra.mxu1 %v4084_v10 }
 0x9d0   :  { %v3783_v7 = vpop.f32.mrb[28].mxu1 }
 0x9d1   :  { %v1192_v8 = vpop.f32.mrb[29].mxu1 }
 0x9d2   :  { %v3784_v9 = vpop.f32.mrb[30].mxu1 }
 0x9d3   :  { %v4009_v11 = vpack.i.bf16 %v3784_v9, %v3783_v7  ;;  %v1195_v15 = vpop.f32.mrb[31].mxu1 }
 0x9d4   :  { %v4014_v13 = vpack.i.bf16 %v1195_v15, %v1192_v8 }
 0x9d5   :  { %4010 = vrot.lane.b32.xlu1 %v4009_v11, %s4527_s3 }
 0x9d6   :  { %4015 = vrot.lane.b32.xlu0 %v4014_v13, %s4527_s3 }
 0x9d8   :  { %v3799_v31 = vpop.f32.mrb[32].mxu1 }
 0x9d9   :  { %v1368_v32 = vpop.f32.mrb[33].mxu1 }
 0x9da   :  { %v3800_v34 = vpop.f32.mrb[34].mxu1 }
 0x9db   :  { %v4024_v35 = vpack.i.bf16 %v3800_v34, %v3799_v31  ;;  %v1371_v36 = vpop.f32.mrb[35].mxu1 }
 0x9dc   :  { %v4019_v37 = vpack.i.bf16 %v1371_v36, %v1368_v32 }
 0x9dd   :  { %4025 = vrot.lane.b32.xlu1 %v4024_v35, %s4541_s25 }
 0x9de   :  { %4020 = vrot.lane.b32.xlu0 %v4019_v37, %s4541_s25 }
 0xa47   :  { %v4011_v39 = vpop.permute.xlu1 %4010 }
 0xa48   :  { %v4016_v43 = vpop.permute.xlu0 %4015  ;;  %v4013_v45 = vunpack.i.h.bf16 %v4011_v39  ;;  %v4012_v47 = vunpack.i.l.bf16 %v4011_v39 }
 0xa49   :  { %v4018_v4 = vunpack.i.h.bf16 %v4016_v43  ;;  %v4017_v24 = vunpack.i.l.bf16 %v4016_v43  ;;  %v4085_v43 = vld [vmem:[%s5623_s16] sm:$0xff]  }
 0xa4a   :  { %v1439_v22 = vsel %vm1435_vm3, %v1434_v55, %v4013_v45  ;;  %v1438_v26 = vsel %vm1435_vm3, %v1433_v49, %v4012_v47  ;;  %3809 = vmatprep.subr.bf16.mxu0 %v4085_v43 }
 0xa4b   :  { %v1436_v50 = vsel %vm1435_vm3, %v1431_v29, %v4017_v24  ;;  %v1437_v18 = vsel %vm1435_vm3, %v1432_v28, %v4018_v4  ;;  %3810 = vmatpush3.bf16.msra.mxu0 %v4085_v43 }
 0xa4c   :  { %3811 = vmatprep.subr.bf16.mxu0 %v4086_v46 }
 0xa4f   :  { %v4026_v41 = vpop.permute.xlu1 %4025  ;;  %3812 = vmatpush3.bf16.msra.mxu0 %v4086_v46 }
 0xa50   :  { %v4028_v16 = vunpack.i.h.bf16 %v4026_v41  ;;  %v4027_v44 = vunpack.i.l.bf16 %v4026_v41  ;;  %v4021_v3 = vpop.permute.xlu0 %4020 }
 0xa51   :  { %v4023_v27 = vunpack.i.h.bf16 %v4021_v3  ;;  %v4022_v21 = vunpack.i.l.bf16 %v4021_v3 }
 0xa52   :  { %v1444_v51 = vsel %vm1440_vm4, %v1439_v22, %v4028_v16  ;;  %v1443_v19 = vsel %vm1440_vm4, %v1438_v26, %v4027_v44  ;;  %v3494_v22 = vld [vmem:[#allocation13] ss:$0 sm:$0xff] }
 0xa53   :  { %v1446_v52 = vpack.c.bf16 %v1444_v51, %v1443_v19  ;;  %v1441_v17 = vsel %vm1440_vm4, %v1436_v50, %v4022_v21  ;;  %v1442_v25 = vsel %vm1440_vm4, %v1437_v18, %v4023_v27  ;;  %v3495_v51 = vld [vmem:[#allocation14] ss:$0 sm:$0xff] }
 0xa54   :  { %v1445_v53 = vpack.c.bf16 %v1442_v25, %v1441_v17 }
 0xa56   :  { %3805 = vmatprep.mubr.msk.bf16.mxu1 %vm382_vm1, %v1445_v53 }
 0xa57   :  { %3806 = vmatmul.mubr.msk.bf16.vlgmr.msra.gmra.mrb[36].mxu1 %vm382_vm1, %v1446_v52 }
 0xb2a   :  { %v3807_v57 = vpop.f32.mrb[36].mxu1 }
 0xb2b   :  { %v1510_v12 = vpop.f32.mrb[37].mxu1  ;;  %v1519_v58 = vadd.f32 %v3807_v57, %v3489_v54 }
 0xb2c   :  { %v1511_v59 = vadd.f32 %v3489_v54, %v1510_v12  ;;  %v3808_v60 = vpop.f32.mrb[38].mxu1 }
 0xb2d   :  { %v1513_v61 = vpop.f32.mrb[39].mxu1  ;;  %v5205_v0 = vadd.f32 %v1519_v58, %v4899_v30  ;;  %v1522_v14 = vadd.f32 %v3808_v60, %v3489_v54 }
 0xb2e   :  { %v5202_v62 = vadd.f32 %v1511_v59, %v4885_v20  ;;  %v1514_v63 = vadd.f32 %v3489_v54, %v1513_v61 }
 0xb2f   :  { %v5215_v6 = vadd.f32 %v1522_v14, %v4901_v33  ;;  %v1537_v20 = vsel %vm382_vm1, %v5205_v0, 0.0  ;;  %v4088_v14 = vld [vmem:[%s5625_s18 + $0x8] sm:$0xff]  }
 0xb30   :  { %v5208_v1 = vadd.f32 %v1514_v63, %v4887_v23  ;;  %v1531_v2 = vsel %vm382_vm1, %v5202_v62, 0.0  ;;  %v4087_v63 = vld [vmem:[%s5625_s18] sm:$0xff]  }
 0xb31   :  { %1532 = vadd.xlane.f32.xlu0 %v1531_v2  ;;  %v1540_v30 = vsel %vm382_vm1, %v5215_v6, 0.0  ;;  %3817 = vmatprep.subr.bf16.mxu1 %v4087_v63  ;;  %v4089_v2 = vld [vmem:[%s5625_s18 + $0x10] sm:$0xff]  }
 0xb32   :  { %v1534_v5 = vsel %vm382_vm1, %v5208_v1, 0.0  ;;  %3818 = vmatpush3.bf16.msra.mxu1 %v4087_v63 }
 0xb33   :  { %1535 = vadd.xlane.f32.xlu1 %v1534_v5  ;;  %3819 = vmatprep.subr.bf16.mxu1 %v4088_v14  ;;  %v4090_v5 = vld [vmem:[%s5625_s18 + $0x18] sm:$0xff]  }
 0xb35   :  { %1538 = vadd.xlane.f32.xlu0 %v1537_v20  ;;  %v3496_v20 = vld [vmem:[#allocation16] ss:$0 sm:$0xff] }
 0xb36   :  { %3820 = vmatpush3.bf16.msra.mxu1 %v4088_v14 }
 0xb37   :  { %3821 = vmatprep.subr.bf16.mxu1 %v4089_v2 }
 0xb39   :  { %1541 = vadd.xlane.f32.xlu0 %v1540_v30 }
 0xb3a   :  { %3822 = vmatpush3.bf16.msra.mxu1 %v4089_v2 }
 0xb3b   :  { %3823 = vmatprep.subr.bf16.mxu1 %v4090_v5 }
 0xb3e   :  { %3824 = vmatpush3.bf16.msra.mxu1 %v4090_v5 }
 0xbbe   :  { %v1533_v23 = vpop.xlane.xlu0 %1532 }
 0xbbf   :  { %v1543_v7 = vmul.f32 0.03125, %v1533_v23 }
 0xbc0   :  { %v1536_v8 = vpop.xlane.xlu1 %1535 }
 0xbc1   :  { %v1547_v9 = vsub.f32 %v5202_v62, %v1543_v7  ;;  %v1544_v10 = vmul.f32 0.03125, %v1536_v8 }
 0xbc2   :  { %v1539_v11 = vpop.xlane.xlu0 %1538 }
 0xbc3   :  { %v1548_v15 = vsub.f32 %v5208_v1, %v1544_v10  ;;  %v1545_v13 = vmul.f32 0.03125, %v1539_v11  ;;  %v1551_v33 = vmul.f32 %v1547_v9, %v1547_v9 }
 0xbc5   :  { %v1549_v31 = vsub.f32 %v5205_v0, %v1545_v13  ;;  %v1555_v32 = vsel %vm382_vm1, %v1551_v33, 0.0  ;;  %v1552_v34 = vmul.f32 %v1548_v15, %v1548_v15 }
 0xbc6   :  { %1556 = vadd.xlane.f32.xlu0 %v1555_v32  ;;  %v1542_v35 = vpop.xlane.xlu0 %1541 }
 0xbc7   :  { %v1546_v36 = vmul.f32 0.03125, %v1542_v35  ;;  %v1558_v37 = vsel %vm382_vm1, %v1552_v34, 0.0  ;;  %v1553_v56 = vmul.f32 %v1549_v31, %v1549_v31 }
 0xbc8   :  { %1559 = vadd.xlane.f32.xlu1 %v1558_v37 }
 0xbc9   :  { %v1550_v38 = vsub.f32 %v5215_v6, %v1546_v36  ;;  %v1561_v39 = vsel %vm382_vm1, %v1553_v56, 0.0 }
 0xbca   :  { %1562 = vadd.xlane.f32.xlu0 %v1561_v39 }
 0xbcb   :  { %v1554_v40 = vmul.f32 %v1550_v38, %v1550_v38 }
 0xbcd   :  { %v1564_v42 = vsel %vm382_vm1, %v1554_v40, 0.0 }
 0xbce   :  { %1565 = vadd.xlane.f32.xlu1 %v1564_v42 }
 0xc53   :  { %v1557_v48 = vpop.xlane.xlu0 %1556 }
 0xc54   :  { %v1567_v45 = vmul.f32 0.03125, %v1557_v48 }
 0xc55   :  { %v1560_v47 = vpop.xlane.xlu1 %1559 }
 0xc56   :  { %v1571_v4 = vadd.f32 1e-06, %v1567_v45  ;;  %v1568_v24 = vmul.f32 0.03125, %v1560_v47 }
 0xc57   :  { %v1563_v28 = vpop.xlane.xlu0 %1562 }
 0xc58   :  { %4177 = vrsqrt.f32 %v1571_v4  ;;  %v1572_v29 = vadd.f32 1e-06, %v1568_v24  ;;  %v1569_v41 = vmul.f32 0.03125, %v1563_v28 }
 0xc5a   :  { %4179 = vrsqrt.f32 %v1572_v29  ;;  %v1573_v55 = vadd.f32 1e-06, %v1569_v41 }
 0xc5b   :  { %v1566_v49 = vpop.xlane.xlu1 %1565 }
 0xc5c   :  { %4181 = vrsqrt.f32 %v1573_v55  ;;  %v1570_v16 = vmul.f32 0.03125, %v1566_v49 }
 0xc5e   :  { %v1574_v44 = vadd.f32 1e-06, %v1570_v16 }
 0xc60   :  { %4183 = vrsqrt.f32 %v1574_v44 }
 0xc62   :  { %v4178_v3 = vpop.eup %4177 }
 0xc63   :  { %v1579_v26 = vmul.f32 %v4178_v3, %v1547_v9 }
 0xc64   :  { %v4180_v27 = vpop.eup %4179 }
 0xc65   :  { %v1580_v21 = vmul.f32 %v4180_v27, %v1548_v15  ;;  %v1589_v50 = vmul.f32 %v3494_v22, %v1579_v26 }
 0xc66   :  { %v4182_v18 = vpop.eup %4181 }
 0xc67   :  { %v1581_v19 = vmul.f32 %v4182_v18, %v1549_v31  ;;  %v1590_v52 = vmul.f32 %v3494_v22, %v1580_v21  ;;  %v1599_v17 = vadd.f32 %v3495_v51, %v1589_v50 }
 0xc69   :  { %v1600_v25 = vadd.f32 %v3495_v51, %v1590_v52  ;;  %v1591_v54 = vmul.f32 %v3494_v22, %v1581_v19 }
 0xc6a   :  { %v4184_v53 = vpop.eup %4183 }
 0xc6b   :  { %v1582_v57 = vmul.f32 %v4184_v53, %v1550_v38  ;;  %v1603_v12 = vpack.c.bf16 %v1600_v25, %v1599_v17  ;;  %v1601_v59 = vadd.f32 %v3495_v51, %v1591_v54  ;;  %v3501_v25 = vld [vmem:[%s5626_s19] ss:$0 sm:$0xff] }
 0xc6d   :  { %v1592_v58 = vmul.f32 %v3494_v22, %v1582_v57  ;;  %3813 = vmatprep.mubr.msk.bf16.mxu0 %vm382_vm1, %v1603_v12 }
 0xc6f   :  { %v1602_v60 = vadd.f32 %v3495_v51, %v1592_v58 }
 0xc71   :  { %v1604_v61 = vpack.c.bf16 %v1602_v60, %v1601_v59 }
 0xc73   :  { %3814 = vmatmul.mubr.msk.bf16.vlgmr.msra.gmra.mrb[16].mxu0 %vm382_vm1, %v1604_v61 }
 0xd46   :  { %v3815_v30 = vpop.f32.mrb[16].mxu0 }
 0xd47   :  { %v1677_v23 = vadd.f32 %v3815_v30, %v3496_v20  ;;  %v1668_v7 = vpop.f32.mrb[17].mxu0 }
 0xd48   :  { %v1669_v8 = vadd.f32 %v3496_v20, %v1668_v7  ;;  %v3816_v9 = vpop.f32.mrb[18].mxu0 }
 0xd49   :  { %v1685_v10 = vmul.f32 %v1677_v23, %v1677_v23  ;;  %v1680_v11 = vadd.f32 %v3816_v9, %v3496_v20  ;;  %v1671_v15 = vpop.f32.mrb[19].mxu0 }
 0xd4a   :  { %v1683_v13 = vmul.f32 %v1669_v8, %v1669_v8  ;;  %v1672_v33 = vadd.f32 %v3496_v20, %v1671_v15 }
 0xd4b   :  { %v1689_v31 = vmul.f32 %v1685_v10, %v1677_v23  ;;  %v1686_v32 = vmul.f32 %v1680_v11, %v1680_v11 }
 0xd4c   :  { %v1687_v34 = vmul.f32 %v1683_v13, %v1669_v8  ;;  %v1684_v35 = vmul.f32 %v1672_v33, %v1672_v33 }
 0xd4d   :  { %v1693_v36 = vmul.f32 0.044715, %v1689_v31  ;;  %v1690_v37 = vmul.f32 %v1686_v32, %v1680_v11 }
 0xd4e   :  { %v1691_v56 = vmul.f32 0.044715, %v1687_v34  ;;  %v1688_v38 = vmul.f32 %v1684_v35, %v1672_v33 }
 0xd4f   :  { %v1697_v39 = vadd.f32 %v1693_v36, %v1677_v23  ;;  %v1694_v40 = vmul.f32 0.044715, %v1690_v37 }
 0xd50   :  { %v1695_v42 = vadd.f32 %v1691_v56, %v1669_v8  ;;  %v1692_v43 = vmul.f32 0.044715, %v1688_v38 }
 0xd51   :  { %v1701_v46 = vmul.f32 0.7978846, %v1697_v39  ;;  %v1698_v48 = vadd.f32 %v1694_v40, %v1680_v11  ;;  %v4091_v40 = vld [vmem:[%s5655_s24 + $0x10] sm:$0xff]  }
 0xd52   :  { %v1699_v45 = vmul.f32 0.7978846, %v1695_v42  ;;  %v1696_v47 = vadd.f32 %v1692_v43, %v1672_v33  ;;  %v4092_v42 = vld [vmem:[%s5617_s10 + $0x10] sm:$0xff]   ;;  %3829 = vmatprep.subr.bf16.mxu0 %v4091_v40  ;;  %v4093_v43 = vld [vmem:[%s5655_s24 + $0x18] sm:$0xff]  }
 0xd53   :  { %4185 = vtanh.f32 %v1701_v46  ;;  %v1702_v4 = vmul.f32 0.7978846, %v1698_v48  ;;  %3845 = vmatprep.subr.bf16.mxu1 %v4092_v42  ;;  %3830 = vmatpush3.bf16.msra.mxu0 %v4091_v40  ;;  %v4094_v46 = vld [vmem:[%s5617_s10 + $0x18] sm:$0xff]   ;;  %v4095_v48 = vld [vmem:[%s5615_s8 + $0x10] sm:$0xff]  }
 0xd54   :  { %4187 = vtanh.f32 %v1699_v45  ;;  %v1700_v24 = vmul.f32 0.7978846, %v1696_v47  ;;  %3831 = vmatprep.subr.bf16.mxu0 %v4093_v43 }
 0xd55   :  { %4189 = vtanh.f32 %v1702_v4 }
 0xd56   :  { %4191 = vtanh.f32 %v1700_v24 }
 0xd57   :  { %3832 = vmatpush3.bf16.msra.mxu0 %v4093_v43 }
 0xd58   :  { %3837 = vmatprep.subr.bf16.mxu0 %v4095_v48 }
 0xd5d   :  { %v4186_v28 = vpop.eup %4185 }
 0xd5e   :  { %v4188_v29 = vpop.eup %4187  ;;  %v1709_v41 = vadd.f32 1.0, %v4186_v28 }
 0xd5f   :  { %v4190_v55 = vpop.eup %4189  ;;  %v1707_v49 = vadd.f32 1.0, %v4188_v29 }
 0xd60   :  { %v4192_v16 = vpop.eup %4191  ;;  %v1713_v44 = vmul.f32 0.5, %v1709_v41  ;;  %v1710_v3 = vadd.f32 1.0, %v4190_v55 }
 0xd61   :  { %v1711_v22 = vmul.f32 0.5, %v1707_v49  ;;  %v1708_v26 = vadd.f32 1.0, %v4192_v16 }
 0xd62   :  { %v1714_v27 = vmul.f32 0.5, %v1710_v3  ;;  %v1717_v50 = vmul.f32 %v1713_v44, %v1677_v23 }
 0xd63   :  { %v1712_v21 = vmul.f32 0.5, %v1708_v26  ;;  %v1715_v51 = vmul.f32 %v1711_v22, %v1669_v8  ;;  %v3508_v26 = vld [vmem:[#allocation2 + $0x1] ss:$0 sm:$0xff] }
 0xd64   :  { %v1718_v18 = vmul.f32 %v1714_v27, %v1680_v11 }
 0xd65   :  { %v1716_v19 = vmul.f32 %v1712_v21, %v1672_v33 }
 0xd66   :  { %v1720_v52 = vpack.c.bf16 %v1718_v18, %v1717_v50 }
 0xd67   :  { %v1719_v17 = vpack.c.bf16 %v1716_v19, %v1715_v51  ;;  %v3509_v19 = vld [vmem:[#allocation5 + $0x1] ss:$0 sm:$0xff] }
 0xd69   :  { %3825 = vmatprep.mubr.msk.bf16.mxu1 %vm320_vm0, %v1719_v17 }
 0xd6a   :  { %3826 = vmatmul.mubr.msk.bf16.vlgmr.msra.gmra.mrb[40].mxu1 %vm320_vm0, %v1720_v52 }
 0xd6b   :  { %3846 = vmatpush3.bf16.msra.mxu1 %v4092_v42  ;;  %v3523_v42 = vld [vmem:[#allocation8 + $0x1] ss:$0 sm:$0xff] }
 0xd6c   :  { %3847 = vmatprep.subr.bf16.mxu1 %v4094_v46 }
 0xd6f   :  { %3848 = vmatpush3.bf16.msra.mxu1 %v4094_v46 }
 0xe3d   :  { %v3827_v53 = vpop.f32.mrb[40].mxu1 }
 0xe3e   :  { %v1800_v54 = vpop.f32.mrb[41].mxu1  ;;  %v1809_v57 = vadd.f32 %v3827_v53, %v3501_v25 }
 0xe3f   :  { %v1801_v12 = vadd.f32 %v3501_v25, %v1800_v54  ;;  %v3828_v58 = vpop.f32.mrb[42].mxu1 }
 0xe40   :  { %v1803_v59 = vpop.f32.mrb[43].mxu1  ;;  %v1812_v61 = vadd.f32 %v3828_v58, %v3501_v25  ;;  %v5258_v14 = vadd.f32 %v1809_v57, %v5205_v0 }
 0xe41   :  { %v5255_v60 = vadd.f32 %v1801_v12, %v5202_v62  ;;  %v1804_v63 = vadd.f32 %v3501_v25, %v1803_v59 }
 0xe42   :  { %v5266_v20 = vadd.f32 %v1812_v61, %v5215_v6  ;;  %v1829_v62 = vsel %vm382_vm1, %v5258_v14, 0.0 }
 0xe43   :  { %v5261_v2 = vadd.f32 %v1804_v63, %v5208_v1  ;;  %v1823_v5 = vsel %vm382_vm1, %v5255_v60, 0.0 }
 0xe44   :  { %1824 = vadd.xlane.f32.xlu0 %v1823_v5  ;;  %v1832_v0 = vsel %vm382_vm1, %v5266_v20, 0.0 }
 0xe45   :  { %v1826_v30 = vsel %vm382_vm1, %v5261_v2, 0.0 }
 0xe46   :  { %1827 = vadd.xlane.f32.xlu1 %v1826_v30  ;;  %v4096_v30 = vld [vmem:[%s5615_s8 + $0x18] sm:$0xff]  }
 0xe48   :  { %1830 = vadd.xlane.f32.xlu0 %v1829_v62 }
 0xe4a   :  { %1833 = vadd.xlane.f32.xlu1 %v1832_v0  ;;  %v3514_v0 = vld [vmem:[#allocation7 + $0x1] ss:$0 sm:$0xff] }
 0xed1   :  { %v1825_v1 = vpop.xlane.xlu0 %1824 }
 0xed2   :  { %v1835_v23 = vmul.f32 0.03125, %v1825_v1 }
 0xed3   :  { %v1828_v7 = vpop.xlane.xlu1 %1827 }
 0xed4   :  { %v1839_v8 = vsub.f32 %v5255_v60, %v1835_v23  ;;  %v1836_v9 = vmul.f32 0.03125, %v1828_v7  ;;  %v3532_v23 = vld [vmem:[#allocation10 + $0x1] ss:$0 sm:$0xff] }
 0xed5   :  { %v1831_v6 = vpop.xlane.xlu0 %1830 }
 0xed6   :  { %v1840_v10 = vsub.f32 %v5261_v2, %v1836_v9  ;;  %v1837_v11 = vmul.f32 0.03125, %v1831_v6  ;;  %v1843_v15 = vmul.f32 %v1839_v8, %v1839_v8 }
 0xed7   :  { %v1834_v13 = vpop.xlane.xlu1 %1833 }
 0xed8   :  { %v1841_v33 = vsub.f32 %v5258_v14, %v1837_v11  ;;  %v1838_v31 = vmul.f32 0.03125, %v1834_v13  ;;  %v1847_v32 = vsel %vm382_vm1, %v1843_v15, 0.0  ;;  %v1844_v34 = vmul.f32 %v1840_v10, %v1840_v10 }
 0xed9   :  { %1848 = vadd.xlane.f32.xlu0 %v1847_v32 }
 0xeda   :  { %v1842_v35 = vsub.f32 %v5266_v20, %v1838_v31  ;;  %v1850_v36 = vsel %vm382_vm1, %v1844_v34, 0.0  ;;  %v1845_v37 = vmul.f32 %v1841_v33, %v1841_v33 }
 0xedb   :  { %1851 = vadd.xlane.f32.xlu1 %v1850_v36 }
 0xedc   :  { %v1853_v56 = vsel %vm382_vm1, %v1845_v37, 0.0  ;;  %v1846_v38 = vmul.f32 %v1842_v35, %v1842_v35 }
 0xedd   :  { %1854 = vadd.xlane.f32.xlu0 %v1853_v56 }
 0xede   :  { %v1856_v39 = vsel %vm382_vm1, %v1846_v38, 0.0 }
 0xedf   :  { %1857 = vadd.xlane.f32.xlu1 %v1856_v39 }
 0xf66   :  { %v1849_v45 = vpop.xlane.xlu0 %1848 }
 0xf67   :  { %v1859_v47 = vmul.f32 0.03125, %v1849_v45 }
 0xf68   :  { %v1852_v4 = vpop.xlane.xlu1 %1851 }
 0xf69   :  { %v1863_v24 = vadd.f32 1e-06, %v1859_v47  ;;  %v1860_v28 = vmul.f32 0.03125, %v1852_v4 }
 0xf6a   :  { %v1855_v29 = vpop.xlane.xlu0 %1854 }
 0xf6b   :  { %4193 = vrsqrt.f32 %v1863_v24  ;;  %v1864_v41 = vadd.f32 1e-06, %v1860_v28  ;;  %v1861_v55 = vmul.f32 0.03125, %v1855_v29 }
 0xf6c   :  { %v1858_v49 = vpop.xlane.xlu1 %1857 }
 0xf6d   :  { %4195 = vrsqrt.f32 %v1864_v41  ;;  %v1865_v16 = vadd.f32 1e-06, %v1861_v55  ;;  %v1862_v44 = vmul.f32 0.03125, %v1858_v49 }
 0xf6f   :  { %4197 = vrsqrt.f32 %v1865_v16  ;;  %v1866_v3 = vadd.f32 1e-06, %v1862_v44  ;;  %v5337_v44 = vld [vmem:[%s5656_s4] sm:$0xff] }
 0xf71   :  { %4199 = vrsqrt.f32 %v1866_v3 }
 0xf75   :  { %v4194_v22 = vpop.eup %4193 }
 0xf76   :  { %v1871_v27 = vmul.f32 %v4194_v22, %v1839_v8 }
 0xf77   :  { %v4196_v21 = vpop.eup %4195 }
 0xf78   :  { %v1872_v50 = vmul.f32 %v4196_v21, %v1840_v10  ;;  %v1881_v18 = vmul.f32 %v3508_v26, %v1871_v27  ;;  %v5343_v27 = vld [vmem:[%s5656_s4 + $0x10] sm:$0xff] }
 0xf79   :  { %v4198_v51 = vpop.eup %4197 }
 0xf7a   :  { %v1873_v52 = vmul.f32 %v4198_v51, %v1841_v33  ;;  %v1882_v17 = vmul.f32 %v3508_v26, %v1872_v50  ;;  %v1891_v57 = vadd.f32 %v3509_v19, %v1881_v18  ;;  %v5349_v50 = vld [vmem:[%s5656_s4 + $0x8] sm:$0xff] }
 0xf7b   :  { %v4200_v25 = vpop.eup %4199 }
 0xf7c   :  { %v1883_v53 = vmul.f32 %v3508_v26, %v1873_v52  ;;  %v1874_v54 = vmul.f32 %v4200_v25, %v1842_v35  ;;  %v1892_v12 = vadd.f32 %v3509_v19, %v1882_v17 }
 0xf7e   :  { %v1884_v58 = vmul.f32 %v3508_v26, %v1874_v54  ;;  %v1895_v59 = vpack.c.bf16 %v1892_v12, %v1891_v57  ;;  %v1893_v61 = vadd.f32 %v3509_v19, %v1883_v53 }
 0xf80   :  { %3833 = vmatprep.mubr.msk.bf16.mxu0 %vm382_vm1, %v1895_v59  ;;  %3849 = vmatprep.mubr.msk.bf16.mxu1 %vm382_vm1, %v1895_v59  ;;  %v1894_v63 = vadd.f32 %v3509_v19, %v1884_v58  ;;  %v5356_v19 = vld [vmem:[%s5656_s4 + $0x18] sm:$0xff] }
 0xf82   :  { %v1896_v5 = vpack.c.bf16 %v1894_v63, %v1893_v61 }
 0xf84   :  { %3834 = vmatmul.mubr.msk.bf16.vlgmr.msra.gmra.mrb[20].mxu0 %vm382_vm1, %v1896_v5  ;;  %3850 = vmatmul.mubr.msk.bf16.vlgmr.msra.gmra.mrb[44].mxu1 %vm382_vm1, %v1896_v5 }
 0xf85   :  { %3838 = vmatpush3.bf16.msra.mxu0 %v4095_v48  ;;  %3841 = vmatprep.mubr.msk.bf16.mxu0 %vm382_vm1, %v1895_v59 }
 0xf86   :  { %3839 = vmatprep.subr.bf16.mxu0 %v4096_v30 }
 0xf89   :  { %3840 = vmatpush3.bf16.msra.mxu0 %v4096_v30 }
 0xf8c   :  { %3842 = vmatmul.mubr.msk.bf16.vlgmr.msra.gmra.mrb[24].mxu0 %vm382_vm1, %v1896_v5 }
0x1057   :  { %v3835_v62 = vpop.f32.mrb[20].mxu0  ;;  %v3851_v1 = vpop.f32.mrb[44].mxu1 }
0x1058   :  { %v1962_v7 = vpop.f32.mrb[21].mxu0  ;;  %v2110_v8 = vpop.f32.mrb[45].mxu1  ;;  %v1971_v10 = vadd.f32 %v3835_v62, %v3514_v0  ;;  %v2119_v11 = vadd.f32 %v3851_v1, %v3532_v23 }
0x1059   :  { %v3836_v9 = vpop.f32.mrb[22].mxu0  ;;  %v3852_v6 = vpop.f32.mrb[46].mxu1  ;;  %v1963_v32 = vadd.f32 %v3514_v0, %v1962_v7  ;;  %v2111_v34 = vadd.f32 %v3532_v23, %v2110_v8 }
0x105a   :  { %v1974_v15 = vadd.f32 %v3836_v9, %v3514_v0  ;;  %v2122_v13 = vadd.f32 %v3852_v6, %v3532_v23  ;;  %v1965_v33 = vpop.f32.mrb[23].mxu0  ;;  %v2113_v31 = vpop.f32.mrb[47].mxu1 }
0x105b   :  { %v1966_v35 = vadd.f32 %v3514_v0, %v1965_v33  ;;  %v2114_v36 = vadd.f32 %v3532_v23, %v2113_v31 }
0x105c   :  { %v5306_v37 = vpack.c.bf16 %v1974_v15, %v1971_v10  ;;  %v5308_v56 = vpack.c.bf16 %v2122_v13, %v2119_v11 }
0x105d   :  { %v5310_v38 = vpack.c.bf16 %v1966_v35, %v1963_v32  ;;  %v5312_v39 = vpack.c.bf16 %v2114_v36, %v2111_v34 }
0x105f   :  { %v3843_v40 = vpop.f32.mrb[24].mxu0  ;;  %3857 = vmatprep.mubr.msk.bf16.mxu0 %vm686_vm2, %v5310_v38  ;;  %3861 = vmatprep.subr.bf16.mxu1 %v5312_v39 }
0x1060   :  { %v2036_v43 = vpop.f32.mrb[25].mxu0  ;;  %3862 = vmatpush3.bf16.msra.mxu1 %v5312_v39  ;;  %v2045_v48 = vadd.f32 %v3843_v40, %v3523_v42 }
0x1061   :  { %v3844_v46 = vpop.f32.mrb[26].mxu0  ;;  %3863 = vmatprep.subr.bf16.mxu1 %v5308_v56  ;;  %v2037_v4 = vadd.f32 %v3523_v42, %v2036_v43 }
0x1062   :  { %v2048_v45 = vadd.f32 %v3844_v46, %v3523_v42  ;;  %v2039_v47 = vpop.f32.mrb[27].mxu0 }
0x1063   :  { %v2040_v24 = vadd.f32 %v3523_v42, %v2039_v47 }
0x1064   :  { %v5319_v28 = vpack.c.bf16 %v2048_v45, %v2045_v48  ;;  %3864 = vmatpush3.bf16.msra.mxu1 %v5308_v56 }
0x1065   :  { %v5322_v29 = vpack.c.bf16 %v2040_v24, %v2037_v4 }
0x1066   :  { %v2141_v55 = vsel %vm686_vm2, %v5319_v28, 0 }
0x1067   :  { %3970 = vmatprep.subr.msk.bf16.mxu0 %vm686_vm2, %v5322_v29  ;;  %v2138_v41 = vsel %vm686_vm2, %v5322_v29, 0 }
0x1068   :  { %3854 = vmatpush3.bf16.xpose.msra.mxu0 %v2138_v41 }
0x1069   :  { %3971 = vmatprep.subr.msk.bf16.mxu0 %vm686_vm2, %v5319_v28 }
0x1070   :  { %3856 = vmatpush3.bf16.xpose.msra.mxu0 %v2141_v55 }
0x1077   :  { %3858 = vmatmul.mubr.msk.bf16.vlgmr.msra.gmra.mrb[28].mxu0 %vm686_vm2, %v5306_v37 }
0x114a   :  { %v3859_v49 = vpop.f32.mrb[28].mxu0 }
0x114b   :  { %v2177_v16 = vpop.f32.mrb[29].mxu0  ;;  %v2186_v21 = vadd.f32 %v5343_v27, %v3859_v49 }
0x114c   :  { %v2178_v3 = vadd.f32 %v5337_v44, %v2177_v16  ;;  %v3860_v22 = vpop.f32.mrb[30].mxu0 }
0x114d   :  { %v2180_v26 = vpop.f32.mrb[31].mxu0  ;;  %v2189_v52 = vadd.f32 %v5356_v19, %v3860_v22  ;;  %v2198_v25 = vsel %vm382_vm1, %v2186_v21, -inf }
0x114e   :  { %v2181_v18 = vadd.f32 %v5349_v50, %v2180_v26  ;;  %v2192_v51 = vsel %vm382_vm1, %v2178_v3, -inf }
0x114f   :  { %2193 = vmax.xlane.f32.xlu0 %v2192_v51  ;;  %v2201_v53 = vsel %vm382_vm1, %v2189_v52, -inf }
0x1150   :  { %v2195_v17 = vsel %vm382_vm1, %v2181_v18, -inf }
0x1151   :  { %2196 = vmax.xlane.f32.xlu1 %v2195_v17 }
0x1153   :  { %2199 = vmax.xlane.f32.xlu0 %v2198_v25 }
0x1155   :  { %2202 = vmax.xlane.f32.xlu1 %v2201_v53 }
0x11dc   :  { %v2194_v54 = vpop.xlane.xlu0 %2193 }
0x11dd   :  { %v2204_v57 = vsub.f32 %v2178_v3, %v2194_v54 }
0x11de   :  { %v2197_v12 = vpop.xlane.xlu1 %2196 }
0x11df   :  { %v2205_v58 = vsub.f32 %v2181_v18, %v2197_v12  ;;  %v2208_v5 = vmul.f32 1.442695, %v2204_v57 }
0x11e0   :  { %v2200_v59 = vpop.xlane.xlu0 %2199 }
0x11e1   :  { %v2210_v61 = vmul.f32 1.442695, %v2205_v58  ;;  %v2206_v63 = vsub.f32 %v2186_v21, %v2200_v59 }
0x11e2   :  { %v2203_v30 = vpop.xlane.xlu1 %2202 }
0x11e3   :  { %4201 = vpow2.f32 %v2210_v61  ;;  %v2212_v62 = vmul.f32 1.442695, %v2206_v63  ;;  %v2207_v0 = vsub.f32 %v2189_v52, %v2203_v30 }
0x11e5   :  { %4203 = vpow2.f32 %v2212_v62  ;;  %v2214_v1 = vmul.f32 1.442695, %v2207_v0 }
0x11e6   :  { %4205 = vpow2.f32 %v2208_v5 }
0x11e7   :  { %4207 = vpow2.f32 %v2214_v1 }
0x11ed   :  { %v4202_v23 = vpop.eup %4201 }
0x11ee   :  { %v2219_v7 = vsel %vm382_vm1, %v4202_v23, 0.0 }
0x11ef   :  { %v4204_v8 = vpop.eup %4203  ;;  %2220 = vadd.xlane.f32.xlu1 %v2219_v7 }
0x11f0   :  { %v4206_v9 = vpop.eup %4205  ;;  %v2222_v6 = vsel %vm382_vm1, %v4204_v8, 0.0 }
0x11f1   :  { %v4208_v10 = vpop.eup %4207  ;;  %2223 = vadd.xlane.f32.xlu0 %v2222_v6  ;;  %v2216_v15 = vsel %vm382_vm1, %v4206_v9, 0.0 }
0x11f2   :  { %v2225_v11 = vsel %vm382_vm1, %v4208_v10, 0.0 }
0x11f3   :  { %2226 = vadd.xlane.f32.xlu1 %v2225_v11 }
0x11f5   :  { %2217 = vadd.xlane.f32.xlu0 %v2216_v15 }
0x1204   :  { %2303 = vrot.lane.b32.xlu1 %v5319_v28, %s4537_s7 }
0x1208   :  { %2295 = vrot.lane.b32.xlu1 %v5310_v38, %s4537_s7 }
0x120b   :  { %2301 = vrot.lane.b32.xlu0 %v5322_v29, %s4537_s7 }
0x120c   :  { %2297 = vrot.lane.b32.xlu1 %v5306_v37, %s4537_s7 }
0x127c   :  { %v2221_v13 = vpop.xlane.xlu1 %2220 }
0x127d   :  { %4209 = vrcp.f32 %v2221_v13 }
0x127e   :  { %v2224_v33 = vpop.xlane.xlu0 %2223 }
0x1280   :  { %v2227_v31 = vpop.xlane.xlu1 %2226 }
0x1281   :  { %4211 = vrcp.f32 %v2227_v31 }
0x1282   :  { %4213 = vrcp.f32 %v2224_v33  ;;  %v2218_v32 = vpop.xlane.xlu0 %2217 }
0x1283   :  { %4215 = vrcp.f32 %v2218_v32 }
0x1284   :  { %v2304_v46 = vpop.permute.xlu1 %2303 }
0x1285   :  { %v2315_v49 = vsel %vm686_vm2, %v2304_v46, 0 }
0x1286   :  { %v2302_v34 = vpop.permute.xlu0 %2301 }
0x1287   :  { %3972 = vmatprep.subr.msk.bf16.mxu1 %vm686_vm2, %v2302_v34  ;;  %v4210_v35 = vpop.eup %4209  ;;  %v2312_v41 = vsel %vm686_vm2, %v2302_v34, 0 }
0x1288   :  { %v2233_v45 = vmul.f32 %v4210_v35, %v4202_v23  ;;  %v2296_v55 = vpop.permute.xlu1 %2295 }
0x128b   :  { %v4212_v36 = vpop.eup %4211 }
0x128c   :  { %v4214_v40 = vpop.eup %4213  ;;  %v2235_v43 = vmul.f32 %v4212_v36, %v4208_v10  ;;  %v2298_v16 = vpop.permute.xlu1 %2297 }
0x128d   :  { %v4216_v42 = vpop.eup %4215  ;;  %v2234_v47 = vmul.f32 %v4214_v40, %v4204_v8 }
0x128e   :  { %v2232_v48 = vmul.f32 %v4216_v42, %v4206_v9 }
0x128f   :  { %v2237_v24 = vpack.c.bf16 %v2235_v43, %v2234_v47 }
0x1290   :  { %v2236_v4 = vpack.c.bf16 %v2233_v45, %v2232_v48 }
0x1292   :  { %3865 = vmatprep.mubr.msk.bf16.mxu1 %vm382_vm1, %v2236_v4 }
0x1293   :  { %3866 = vmatmul.mubr.msk.bf16.vlgmr.msra.gmra.mrb[48].mxu1 %vm382_vm1, %v2237_v24 }
0x1294   :  { %3870 = vmatpush3.bf16.xpose.msra.mxu1 %v2312_v41  ;;  %3873 = vmatprep.mubr.msk.bf16.mxu1 %vm686_vm2, %v2296_v55 }
0x1295   :  { %3973 = vmatprep.subr.msk.bf16.mxu1 %vm686_vm2, %v2304_v46 }
0x129c   :  { %3872 = vmatpush3.bf16.xpose.msra.mxu1 %v2315_v49 }
0x12a3   :  { %3874 = vmatmul.mubr.msk.bf16.vlgmr.msra.gmra.mrb[52].mxu1 %vm686_vm2, %v2298_v16 }
0x1366   :  { %v5382_v3 = vpop.f32.mrb[48].mxu1 }
0x1367   :  { %v5384_v22 = vpop.f32.mrb[49].mxu1 }
0x1368   :  { %v5386_v26 = vpop.f32.mrb[50].mxu1 }
0x1369   :  { %v5388_v21 = vpop.f32.mrb[51].mxu1 }
0x1376   :  { %v3875_v18 = vpop.f32.mrb[52].mxu1 }
0x1377   :  { %v2351_v51 = vpop.f32.mrb[53].mxu1  ;;  %v2360_v53 = vadd.f32 %v5343_v27, %v3875_v18 }
0x1378   :  { %v2352_v52 = vadd.f32 %v5337_v44, %v2351_v51  ;;  %v3876_v17 = vpop.f32.mrb[54].mxu1 }
0x1379   :  { %v2354_v25 = vpop.f32.mrb[55].mxu1  ;;  %v2363_v58 = vadd.f32 %v5356_v19, %v3876_v17  ;;  %v2372_v59 = vsel %vm382_vm1, %v2360_v53, -inf }
0x137a   :  { %v2355_v54 = vadd.f32 %v5349_v50, %v2354_v25  ;;  %v2366_v57 = vsel %vm382_vm1, %v2352_v52, -inf }
0x137b   :  { %2367 = vmax.xlane.f32.xlu0 %v2366_v57  ;;  %v2375_v61 = vsel %vm382_vm1, %v2363_v58, -inf }
0x137c   :  { %v2369_v12 = vsel %vm382_vm1, %v2355_v54, -inf }
0x137d   :  { %2370 = vmax.xlane.f32.xlu1 %v2369_v12 }
0x137f   :  { %2373 = vmax.xlane.f32.xlu0 %v2372_v59 }
0x1383   :  { %2376 = vmax.xlane.f32.xlu0 %v2375_v61 }
0x138e   :  { %2416 = vrot.lane.b32.xlu1 %v5308_v56, %s4537_s7 }
0x1408   :  { %v2368_v63 = vpop.xlane.xlu0 %2367 }
0x1409   :  { %v2378_v5 = vsub.f32 %v2352_v52, %v2368_v63 }
0x140a   :  { %v2371_v30 = vpop.xlane.xlu1 %2370 }
0x140b   :  { %v2382_v1 = vmul.f32 1.442695, %v2378_v5  ;;  %v2379_v23 = vsub.f32 %v2355_v54, %v2371_v30 }
0x140c   :  { %v2374_v62 = vpop.xlane.xlu0 %2373 }
0x140d   :  { %v2380_v0 = vsub.f32 %v2360_v53, %v2374_v62  ;;  %v2384_v6 = vmul.f32 1.442695, %v2379_v23 }
0x140e   :  { %v2417_v36 = vpop.permute.xlu1 %2416 }
0x140f   :  { %v2386_v7 = vmul.f32 1.442695, %v2380_v0 }
0x1410   :  { %v2377_v8 = vpop.xlane.xlu0 %2376 }
0x1411   :  { %4217 = vpow2.f32 %v2386_v7  ;;  %v2381_v9 = vsub.f32 %v2363_v58, %v2377_v8 }
0x1412   :  { %4219 = vpow2.f32 %v2382_v1 }
0x1413   :  { %v2388_v10 = vmul.f32 1.442695, %v2381_v9 }
0x1415   :  { %4221 = vpow2.f32 %v2388_v10 }
0x1416   :  { %4223 = vpow2.f32 %v2384_v6 }
0x141b   :  { %v4218_v11 = vpop.eup %4217 }
0x141c   :  { %v2396_v15 = vsel %vm382_vm1, %v4218_v11, 0.0  ;;  %v4220_v13 = vpop.eup %4219 }
0x141d   :  { %2397 = vadd.xlane.f32.xlu0 %v2396_v15  ;;  %v2390_v31 = vsel %vm382_vm1, %v4220_v13, 0.0 }
0x141f   :  { %v4222_v33 = vpop.eup %4221 }
0x1420   :  { %v2399_v32 = vsel %vm382_vm1, %v4222_v33, 0.0  ;;  %v4224_v34 = vpop.eup %4223 }
0x1421   :  { %2391 = vadd.xlane.f32.xlu0 %v2390_v31  ;;  %2400 = vadd.xlane.f32.xlu1 %v2399_v32  ;;  %v2393_v35 = vsel %vm382_vm1, %v4224_v34, 0.0 }
0x1425   :  { %2394 = vadd.xlane.f32.xlu1 %v2393_v35 }
0x1436   :  { %2479 = vrot.lane.b32.xlu1 %v5322_v29, %s4538_s17 }
0x1437   :  { %2414 = vrot.lane.b32.xlu0 %v5312_v39, %s4537_s7 }
0x143a   :  { %2481 = vrot.lane.b32.xlu1 %v5319_v28, %s4538_s17 }
0x143b   :  { %2475 = vrot.lane.b32.xlu0 %v5310_v38, %s4538_s17 }
0x143e   :  { %2477 = vrot.lane.b32.xlu1 %v5306_v37, %s4538_s17 }
0x14aa   :  { %v2398_v40 = vpop.xlane.xlu0 %2397 }
0x14ae   :  { %v2401_v42 = vpop.xlane.xlu1 %2400  ;;  %v2392_v43 = vpop.xlane.xlu0 %2391 }
0x14af   :  { %4225 = vrcp.f32 %v2401_v42 }
0x14b0   :  { %4227 = vrcp.f32 %v2392_v43 }
0x14b1   :  { %4229 = vrcp.f32 %v2398_v40 }
0x14b2   :  { %v2395_v46 = vpop.xlane.xlu1 %2394  ;;  %v2415_v48 = vpop.permute.xlu0 %2414 }
0x14b3   :  { %4231 = vrcp.f32 %v2395_v46  ;;  %3877 = vmatprep.subr.bf16.mxu0 %v2415_v48 }
0x14b4   :  { %3878 = vmatpush3.bf16.msra.mxu0 %v2415_v48 }
0x14b5   :  { %3879 = vmatprep.subr.bf16.mxu0 %v2417_v36 }
0x14b6   :  { %v2480_v45 = vpop.permute.xlu1 %2479  ;;  %v2476_v25 = vpop.permute.xlu0 %2475 }
0x14b7   :  { %v2490_v17 = vsel %vm686_vm2, %v2480_v45, 0 }
0x14b8   :  { %3880 = vmatpush3.bf16.msra.mxu0 %v2417_v36 }
0x14b9   :  { %3974 = vmatprep.subr.msk.bf16.mxu0 %vm686_vm2, %v2480_v45  ;;  %v4226_v47 = vpop.eup %4225 }
0x14ba   :  { %v4228_v4 = vpop.eup %4227  ;;  %v2409_v55 = vmul.f32 %v4226_v47, %v4222_v33  ;;  %v2482_v53 = vpop.permute.xlu1 %2481 }
0x14bb   :  { %v4230_v24 = vpop.eup %4229  ;;  %v2406_v49 = vmul.f32 %v4228_v4, %v4220_v13  ;;  %v2493_v54 = vsel %vm686_vm2, %v2482_v53, 0 }
0x14bc   :  { %v2408_v18 = vmul.f32 %v4230_v24, %v4218_v11 }
0x14bd   :  { %v4232_v41 = vpop.eup %4231 }
0x14be   :  { %v2407_v16 = vmul.f32 %v4232_v41, %v4224_v34  ;;  %v2411_v52 = vpack.c.bf16 %v2409_v55, %v2408_v18  ;;  %v2478_v57 = vpop.permute.xlu1 %2477 }
0x14c0   :  { %v2410_v51 = vpack.c.bf16 %v2407_v16, %v2406_v49 }
0x14c2   :  { %3881 = vmatprep.mubr.msk.bf16.mxu0 %vm382_vm1, %v2410_v51 }
0x14c3   :  { %3882 = vmatmul.mubr.msk.bf16.vlgmr.msra.gmra.mrb[32].mxu0 %vm382_vm1, %v2411_v52 }
0x14c4   :  { %3886 = vmatpush3.bf16.xpose.msra.mxu0 %v2490_v17  ;;  %3889 = vmatprep.mubr.msk.bf16.mxu0 %vm686_vm2, %v2476_v25 }
0x14c5   :  { %3975 = vmatprep.subr.msk.bf16.mxu0 %vm686_vm2, %v2482_v53 }
0x14cc   :  { %3888 = vmatpush3.bf16.xpose.msra.mxu0 %v2493_v54 }
0x14d3   :  { %3890 = vmatmul.mubr.msk.bf16.vlgmr.msra.gmra.mrb[36].mxu0 %vm686_vm2, %v2478_v57 }
0x1596   :  { %v5422_v12 = vpop.f32.mrb[32].mxu0 }
0x1597   :  { %v5424_v58 = vpop.f32.mrb[33].mxu0 }
0x1598   :  { %v5426_v59 = vpop.f32.mrb[34].mxu0 }
0x1599   :  { %v4034_v61 = vpack.i.bf16 %v5426_v59, %v5422_v12  ;;  %v5430_v63 = vpop.f32.mrb[35].mxu0 }
0x159a   :  { %v4029_v5 = vpack.i.bf16 %v5430_v63, %v5424_v58 }
0x15a6   :  { %v3891_v30 = vpop.f32.mrb[36].mxu0 }
0x15a7   :  { %v2529_v62 = vpop.f32.mrb[37].mxu0  ;;  %v2538_v7 = vadd.f32 %v5343_v27, %v3891_v30 }
0x15a8   :  { %v2530_v0 = vadd.f32 %v5337_v44, %v2529_v62  ;;  %v3892_v1 = vpop.f32.mrb[38].mxu0 }
0x15a9   :  { %v2532_v23 = vpop.f32.mrb[39].mxu0  ;;  %v2541_v10 = vadd.f32 %v5356_v19, %v3892_v1  ;;  %v2550_v11 = vsel %vm382_vm1, %v2538_v7, -inf }
0x15aa   :  { %v2533_v8 = vadd.f32 %v5349_v50, %v2532_v23  ;;  %v2544_v9 = vsel %vm382_vm1, %v2530_v0, -inf }
0x15ab   :  { %2545 = vmax.xlane.f32.xlu0 %v2544_v9  ;;  %v2553_v15 = vsel %vm382_vm1, %v2541_v10, -inf }
0x15ac   :  { %v2547_v6 = vsel %vm382_vm1, %v2533_v8, -inf }
0x15ad   :  { %2548 = vmax.xlane.f32.xlu1 %v2547_v6 }
0x15af   :  { %2551 = vmax.xlane.f32.xlu0 %v2550_v11 }
0x15b3   :  { %2554 = vmax.xlane.f32.xlu0 %v2553_v15 }
0x15be   :  { %2592 = vrot.lane.b32.xlu1 %v5308_v56, %s4538_s17 }
0x1638   :  { %v2546_v13 = vpop.xlane.xlu0 %2545 }
0x1639   :  { %v2556_v33 = vsub.f32 %v2530_v0, %v2546_v13 }
0x163a   :  { %v2549_v31 = vpop.xlane.xlu1 %2548 }
0x163b   :  { %v2560_v35 = vmul.f32 1.442695, %v2556_v33  ;;  %v2557_v36 = vsub.f32 %v2533_v8, %v2549_v31 }
0x163c   :  { %v2552_v32 = vpop.xlane.xlu0 %2551 }
0x163d   :  { %v2558_v34 = vsub.f32 %v2538_v7, %v2552_v32  ;;  %v2562_v46 = vmul.f32 1.442695, %v2557_v36 }
0x163e   :  { %v2593_v18 = vpop.permute.xlu1 %2592 }
0x163f   :  { %v2564_v40 = vmul.f32 1.442695, %v2558_v34 }
0x1640   :  { %v2555_v42 = vpop.xlane.xlu0 %2554 }
0x1641   :  { %4233 = vpow2.f32 %v2564_v40  ;;  %v2559_v43 = vsub.f32 %v2541_v10, %v2555_v42 }
0x1642   :  { %4235 = vpow2.f32 %v2560_v35 }
0x1643   :  { %v2566_v48 = vmul.f32 1.442695, %v2559_v43 }
0x1645   :  { %4237 = vpow2.f32 %v2566_v48 }
0x1646   :  { %4239 = vpow2.f32 %v2562_v46 }
0x164b   :  { %v4234_v45 = vpop.eup %4233 }
0x164c   :  { %v2574_v47 = vsel %vm382_vm1, %v4234_v45, 0.0  ;;  %v4236_v4 = vpop.eup %4235 }
0x164d   :  { %2575 = vadd.xlane.f32.xlu0 %v2574_v47  ;;  %v2568_v41 = vsel %vm382_vm1, %v4236_v4, 0.0 }
0x164f   :  { %v4238_v24 = vpop.eup %4237 }
0x1650   :  { %v2577_v55 = vsel %vm382_vm1, %v4238_v24, 0.0  ;;  %v4240_v49 = vpop.eup %4239 }
0x1651   :  { %2569 = vadd.xlane.f32.xlu0 %v2568_v41  ;;  %2578 = vadd.xlane.f32.xlu1 %v2577_v55  ;;  %v2571_v16 = vsel %vm382_vm1, %v4240_v49, 0.0 }
0x1655   :  { %2572 = vadd.xlane.f32.xlu1 %v2571_v16 }
0x1666   :  { %2655 = vrot.lane.b32.xlu1 %v5322_v29, %s4539_s0 }
0x1667   :  { %2590 = vrot.lane.b32.xlu0 %v5312_v39, %s4538_s17 }
0x166a   :  { %2657 = vrot.lane.b32.xlu1 %v5319_v28, %s4539_s0 }
0x166b   :  { %2651 = vrot.lane.b32.xlu0 %v5310_v38, %s4539_s0 }
0x166e   :  { %2653 = vrot.lane.b32.xlu1 %v5306_v37, %s4539_s0 }
0x16da   :  { %v2576_v51 = vpop.xlane.xlu0 %2575 }
0x16de   :  { %v2579_v52 = vpop.xlane.xlu1 %2578  ;;  %v2570_v17 = vpop.xlane.xlu0 %2569 }
0x16df   :  { %4241 = vrcp.f32 %v2579_v52 }
0x16e0   :  { %4243 = vrcp.f32 %v2570_v17 }
0x16e1   :  { %4245 = vrcp.f32 %v2576_v51 }
0x16e2   :  { %v2573_v29 = vpop.xlane.xlu1 %2572  ;;  %v2591_v25 = vpop.permute.xlu0 %2590 }
0x16e3   :  { %4247 = vrcp.f32 %v2573_v29  ;;  %3893 = vmatprep.subr.bf16.mxu1 %v2591_v25 }
0x16e4   :  { %3894 = vmatpush3.bf16.msra.mxu1 %v2591_v25 }
0x16e5   :  { %3895 = vmatprep.subr.bf16.mxu1 %v2593_v18 }
0x16e6   :  { %v2656_v28 = vpop.permute.xlu1 %2655  ;;  %v2652_v8 = vpop.permute.xlu0 %2651 }
0x16e7   :  { %v2666_v7 = vsel %vm686_vm2, %v2656_v28, 0 }
0x16e8   :  { %3896 = vmatpush3.bf16.msra.mxu1 %v2593_v18 }
0x16e9   :  { %3976 = vmatprep.subr.msk.bf16.mxu1 %vm686_vm2, %v2656_v28  ;;  %v4242_v38 = vpop.eup %4241 }
0x16ea   :  { %v4244_v53 = vpop.eup %4243  ;;  %v2587_v57 = vmul.f32 %v4242_v38, %v4238_v24  ;;  %v2658_v9 = vpop.permute.xlu1 %2657 }
0x16eb   :  { %v4246_v37 = vpop.eup %4245  ;;  %v2584_v30 = vmul.f32 %v4244_v53, %v4236_v4  ;;  %v2669_v6 = vsel %vm686_vm2, %v2658_v9, 0 }
0x16ec   :  { %v2586_v0 = vmul.f32 %v4246_v37, %v4234_v45 }
0x16ed   :  { %v4248_v54 = vpop.eup %4247 }
0x16ee   :  { %v2585_v62 = vmul.f32 %v4248_v54, %v4240_v49  ;;  %v2589_v23 = vpack.c.bf16 %v2587_v57, %v2586_v0  ;;  %v2654_v10 = vpop.permute.xlu1 %2653 }
0x16f0   :  { %v2588_v1 = vpack.c.bf16 %v2585_v62, %v2584_v30 }
0x16f2   :  { %3897 = vmatprep.mubr.msk.bf16.mxu1 %vm382_vm1, %v2588_v1 }
0x16f3   :  { %3898 = vmatmul.mubr.msk.bf16.vlgmr.msra.gmra.mrb[56].mxu1 %vm382_vm1, %v2589_v23 }
0x16f4   :  { %3902 = vmatpush3.bf16.xpose.msra.mxu1 %v2666_v7  ;;  %3905 = vmatprep.mubr.msk.bf16.mxu1 %vm686_vm2, %v2652_v8 }
0x16f5   :  { %3977 = vmatprep.subr.msk.bf16.mxu1 %vm686_vm2, %v2658_v9 }
0x16fc   :  { %3904 = vmatpush3.bf16.xpose.msra.mxu1 %v2669_v6  ;;  %v4097_v6 = vld [vmem:[%s5619_s12 + $0x10] sm:$0xff]  }
0x1703   :  { %3906 = vmatmul.mubr.msk.bf16.vlgmr.msra.gmra.mrb[60].mxu1 %vm686_vm2, %v2654_v10  ;;  %v4098_v10 = vld [vmem:[%s5619_s12 + $0x18] sm:$0xff]  }
0x17c6   :  { %v3899_v11 = vpop.f32.mrb[56].mxu1 }
0x17c7   :  { %v2636_v15 = vpop.f32.mrb[57].mxu1 }
0x17c8   :  { %v3900_v13 = vpop.f32.mrb[58].mxu1 }
0x17c9   :  { %v4044_v33 = vpack.i.bf16 %v3900_v13, %v3899_v11  ;;  %v2639_v31 = vpop.f32.mrb[59].mxu1 }
0x17ca   :  { %v4039_v32 = vpack.i.bf16 %v2639_v31, %v2636_v15 }
0x17d6   :  { %v3907_v34 = vpop.f32.mrb[60].mxu1 }
0x17d7   :  { %v2705_v35 = vpop.f32.mrb[61].mxu1  ;;  %v2714_v43 = vadd.f32 %v5343_v27, %v3907_v34 }
0x17d8   :  { %v2706_v36 = vadd.f32 %v5337_v44, %v2705_v35  ;;  %v3908_v40 = vpop.f32.mrb[62].mxu1 }
0x17d9   :  { %v2708_v42 = vpop.f32.mrb[63].mxu1  ;;  %v2717_v47 = vadd.f32 %v5356_v19, %v3908_v40  ;;  %v2726_v4 = vsel %vm382_vm1, %v2714_v43, -inf }
0x17da   :  { %v2709_v46 = vadd.f32 %v5349_v50, %v2708_v42  ;;  %v2720_v48 = vsel %vm382_vm1, %v2706_v36, -inf }
0x17db   :  { %2721 = vmax.xlane.f32.xlu0 %v2720_v48  ;;  %v2729_v24 = vsel %vm382_vm1, %v2717_v47, -inf }
0x17dc   :  { %v2723_v45 = vsel %vm382_vm1, %v2709_v46, -inf }
0x17dd   :  { %2724 = vmax.xlane.f32.xlu1 %v2723_v45 }
0x17df   :  { %2727 = vmax.xlane.f32.xlu0 %v2726_v4 }
0x17e3   :  { %2730 = vmax.xlane.f32.xlu0 %v2729_v24 }
0x1868   :  { %v2722_v44 = vpop.xlane.xlu0 %2721 }
0x1869   :  { %v2732_v41 = vsub.f32 %v2706_v36, %v2722_v44 }
0x186a   :  { %v2725_v55 = vpop.xlane.xlu1 %2724 }
0x186b   :  { %v2736_v50 = vmul.f32 1.442695, %v2732_v41  ;;  %v2733_v16 = vsub.f32 %v2709_v46, %v2725_v55 }
0x186c   :  { %v2728_v27 = vpop.xlane.xlu0 %2727 }
0x186d   :  { %v2734_v49 = vsub.f32 %v2714_v43, %v2728_v27  ;;  %v2738_v17 = vmul.f32 1.442695, %v2733_v16 }
0x186f   :  { %v2740_v18 = vmul.f32 1.442695, %v2734_v49 }
0x1870   :  { %v2731_v51 = vpop.xlane.xlu0 %2730 }
0x1871   :  { %4249 = vpow2.f32 %v2740_v18  ;;  %v2735_v52 = vsub.f32 %v2717_v47, %v2731_v51 }
0x1872   :  { %4251 = vpow2.f32 %v2736_v50 }
0x1873   :  { %v2742_v19 = vmul.f32 1.442695, %v2735_v52 }
0x1875   :  { %4253 = vpow2.f32 %v2742_v19 }
0x1876   :  { %4255 = vpow2.f32 %v2738_v17 }
0x187b   :  { %v4250_v29 = vpop.eup %4249 }
0x187c   :  { %v2750_v25 = vsel %vm382_vm1, %v4250_v29, 0.0  ;;  %v4252_v28 = vpop.eup %4251 }
0x187d   :  { %2751 = vadd.xlane.f32.xlu0 %v2750_v25  ;;  %v2744_v53 = vsel %vm382_vm1, %v4252_v28, 0.0 }
0x187f   :  { %v4254_v38 = vpop.eup %4253 }
0x1880   :  { %v2753_v37 = vsel %vm382_vm1, %v4254_v38, 0.0  ;;  %v4256_v54 = vpop.eup %4255 }
0x1881   :  { %2745 = vadd.xlane.f32.xlu0 %v2744_v53  ;;  %2754 = vadd.xlane.f32.xlu1 %v2753_v37  ;;  %v2747_v57 = vsel %vm382_vm1, %v4256_v54, 0.0  ;;  %v3557_v53 = vld [vmem:[#allocation11 + $0x1] ss:$0 sm:$0xff] }
0x1885   :  { %2748 = vadd.xlane.f32.xlu1 %v2747_v57 }
0x1896   :  { %2768 = vrot.lane.b32.xlu1 %v5308_v56, %s4539_s0 }
0x1897   :  { %2766 = vrot.lane.b32.xlu0 %v5312_v39, %s4539_s0 }
0x189a   :  { %4030 = vrot.lane.b32.xlu1 %v4029_v5, %s4540_s11 }
0x189b   :  { %4040 = vrot.lane.b32.xlu0 %v4039_v32, %s4527_s3 }
0x189e   :  { %4035 = vrot.lane.b32.xlu1 %v4034_v61, %s4540_s11 }
0x18a2   :  { %4045 = vrot.lane.b32.xlu1 %v4044_v33, %s4527_s3 }
0x190a   :  { %v2752_v30 = vpop.xlane.xlu0 %2751 }
0x190e   :  { %v2755_v62 = vpop.xlane.xlu1 %2754  ;;  %v2746_v56 = vpop.xlane.xlu0 %2745 }
0x190f   :  { %4257 = vrcp.f32 %v2755_v62 }
0x1910   :  { %4259 = vrcp.f32 %v2746_v56 }
0x1911   :  { %4261 = vrcp.f32 %v2752_v30 }
0x1912   :  { %v2749_v39 = vpop.xlane.xlu1 %2748  ;;  %v2767_v0 = vpop.permute.xlu0 %2766 }
0x1913   :  { %4263 = vrcp.f32 %v2749_v39  ;;  %3909 = vmatprep.subr.bf16.mxu0 %v2767_v0 }
0x1914   :  { %3910 = vmatpush3.bf16.msra.mxu0 %v2767_v0 }
0x1916   :  { %v2769_v58 = vpop.permute.xlu1 %2768  ;;  %v4041_v43 = vpop.permute.xlu0 %4040 }
0x1917   :  { %3911 = vmatprep.subr.bf16.mxu0 %v2769_v58  ;;  %v4043_v4 = vunpack.i.h.bf16 %v4041_v43  ;;  %v4042_v24 = vunpack.i.l.bf16 %v4041_v43  ;;  %v4099_v43 = vld [vmem:[%s5623_s16 + $0x10] sm:$0xff]  }
0x1918   :  { %3912 = vmatpush3.bf16.msra.mxu0 %v2769_v58  ;;  %3925 = vmatprep.subr.bf16.mxu1 %v4099_v43 }
0x1919   :  { %v4258_v63 = vpop.eup %4257  ;;  %3917 = vmatprep.subr.bf16.mxu0 %v4097_v6  ;;  %3926 = vmatpush3.bf16.msra.mxu1 %v4099_v43 }
0x191a   :  { %v4260_v5 = vpop.eup %4259  ;;  %v2763_v61 = vmul.f32 %v4258_v63, %v4254_v38  ;;  %v4031_v34 = vpop.permute.xlu1 %4030 }
0x191b   :  { %v4262_v12 = vpop.eup %4261  ;;  %v2760_v1 = vmul.f32 %v4260_v5, %v4252_v28  ;;  %v4033_v40 = vunpack.i.h.bf16 %v4031_v34  ;;  %v4032_v42 = vunpack.i.l.bf16 %v4031_v34 }
0x191c   :  { %v2762_v7 = vmul.f32 %v4262_v12, %v4250_v29 }
0x191d   :  { %v4264_v59 = vpop.eup %4263  ;;  %v2876_v44 = vsel %vm686_vm2, %v5388_v21, %v4033_v40  ;;  %v2875_v41 = vsel %vm686_vm2, %v5384_v22, %v4032_v42 }
0x191e   :  { %v2761_v23 = vmul.f32 %v4264_v59, %v4256_v54  ;;  %v2765_v9 = vpack.c.bf16 %v2763_v61, %v2762_v7  ;;  %v4036_v35 = vpop.permute.xlu1 %4035  ;;  %v2879_v29 = vsel %vm1435_vm3, %v2875_v41, %v4042_v24 }
0x191f   :  { %v4038_v46 = vunpack.i.h.bf16 %v4036_v35  ;;  %v4037_v48 = vunpack.i.l.bf16 %v4036_v35 }
0x1920   :  { %v2764_v8 = vpack.c.bf16 %v2761_v23, %v2760_v1 }
0x1921   :  { %v2878_v27 = vsel %vm686_vm2, %v5386_v26, %v4038_v46  ;;  %v2877_v49 = vsel %vm686_vm2, %v5382_v3, %v4037_v48  ;;  %v2880_v26 = vsel %vm1435_vm3, %v2876_v44, %v4043_v4  ;;  %v4100_v46 = vld [vmem:[%s5623_s16 + $0x18] sm:$0xff]  }
0x1922   :  { %3913 = vmatprep.mubr.msk.bf16.mxu0 %vm382_vm1, %v2764_v8  ;;  %v4046_v36 = vpop.permute.xlu1 %4045  ;;  %3927 = vmatprep.subr.bf16.mxu1 %v4100_v46 }
0x1923   :  { %3914 = vmatmul.mubr.msk.bf16.vlgmr.msra.gmra.mrb[40].mxu0 %vm382_vm1, %v2765_v9  ;;  %v4048_v45 = vunpack.i.h.bf16 %v4046_v36  ;;  %v4047_v47 = vunpack.i.l.bf16 %v4046_v36  ;;  %3928 = vmatpush3.bf16.msra.mxu1 %v4100_v46 }
0x1924   :  { %3918 = vmatpush3.bf16.msra.mxu0 %v4097_v6 }
0x1925   :  { %3919 = vmatprep.subr.bf16.mxu0 %v4098_v10  ;;  %v2881_v51 = vsel %vm1435_vm3, %v2877_v49, %v4047_v47  ;;  %v2882_v52 = vsel %vm1435_vm3, %v2878_v27, %v4048_v45 }
0x1928   :  { %3920 = vmatpush3.bf16.msra.mxu0 %v4098_v10 }
0x19f6   :  { %v3915_v11 = vpop.f32.mrb[40].mxu0 }
0x19f7   :  { %v2812_v15 = vpop.f32.mrb[41].mxu0 }
0x19f8   :  { %v3916_v13 = vpop.f32.mrb[42].mxu0 }
0x19f9   :  { %v4054_v33 = vpack.i.bf16 %v3916_v13, %v3915_v11  ;;  %v2815_v31 = vpop.f32.mrb[43].mxu0 }
0x19fa   :  { %v4049_v32 = vpack.i.bf16 %v2815_v31, %v2812_v15 }
0x19fb   :  { %4055 = vrot.lane.b32.xlu1 %v4054_v33, %s4541_s25 }
0x19fc   :  { %4050 = vrot.lane.b32.xlu0 %v4049_v32, %s4541_s25 }
0x1a6d   :  { %v4056_v55 = vpop.permute.xlu1 %4055 }
0x1a6e   :  { %v4058_v50 = vunpack.i.h.bf16 %v4056_v55  ;;  %v4057_v16 = vunpack.i.l.bf16 %v4056_v55  ;;  %v4051_v18 = vpop.permute.xlu0 %4050 }
0x1a6f   :  { %v4053_v17 = vunpack.i.h.bf16 %v4051_v18  ;;  %v4052_v19 = vunpack.i.l.bf16 %v4051_v18 }
0x1a70   :  { %v2886_v21 = vsel %vm1440_vm4, %v2882_v52, %v4058_v50  ;;  %v2885_v22 = vsel %vm1440_vm4, %v2881_v51, %v4057_v16  ;;  %v3562_v51 = vld [vmem:[#allocation13 + $0x1] ss:$0 sm:$0xff] }
0x1a71   :  { %v2888_v25 = vpack.c.bf16 %v2886_v21, %v2885_v22  ;;  %v2883_v3 = vsel %vm1440_vm4, %v2879_v29, %v4052_v19  ;;  %v2884_v28 = vsel %vm1440_vm4, %v2880_v26, %v4053_v17  ;;  %v3563_v29 = vld [vmem:[#allocation14 + $0x1] ss:$0 sm:$0xff] }
0x1a72   :  { %v2887_v38 = vpack.c.bf16 %v2884_v28, %v2883_v3 }
0x1a74   :  { %3921 = vmatprep.mubr.msk.bf16.mxu0 %vm382_vm1, %v2887_v38 }
0x1a75   :  { %3922 = vmatmul.mubr.msk.bf16.vlgmr.msra.gmra.mrb[44].mxu0 %vm382_vm1, %v2888_v25 }
0x1b48   :  { %v3923_v37 = vpop.f32.mrb[44].mxu0 }
0x1b49   :  { %v2954_v54 = vpop.f32.mrb[45].mxu0  ;;  %v2963_v57 = vadd.f32 %v3923_v37, %v3557_v53 }
0x1b4a   :  { %v2955_v30 = vadd.f32 %v3557_v53, %v2954_v54  ;;  %v3924_v62 = vpop.f32.mrb[46].mxu0 }
0x1b4b   :  { %v2957_v56 = vpop.f32.mrb[47].mxu0  ;;  %v5524_v58 = vadd.f32 %v2963_v57, %v5258_v14  ;;  %v2966_v63 = vadd.f32 %v3924_v62, %v3557_v53 }
0x1b4c   :  { %v5521_v39 = vadd.f32 %v2955_v30, %v5255_v60  ;;  %v2958_v0 = vadd.f32 %v3557_v53, %v2957_v56 }
0x1b4d   :  { %v5534_v61 = vadd.f32 %v2966_v63, %v5266_v20  ;;  %v2983_v60 = vsel %vm382_vm1, %v5524_v58, 0.0  ;;  %v4102_v63 = vld [vmem:[%s5625_s18 + $0x28] sm:$0xff]  }
0x1b4e   :  { %v5527_v5 = vadd.f32 %v2958_v0, %v5261_v2  ;;  %v2977_v12 = vsel %vm382_vm1, %v5521_v39, 0.0  ;;  %v4101_v0 = vld [vmem:[%s5625_s18 + $0x20] sm:$0xff]  }
0x1b4f   :  { %2978 = vadd.xlane.f32.xlu0 %v2977_v12  ;;  %v2986_v14 = vsel %vm382_vm1, %v5534_v61, 0.0  ;;  %3933 = vmatprep.subr.bf16.mxu0 %v4101_v0  ;;  %v4103_v12 = vld [vmem:[%s5625_s18 + $0x30] sm:$0xff]  }
0x1b50   :  { %v2980_v59 = vsel %vm382_vm1, %v5527_v5, 0.0  ;;  %3934 = vmatpush3.bf16.msra.mxu0 %v4101_v0 }
0x1b51   :  { %2981 = vadd.xlane.f32.xlu1 %v2980_v59  ;;  %3935 = vmatprep.subr.bf16.mxu0 %v4102_v63  ;;  %v4104_v59 = vld [vmem:[%s5625_s18 + $0x38] sm:$0xff]  }
0x1b53   :  { %2984 = vadd.xlane.f32.xlu0 %v2983_v60  ;;  %v3568_v60 = vld [vmem:[#allocation16 + $0x1] ss:$0 sm:$0xff] }
0x1b54   :  { %3936 = vmatpush3.bf16.msra.mxu0 %v4102_v63 }
0x1b55   :  { %3937 = vmatprep.subr.bf16.mxu0 %v4103_v12 }
0x1b57   :  { %2987 = vadd.xlane.f32.xlu0 %v2986_v14 }
0x1b58   :  { %3938 = vmatpush3.bf16.msra.mxu0 %v4103_v12 }
0x1b59   :  { %3939 = vmatprep.subr.bf16.mxu0 %v4104_v59 }
0x1b5c   :  { %3940 = vmatpush3.bf16.msra.mxu0 %v4104_v59 }
0x1bdc   :  { %v2979_v2 = vpop.xlane.xlu0 %2978 }
0x1bdd   :  { %v2989_v1 = vmul.f32 0.03125, %v2979_v2 }
0x1bde   :  { %v2982_v23 = vpop.xlane.xlu1 %2981 }
0x1bdf   :  { %v2993_v7 = vsub.f32 %v5521_v39, %v2989_v1  ;;  %v2990_v8 = vmul.f32 0.03125, %v2982_v23 }
0x1be0   :  { %v2985_v9 = vpop.xlane.xlu0 %2984 }
0x1be1   :  { %v2994_v6 = vsub.f32 %v5527_v5, %v2990_v8  ;;  %v2991_v10 = vmul.f32 0.03125, %v2985_v9  ;;  %v2997_v20 = vmul.f32 %v2993_v7, %v2993_v7 }
0x1be3   :  { %v2995_v11 = vsub.f32 %v5524_v58, %v2991_v10  ;;  %v3001_v15 = vsel %vm382_vm1, %v2997_v20, 0.0  ;;  %v2998_v13 = vmul.f32 %v2994_v6, %v2994_v6 }
0x1be4   :  { %3002 = vadd.xlane.f32.xlu0 %v3001_v15  ;;  %v2988_v33 = vpop.xlane.xlu0 %2987 }
0x1be5   :  { %v2992_v31 = vmul.f32 0.03125, %v2988_v33  ;;  %v3004_v32 = vsel %vm382_vm1, %v2998_v13, 0.0  ;;  %v2999_v34 = vmul.f32 %v2995_v11, %v2995_v11 }
0x1be6   :  { %3005 = vadd.xlane.f32.xlu1 %v3004_v32 }
0x1be7   :  { %v2996_v35 = vsub.f32 %v5534_v61, %v2992_v31  ;;  %v3007_v36 = vsel %vm382_vm1, %v2999_v34, 0.0 }
0x1be8   :  { %3008 = vadd.xlane.f32.xlu0 %v3007_v36 }
0x1be9   :  { %v3000_v40 = vmul.f32 %v2996_v35, %v2996_v35 }
0x1beb   :  { %v3010_v42 = vsel %vm382_vm1, %v3000_v40, 0.0 }
0x1bec   :  { %3011 = vadd.xlane.f32.xlu1 %v3010_v42 }
0x1c71   :  { %v3003_v48 = vpop.xlane.xlu0 %3002 }
0x1c72   :  { %v3013_v45 = vmul.f32 0.03125, %v3003_v48 }
0x1c73   :  { %v3006_v47 = vpop.xlane.xlu1 %3005 }
0x1c74   :  { %v3017_v4 = vadd.f32 1e-06, %v3013_v45  ;;  %v3014_v24 = vmul.f32 0.03125, %v3006_v47 }
0x1c75   :  { %v3009_v44 = vpop.xlane.xlu0 %3008 }
0x1c76   :  { %4265 = vrsqrt.f32 %v3017_v4  ;;  %v3018_v41 = vadd.f32 1e-06, %v3014_v24  ;;  %v3015_v55 = vmul.f32 0.03125, %v3009_v44 }
0x1c78   :  { %4267 = vrsqrt.f32 %v3018_v41  ;;  %v3019_v27 = vadd.f32 1e-06, %v3015_v55 }
0x1c79   :  { %v3012_v49 = vpop.xlane.xlu1 %3011 }
0x1c7a   :  { %4269 = vrsqrt.f32 %v3019_v27  ;;  %v3016_v50 = vmul.f32 0.03125, %v3012_v49 }
0x1c7c   :  { %v3020_v16 = vadd.f32 1e-06, %v3016_v50 }
0x1c7e   :  { %4271 = vrsqrt.f32 %v3020_v16 }
0x1c80   :  { %v4266_v18 = vpop.eup %4265 }
0x1c81   :  { %v3025_v52 = vmul.f32 %v4266_v18, %v2993_v7 }
0x1c82   :  { %v4268_v17 = vpop.eup %4267 }
0x1c83   :  { %v3026_v19 = vmul.f32 %v4268_v17, %v2994_v6  ;;  %v3035_v21 = vmul.f32 %v3562_v51, %v3025_v52 }
0x1c84   :  { %v4270_v22 = vpop.eup %4269 }
0x1c85   :  { %v3027_v26 = vmul.f32 %v4270_v22, %v2995_v11  ;;  %v3036_v25 = vmul.f32 %v3562_v51, %v3026_v19  ;;  %v3045_v3 = vadd.f32 %v3563_v29, %v3035_v21 }
0x1c87   :  { %v3046_v28 = vadd.f32 %v3563_v29, %v3036_v25  ;;  %v3037_v53 = vmul.f32 %v3562_v51, %v3027_v26 }
0x1c88   :  { %v4272_v38 = vpop.eup %4271 }
0x1c89   :  { %v3028_v37 = vmul.f32 %v4272_v38, %v2996_v35  ;;  %v3049_v54 = vpack.c.bf16 %v3046_v28, %v3045_v3  ;;  %v3047_v30 = vadd.f32 %v3563_v29, %v3037_v53  ;;  %v3582_v28 = vld [vmem:[%s5626_s19 + $0x1] ss:$0 sm:$0xff] }
0x1c8b   :  { %v3038_v57 = vmul.f32 %v3562_v51, %v3028_v37  ;;  %3929 = vmatprep.mubr.msk.bf16.mxu1 %vm382_vm1, %v3049_v54 }
0x1c8d   :  { %v3048_v62 = vadd.f32 %v3563_v29, %v3038_v57 }
0x1c8f   :  { %v3050_v56 = vpack.c.bf16 %v3048_v62, %v3047_v30 }
0x1c91   :  { %3930 = vmatmul.mubr.msk.bf16.vlgmr.msra.gmra.mrb[64].mxu1 %vm382_vm1, %v3050_v56 }
0x1d64   :  { %v3931_v14 = vpop.f32.mrb[64].mxu1 }
0x1d65   :  { %v3125_v2 = vadd.f32 %v3931_v14, %v3568_v60  ;;  %v3116_v1 = vpop.f32.mrb[65].mxu1 }
0x1d66   :  { %v3117_v23 = vadd.f32 %v3568_v60, %v3116_v1  ;;  %v3932_v7 = vpop.f32.mrb[66].mxu1 }
0x1d67   :  { %v3133_v8 = vmul.f32 %v3125_v2, %v3125_v2  ;;  %v3128_v9 = vadd.f32 %v3932_v7, %v3568_v60  ;;  %v3119_v6 = vpop.f32.mrb[67].mxu1 }
0x1d68   :  { %v3131_v10 = vmul.f32 %v3117_v23, %v3117_v23  ;;  %v3120_v20 = vadd.f32 %v3568_v60, %v3119_v6 }
0x1d69   :  { %v3137_v11 = vmul.f32 %v3133_v8, %v3125_v2  ;;  %v3134_v15 = vmul.f32 %v3128_v9, %v3128_v9 }
0x1d6a   :  { %v3135_v13 = vmul.f32 %v3131_v10, %v3117_v23  ;;  %v3132_v33 = vmul.f32 %v3120_v20, %v3120_v20 }
0x1d6b   :  { %v3141_v31 = vmul.f32 0.044715, %v3137_v11  ;;  %v3138_v32 = vmul.f32 %v3134_v15, %v3128_v9 }
0x1d6c   :  { %v3139_v34 = vmul.f32 0.044715, %v3135_v13  ;;  %v3136_v35 = vmul.f32 %v3132_v33, %v3120_v20 }
0x1d6d   :  { %v3145_v36 = vadd.f32 %v3141_v31, %v3125_v2  ;;  %v3142_v40 = vmul.f32 0.044715, %v3138_v32 }
0x1d6e   :  { %v3143_v42 = vadd.f32 %v3139_v34, %v3117_v23  ;;  %v3140_v43 = vmul.f32 0.044715, %v3136_v35 }
0x1d6f   :  { %v3149_v46 = vmul.f32 0.7978846, %v3145_v36  ;;  %v3146_v48 = vadd.f32 %v3142_v40, %v3128_v9  ;;  %v4542_v40 = vmov 0.0|0.0  }
0x1d70   :  { %v3147_v45 = vmul.f32 0.7978846, %v3143_v42  ;;  %v3144_v47 = vadd.f32 %v3140_v43, %v3120_v20  ;;  %3956 = vmatprep.subr.bf16.mxu1 %v4542_v40  ;;  %v4544_v42 = vmov 0.0  }
0x1d71   :  { %4273 = vtanh.f32 %v3149_v46  ;;  %v3150_v4 = vmul.f32 0.7978846, %v3146_v48  ;;  %3953 = vmatprep.mubr.msk.f32.mxu1 %vm4543_vm5, %v4544_v42 }
0x1d72   :  { %4275 = vtanh.f32 %v3147_v45  ;;  %v3148_v24 = vmul.f32 0.7978846, %v3144_v47 }
0x1d73   :  { %4277 = vtanh.f32 %v3150_v4 }
0x1d74   :  { %4279 = vtanh.f32 %v3148_v24 }
0x1d7b   :  { %v4274_v44 = vpop.eup %4273 }
0x1d7c   :  { %v4276_v41 = vpop.eup %4275  ;;  %v3157_v55 = vadd.f32 1.0, %v4274_v44 }
0x1d7d   :  { %v4278_v27 = vpop.eup %4277  ;;  %v3155_v49 = vadd.f32 1.0, %v4276_v41 }
0x1d7e   :  { %v4280_v50 = vpop.eup %4279  ;;  %v3161_v16 = vmul.f32 0.5, %v3157_v55  ;;  %v3158_v18 = vadd.f32 1.0, %v4278_v27 }
0x1d7f   :  { %v3159_v51 = vmul.f32 0.5, %v3155_v49  ;;  %v3156_v52 = vadd.f32 1.0, %v4280_v50 }
0x1d80   :  { %v3162_v17 = vmul.f32 0.5, %v3158_v18  ;;  %v3165_v21 = vmul.f32 %v3161_v16, %v3125_v2  ;;  %v3589_v16 = vld [vmem:[%s5627_s20] ss:$0 sm:$0xff] }
0x1d81   :  { %v3160_v19 = vmul.f32 0.5, %v3156_v52  ;;  %v3163_v29 = vmul.f32 %v3159_v51, %v3117_v23 }
0x1d82   :  { %v3166_v22 = vmul.f32 %v3162_v17, %v3128_v9 }
0x1d83   :  { %v3164_v26 = vmul.f32 %v3160_v19, %v3120_v20 }
0x1d84   :  { %v3168_v25 = vpack.c.bf16 %v3166_v22, %v3165_v21  ;;  %v3590_v21 = vld [vmem:[%s5628_s21] ss:$0 sm:$0xff]  ;;  %s4545_s21 = smov [#allocation17]  }
0x1d85   :  { %v3167_v3 = vpack.c.bf16 %v3164_v26, %v3163_v29  ;;  %s3425_s30 = sshll.u32 %s4545_s21, 4  ;;  %s3426_s30 = int_to_ptr.vmem [resolvable:$true] %s3425_s30 }
0x1d86   :  { %s4491_s23 = scalar_lea.vmem %s3426_s30, 32  ;;  %p4496_p3 = scmp.lt.s32.totalorder %s3426_s30, %s3426_s30 }
0x1d87   :  { %3941 = vmatprep.mubr.msk.bf16.mxu0 %vm320_vm0, %v3167_v3  ;;  %p4492_p2 = scmp.ne.s32.totalorder %s3426_s30, %s4491_s23  ;;  %p4497_p4 = scmp.lt.s32.totalorder %s4491_s23, %s4491_s23 }
0x1d88   :  { %3942 = vmatmul.mubr.msk.bf16.vlgmr.msra.gmra.mrb[48].mxu0 %vm320_vm0, %v3168_v25 }
0x1d89   :  { %p4498_p5 = por %p4497_p4, %p4496_p3 }
0x1d8b   :  { %p4499_p6 = pnand %p4498_p5, %p4492_p2 }
0x1e5b   :  { %v3943_v38 = vpop.f32.mrb[48].mxu0 }
0x1e5c   :  { %v3250_v53 = vpop.f32.mrb[49].mxu0  ;;  %v3259_v37 = vadd.f32 %v3943_v38, %v3582_v28 }
0x1e5d   :  { %v3251_v54 = vadd.f32 %v3582_v28, %v3250_v53  ;;  %v3944_v57 = vpop.f32.mrb[50].mxu0 }
0x1e5e   :  { %v3253_v30 = vpop.f32.mrb[51].mxu0  ;;  %v3262_v56 = vadd.f32 %v3944_v57, %v3582_v28  ;;  %v3267_v63 = vadd.f32 %v3259_v37, %v5524_v58 }
0x1e5f   :  { %v3265_v62 = vadd.f32 %v3251_v54, %v5521_v39  ;;  %v3254_v0 = vadd.f32 %v3582_v28, %v3253_v30 }
0x1e60   :  { %v3268_v60 = vadd.f32 %v3262_v56, %v5534_v61  ;;  %v3277_v2 = vsel %vm382_vm1, %v3267_v63, 0.0 }
0x1e61   :  { %v3266_v12 = vadd.f32 %v3254_v0, %v5527_v5  ;;  %v3271_v59 = vsel %vm382_vm1, %v3265_v62, 0.0 }
0x1e62   :  { %3272 = vadd.xlane.f32.xlu0 %v3271_v59  ;;  %v3280_v1 = vsel %vm382_vm1, %v3268_v60, 0.0 }
0x1e63   :  { %v3274_v14 = vsel %vm382_vm1, %v3266_v12, 0.0 }
0x1e64   :  { %3275 = vadd.xlane.f32.xlu1 %v3274_v14 }
0x1e66   :  { %3278 = vadd.xlane.f32.xlu0 %v3277_v2 }
0x1e68   :  { %3281 = vadd.xlane.f32.xlu1 %v3280_v1 }
0x1eef   :  { %v3273_v39 = vpop.xlane.xlu0 %3272 }
0x1ef0   :  { %v3283_v23 = vmul.f32 0.03125, %v3273_v39 }
0x1ef1   :  { %v3276_v7 = vpop.xlane.xlu1 %3275 }
0x1ef2   :  { %v3287_v58 = vsub.f32 %v3265_v62, %v3283_v23  ;;  %v3284_v8 = vmul.f32 0.03125, %v3276_v7  ;;  %v3343_v62 = vld [vmem:[%s5629_s22] sm:$0x3] }
0x1ef3   :  { %v3279_v5 = vpop.xlane.xlu0 %3278 }
0x1ef4   :  { %v3288_v9 = vsub.f32 %v3266_v12, %v3284_v8  ;;  %v3285_v6 = vmul.f32 0.03125, %v3279_v5  ;;  %v3291_v10 = vmul.f32 %v3287_v58, %v3287_v58 }
0x1ef5   :  { %v3282_v20 = vpop.xlane.xlu1 %3281 }
0x1ef6   :  { %v3289_v61 = vsub.f32 %v3267_v63, %v3285_v6  ;;  %v3286_v11 = vmul.f32 0.03125, %v3282_v20  ;;  %v3295_v15 = vsel %vm382_vm1, %v3291_v10, 0.0  ;;  %v3292_v13 = vmul.f32 %v3288_v9, %v3288_v9 }
0x1ef7   :  { %3296 = vadd.xlane.f32.xlu0 %v3295_v15 }
0x1ef8   :  { %v3290_v33 = vsub.f32 %v3268_v60, %v3286_v11  ;;  %v3298_v31 = vsel %vm382_vm1, %v3292_v13, 0.0  ;;  %v3293_v32 = vmul.f32 %v3289_v61, %v3289_v61 }
0x1ef9   :  { %3299 = vadd.xlane.f32.xlu1 %v3298_v31 }
0x1efa   :  { %v3301_v34 = vsel %vm382_vm1, %v3293_v32, 0.0  ;;  %v3294_v35 = vmul.f32 %v3290_v33, %v3290_v33 }
0x1efb   :  { %3302 = vadd.xlane.f32.xlu0 %v3301_v34 }
0x1efc   :  { %v3304_v36 = vsel %vm382_vm1, %v3294_v35, 0.0 }
0x1efd   :  { %3305 = vadd.xlane.f32.xlu1 %v3304_v36 }
0x1f84   :  { %v3297_v43 = vpop.xlane.xlu0 %3296 }
0x1f85   :  { %v3307_v46 = vmul.f32 0.03125, %v3297_v43 }
0x1f86   :  { %v3300_v48 = vpop.xlane.xlu1 %3299 }
0x1f87   :  { %v3311_v45 = vadd.f32 1e-06, %v3307_v46  ;;  %v3308_v47 = vmul.f32 0.03125, %v3300_v48 }
0x1f88   :  { %v3303_v4 = vpop.xlane.xlu0 %3302 }
0x1f89   :  { %4281 = vrsqrt.f32 %v3311_v45  ;;  %v3312_v24 = vadd.f32 1e-06, %v3308_v47  ;;  %v3309_v44 = vmul.f32 0.03125, %v3303_v4 }
0x1f8a   :  { %v3306_v41 = vpop.xlane.xlu1 %3305 }
0x1f8b   :  { %4283 = vrsqrt.f32 %v3312_v24  ;;  %v3313_v55 = vadd.f32 1e-06, %v3309_v44  ;;  %v3310_v27 = vmul.f32 0.03125, %v3306_v41 }
0x1f8d   :  { %4285 = vrsqrt.f32 %v3313_v55  ;;  %v3314_v49 = vadd.f32 1e-06, %v3310_v27 }
0x1f8f   :  { %4287 = vrsqrt.f32 %v3314_v49 }
0x1f93   :  { %v4282_v50 = vpop.eup %4281 }
0x1f94   :  { %v3319_v18 = vmul.f32 %v4282_v50, %v3287_v58 }
0x1f95   :  { %v4284_v51 = vpop.eup %4283 }
0x1f96   :  { %v3320_v52 = vmul.f32 %v4284_v51, %v3288_v9  ;;  %v3329_v17 = vmul.f32 %v3589_v16, %v3319_v18 }
0x1f97   :  { %v4286_v19 = vpop.eup %4285 }
0x1f98   :  { %v3321_v22 = vmul.f32 %v4286_v19, %v3289_v61  ;;  %v3330_v29 = vmul.f32 %v3589_v16, %v3320_v52  ;;  %v3339_v3 = vadd.f32 %v3590_v21, %v3329_v17 }
0x1f99   :  { %v4288_v26 = vpop.eup %4287 }
0x1f9a   :  { %v3322_v25 = vmul.f32 %v4288_v26, %v3290_v33  ;;  %v3340_v28 = vadd.f32 %v3590_v21, %v3330_v29  ;;  %v3331_v38 = vmul.f32 %v3589_v16, %v3321_v22 }
0x1f9c   :  { %v3957_v53 = vpack.c.bf16 %v3340_v28, %v3339_v3  ;;  %v3332_v37 = vmul.f32 %v3589_v16, %v3322_v25  ;;  %v3341_v54 = vadd.f32 %v3590_v21, %v3331_v38 }
0x1f9e   :  { %3958 = vmatpush3.bf16.msra.mxu1 %v3957_v53  ;;  %v3342_v57 = vadd.f32 %v3590_v21, %v3332_v37 }
0x1f9f   :  { %3959 = vmatprep.subr.bf16.mxu1 %v4542_v40 }
0x1fa0   :  { %v3960_v30 = vpack.c.bf16 %v3342_v57, %v3341_v54 }
0x1fa2   :  { %3961 = vmatpush3.bf16.msra.mxu1 %v3960_v30 }
0x1fa5   :  { %3954 = vmatmul.mubr.msk.f32.vlgmr.msra.gmra.mrb[68].mxu1 %vm382_vm1, %v3343_v62 }
0x2078   :  { %v3413_v56 = vpop.f32.mrb[68].mxu1 }
0x2079   :  { %v3955_v0 = vpop.f32.mrb[69].mxu1  ;;  %3418 = vst.msk [vmem:[#allocation17] sm:$0x3] %vm3417_vm6, %v3413_v56 }
0x207a   :  { %4502 = shalt.err (!%p4499_p6)
}
0x207b   :  { %s5657_s2 = sld [smem:[#allocation32_spill]] }
0x2081   :  { %s4503_s22 = scalar_lea.hbm %s5657_s2, 32 }
0x2082   :  { %p4504_p7 = scmp.ne.s32.totalorder %s5657_s2, %s4503_s22  ;;  %p4507_p8 = scmp.lt.u32.totalorder %s4503_s22, %s5657_s2 }
0x2084   :  { %p4509_p9 = pnand %p4507_p8, %p4504_p7 }
0x2086   :  { %4512 = shalt.err (!%p4509_p9)
}
0x2087   :  { %3428 = dma.vmem_to_hbm [thread:$0]  %s3426_s30, 32, %s5657_s2, [#allocation4]  }
0x2088   :  { %4523 = dma.done.wait [#allocation4], 32  }
0x2089   :  { %4524 = vsyncadd [#allocation4], 4294967264 }
0x208a   :  { %3432 = vsyncpa [#allocation3], 1 }
0x208b   :  { %3433 = vsyncpa [#allocation6], 1 }
0x208c   :  { %3434 = vsyncpa [#allocation9], 1 }
0x208d   :  { %3435 = vsyncpa [#allocation12], 1 }
0x208e   :  { %3436 = vsyncpa [#allocation15], 1 }
0x208f   :  { %3437 = vsyncpa [#allocation4], 1 }

// kernel: tpu_custom_call.1
= control target key start
LH: loop header
LB: loop body
LE: loop exit
PB: predicated region body
PF: predicated region fallthrough
CT: control target
= control target key end

     0   :  { %s5607_s0 = inlined_call_operand.vmem [shape: bf16[1,32,192], index: 0, kind: input, shape index: {}]   ;;  %s5608_s1 = inlined_call_operand.vmem [shape: bf16[192,32], index: 1, kind: input, shape index: {}]   ;;  %s5609_s2 = inlined_call_operand.vmem [shape: f32[32,32], index: 2, kind: input, shape index: {}]   ;;  %s5610_s3 = inlined_call_operand.vmem [shape: f32[32,32], index: 3, kind: input, shape index: {}]   ;;  %s5611_s4 = inlined_call_operand.hbm [shape: f32[2,1,32], index: 4, kind: input, shape index: {}]   ;;  %s5612_s5 = inlined_call_operand.hbm [shape: f32[2,1,32], index: 5, kind: input, shape index: {}]   ;;  %s5613_s6 = inlined_call_operand.vmem [shape: bf16[2,32,32], index: 6, kind: input, shape index: {}]   ;;  %s5614_s7 = inlined_call_operand.hbm [shape: f32[2,1,32], index: 7, kind: input, shape index: {}]   ;;  %s5615_s8 = inlined_call_operand.vmem [shape: bf16[2,32,32], index: 8, kind: input, shape index: {}]   ;;  %s5616_s9 = inlined_call_operand.hbm [shape: f32[2,1,32], index: 9, kind: input, shape index: {}]   ;;  %s5617_s10 = inlined_call_operand.vmem [shape: bf16[2,32,32], index: 10, kind: input, shape index: {}]   ;;  %s5618_s11 = inlined_call_operand.hbm [shape: f32[2,1,32], index: 11, kind: input, shape index: {}]   ;;  %s5619_s12 = inlined_call_operand.vmem [shape: bf16[2,32,32], index: 12, kind: input, shape index: {}]   ;;  %s5620_s13 = inlined_call_operand.hbm [shape: f32[2,1,32], index: 13, kind: input, shape index: {}]   ;;  %s5621_s14 = inlined_call_operand.hbm [shape: f32[2,1,32], index: 14, kind: input, shape index: {}]   ;;  %s5622_s15 = inlined_call_operand.hbm [shape: f32[2,1,32], index: 15, kind: input, shape index: {}]   ;;  %s5623_s16 = inlined_call_operand.vmem [shape: bf16[2,32,64], index: 16, kind: input, shape index: {}]   ;;  %s5624_s17 = inlined_call_operand.hbm [shape: f32[2,1,64], index: 17, kind: input, shape index: {}]   ;;  %s5625_s18 = inlined_call_operand.vmem [shape: bf16[2,64,32], index: 18, kind: input, shape index: {}]   ;;  %s5626_s19 = inlined_call_operand.vmem [shape: f32[2,1,32], index: 19, kind: input, shape index: {}]   ;;  %s5627_s20 = inlined_call_operand.vmem [shape: f32[1,32], index: 20, kind: input, shape index: {}]   ;;  %s5628_s21 = inlined_call_operand.vmem [shape: f32[1,32], index: 21, kind: input, shape index: {}]   ;;  %s5629_s22 = inlined_call_operand.vmem [shape: f32[2,32], index: 22, kind: input, shape index: {}]   ;;  %s5630_s23 = inlined_call_operand.hbm [shape: f32[2,32], index: 23, kind: output, shape index: {}]  }
   0x1   :  { %5640 = sst [smem:[#allocation24_spill]] %s5607_s0 }
   0x2   :  { %5641 = sst [smem:[#allocation25_spill]] %s5608_s1 }
   0x3   :  { %5642 = sst [smem:[#allocation26_spill]] %s5609_s2 }
   0x4   :  { %5643 = sst [smem:[#allocation27_spill]] %s5610_s3 }
   0x5   :  { %5644 = sst [smem:[#allocation28_spill]] %s5611_s4 }
   0x6   :  { %5645 = sst [smem:[#allocation29_spill]] %s5612_s5 }
   0x7   :  { %5646 = sst [smem:[#allocation30_spill]] %s5613_s6 }
   0x8   :  { %5647 = sst [smem:[#allocation31_spill]] %s5614_s7 }
   0x9   :  { %5648 = sst [smem:[#allocation32_spill]] %s5630_s23 }
   0xa   :  { %28 = vsyncpa [#allocation3], 0 }
   0xb   :  { %29 = vsyncpa [#allocation6], 0 }
   0xc   :  { %30 = vsyncpa [#allocation9], 0 }
   0xd   :  { %31 = vsyncpa [#allocation12], 0 }
   0xe   :  { %32 = vsyncpa [#allocation15], 0 }
   0xf   :  { %33 = vsyncpa [#allocation4], 0  ;;  %s4525_s4 = smov [#allocation5]   ;;  %s4526_s24 = smov [#allocation8]  }
  0x10   :  { %s59_s30 = sshll.u32 %s4525_s4, 4  ;;  %s87_s25 = sshll.u32 %s4526_s24, 4  ;;  %s60_s30 = int_to_ptr.vmem [resolvable:$true] %s59_s30  ;;  %s4666_s25 = int_to_ptr.vmem [resolvable:$true] %s87_s25 }
  0x11   :  { %s5649_s26 = sld [smem:[#allocation29_spill]] }
  0x17   :  { %s4293_s2 = scalar_lea.hbm %s5649_s26, 32 }
  0x18   :  { %p4294_p0 = scmp.ne.s32.totalorder %s5649_s26, %s4293_s2  ;;  %p4297_p1 = scmp.lt.u32.totalorder %s4293_s2, %s5649_s26 }
  0x1a   :  { %p4299_p2 = pnand %p4297_p1, %p4294_p0 }
  0x1c   :  { %4302 = shalt.err (!%p4299_p2)
}
  0x1d   :  { %s4303_s29 = scalar_lea.vmem %s60_s30, 32  ;;  %p4308_p4 = scmp.lt.s32.totalorder %s60_s30, %s60_s30 }
  0x1e   :  { %p4304_p3 = scmp.ne.s32.totalorder %s60_s30, %s4303_s29  ;;  %p4309_p5 = scmp.lt.s32.totalorder %s4303_s29, %s4303_s29 }
  0x20   :  { %p4310_p6 = por %p4309_p5, %p4308_p4 }
  0x22   :  { %p4311_p7 = pnand %p4310_p6, %p4304_p3 }
  0x24   :  { %4314 = shalt.err (!%p4311_p7)
}
  0x25   :  { %s4527_s3 = smov 16   ;;  %s4528_s0 = smov 1  }
  0x26   :  { %65 = dma.hbm_to_vmem [thread:$0]  %s5649_s26, 32, %s60_s30, [#allocation6], %s4527_s3, %s4527_s3, %s4528_s0  }
  0x27   :  { %s4315_s2 = scalar_lea.hbm %s5616_s9, 32 }
  0x28   :  { %p4316_p8 = scmp.ne.s32.totalorder %s5616_s9, %s4315_s2  ;;  %p4319_p9 = scmp.lt.u32.totalorder %s4315_s2, %s5616_s9 }
  0x2a   :  { %p4321_p10 = pnand %p4319_p9, %p4316_p8 }
  0x2c   :  { %4324 = shalt.err (!%p4321_p10)
}
  0x2d   :  { %s4325_s29 = scalar_lea.vmem %s4666_s25, 32  ;;  %p4330_p12 = scmp.lt.s32.totalorder %s4666_s25, %s4666_s25 }
  0x2e   :  { %p4326_p11 = scmp.ne.s32.totalorder %s4666_s25, %s4325_s29  ;;  %p4331_p13 = scmp.lt.s32.totalorder %s4325_s29, %s4325_s29 }
  0x30   :  { %p4332_p0 = por %p4331_p13, %p4330_p12 }
  0x32   :  { %p4333_p1 = pnand %p4332_p0, %p4326_p11 }
  0x34   :  { %4336 = shalt.err (!%p4333_p1)
}
  0x35   :  { %93 = dma.hbm_to_vmem [thread:$0]  %s5616_s9, 32, %s4666_s25, [#allocation9], %s4527_s3, %s4527_s3, %s4528_s0  }
  0x36   :  { %s4529_s4 = smov [#allocation11]   ;;  %s4530_s5 = smov [#allocation14]  }
  0x37   :  { %s115_s24 = sshll.u32 %s4529_s4, 4  ;;  %s139_s1 = sshll.u32 %s4530_s5, 4  ;;  %s116_s24 = int_to_ptr.vmem [resolvable:$true] %s115_s24  ;;  %s4703_s1 = int_to_ptr.vmem [resolvable:$true] %s139_s1 }
  0x38   :  { %s4337_s27 = scalar_lea.hbm %s5620_s13, 32 }
  0x39   :  { %p4338_p2 = scmp.ne.s32.totalorder %s5620_s13, %s4337_s27  ;;  %p4341_p3 = scmp.lt.u32.totalorder %s4337_s27, %s5620_s13 }
  0x3b   :  { %p4343_p4 = pnand %p4341_p3, %p4338_p2 }
  0x3d   :  { %4346 = shalt.err (!%p4343_p4)
}
  0x3e   :  { %s4347_s9 = scalar_lea.vmem %s116_s24, 32  ;;  %p4352_p6 = scmp.lt.s32.totalorder %s116_s24, %s116_s24 }
  0x3f   :  { %p4348_p5 = scmp.ne.s32.totalorder %s116_s24, %s4347_s9  ;;  %p4353_p7 = scmp.lt.s32.totalorder %s4347_s9, %s4347_s9 }
  0x41   :  { %p4354_p8 = por %p4353_p7, %p4352_p6 }
  0x43   :  { %p4355_p9 = pnand %p4354_p8, %p4348_p5 }
  0x45   :  { %4358 = shalt.err (!%p4355_p9)
}
  0x46   :  { %121 = dma.hbm_to_vmem [thread:$0]  %s5620_s13, 32, %s116_s24, [#allocation12], %s4527_s3, %s4527_s3, %s4528_s0  }
  0x47   :  { %s4359_s23 = scalar_lea.hbm %s5622_s15, 32 }
  0x48   :  { %p4360_p10 = scmp.ne.s32.totalorder %s5622_s15, %s4359_s23  ;;  %p4363_p11 = scmp.lt.u32.totalorder %s4359_s23, %s5622_s15 }
  0x4a   :  { %p4365_p12 = pnand %p4363_p11, %p4360_p10 }
  0x4c   :  { %4368 = shalt.err (!%p4365_p12)
}
  0x4d   :  { %s4369_s7 = scalar_lea.vmem %s4703_s1, 32  ;;  %p4374_p0 = scmp.lt.s32.totalorder %s4703_s1, %s4703_s1 }
  0x4e   :  { %p4370_p13 = scmp.ne.s32.totalorder %s4703_s1, %s4369_s7  ;;  %p4375_p1 = scmp.lt.s32.totalorder %s4369_s7, %s4369_s7 }
  0x50   :  { %p4376_p2 = por %p4375_p1, %p4374_p0 }
  0x52   :  { %p4377_p3 = pnand %p4376_p2, %p4370_p13 }
  0x54   :  { %4380 = shalt.err (!%p4377_p3)
}
  0x55   :  { %145 = dma.hbm_to_vmem [thread:$0]  %s5622_s15, 32, %s4703_s1, [#allocation15], %s4527_s3, %s4527_s3, %s4528_s0  }
  0x56   :  { %s4531_s28 = smov [#allocation2]   ;;  %s4532_s9 = smov [#allocation7]  }
  0x57   :  { %s47_s29 = sshll.u32 %s4531_s28, 4  ;;  %s73_s25 = sshll.u32 %s4532_s9, 4  ;;  %s48_s29 = int_to_ptr.vmem [resolvable:$true] %s47_s29  ;;  %s4740_s25 = int_to_ptr.vmem [resolvable:$true] %s73_s25 }
  0x58   :  { %s5650_s4 = sld [smem:[#allocation28_spill]] }
  0x5e   :  { %s4381_s23 = scalar_lea.hbm %s5650_s4, 32 }
  0x5f   :  { %p4382_p4 = scmp.ne.s32.totalorder %s5650_s4, %s4381_s23  ;;  %p4385_p5 = scmp.lt.u32.totalorder %s4381_s23, %s5650_s4 }
  0x61   :  { %p4387_p6 = pnand %p4385_p5, %p4382_p4 }
  0x63   :  { %4390 = shalt.err (!%p4387_p6)
}
  0x64   :  { %s4391_s15 = scalar_lea.vmem %s48_s29, 32  ;;  %p4396_p8 = scmp.lt.s32.totalorder %s48_s29, %s48_s29 }
  0x65   :  { %p4392_p7 = scmp.ne.s32.totalorder %s48_s29, %s4391_s15  ;;  %p4397_p9 = scmp.lt.s32.totalorder %s4391_s15, %s4391_s15 }
  0x67   :  { %p4398_p10 = por %p4397_p9, %p4396_p8 }
  0x69   :  { %p4399_p11 = pnand %p4398_p10, %p4392_p7 }
  0x6b   :  { %4402 = shalt.err (!%p4399_p11)
}
  0x6c   :  { %53 = dma.hbm_to_vmem [thread:$0]  %s5650_s4, 32, %s48_s29, [#allocation3], %s4527_s3, %s4527_s3, %s4528_s0  }
  0x6d   :  { %s5651_s28 = sld [smem:[#allocation31_spill]] }
  0x73   :  { %s4403_s9 = scalar_lea.hbm %s5651_s28, 32 }
  0x74   :  { %p4404_p12 = scmp.ne.s32.totalorder %s5651_s28, %s4403_s9  ;;  %p4407_p13 = scmp.lt.u32.totalorder %s4403_s9, %s5651_s28 }
  0x76   :  { %p4409_p0 = pnand %p4407_p13, %p4404_p12 }
  0x78   :  { %4412 = shalt.err (!%p4409_p0)
}
  0x79   :  { %s4413_s2 = scalar_lea.vmem %s4740_s25, 32  ;;  %p4418_p2 = scmp.lt.s32.totalorder %s4740_s25, %s4740_s25 }
  0x7a   :  { %p4414_p1 = scmp.ne.s32.totalorder %s4740_s25, %s4413_s2  ;;  %p4419_p3 = scmp.lt.s32.totalorder %s4413_s2, %s4413_s2 }
  0x7c   :  { %p4420_p4 = por %p4419_p3, %p4418_p2 }
  0x7e   :  { %p4421_p5 = pnand %p4420_p4, %p4414_p1 }
  0x80   :  { %4424 = shalt.err (!%p4421_p5)
}
  0x81   :  { %79 = dma.hbm_to_vmem [thread:$0]  %s5651_s28, 32, %s4740_s25, [#allocation6], %s4527_s3, %s4527_s3, %s4528_s0  }
  0x82   :  { %s4533_s6 = smov [#allocation10]   ;;  %s4534_s15 = smov [#allocation13]  }
  0x83   :  { %s101_s27 = sshll.u32 %s4533_s6, 4  ;;  %s127_s1 = sshll.u32 %s4534_s15, 4  ;;  %s102_s27 = int_to_ptr.vmem [resolvable:$true] %s101_s27  ;;  %s4777_s1 = int_to_ptr.vmem [resolvable:$true] %s127_s1 }
  0x84   :  { %s4425_s24 = scalar_lea.hbm %s5618_s11, 32 }
  0x85   :  { %p4426_p6 = scmp.ne.s32.totalorder %s5618_s11, %s4425_s24  ;;  %p4429_p7 = scmp.lt.u32.totalorder %s4425_s24, %s5618_s11 }
  0x87   :  { %p4431_p8 = pnand %p4429_p7, %p4426_p6 }
  0x89   :  { %4434 = shalt.err (!%p4431_p8)
}
  0x8a   :  { %s4435_s25 = scalar_lea.vmem %s102_s27, 32  ;;  %p4440_p10 = scmp.lt.s32.totalorder %s102_s27, %s102_s27 }
  0x8b   :  { %p4436_p9 = scmp.ne.s32.totalorder %s102_s27, %s4435_s25  ;;  %p4441_p11 = scmp.lt.s32.totalorder %s4435_s25, %s4435_s25 }
  0x8d   :  { %p4442_p12 = por %p4441_p11, %p4440_p10 }
  0x8f   :  { %p4443_p13 = pnand %p4442_p12, %p4436_p9 }
  0x91   :  { %4446 = shalt.err (!%p4443_p13)
}
  0x92   :  { %107 = dma.hbm_to_vmem [thread:$0]  %s5618_s11, 32, %s102_s27, [#allocation9], %s4527_s3, %s4527_s3, %s4528_s0  }
  0x93   :  { %s4447_s4 = scalar_lea.hbm %s5621_s14, 32 }
  0x94   :  { %p4448_p0 = scmp.ne.s32.totalorder %s5621_s14, %s4447_s4  ;;  %p4451_p1 = scmp.lt.u32.totalorder %s4447_s4, %s5621_s14 }
  0x96   :  { %p4453_p2 = pnand %p4451_p1, %p4448_p0 }
  0x98   :  { %4456 = shalt.err (!%p4453_p2)
}
  0x99   :  { %s4457_s24 = scalar_lea.vmem %s4777_s1, 32  ;;  %p4462_p4 = scmp.lt.s32.totalorder %s4777_s1, %s4777_s1 }
  0x9a   :  { %p4458_p3 = scmp.ne.s32.totalorder %s4777_s1, %s4457_s24  ;;  %p4463_p5 = scmp.lt.s32.totalorder %s4457_s24, %s4457_s24 }
  0x9c   :  { %p4464_p6 = por %p4463_p5, %p4462_p4 }
  0x9e   :  { %p4465_p7 = pnand %p4464_p6, %p4458_p3 }
  0xa0   :  { %4468 = shalt.err (!%p4465_p7)
}
  0xa1   :  { %133 = dma.hbm_to_vmem [thread:$0]  %s5621_s14, 32, %s4777_s1, [#allocation12], %s4527_s3, %s4527_s3, %s4528_s0  }
  0xa2   :  { %s4535_s9 = smov [#allocation16]   ;;  %s4469_s25 = scalar_lea.hbm %s5624_s17, 32 }
  0xa3   :  { %s153_s30 = sshll.u32 %s4535_s9, 4  ;;  %p4470_p8 = scmp.ne.s32.totalorder %s5624_s17, %s4469_s25  ;;  %s154_s30 = int_to_ptr.vmem [resolvable:$true] %s153_s30 }
  0xa4   :  { %p4473_p9 = scmp.lt.u32.totalorder %s4469_s25, %s5624_s17 }
  0xa6   :  { %p4475_p10 = pnand %p4473_p9, %p4470_p8 }
  0xa8   :  { %4478 = shalt.err (!%p4475_p10)
}
  0xa9   :  { %s4479_s4 = scalar_lea.vmem %s154_s30, 32  ;;  %p4484_p12 = scmp.lt.s32.totalorder %s154_s30, %s154_s30 }
  0xaa   :  { %p4480_p11 = scmp.ne.s32.totalorder %s154_s30, %s4479_s4  ;;  %p4485_p13 = scmp.lt.s32.totalorder %s4479_s4, %s4479_s4 }
  0xac   :  { %p4486_p0 = por %p4485_p13, %p4484_p12 }
  0xae   :  { %p4487_p1 = pnand %p4486_p0, %p4480_p11 }
  0xb0   :  { %4490 = shalt.err (!%p4487_p1)
}
  0xb1   :  { %159 = dma.hbm_to_vmem [thread:$0]  %s5624_s17, 32, %s154_s30, [#allocation15], %s4527_s3, %s4527_s3, %s4528_s0  }
  0xb2   :  { %4513 = dma.done.wait [#allocation3], 32  }
  0xb3   :  { %4514 = vsyncadd [#allocation3], 4294967264 }
  0xb4   :  { %4515 = dma.done.wait [#allocation6], 64  }
  0xb5   :  { %4516 = vsyncadd [#allocation6], 4294967232 }
  0xb6   :  { %4517 = dma.done.wait [#allocation9], 64  }
  0xb7   :  { %4518 = vsyncadd [#allocation9], 4294967232 }
  0xb8   :  { %4519 = dma.done.wait [#allocation12], 64  }
  0xb9   :  { %4520 = vsyncadd [#allocation12], 4294967232 }
  0xba   :  { %4521 = dma.done.wait [#allocation15], 64  }
  0xbb   :  { %4522 = vsyncadd [#allocation15], 4294967232  ;;  %v4536_v0 = vmov 0   ;;  %s5652_s7 = sld [smem:[#allocation25_spill]]  ;;  %vm320_vm0 = vcmask 523264   ;;  %s5653_s26 = sld [smem:[#allocation24_spill]] }
  0xbc   :  { %327 = vmatprep.subr.bf16.mxu0 %v4536_v0  ;;  %s5654_s2 = sld [smem:[#allocation26_spill]]  ;;  %vm382_vm1 = vcmask 261120   ;;  %s5655_s24 = sld [smem:[#allocation30_spill]]  ;;  %v4079_v59 = vld [vmem:[%s5615_s8] sm:$0xff]   ;;  %vm686_vm2 = vcmask 64512   ;;  %vm1435_vm3 = vcmask 130048  }
  0xbd   :  { %s5656_s4 = sld [smem:[#allocation27_spill]]  ;;  %s4538_s17 = smov 112   ;;  %vm1440_vm4 = vcmask 195584   ;;  %vm4543_vm5 = vmmov 0   ;;  %vm3417_vm6 = vcmask 254976  }
  0xbe   :  { %s4539_s0 = smov 104   ;;  %s4540_s11 = smov 8  }
  0xbf   :  { %s4541_s25 = smov 24  }
  0xc1   :  { %v4059_v1 = vld [vmem:[%s5652_s7] sm:$0xff]   ;;  %v4060_v2 = vld [vmem:[%s5652_s7 + $0x8] sm:$0xff]   ;;  %v4061_v3 = vld [vmem:[%s5652_s7 + $0x10] sm:$0xff]  }
  0xc2   :  { %328 = vmatpush1.bf16.msra.mxu0 %v4059_v1  ;;  %v4062_v4 = vld [vmem:[%s5652_s7 + $0x18] sm:$0xff]   ;;  %v4073_v5 = vld [vmem:[%s5653_s26 + $0x4] ss:$8 sps:$4 sm:$0xff]   ;;  %v4065_v8 = vld [vmem:[%s5652_s7 + $0x30] sm:$0xff]  }
  0xc3   :  { %329 = vmatprep.subr.bf16.mxu0 %v4536_v0  ;;  %v4063_v6 = vld [vmem:[%s5652_s7 + $0x20] sm:$0xff]   ;;  %3454 = vmatprep.mubr.msk.bf16.mxu0 %vm320_vm0, %v4073_v5  ;;  %v4064_v7 = vld [vmem:[%s5652_s7 + $0x28] sm:$0xff]   ;;  %v4066_v9 = vld [vmem:[%s5652_s7 + $0x38] sm:$0xff]  }
  0xc4   :  { %v4067_v10 = vld [vmem:[%s5652_s7 + $0x40] sm:$0xff]   ;;  %v4068_v11 = vld [vmem:[%s5652_s7 + $0x48] sm:$0xff]   ;;  %v4069_v12 = vld [vmem:[%s5652_s7 + $0x50] sm:$0xff]  }
  0xc5   :  { %v4070_v13 = vld [vmem:[%s5652_s7 + $0x58] sm:$0xff]   ;;  %v4071_v14 = vld [vmem:[%s5653_s26] ss:$8 sps:$4 sm:$0xff]   ;;  %v228_v26 = vld [vmem:[%s5654_s2 + $0x10] sm:$0xff]  ;;  %s4537_s7 = smov 120  }
  0xc6   :  { %330 = vmatpush1.bf16.msra.mxu0 %v4060_v2  ;;  %v4074_v15 = vld [vmem:[%s5653_s26 + $0x14] ss:$8 sps:$4 sm:$0xff]   ;;  %v4076_v16 = vld [vmem:[%s5653_s26 + $0x10] ss:$8 sps:$4 sm:$0xff]   ;;  %v226_v17 = vld [vmem:[%s5654_s2] sm:$0xff] }
  0xc7   :  { %331 = vmatprep.subr.bf16.mxu0 %v4536_v0  ;;  %v227_v19 = vld [vmem:[%s5654_s2 + $0x8] sm:$0xff]  ;;  %v229_v29 = vld [vmem:[%s5654_s2 + $0x18] sm:$0xff]  ;;  %v4077_v57 = vld [vmem:[%s5655_s24] sm:$0xff]  }
  0xc8   :  { %3713 = vmatprep.subr.bf16.mxu1 %v4077_v57  ;;  %v4078_v58 = vld [vmem:[%s5655_s24 + $0x8] sm:$0xff]  }
  0xc9   :  { %3714 = vmatpush3.bf16.msra.mxu1 %v4077_v57 }
  0xca   :  { %332 = vmatpush1.bf16.msra.mxu0 %v4061_v3  ;;  %3715 = vmatprep.subr.bf16.mxu1 %v4078_v58 }
  0xcb   :  { %333 = vmatprep.subr.bf16.mxu0 %v4536_v0 }
  0xcd   :  { %3716 = vmatpush3.bf16.msra.mxu1 %v4078_v58  ;;  %v3468_v58 = vld [vmem:[#allocation10] ss:$0 sm:$0xff] }
  0xce   :  { %334 = vmatpush1.bf16.msra.mxu0 %v4062_v4  ;;  %3721 = vmatprep.subr.bf16.mxu1 %v4079_v59 }
  0xcf   :  { %335 = vmatprep.subr.bf16.mxu0 %v4536_v0 }
  0xd2   :  { %336 = vmatpush1.bf16.msra.mxu0 %v4063_v6 }
  0xd3   :  { %337 = vmatprep.subr.bf16.mxu0 %v4536_v0 }
  0xd6   :  { %338 = vmatpush1.bf16.msra.mxu0 %v4064_v7 }
  0xd7   :  { %339 = vmatprep.subr.bf16.mxu0 %v4536_v0 }
  0xda   :  { %340 = vmatpush1.bf16.msra.mxu0 %v4065_v8 }
  0xdb   :  { %341 = vmatprep.subr.bf16.mxu0 %v4536_v0 }
  0xde   :  { %342 = vmatpush1.bf16.msra.mxu0 %v4066_v9 }
  0xdf   :  { %343 = vmatprep.subr.bf16.mxu0 %v4536_v0 }
  0xe2   :  { %344 = vmatpush1.bf16.msra.mxu0 %v4067_v10  ;;  %v3456_v10 = vld [vmem:[#allocation2] ss:$0 sm:$0xff] }
  0xe3   :  { %345 = vmatprep.subr.bf16.mxu0 %v4536_v0 }
  0xe6   :  { %346 = vmatpush1.bf16.msra.mxu0 %v4068_v11 }
  0xe7   :  { %347 = vmatprep.subr.bf16.mxu0 %v4536_v0 }
  0xea   :  { %348 = vmatpush1.bf16.msra.mxu0 %v4069_v12 }
  0xeb   :  { %349 = vmatprep.subr.bf16.mxu0 %v4536_v0 }
  0xee   :  { %350 = vmatpush1.bf16.msra.mxu0 %v4070_v13 }
  0xf1   :  { %360 = vmatmul.mubr.bf16.vlgmr.msra.gmra.mrb[0].mxu0 %v4071_v14  ;;  %v3457_v14 = vld [vmem:[#allocation5] ss:$0 sm:$0xff] }
  0xf2   :  { %3455 = vmatprep.mubr.msk.bf16.mxu0 %vm320_vm0, %v4074_v15 }
  0xf9   :  { %368 = vmatmul.mubr.bf16.gmra.mrb[4].mxu0 %v4076_v16 }
 0x1c4   :  { %v361_v18 = vpop.f32.mrb[0].mxu0 }
 0x1c5   :  { %v4885_v20 = vadd.f32 %v361_v18, %v226_v17  ;;  %v363_v21 = vpop.f32.mrb[1].mxu0 }
 0x1c6   :  { %v364_v22 = vpop.f32.mrb[2].mxu0 }
 0x1c7   :  { %v4887_v23 = vadd.f32 %v364_v22, %v227_v19  ;;  %v366_v24 = vpop.f32.mrb[3].mxu0  ;;  %v383_v25 = vsel %vm382_vm1, %v4885_v20, 0.0 }
 0x1c8   :  { %384 = vadd.xlane.f32.xlu0 %v383_v25 }
 0x1c9   :  { %v386_v27 = vsel %vm382_vm1, %v4887_v23, 0.0 }
 0x1cc   :  { %v369_v28 = vpop.f32.mrb[4].mxu0  ;;  %387 = vadd.xlane.f32.xlu0 %v386_v27 }
 0x1cd   :  { %v4899_v30 = vadd.f32 %v369_v28, %v228_v26  ;;  %v371_v31 = vpop.f32.mrb[5].mxu0 }
 0x1ce   :  { %v372_v32 = vpop.f32.mrb[6].mxu0  ;;  %v4080_v31 = vld [vmem:[%s5615_s8 + $0x8] sm:$0xff]  }
 0x1cf   :  { %v4901_v33 = vadd.f32 %v372_v32, %v229_v29  ;;  %v374_v34 = vpop.f32.mrb[7].mxu0  ;;  %v389_v35 = vsel %vm382_vm1, %v4899_v30, 0.0  ;;  %v4081_v32 = vld [vmem:[%s5617_s10] sm:$0xff]  }
 0x1d0   :  { %390 = vadd.xlane.f32.xlu1 %v389_v35  ;;  %v4082_v34 = vld [vmem:[%s5617_s10 + $0x8] sm:$0xff]  }
 0x1d1   :  { %v392_v36 = vsel %vm382_vm1, %v4901_v33, 0.0 }
 0x1d4   :  { %393 = vadd.xlane.f32.xlu1 %v392_v36  ;;  %v3458_v36 = vld [vmem:[#allocation7] ss:$0 sm:$0xff] }
 0x255   :  { %v385_v37 = vpop.xlane.xlu0 %384 }
 0x256   :  { %v396_v38 = vmul.f32 0.03125, %v385_v37 }
 0x258   :  { %v400_v39 = vsub.f32 %v4885_v20, %v396_v38 }
 0x259   :  { %v388_v40 = vpop.xlane.xlu0 %387 }
 0x25a   :  { %v397_v41 = vmul.f32 0.03125, %v388_v40  ;;  %v404_v42 = vmul.f32 %v400_v39, %v400_v39 }
 0x25c   :  { %v401_v43 = vsub.f32 %v4887_v23, %v397_v41  ;;  %v408_v44 = vsel %vm382_vm1, %v404_v42, 0.0 }
 0x25d   :  { %v391_v45 = vpop.xlane.xlu1 %390  ;;  %409 = vadd.xlane.f32.xlu0 %v408_v44 }
 0x25e   :  { %v398_v46 = vmul.f32 0.03125, %v391_v45  ;;  %v405_v47 = vmul.f32 %v401_v43, %v401_v43 }
 0x260   :  { %v402_v48 = vsub.f32 %v4899_v30, %v398_v46  ;;  %v411_v49 = vsel %vm382_vm1, %v405_v47, 0.0  ;;  %v3463_v47 = vld [vmem:[#allocation8] ss:$0 sm:$0xff] }
 0x261   :  { %v394_v50 = vpop.xlane.xlu1 %393  ;;  %412 = vadd.xlane.f32.xlu1 %v411_v49 }
 0x262   :  { %v399_v51 = vmul.f32 0.03125, %v394_v50  ;;  %v406_v52 = vmul.f32 %v402_v48, %v402_v48 }
 0x264   :  { %v403_v53 = vsub.f32 %v4901_v33, %v399_v51  ;;  %v414_v54 = vsel %vm382_vm1, %v406_v52, 0.0 }
 0x265   :  { %415 = vadd.xlane.f32.xlu0 %v414_v54 }
 0x266   :  { %v407_v55 = vmul.f32 %v403_v53, %v403_v53 }
 0x268   :  { %v417_v56 = vsel %vm382_vm1, %v407_v55, 0.0 }
 0x269   :  { %418 = vadd.xlane.f32.xlu1 %v417_v56 }
 0x2ea   :  { %v410_v60 = vpop.xlane.xlu0 %409 }
 0x2eb   :  { %v420_v61 = vmul.f32 0.03125, %v410_v60 }
 0x2ed   :  { %v424_v62 = vadd.f32 1e-06, %v420_v61 }
 0x2ee   :  { %v413_v63 = vpop.xlane.xlu1 %412 }
 0x2ef   :  { %4105 = vrsqrt.f32 %v424_v62  ;;  %v421_v0 = vmul.f32 0.03125, %v413_v63 }
 0x2f1   :  { %v425_v1 = vadd.f32 1e-06, %v421_v0 }
 0x2f2   :  { %v416_v2 = vpop.xlane.xlu0 %415 }
 0x2f3   :  { %4107 = vrsqrt.f32 %v425_v1  ;;  %v422_v3 = vmul.f32 0.03125, %v416_v2 }
 0x2f5   :  { %v426_v4 = vadd.f32 1e-06, %v422_v3 }
 0x2f6   :  { %v419_v5 = vpop.xlane.xlu1 %418 }
 0x2f7   :  { %4109 = vrsqrt.f32 %v426_v4  ;;  %v423_v6 = vmul.f32 0.03125, %v419_v5 }
 0x2f9   :  { %v4106_v7 = vpop.eup %4105  ;;  %v427_v8 = vadd.f32 1e-06, %v423_v6 }
 0x2fa   :  { %v432_v9 = vmul.f32 %v4106_v7, %v400_v39 }
 0x2fb   :  { %4111 = vrsqrt.f32 %v427_v8 }
 0x2fc   :  { %v442_v13 = vmul.f32 %v3456_v10, %v432_v9 }
 0x2fd   :  { %v4108_v11 = vpop.eup %4107 }
 0x2fe   :  { %v433_v12 = vmul.f32 %v4108_v11, %v401_v43  ;;  %v452_v17 = vadd.f32 %v3457_v14, %v442_v13 }
 0x300   :  { %v443_v15 = vmul.f32 %v3456_v10, %v433_v12  ;;  %v4984_v12 = vld [vmem:[%s5656_s4] sm:$0xff] }
 0x301   :  { %v4110_v16 = vpop.eup %4109 }
 0x302   :  { %v453_v18 = vadd.f32 %v3457_v14, %v443_v15  ;;  %v434_v19 = vmul.f32 %v4110_v16, %v402_v48  ;;  %v4994_v16 = vld [vmem:[%s5656_s4 + $0x8] sm:$0xff] }
 0x304   :  { %v456_v21 = vpack.c.bf16 %v453_v18, %v452_v17  ;;  %v444_v25 = vmul.f32 %v3456_v10, %v434_v19 }
 0x305   :  { %v4112_v22 = vpop.eup %4111 }
 0x306   :  { %3717 = vmatprep.mubr.msk.bf16.mxu1 %vm382_vm1, %v456_v21  ;;  %v435_v24 = vmul.f32 %v4112_v22, %v403_v53  ;;  %v454_v27 = vadd.f32 %v3457_v14, %v444_v25  ;;  %v5003_v25 = vld [vmem:[%s5656_s4 + $0x18] sm:$0xff] }
 0x308   :  { %v445_v26 = vmul.f32 %v3456_v10, %v435_v24 }
 0x30a   :  { %v455_v28 = vadd.f32 %v3457_v14, %v445_v26  ;;  %v4989_v14 = vld [vmem:[%s5656_s4 + $0x10] sm:$0xff] }
 0x30c   :  { %v457_v29 = vpack.c.bf16 %v455_v28, %v454_v27 }
 0x30e   :  { %3718 = vmatmul.mubr.msk.bf16.vlgmr.msra.gmra.mrb[0].mxu1 %vm382_vm1, %v457_v29 }
 0x30f   :  { %3722 = vmatpush3.bf16.msra.mxu1 %v4079_v59  ;;  %3725 = vmatprep.mubr.msk.bf16.mxu1 %vm382_vm1, %v456_v21 }
 0x310   :  { %3723 = vmatprep.subr.bf16.mxu1 %v4080_v31 }
 0x313   :  { %3724 = vmatpush3.bf16.msra.mxu1 %v4080_v31 }
 0x314   :  { %3729 = vmatprep.subr.bf16.mxu1 %v4081_v32 }
 0x316   :  { %3726 = vmatmul.mubr.msk.bf16.vlgmr.msra.gmra.mrb[4].mxu1 %vm382_vm1, %v457_v29 }
 0x317   :  { %3730 = vmatpush3.bf16.msra.mxu1 %v4081_v32  ;;  %3733 = vmatprep.mubr.msk.bf16.mxu1 %vm382_vm1, %v456_v21 }
 0x318   :  { %3731 = vmatprep.subr.bf16.mxu1 %v4082_v34 }
 0x31b   :  { %3732 = vmatpush3.bf16.msra.mxu1 %v4082_v34 }
 0x31e   :  { %3734 = vmatmul.mubr.msk.bf16.vlgmr.msra.gmra.mrb[8].mxu1 %vm382_vm1, %v457_v29 }
 0x3e1   :  { %v3719_v35 = vpop.f32.mrb[0].mxu1 }
 0x3e2   :  { %v521_v37 = vpop.f32.mrb[1].mxu1  ;;  %v530_v39 = vadd.f32 %v3719_v35, %v3458_v36 }
 0x3e3   :  { %v3720_v38 = vpop.f32.mrb[2].mxu1  ;;  %v522_v42 = vadd.f32 %v3458_v36, %v521_v37 }
 0x3e4   :  { %v533_v40 = vadd.f32 %v3720_v38, %v3458_v36  ;;  %v524_v41 = vpop.f32.mrb[3].mxu1 }
 0x3e5   :  { %v525_v43 = vadd.f32 %v3458_v36, %v524_v41 }
 0x3e6   :  { %v4939_v44 = vpack.c.bf16 %v533_v40, %v530_v39 }
 0x3e7   :  { %v4941_v45 = vpack.c.bf16 %v525_v43, %v522_v42 }
 0x3e9   :  { %v3727_v46 = vpop.f32.mrb[4].mxu1  ;;  %3741 = vmatprep.mubr.msk.bf16.mxu1 %vm686_vm2, %v4941_v45 }
 0x3ea   :  { %v593_v48 = vpop.f32.mrb[5].mxu1  ;;  %v602_v50 = vadd.f32 %v3727_v46, %v3463_v47 }
 0x3eb   :  { %v3728_v49 = vpop.f32.mrb[6].mxu1  ;;  %v594_v53 = vadd.f32 %v3463_v47, %v593_v48 }
 0x3ec   :  { %v605_v51 = vadd.f32 %v3728_v49, %v3463_v47  ;;  %v596_v52 = vpop.f32.mrb[7].mxu1 }
 0x3ed   :  { %v597_v54 = vadd.f32 %v3463_v47, %v596_v52 }
 0x3ee   :  { %v4945_v55 = vpack.c.bf16 %v605_v51, %v602_v50 }
 0x3ef   :  { %v4947_v56 = vpack.c.bf16 %v597_v54, %v594_v53 }
 0x3f0   :  { %859 = vrot.lane.b32.xlu1 %v4945_v55, %s4537_s7  ;;  %v697_v5 = vsel %vm686_vm2, %v4945_v55, 0 }
 0x3f1   :  { %v3735_v57 = vpop.f32.mrb[8].mxu1  ;;  %857 = vrot.lane.b32.xlu0 %v4947_v56, %s4537_s7  ;;  %3962 = vmatprep.subr.msk.bf16.mxu1 %vm686_vm2, %v4947_v56  ;;  %v694_v59 = vsel %vm686_vm2, %v4947_v56, 0 }
 0x3f2   :  { %v665_v60 = vpop.f32.mrb[9].mxu1  ;;  %3738 = vmatpush3.bf16.xpose.msra.mxu1 %v694_v59  ;;  %v674_v62 = vadd.f32 %v3735_v57, %v3468_v58 }
 0x3f3   :  { %v3736_v61 = vpop.f32.mrb[10].mxu1  ;;  %3963 = vmatprep.subr.msk.bf16.mxu1 %vm686_vm2, %v4945_v55  ;;  %v666_v1 = vadd.f32 %v3468_v58, %v665_v60 }
 0x3f4   :  { %v677_v63 = vadd.f32 %v3736_v61, %v3468_v58  ;;  %v668_v0 = vpop.f32.mrb[11].mxu1  ;;  %851 = vrot.lane.b32.xlu1 %v4941_v45, %s4537_s7 }
 0x3f5   :  { %v669_v2 = vadd.f32 %v3468_v58, %v668_v0 }
 0x3f6   :  { %v4961_v3 = vpack.c.bf16 %v677_v63, %v674_v62 }
 0x3f7   :  { %v4963_v4 = vpack.c.bf16 %v669_v2, %v666_v1 }
 0x3f8   :  { %853 = vrot.lane.b32.xlu1 %v4939_v44, %s4537_s7 }
 0x3fa   :  { %3740 = vmatpush3.bf16.xpose.msra.mxu1 %v697_v5 }
 0x3fb   :  { %3745 = vmatprep.subr.bf16.mxu1 %v4963_v4 }
 0x401   :  { %3742 = vmatmul.mubr.msk.bf16.vlgmr.msra.gmra.mrb[12].mxu1 %vm686_vm2, %v4939_v44 }
 0x402   :  { %3746 = vmatpush3.bf16.msra.mxu1 %v4963_v4 }
 0x403   :  { %3747 = vmatprep.subr.bf16.mxu1 %v4961_v3 }
 0x406   :  { %3748 = vmatpush3.bf16.msra.mxu1 %v4961_v3 }
 0x462   :  { %v860_v6 = vpop.permute.xlu1 %859 }
 0x463   :  { %v858_v7 = vpop.permute.xlu0 %857  ;;  %v871_v10 = vsel %vm686_vm2, %v860_v6, 0 }
 0x464   :  { %3964 = vmatprep.subr.msk.bf16.mxu0 %vm686_vm2, %v858_v7  ;;  %v868_v8 = vsel %vm686_vm2, %v858_v7, 0 }
 0x465   :  { %3754 = vmatpush3.bf16.xpose.msra.mxu0 %v868_v8 }
 0x466   :  { %3965 = vmatprep.subr.msk.bf16.mxu0 %vm686_vm2, %v860_v6  ;;  %v852_v9 = vpop.permute.xlu1 %851 }
 0x467   :  { %3757 = vmatprep.mubr.msk.bf16.mxu0 %vm686_vm2, %v852_v9 }
 0x46a   :  { %v854_v11 = vpop.permute.xlu1 %853 }
 0x46d   :  { %3756 = vmatpush3.bf16.xpose.msra.mxu0 %v871_v10 }
 0x474   :  { %3758 = vmatmul.mubr.msk.bf16.vlgmr.msra.gmra.mrb[8].mxu0 %vm686_vm2, %v854_v11 }
 0x4d4   :  { %v3743_v13 = vpop.f32.mrb[12].mxu1 }
 0x4d5   :  { %v733_v15 = vpop.f32.mrb[13].mxu1  ;;  %v742_v21 = vadd.f32 %v3743_v13, %v4989_v14 }
 0x4d6   :  { %v734_v17 = vadd.f32 %v733_v15, %v4984_v12  ;;  %v3744_v18 = vpop.f32.mrb[14].mxu1 }
 0x4d7   :  { %v736_v19 = vpop.f32.mrb[15].mxu1  ;;  %v745_v27 = vadd.f32 %v3744_v18, %v5003_v25  ;;  %v754_v28 = vsel %vm382_vm1, %v742_v21, -inf }
 0x4d8   :  { %v737_v22 = vadd.f32 %v736_v19, %v4994_v16  ;;  %v748_v24 = vsel %vm382_vm1, %v734_v17, -inf }
 0x4d9   :  { %749 = vmax.xlane.f32.xlu0 %v748_v24  ;;  %v757_v29 = vsel %vm382_vm1, %v745_v27, -inf }
 0x4da   :  { %v751_v26 = vsel %vm382_vm1, %v737_v22, -inf }
 0x4db   :  { %752 = vmax.xlane.f32.xlu1 %v751_v26 }
 0x4dd   :  { %755 = vmax.xlane.f32.xlu0 %v754_v28 }
 0x4e1   :  { %758 = vmax.xlane.f32.xlu0 %v757_v29 }
 0x547   :  { %v3759_v31 = vpop.f32.mrb[8].mxu0 }
 0x548   :  { %v907_v32 = vpop.f32.mrb[9].mxu0  ;;  %v916_v37 = vadd.f32 %v3759_v31, %v4989_v14 }
 0x549   :  { %v908_v34 = vadd.f32 %v907_v32, %v4984_v12  ;;  %v3760_v35 = vpop.f32.mrb[10].mxu0 }
 0x54a   :  { %v910_v36 = vpop.f32.mrb[11].mxu0  ;;  %v919_v40 = vadd.f32 %v3760_v35, %v5003_v25  ;;  %v928_v42 = vsel %vm382_vm1, %v916_v37, -inf }
 0x54b   :  { %v911_v38 = vadd.f32 %v910_v36, %v4994_v16  ;;  %v922_v39 = vsel %vm382_vm1, %v908_v34, -inf }
 0x54c   :  { %923 = vmax.xlane.f32.xlu0 %v922_v39  ;;  %v931_v43 = vsel %vm382_vm1, %v919_v40, -inf }
 0x54d   :  { %v925_v41 = vsel %vm382_vm1, %v911_v38, -inf }
 0x54e   :  { %926 = vmax.xlane.f32.xlu1 %v925_v41 }
 0x550   :  { %929 = vmax.xlane.f32.xlu0 %v928_v42 }
 0x552   :  { %932 = vmax.xlane.f32.xlu1 %v931_v43 }
 0x566   :  { %v750_v46 = vpop.xlane.xlu0 %749 }
 0x567   :  { %v760_v47 = vsub.f32 %v734_v17, %v750_v46 }
 0x568   :  { %v753_v48 = vpop.xlane.xlu1 %752 }
 0x569   :  { %v764_v51 = vmul.f32 1.442695, %v760_v47  ;;  %v761_v52 = vsub.f32 %v737_v22, %v753_v48 }
 0x56a   :  { %v756_v49 = vpop.xlane.xlu0 %755 }
 0x56b   :  { %v762_v50 = vsub.f32 %v742_v21, %v756_v49  ;;  %v766_v58 = vmul.f32 1.442695, %v761_v52 }
 0x56d   :  { %v768_v53 = vmul.f32 1.442695, %v762_v50 }
 0x56e   :  { %v759_v54 = vpop.xlane.xlu0 %758 }
 0x56f   :  { %4113 = vpow2.f32 %v768_v53  ;;  %v763_v57 = vsub.f32 %v745_v27, %v759_v54 }
 0x570   :  { %4115 = vpow2.f32 %v764_v51 }
 0x571   :  { %v770_v59 = vmul.f32 1.442695, %v763_v57 }
 0x573   :  { %4117 = vpow2.f32 %v770_v59 }
 0x574   :  { %4119 = vpow2.f32 %v766_v58 }
 0x579   :  { %v5017_v60 = vpop.eup %4113 }
 0x57a   :  { %v778_v61 = vsel %vm382_vm1, %v5017_v60, 0.0  ;;  %v5021_v62 = vpop.eup %4115 }
 0x57b   :  { %779 = vadd.xlane.f32.xlu0 %v778_v61  ;;  %v772_v0 = vsel %vm382_vm1, %v5021_v62, 0.0 }
 0x57d   :  { %v4118_v63 = vpop.eup %4117 }
 0x57e   :  { %v781_v1 = vsel %vm382_vm1, %v4118_v63, 0.0  ;;  %v4120_v2 = vpop.eup %4119 }
 0x57f   :  { %773 = vadd.xlane.f32.xlu0 %v772_v0  ;;  %782 = vadd.xlane.f32.xlu1 %v781_v1  ;;  %v775_v5 = vsel %vm382_vm1, %v4120_v2, 0.0 }
 0x583   :  { %776 = vadd.xlane.f32.xlu1 %v775_v5 }
 0x594   :  { %972 = vrot.lane.b32.xlu1 %v4961_v3, %s4537_s7 }
 0x5d9   :  { %v924_v6 = vpop.xlane.xlu0 %923 }
 0x5da   :  { %v934_v7 = vsub.f32 %v908_v34, %v924_v6 }
 0x5db   :  { %v927_v8 = vpop.xlane.xlu1 %926 }
 0x5dc   :  { %v935_v10 = vsub.f32 %v911_v38, %v927_v8  ;;  %v938_v13 = vmul.f32 1.442695, %v934_v7 }
 0x5dd   :  { %v930_v9 = vpop.xlane.xlu0 %929 }
 0x5de   :  { %v936_v11 = vsub.f32 %v916_v37, %v930_v9  ;;  %v940_v19 = vmul.f32 1.442695, %v935_v10 }
 0x5df   :  { %v933_v15 = vpop.xlane.xlu1 %932 }
 0x5e0   :  { %v942_v17 = vmul.f32 1.442695, %v936_v11  ;;  %v937_v18 = vsub.f32 %v919_v40, %v933_v15 }
 0x5e2   :  { %4121 = vpow2.f32 %v942_v17  ;;  %v944_v21 = vmul.f32 1.442695, %v937_v18 }
 0x5e3   :  { %4123 = vpow2.f32 %v938_v13 }
 0x5e4   :  { %4125 = vpow2.f32 %v944_v21 }
 0x5e5   :  { %4127 = vpow2.f32 %v940_v19 }
 0x5ec   :  { %v5029_v22 = vpop.eup %4121 }
 0x5ed   :  { %v5031_v24 = vpop.eup %4123  ;;  %v952_v26 = vsel %vm382_vm1, %v5029_v22, 0.0 }
 0x5ee   :  { %v5035_v27 = vpop.eup %4125  ;;  %953 = vadd.xlane.f32.xlu0 %v952_v26  ;;  %v946_v31 = vsel %vm382_vm1, %v5031_v24, 0.0 }
 0x5ef   :  { %v955_v28 = vsel %vm382_vm1, %v5035_v27, 0.0  ;;  %v5039_v29 = vpop.eup %4127 }
 0x5f0   :  { %956 = vadd.xlane.f32.xlu1 %v955_v28  ;;  %v949_v32 = vsel %vm382_vm1, %v5039_v29, 0.0 }
 0x5f2   :  { %947 = vadd.xlane.f32.xlu0 %v946_v31 }
 0x5f4   :  { %950 = vadd.xlane.f32.xlu1 %v949_v32 }
 0x605   :  { %1035 = vrot.lane.b32.xlu1 %v4947_v56, %s4538_s17 }
 0x608   :  { %970 = vrot.lane.b32.xlu0 %v4963_v4, %s4537_s7  ;;  %v780_v34 = vpop.xlane.xlu0 %779 }
 0x609   :  { %1037 = vrot.lane.b32.xlu1 %v4945_v55, %s4538_s17 }
 0x60c   :  { %v783_v35 = vpop.xlane.xlu1 %782  ;;  %1211 = vrot.lane.b32.xlu0 %v4947_v56, %s4539_s0  ;;  %v774_v36 = vpop.xlane.xlu0 %773 }
 0x60d   :  { %1031 = vrot.lane.b32.xlu1 %v4941_v45, %s4538_s17  ;;  %4129 = vrcp.f32 %v783_v35 }
 0x60e   :  { %4131 = vrcp.f32 %v774_v36 }
 0x60f   :  { %4133 = vrcp.f32 %v780_v34 }
 0x610   :  { %v777_v37 = vpop.xlane.xlu1 %776  ;;  %1033 = vrot.lane.b32.xlu0 %v4939_v44, %s4538_s17 }
 0x611   :  { %4135 = vrcp.f32 %v777_v37  ;;  %1213 = vrot.lane.b32.xlu1 %v4945_v55, %s4539_s0 }
 0x614   :  { %1207 = vrot.lane.b32.xlu0 %v4941_v45, %s4539_s0  ;;  %v973_v45 = vpop.permute.xlu1 %972 }
 0x615   :  { %1209 = vrot.lane.b32.xlu1 %v4939_v44, %s4539_s0 }
 0x617   :  { %v4130_v56 = vpop.eup %4129 }
 0x618   :  { %v4132_v38 = vpop.eup %4131  ;;  %v791_v41 = vmul.f32 %v4130_v56, %v4118_v63 }
 0x619   :  { %v4134_v39 = vpop.eup %4133  ;;  %v788_v42 = vmul.f32 %v4132_v38, %v5021_v62 }
 0x61a   :  { %v790_v46 = vmul.f32 %v4134_v39, %v5017_v60 }
 0x61b   :  { %v4136_v40 = vpop.eup %4135 }
 0x61c   :  { %v789_v43 = vmul.f32 %v4136_v40, %v4120_v2  ;;  %v793_v48 = vpack.c.bf16 %v791_v41, %v790_v46 }
 0x61e   :  { %v792_v47 = vpack.c.bf16 %v789_v43, %v788_v42 }
 0x620   :  { %3749 = vmatprep.mubr.msk.bf16.mxu1 %vm382_vm1, %v792_v47 }
 0x621   :  { %3750 = vmatmul.mubr.msk.bf16.vlgmr.msra.gmra.mrb[16].mxu1 %vm382_vm1, %v793_v48 }
 0x67b   :  { %v954_v55 = vpop.xlane.xlu0 %953 }
 0x67d   :  { %v957_v49 = vpop.xlane.xlu1 %956 }
 0x67e   :  { %4137 = vrcp.f32 %v957_v49 }
 0x67f   :  { %v948_v44 = vpop.xlane.xlu0 %947 }
 0x680   :  { %4139 = vrcp.f32 %v948_v44 }
 0x681   :  { %4141 = vrcp.f32 %v954_v55  ;;  %v951_v50 = vpop.xlane.xlu1 %950 }
 0x682   :  { %4143 = vrcp.f32 %v951_v50 }
 0x683   :  { %v971_v51 = vpop.permute.xlu0 %970 }
 0x684   :  { %3761 = vmatprep.subr.bf16.mxu1 %v971_v51 }
 0x685   :  { %v1036_v52 = vpop.permute.xlu1 %1035  ;;  %3762 = vmatpush3.bf16.msra.mxu1 %v971_v51 }
 0x686   :  { %3763 = vmatprep.subr.bf16.mxu1 %v973_v45  ;;  %v1046_v10 = vsel %vm686_vm2, %v1036_v52, 0 }
 0x687   :  { %v1212_v53 = vpop.permute.xlu0 %1211 }
 0x688   :  { %3968 = vmatprep.subr.msk.bf16.mxu0 %vm686_vm2, %v1212_v53  ;;  %v1222_v54 = vsel %vm686_vm2, %v1212_v53, 0  ;;  %v4138_v57 = vpop.eup %4137 }
 0x689   :  { %v1038_v58 = vpop.permute.xlu1 %1037  ;;  %3764 = vmatpush3.bf16.msra.mxu1 %v973_v45  ;;  %3786 = vmatpush3.bf16.xpose.msra.mxu0 %v1222_v54  ;;  %v965_v63 = vmul.f32 %v4138_v57, %v5035_v27 }
 0x68a   :  { %v4140_v59 = vpop.eup %4139  ;;  %3966 = vmatprep.subr.msk.bf16.mxu1 %vm686_vm2, %v1036_v52  ;;  %v1049_v15 = vsel %vm686_vm2, %v1038_v58, 0 }
 0x68b   :  { %v4142_v60 = vpop.eup %4141  ;;  %v1034_v61 = vpop.permute.xlu0 %1033  ;;  %v962_v1 = vmul.f32 %v4140_v59, %v5031_v24 }
 0x68c   :  { %v4144_v62 = vpop.eup %4143  ;;  %v964_v5 = vmul.f32 %v4142_v60, %v5029_v22 }
 0x68d   :  { %v1032_v0 = vpop.permute.xlu1 %1031  ;;  %v963_v2 = vmul.f32 %v4144_v62, %v5039_v29 }
 0x68e   :  { %v967_v8 = vpack.c.bf16 %v965_v63, %v964_v5 }
 0x68f   :  { %v1208_v6 = vpop.permute.xlu0 %1207  ;;  %v966_v7 = vpack.c.bf16 %v963_v2, %v962_v1 }
 0x690   :  { %3789 = vmatprep.mubr.msk.bf16.mxu0 %vm686_vm2, %v1208_v6 }
 0x691   :  { %v1214_v9 = vpop.permute.xlu1 %1213  ;;  %3765 = vmatprep.mubr.msk.bf16.mxu1 %vm382_vm1, %v966_v7 }
 0x692   :  { %3766 = vmatmul.mubr.msk.bf16.vlgmr.msra.gmra.mrb[20].mxu1 %vm382_vm1, %v967_v8  ;;  %3969 = vmatprep.subr.msk.bf16.mxu0 %vm686_vm2, %v1214_v9  ;;  %v1225_v11 = vsel %vm686_vm2, %v1214_v9, 0 }
 0x693   :  { %3770 = vmatpush3.bf16.xpose.msra.mxu1 %v1046_v10  ;;  %3773 = vmatprep.mubr.msk.bf16.mxu1 %vm686_vm2, %v1032_v0 }
 0x694   :  { %3967 = vmatprep.subr.msk.bf16.mxu1 %vm686_vm2, %v1038_v58  ;;  %3788 = vmatpush3.bf16.xpose.msra.mxu0 %v1225_v11 }
 0x695   :  { %v1210_v13 = vpop.permute.xlu1 %1209 }
 0x69b   :  { %3772 = vmatpush3.bf16.xpose.msra.mxu1 %v1049_v15  ;;  %3790 = vmatmul.mubr.msk.bf16.vlgmr.msra.gmra.mrb[12].mxu0 %vm686_vm2, %v1210_v13 }
 0x6a2   :  { %3774 = vmatmul.mubr.msk.bf16.vlgmr.msra.gmra.mrb[24].mxu1 %vm686_vm2, %v1034_v61 }
 0x6f4   :  { %v5085_v17 = vpop.f32.mrb[16].mxu1 }
 0x6f5   :  { %v5087_v18 = vpop.f32.mrb[17].mxu1 }
 0x6f6   :  { %v5089_v19 = vpop.f32.mrb[18].mxu1 }
 0x6f7   :  { %v5091_v21 = vpop.f32.mrb[19].mxu1 }
 0x765   :  { %v5093_v22 = vpop.f32.mrb[20].mxu1 }
 0x766   :  { %v5095_v24 = vpop.f32.mrb[21].mxu1 }
 0x767   :  { %v5097_v26 = vpop.f32.mrb[22].mxu1 }
 0x768   :  { %v4004_v27 = vpack.i.bf16 %v5097_v26, %v5093_v22  ;;  %v5101_v28 = vpop.f32.mrb[23].mxu1 }
 0x769   :  { %v3999_v29 = vpack.i.bf16 %v5101_v28, %v5095_v24 }
 0x76e   :  { %v3791_v31 = vpop.f32.mrb[12].mxu0 }
 0x76f   :  { %v1261_v32 = vpop.f32.mrb[13].mxu0  ;;  %v1270_v50 = vadd.f32 %v3791_v31, %v4989_v14 }
 0x770   :  { %v3792_v34 = vpop.f32.mrb[14].mxu0  ;;  %v1262_v49 = vadd.f32 %v1261_v32, %v4984_v12 }
 0x771   :  { %v1264_v35 = vpop.f32.mrb[15].mxu0  ;;  %v1273_v45 = vadd.f32 %v3792_v34, %v5003_v25  ;;  %v1282_v52 = vsel %vm382_vm1, %v1270_v50, -inf }
 0x772   :  { %v1265_v43 = vadd.f32 %v1264_v35, %v4994_v16  ;;  %v1276_v51 = vsel %vm382_vm1, %v1262_v49, -inf }
 0x773   :  { %v1285_v44 = vsel %vm382_vm1, %v1273_v45, -inf }
 0x774   :  { %v1279_v55 = vsel %vm382_vm1, %v1265_v43, -inf }
 0x775   :  { %v3775_v36 = vpop.f32.mrb[24].mxu1 }
 0x776   :  { %v1085_v37 = vpop.f32.mrb[25].mxu1  ;;  %v1094_v40 = vadd.f32 %v3775_v36, %v4989_v14 }
 0x777   :  { %v1086_v56 = vadd.f32 %v1085_v37, %v4984_v12  ;;  %v3776_v38 = vpop.f32.mrb[26].mxu1 }
 0x778   :  { %v1088_v39 = vpop.f32.mrb[27].mxu1  ;;  %v5115_v47 = vadd.f32 %v3776_v38, %v5003_v25  ;;  %v1106_v48 = vsel %vm382_vm1, %v1094_v40, -inf }
 0x779   :  { %v5108_v41 = vadd.f32 %v1088_v39, %v4994_v16  ;;  %v1100_v42 = vsel %vm382_vm1, %v1086_v56, -inf }
 0x77a   :  { %1101 = vmax.xlane.f32.xlu0 %v1100_v42  ;;  %v1109_v16 = vsel %vm382_vm1, %v5115_v47, -inf }
 0x77b   :  { %v1103_v46 = vsel %vm382_vm1, %v5108_v41, -inf }
 0x77c   :  { %1104 = vmax.xlane.f32.xlu1 %v1103_v46 }
 0x77e   :  { %1107 = vmax.xlane.f32.xlu0 %v1106_v48 }
 0x780   :  { %1280 = vmax.xlane.f32.xlu1 %v1279_v55 }
 0x782   :  { %1110 = vmax.xlane.f32.xlu0 %v1109_v16 }
 0x784   :  { %1286 = vmax.xlane.f32.xlu1 %v1285_v44 }
 0x786   :  { %1277 = vmax.xlane.f32.xlu0 %v1276_v51 }
 0x78a   :  { %1283 = vmax.xlane.f32.xlu0 %v1282_v52 }
 0x807   :  { %v1102_v25 = vpop.xlane.xlu0 %1101 }
 0x808   :  { %v1112_v6 = vsub.f32 %v1086_v56, %v1102_v25 }
 0x809   :  { %v1105_v53 = vpop.xlane.xlu1 %1104 }
 0x80a   :  { %v1116_v11 = vmul.f32 1.442695, %v1112_v6  ;;  %v4083_v6 = vld [vmem:[%s5619_s12] sm:$0xff]  }
 0x80b   :  { %v1108_v54 = vpop.xlane.xlu0 %1107 }
 0x80c   :  { %v1114_v14 = vsub.f32 %v1094_v40, %v1108_v54  ;;  %v1113_v40 = vsub.f32 %v5108_v41, %v1105_v53 }
 0x80d   :  { %v1281_v57 = vpop.xlane.xlu1 %1280 }
 0x80e   :  { %v1289_v12 = vsub.f32 %v1265_v43, %v1281_v57  ;;  %v1120_v7 = vmul.f32 1.442695, %v1114_v14  ;;  %v1118_v43 = vmul.f32 1.442695, %v1113_v40 }
 0x80f   :  { %v1111_v58 = vpop.xlane.xlu0 %1110 }
 0x810   :  { %v1294_v59 = vmul.f32 1.442695, %v1289_v12  ;;  %v1115_v39 = vsub.f32 %v5115_v47, %v1111_v58 }
 0x811   :  { %v1287_v60 = vpop.xlane.xlu1 %1286 }
 0x812   :  { %4145 = vpow2.f32 %v1294_v59  ;;  %v1291_v61 = vsub.f32 %v1273_v45, %v1287_v60  ;;  %v1122_v42 = vmul.f32 1.442695, %v1115_v39 }
 0x813   :  { %v1278_v62 = vpop.xlane.xlu0 %1277 }
 0x814   :  { %v1298_v63 = vmul.f32 1.442695, %v1291_v61  ;;  %v1288_v0 = vsub.f32 %v1262_v49, %v1278_v62 }
 0x816   :  { %4147 = vpow2.f32 %v1298_v63  ;;  %v1292_v1 = vmul.f32 1.442695, %v1288_v0 }
 0x817   :  { %v1284_v2 = vpop.xlane.xlu0 %1283 }
 0x818   :  { %4149 = vpow2.f32 %v1292_v1  ;;  %v1290_v5 = vsub.f32 %v1270_v50, %v1284_v2 }
 0x81a   :  { %v1296_v8 = vmul.f32 1.442695, %v1290_v5 }
 0x81c   :  { %v5127_v9 = vpop.eup %4145  ;;  %4151 = vpow2.f32 %v1296_v8 }
 0x81d   :  { %v1303_v10 = vsel %vm382_vm1, %v5127_v9, 0.0  ;;  %4153 = vpow2.f32 %v1120_v7 }
 0x81e   :  { %1304 = vadd.xlane.f32.xlu1 %v1303_v10  ;;  %4155 = vpow2.f32 %v1116_v11  ;;  %v4084_v10 = vld [vmem:[%s5619_s12 + $0x8] sm:$0xff]  }
 0x81f   :  { %4157 = vpow2.f32 %v1122_v42 }
 0x820   :  { %v5131_v13 = vpop.eup %4147  ;;  %4159 = vpow2.f32 %v1118_v43 }
 0x821   :  { %v1309_v15 = vsel %vm382_vm1, %v5131_v13, 0.0 }
 0x822   :  { %v5135_v31 = vpop.eup %4149  ;;  %1310 = vadd.xlane.f32.xlu1 %v1309_v15 }
 0x823   :  { %v1300_v32 = vsel %vm382_vm1, %v5135_v31, 0.0 }
 0x824   :  { %1301 = vadd.xlane.f32.xlu0 %v1300_v32 }
 0x826   :  { %v5139_v34 = vpop.eup %4151 }
 0x827   :  { %v1306_v35 = vsel %vm382_vm1, %v5139_v34, 0.0  ;;  %v4154_v36 = vpop.eup %4153 }
 0x828   :  { %1307 = vadd.xlane.f32.xlu0 %v1306_v35  ;;  %v1130_v37 = vsel %vm382_vm1, %v4154_v36, 0.0  ;;  %v4156_v56 = vpop.eup %4155 }
 0x829   :  { %v1124_v38 = vsel %vm382_vm1, %v4156_v56, 0.0  ;;  %v4158_v46 = vpop.eup %4157 }
 0x82a   :  { %v1133_v48 = vsel %vm382_vm1, %v4158_v46, 0.0  ;;  %v4160_v45 = vpop.eup %4159 }
 0x82b   :  { %v1127_v47 = vsel %vm382_vm1, %v4160_v45, 0.0 }
 0x82c   :  { %1131 = vadd.xlane.f32.xlu0 %v1130_v37 }
 0x830   :  { %1125 = vadd.xlane.f32.xlu0 %v1124_v38 }
 0x833   :  { %1148 = vrot.lane.b32.xlu1 %v4961_v3, %s4538_s17 }
 0x837   :  { %1322 = vrot.lane.b32.xlu1 %v4963_v4, %s4539_s0 }
 0x846   :  { %1146 = vrot.lane.b32.xlu0 %v4963_v4, %s4538_s17 }
 0x84a   :  { %4000 = vrot.lane.b32.xlu0 %v3999_v29, %s4540_s11 }
 0x85b   :  { %1134 = vadd.xlane.f32.xlu1 %v1133_v48 }
 0x85f   :  { %1128 = vadd.xlane.f32.xlu1 %v1127_v47 }
 0x870   :  { %1324 = vrot.lane.b32.xlu1 %v4961_v3, %s4539_s0 }
 0x874   :  { %4005 = vrot.lane.b32.xlu1 %v4004_v27, %s4540_s11 }
 0x8ab   :  { %v1305_v24 = vpop.xlane.xlu1 %1304 }
 0x8ac   :  { %4161 = vrcp.f32 %v1305_v24 }
 0x8af   :  { %v1311_v41 = vpop.xlane.xlu1 %1310 }
 0x8b1   :  { %v1302_v4 = vpop.xlane.xlu0 %1301 }
 0x8b2   :  { %4163 = vrcp.f32 %v1302_v4 }
 0x8b3   :  { %v1149_v49 = vpop.permute.xlu1 %1148 }
 0x8b5   :  { %v1308_v28 = vpop.xlane.xlu0 %1307 }
 0x8b6   :  { %v4162_v26 = vpop.eup %4161 }
 0x8b7   :  { %v1323_v44 = vpop.permute.xlu1 %1322  ;;  %v1317_v60 = vmul.f32 %v4162_v26, %v5127_v9 }
 0x8b9   :  { %v1132_v29 = vpop.xlane.xlu0 %1131 }
 0x8bc   :  { %v4164_v27 = vpop.eup %4163 }
 0x8bd   :  { %v1126_v55 = vpop.xlane.xlu0 %1125  ;;  %v1316_v12 = vmul.f32 %v4164_v27, %v5135_v31 }
 0x8bf   :  { %v1320_v63 = vpack.c.bf16 %v1317_v60, %v1316_v12 }
 0x8c1   :  { %v1147_v16 = vpop.permute.xlu0 %1146 }
 0x8c2   :  { %3777 = vmatprep.subr.bf16.mxu1 %v1147_v16 }
 0x8c3   :  { %3778 = vmatpush3.bf16.msra.mxu1 %v1147_v16 }
 0x8c4   :  { %3779 = vmatprep.subr.bf16.mxu1 %v1149_v49 }
 0x8c5   :  { %v4001_v38 = vpop.permute.xlu0 %4000 }
 0x8c6   :  { %v4003_v40 = vunpack.i.h.bf16 %v4001_v38  ;;  %v4002_v42 = vunpack.i.l.bf16 %v4001_v38 }
 0x8c7   :  { %3780 = vmatpush3.bf16.msra.mxu1 %v1149_v49 }
 0x8c8   :  { %3793 = vmatprep.subr.bf16.mxu1 %v1323_v44 }
 0x8e8   :  { %v1135_v3 = vpop.xlane.xlu1 %1134 }
 0x8e9   :  { %4165 = vrcp.f32 %v1135_v3 }
 0x8ea   :  { %4167 = vrcp.f32 %v1126_v55 }
 0x8eb   :  { %4169 = vrcp.f32 %v1132_v29  ;;  %v1431_v29 = vsel %vm686_vm2, %v5087_v18, %v4002_v42 }
 0x8ec   :  { %v1129_v22 = vpop.xlane.xlu1 %1128 }
 0x8ed   :  { %4171 = vrcp.f32 %v1129_v22 }
 0x8ee   :  { %4173 = vrcp.f32 %v1308_v28  ;;  %v1432_v28 = vsel %vm686_vm2, %v5091_v21, %v4003_v40 }
 0x8ef   :  { %4175 = vrcp.f32 %v1311_v41 }
 0x8f0   :  { %v1325_v14 = vpop.permute.xlu1 %1324 }
 0x8f3   :  { %v4166_v50 = vpop.eup %4165 }
 0x8f4   :  { %v4168_v51 = vpop.eup %4167  ;;  %v1143_v53 = vmul.f32 %v4166_v50, %v4158_v46 }
 0x8f5   :  { %v4170_v52 = vpop.eup %4169  ;;  %v1140_v54 = vmul.f32 %v4168_v51, %v4156_v56  ;;  %v4006_v56 = vpop.permute.xlu1 %4005 }
 0x8f6   :  { %v1142_v58 = vmul.f32 %v4170_v52, %v4154_v36  ;;  %v4008_v46 = vunpack.i.h.bf16 %v4006_v56  ;;  %v4007_v48 = vunpack.i.l.bf16 %v4006_v56 }
 0x8f7   :  { %v4172_v25 = vpop.eup %4171 }
 0x8f8   :  { %v1141_v57 = vmul.f32 %v4172_v25, %v4160_v45  ;;  %v1145_v61 = vpack.c.bf16 %v1143_v53, %v1142_v58  ;;  %v4174_v62 = vpop.eup %4173  ;;  %v1434_v55 = vsel %vm686_vm2, %v5089_v19, %v4008_v46  ;;  %v1433_v49 = vsel %vm686_vm2, %v5085_v17, %v4007_v48  ;;  %v4086_v46 = vld [vmem:[%s5623_s16 + $0x8] sm:$0xff]  }
 0x8f9   :  { %v4176_v0 = vpop.eup %4175  ;;  %v1318_v1 = vmul.f32 %v4174_v62, %v5139_v34 }
 0x8fa   :  { %v1144_v59 = vpack.c.bf16 %v1141_v57, %v1140_v54  ;;  %v1319_v2 = vmul.f32 %v4176_v0, %v5131_v13  ;;  %v3489_v54 = vld [vmem:[#allocation11] ss:$0 sm:$0xff] }
 0x8fc   :  { %3781 = vmatprep.mubr.msk.bf16.mxu1 %vm382_vm1, %v1144_v59  ;;  %v1321_v5 = vpack.c.bf16 %v1319_v2, %v1318_v1 }
 0x8fd   :  { %3782 = vmatmul.mubr.msk.bf16.vlgmr.msra.gmra.mrb[28].mxu1 %vm382_vm1, %v1145_v61 }
 0x8fe   :  { %3794 = vmatpush3.bf16.msra.mxu1 %v1323_v44  ;;  %3797 = vmatprep.mubr.msk.bf16.mxu1 %vm382_vm1, %v1320_v63 }
 0x8ff   :  { %3795 = vmatprep.subr.bf16.mxu1 %v1325_v14 }
 0x902   :  { %3796 = vmatpush3.bf16.msra.mxu1 %v1325_v14 }
 0x903   :  { %3801 = vmatprep.subr.bf16.mxu1 %v4083_v6 }
 0x905   :  { %3798 = vmatmul.mubr.msk.bf16.vlgmr.msra.gmra.mrb[32].mxu1 %vm382_vm1, %v1321_v5 }
 0x906   :  { %3802 = vmatpush3.bf16.msra.mxu1 %v4083_v6 }
 0x907   :  { %3803 = vmatprep.subr.bf16.mxu1 %v4084_v10 }
 0x90a   :  { %3804 = vmatpush3.bf16.msra.mxu1 %v4084_v10 }
 0x9d0   :  { %v3783_v7 = vpop.f32.mrb[28].mxu1 }
 0x9d1   :  { %v1192_v8 = vpop.f32.mrb[29].mxu1 }
 0x9d2   :  { %v3784_v9 = vpop.f32.mrb[30].mxu1 }
 0x9d3   :  { %v4009_v11 = vpack.i.bf16 %v3784_v9, %v3783_v7  ;;  %v1195_v15 = vpop.f32.mrb[31].mxu1 }
 0x9d4   :  { %v4014_v13 = vpack.i.bf16 %v1195_v15, %v1192_v8 }
 0x9d5   :  { %4010 = vrot.lane.b32.xlu1 %v4009_v11, %s4527_s3 }
 0x9d6   :  { %4015 = vrot.lane.b32.xlu0 %v4014_v13, %s4527_s3 }
 0x9d8   :  { %v3799_v31 = vpop.f32.mrb[32].mxu1 }
 0x9d9   :  { %v1368_v32 = vpop.f32.mrb[33].mxu1 }
 0x9da   :  { %v3800_v34 = vpop.f32.mrb[34].mxu1 }
 0x9db   :  { %v4024_v35 = vpack.i.bf16 %v3800_v34, %v3799_v31  ;;  %v1371_v36 = vpop.f32.mrb[35].mxu1 }
 0x9dc   :  { %v4019_v37 = vpack.i.bf16 %v1371_v36, %v1368_v32 }
 0x9dd   :  { %4025 = vrot.lane.b32.xlu1 %v4024_v35, %s4541_s25 }
 0x9de   :  { %4020 = vrot.lane.b32.xlu0 %v4019_v37, %s4541_s25 }
 0xa47   :  { %v4011_v39 = vpop.permute.xlu1 %4010 }
 0xa48   :  { %v4016_v43 = vpop.permute.xlu0 %4015  ;;  %v4013_v45 = vunpack.i.h.bf16 %v4011_v39  ;;  %v4012_v47 = vunpack.i.l.bf16 %v4011_v39 }
 0xa49   :  { %v4018_v4 = vunpack.i.h.bf16 %v4016_v43  ;;  %v4017_v24 = vunpack.i.l.bf16 %v4016_v43  ;;  %v4085_v43 = vld [vmem:[%s5623_s16] sm:$0xff]  }
 0xa4a   :  { %v1439_v22 = vsel %vm1435_vm3, %v1434_v55, %v4013_v45  ;;  %v1438_v26 = vsel %vm1435_vm3, %v1433_v49, %v4012_v47  ;;  %3809 = vmatprep.subr.bf16.mxu0 %v4085_v43 }
 0xa4b   :  { %v1436_v50 = vsel %vm1435_vm3, %v1431_v29, %v4017_v24  ;;  %v1437_v18 = vsel %vm1435_vm3, %v1432_v28, %v4018_v4  ;;  %3810 = vmatpush3.bf16.msra.mxu0 %v4085_v43 }
 0xa4c   :  { %3811 = vmatprep.subr.bf16.mxu0 %v4086_v46 }
 0xa4f   :  { %v4026_v41 = vpop.permute.xlu1 %4025  ;;  %3812 = vmatpush3.bf16.msra.mxu0 %v4086_v46 }
 0xa50   :  { %v4028_v16 = vunpack.i.h.bf16 %v4026_v41  ;;  %v4027_v44 = vunpack.i.l.bf16 %v4026_v41  ;;  %v4021_v3 = vpop.permute.xlu0 %4020 }
 0xa51   :  { %v4023_v27 = vunpack.i.h.bf16 %v4021_v3  ;;  %v4022_v21 = vunpack.i.l.bf16 %v4021_v3 }
 0xa52   :  { %v1444_v51 = vsel %vm1440_vm4, %v1439_v22, %v4028_v16  ;;  %v1443_v19 = vsel %vm1440_vm4, %v1438_v26, %v4027_v44  ;;  %v3494_v22 = vld [vmem:[#allocation13] ss:$0 sm:$0xff] }
 0xa53   :  { %v1446_v52 = vpack.c.bf16 %v1444_v51, %v1443_v19  ;;  %v1441_v17 = vsel %vm1440_vm4, %v1436_v50, %v4022_v21  ;;  %v1442_v25 = vsel %vm1440_vm4, %v1437_v18, %v4023_v27  ;;  %v3495_v51 = vld [vmem:[#allocation14] ss:$0 sm:$0xff] }
 0xa54   :  { %v1445_v53 = vpack.c.bf16 %v1442_v25, %v1441_v17 }
 0xa56   :  { %3805 = vmatprep.mubr.msk.bf16.mxu1 %vm382_vm1, %v1445_v53 }
 0xa57   :  { %3806 = vmatmul.mubr.msk.bf16.vlgmr.msra.gmra.mrb[36].mxu1 %vm382_vm1, %v1446_v52 }
 0xb2a   :  { %v3807_v57 = vpop.f32.mrb[36].mxu1 }
 0xb2b   :  { %v1510_v12 = vpop.f32.mrb[37].mxu1  ;;  %v1519_v58 = vadd.f32 %v3807_v57, %v3489_v54 }
 0xb2c   :  { %v1511_v59 = vadd.f32 %v3489_v54, %v1510_v12  ;;  %v3808_v60 = vpop.f32.mrb[38].mxu1 }
 0xb2d   :  { %v1513_v61 = vpop.f32.mrb[39].mxu1  ;;  %v5205_v0 = vadd.f32 %v1519_v58, %v4899_v30  ;;  %v1522_v14 = vadd.f32 %v3808_v60, %v3489_v54 }
 0xb2e   :  { %v5202_v62 = vadd.f32 %v1511_v59, %v4885_v20  ;;  %v1514_v63 = vadd.f32 %v3489_v54, %v1513_v61 }
 0xb2f   :  { %v5215_v6 = vadd.f32 %v1522_v14, %v4901_v33  ;;  %v1537_v20 = vsel %vm382_vm1, %v5205_v0, 0.0  ;;  %v4088_v14 = vld [vmem:[%s5625_s18 + $0x8] sm:$0xff]  }
 0xb30   :  { %v5208_v1 = vadd.f32 %v1514_v63, %v4887_v23  ;;  %v1531_v2 = vsel %vm382_vm1, %v5202_v62, 0.0  ;;  %v4087_v63 = vld [vmem:[%s5625_s18] sm:$0xff]  }
 0xb31   :  { %1532 = vadd.xlane.f32.xlu0 %v1531_v2  ;;  %v1540_v30 = vsel %vm382_vm1, %v5215_v6, 0.0  ;;  %3817 = vmatprep.subr.bf16.mxu1 %v4087_v63  ;;  %v4089_v2 = vld [vmem:[%s5625_s18 + $0x10] sm:$0xff]  }
 0xb32   :  { %v1534_v5 = vsel %vm382_vm1, %v5208_v1, 0.0  ;;  %3818 = vmatpush3.bf16.msra.mxu1 %v4087_v63 }
 0xb33   :  { %1535 = vadd.xlane.f32.xlu1 %v1534_v5  ;;  %3819 = vmatprep.subr.bf16.mxu1 %v4088_v14  ;;  %v4090_v5 = vld [vmem:[%s5625_s18 + $0x18] sm:$0xff]  }
 0xb35   :  { %1538 = vadd.xlane.f32.xlu0 %v1537_v20  ;;  %v3496_v20 = vld [vmem:[#allocation16] ss:$0 sm:$0xff] }
 0xb36   :  { %3820 = vmatpush3.bf16.msra.mxu1 %v4088_v14 }
 0xb37   :  { %3821 = vmatprep.subr.bf16.mxu1 %v4089_v2 }
 0xb39   :  { %1541 = vadd.xlane.f32.xlu0 %v1540_v30 }
 0xb3a   :  { %3822 = vmatpush3.bf16.msra.mxu1 %v4089_v2 }
 0xb3b   :  { %3823 = vmatprep.subr.bf16.mxu1 %v4090_v5 }
 0xb3e   :  { %3824 = vmatpush3.bf16.msra.mxu1 %v4090_v5 }
 0xbbe   :  { %v1533_v23 = vpop.xlane.xlu0 %1532 }
 0xbbf   :  { %v1543_v7 = vmul.f32 0.03125, %v1533_v23 }
 0xbc0   :  { %v1536_v8 = vpop.xlane.xlu1 %1535 }
 0xbc1   :  { %v1547_v9 = vsub.f32 %v5202_v62, %v1543_v7  ;;  %v1544_v10 = vmul.f32 0.03125, %v1536_v8 }
 0xbc2   :  { %v1539_v11 = vpop.xlane.xlu0 %1538 }
 0xbc3   :  { %v1548_v15 = vsub.f32 %v5208_v1, %v1544_v10  ;;  %v1545_v13 = vmul.f32 0.03125, %v1539_v11  ;;  %v1551_v33 = vmul.f32 %v1547_v9, %v1547_v9 }
 0xbc5   :  { %v1549_v31 = vsub.f32 %v5205_v0, %v1545_v13  ;;  %v1555_v32 = vsel %vm382_vm1, %v1551_v33, 0.0  ;;  %v1552_v34 = vmul.f32 %v1548_v15, %v1548_v15 }
 0xbc6   :  { %1556 = vadd.xlane.f32.xlu0 %v1555_v32  ;;  %v1542_v35 = vpop.xlane.xlu0 %1541 }
 0xbc7   :  { %v1546_v36 = vmul.f32 0.03125, %v1542_v35  ;;  %v1558_v37 = vsel %vm382_vm1, %v1552_v34, 0.0  ;;  %v1553_v56 = vmul.f32 %v1549_v31, %v1549_v31 }
 0xbc8   :  { %1559 = vadd.xlane.f32.xlu1 %v1558_v37 }
 0xbc9   :  { %v1550_v38 = vsub.f32 %v5215_v6, %v1546_v36  ;;  %v1561_v39 = vsel %vm382_vm1, %v1553_v56, 0.0 }
 0xbca   :  { %1562 = vadd.xlane.f32.xlu0 %v1561_v39 }
 0xbcb   :  { %v1554_v40 = vmul.f32 %v1550_v38, %v1550_v38 }
 0xbcd   :  { %v1564_v42 = vsel %vm382_vm1, %v1554_v40, 0.0 }
 0xbce   :  { %1565 = vadd.xlane.f32.xlu1 %v1564_v42 }
 0xc53   :  { %v1557_v48 = vpop.xlane.xlu0 %1556 }
 0xc54   :  { %v1567_v45 = vmul.f32 0.03125, %v1557_v48 }
 0xc55   :  { %v1560_v47 = vpop.xlane.xlu1 %1559 }
 0xc56   :  { %v1571_v4 = vadd.f32 1e-06, %v1567_v45  ;;  %v1568_v24 = vmul.f32 0.03125, %v1560_v47 }
 0xc57   :  { %v1563_v28 = vpop.xlane.xlu0 %1562 }
 0xc58   :  { %4177 = vrsqrt.f32 %v1571_v4  ;;  %v1572_v29 = vadd.f32 1e-06, %v1568_v24  ;;  %v1569_v41 = vmul.f32 0.03125, %v1563_v28 }
 0xc5a   :  { %4179 = vrsqrt.f32 %v1572_v29  ;;  %v1573_v55 = vadd.f32 1e-06, %v1569_v41 }
 0xc5b   :  { %v1566_v49 = vpop.xlane.xlu1 %1565 }
 0xc5c   :  { %4181 = vrsqrt.f32 %v1573_v55  ;;  %v1570_v16 = vmul.f32 0.03125, %v1566_v49 }
 0xc5e   :  { %v1574_v44 = vadd.f32 1e-06, %v1570_v16 }
 0xc60   :  { %4183 = vrsqrt.f32 %v1574_v44 }
 0xc62   :  { %v4178_v3 = vpop.eup %4177 }
 0xc63   :  { %v1579_v26 = vmul.f32 %v4178_v3, %v1547_v9 }
 0xc64   :  { %v4180_v27 = vpop.eup %4179 }
 0xc65   :  { %v1580_v21 = vmul.f32 %v4180_v27, %v1548_v15  ;;  %v1589_v50 = vmul.f32 %v3494_v22, %v1579_v26 }
 0xc66   :  { %v4182_v18 = vpop.eup %4181 }
 0xc67   :  { %v1581_v19 = vmul.f32 %v4182_v18, %v1549_v31  ;;  %v1590_v52 = vmul.f32 %v3494_v22, %v1580_v21  ;;  %v1599_v17 = vadd.f32 %v3495_v51, %v1589_v50 }
 0xc69   :  { %v1600_v25 = vadd.f32 %v3495_v51, %v1590_v52  ;;  %v1591_v54 = vmul.f32 %v3494_v22, %v1581_v19 }
 0xc6a   :  { %v4184_v53 = vpop.eup %4183 }
 0xc6b   :  { %v1582_v57 = vmul.f32 %v4184_v53, %v1550_v38  ;;  %v1603_v12 = vpack.c.bf16 %v1600_v25, %v1599_v17  ;;  %v1601_v59 = vadd.f32 %v3495_v51, %v1591_v54  ;;  %v3501_v25 = vld [vmem:[%s5626_s19] ss:$0 sm:$0xff] }
 0xc6d   :  { %v1592_v58 = vmul.f32 %v3494_v22, %v1582_v57  ;;  %3813 = vmatprep.mubr.msk.bf16.mxu0 %vm382_vm1, %v1603_v12 }
 0xc6f   :  { %v1602_v60 = vadd.f32 %v3495_v51, %v1592_v58 }
 0xc71   :  { %v1604_v61 = vpack.c.bf16 %v1602_v60, %v1601_v59 }
 0xc73   :  { %3814 = vmatmul.mubr.msk.bf16.vlgmr.msra.gmra.mrb[16].mxu0 %vm382_vm1, %v1604_v61 }
 0xd46   :  { %v3815_v30 = vpop.f32.mrb[16].mxu0 }
 0xd47   :  { %v1677_v23 = vadd.f32 %v3815_v30, %v3496_v20  ;;  %v1668_v7 = vpop.f32.mrb[17].mxu0 }
 0xd48   :  { %v1669_v8 = vadd.f32 %v3496_v20, %v1668_v7  ;;  %v3816_v9 = vpop.f32.mrb[18].mxu0 }
 0xd49   :  { %v1685_v10 = vmul.f32 %v1677_v23, %v1677_v23  ;;  %v1680_v11 = vadd.f32 %v3816_v9, %v3496_v20  ;;  %v1671_v15 = vpop.f32.mrb[19].mxu0 }
 0xd4a   :  { %v1683_v13 = vmul.f32 %v1669_v8, %v1669_v8  ;;  %v1672_v33 = vadd.f32 %v3496_v20, %v1671_v15 }
 0xd4b   :  { %v1689_v31 = vmul.f32 %v1685_v10, %v1677_v23  ;;  %v1686_v32 = vmul.f32 %v1680_v11, %v1680_v11 }
 0xd4c   :  { %v1687_v34 = vmul.f32 %v1683_v13, %v1669_v8  ;;  %v1684_v35 = vmul.f32 %v1672_v33, %v1672_v33 }
 0xd4d   :  { %v1693_v36 = vmul.f32 0.044715, %v1689_v31  ;;  %v1690_v37 = vmul.f32 %v1686_v32, %v1680_v11 }
 0xd4e   :  { %v1691_v56 = vmul.f32 0.044715, %v1687_v34  ;;  %v1688_v38 = vmul.f32 %v1684_v35, %v1672_v33 }
 0xd4f   :  { %v1697_v39 = vadd.f32 %v1693_v36, %v1677_v23  ;;  %v1694_v40 = vmul.f32 0.044715, %v1690_v37 }
 0xd50   :  { %v1695_v42 = vadd.f32 %v1691_v56, %v1669_v8  ;;  %v1692_v43 = vmul.f32 0.044715, %v1688_v38 }
 0xd51   :  { %v1701_v46 = vmul.f32 0.7978846, %v1697_v39  ;;  %v1698_v48 = vadd.f32 %v1694_v40, %v1680_v11  ;;  %v4091_v40 = vld [vmem:[%s5655_s24 + $0x10] sm:$0xff]  }
 0xd52   :  { %v1699_v45 = vmul.f32 0.7978846, %v1695_v42  ;;  %v1696_v47 = vadd.f32 %v1692_v43, %v1672_v33  ;;  %v4092_v42 = vld [vmem:[%s5617_s10 + $0x10] sm:$0xff]   ;;  %3829 = vmatprep.subr.bf16.mxu0 %v4091_v40  ;;  %v4093_v43 = vld [vmem:[%s5655_s24 + $0x18] sm:$0xff]  }
 0xd53   :  { %4185 = vtanh.f32 %v1701_v46  ;;  %v1702_v4 = vmul.f32 0.7978846, %v1698_v48  ;;  %3845 = vmatprep.subr.bf16.mxu1 %v4092_v42  ;;  %3830 = vmatpush3.bf16.msra.mxu0 %v4091_v40  ;;  %v4094_v46 = vld [vmem:[%s5617_s10 + $0x18] sm:$0xff]   ;;  %v4095_v48 = vld [vmem:[%s5615_s8 + $0x10] sm:$0xff]  }
 0xd54   :  { %4187 = vtanh.f32 %v1699_v45  ;;  %v1700_v24 = vmul.f32 0.7978846, %v1696_v47  ;;  %3831 = vmatprep.subr.bf16.mxu0 %v4093_v43 }
 0xd55   :  { %4189 = vtanh.f32 %v1702_v4 }
 0xd56   :  { %4191 = vtanh.f32 %v1700_v24 }
 0xd57   :  { %3832 = vmatpush3.bf16.msra.mxu0 %v4093_v43 }
 0xd58   :  { %3837 = vmatprep.subr.bf16.mxu0 %v4095_v48 }
 0xd5d   :  { %v4186_v28 = vpop.eup %4185 }
 0xd5e   :  { %v4188_v29 = vpop.eup %4187  ;;  %v1709_v41 = vadd.f32 1.0, %v4186_v28 }
 0xd5f   :  { %v4190_v55 = vpop.eup %4189  ;;  %v1707_v49 = vadd.f32 1.0, %v4188_v29 }
 0xd60   :  { %v4192_v16 = vpop.eup %4191  ;;  %v1713_v44 = vmul.f32 0.5, %v1709_v41  ;;  %v1710_v3 = vadd.f32 1.0, %v4190_v55 }
 0xd61   :  { %v1711_v22 = vmul.f32 0.5, %v1707_v49  ;;  %v1708_v26 = vadd.f32 1.0, %v4192_v16 }
 0xd62   :  { %v1714_v27 = vmul.f32 0.5, %v1710_v3  ;;  %v1717_v50 = vmul.f32 %v1713_v44, %v1677_v23 }
 0xd63   :  { %v1712_v21 = vmul.f32 0.5, %v1708_v26  ;;  %v1715_v51 = vmul.f32 %v1711_v22, %v1669_v8  ;;  %v3508_v26 = vld [vmem:[#allocation2 + $0x1] ss:$0 sm:$0xff] }
 0xd64   :  { %v1718_v18 = vmul.f32 %v1714_v27, %v1680_v11 }
 0xd65   :  { %v1716_v19 = vmul.f32 %v1712_v21, %v1672_v33 }
 0xd66   :  { %v1720_v52 = vpack.c.bf16 %v1718_v18, %v1717_v50 }
 0xd67   :  { %v1719_v17 = vpack.c.bf16 %v1716_v19, %v1715_v51  ;;  %v3509_v19 = vld [vmem:[#allocation5 + $0x1] ss:$0 sm:$0xff] }
 0xd69   :  { %3825 = vmatprep.mubr.msk.bf16.mxu1 %vm320_vm0, %v1719_v17 }
 0xd6a   :  { %3826 = vmatmul.mubr.msk.bf16.vlgmr.msra.gmra.mrb[40].mxu1 %vm320_vm0, %v1720_v52 }
 0xd6b   :  { %3846 = vmatpush3.bf16.msra.mxu1 %v4092_v42  ;;  %v3523_v42 = vld [vmem:[#allocation8 + $0x1] ss:$0 sm:$0xff] }
 0xd6c   :  { %3847 = vmatprep.subr.bf16.mxu1 %v4094_v46 }
 0xd6f   :  { %3848 = vmatpush3.bf16.msra.mxu1 %v4094_v46 }
 0xe3d   :  { %v3827_v53 = vpop.f32.mrb[40].mxu1 }
 0xe3e   :  { %v1800_v54 = vpop.f32.mrb[41].mxu1  ;;  %v1809_v57 = vadd.f32 %v3827_v53, %v3501_v25 }
 0xe3f   :  { %v1801_v12 = vadd.f32 %v3501_v25, %v1800_v54  ;;  %v3828_v58 = vpop.f32.mrb[42].mxu1 }
 0xe40   :  { %v1803_v59 = vpop.f32.mrb[43].mxu1  ;;  %v1812_v61 = vadd.f32 %v3828_v58, %v3501_v25  ;;  %v5258_v14 = vadd.f32 %v1809_v57, %v5205_v0 }
 0xe41   :  { %v5255_v60 = vadd.f32 %v1801_v12, %v5202_v62  ;;  %v1804_v63 = vadd.f32 %v3501_v25, %v1803_v59 }
 0xe42   :  { %v5266_v20 = vadd.f32 %v1812_v61, %v5215_v6  ;;  %v1829_v62 = vsel %vm382_vm1, %v5258_v14, 0.0 }
 0xe43   :  { %v5261_v2 = vadd.f32 %v1804_v63, %v5208_v1  ;;  %v1823_v5 = vsel %vm382_vm1, %v5255_v60, 0.0 }
 0xe44   :  { %1824 = vadd.xlane.f32.xlu0 %v1823_v5  ;;  %v1832_v0 = vsel %vm382_vm1, %v5266_v20, 0.0 }
 0xe45   :  { %v1826_v30 = vsel %vm382_vm1, %v5261_v2, 0.0 }
 0xe46   :  { %1827 = vadd.xlane.f32.xlu1 %v1826_v30  ;;  %v4096_v30 = vld [vmem:[%s5615_s8 + $0x18] sm:$0xff]  }
 0xe48   :  { %1830 = vadd.xlane.f32.xlu0 %v1829_v62 }
 0xe4a   :  { %1833 = vadd.xlane.f32.xlu1 %v1832_v0  ;;  %v3514_v0 = vld [vmem:[#allocation7 + $0x1] ss:$0 sm:$0xff] }
 0xed1   :  { %v1825_v1 = vpop.xlane.xlu0 %1824 }
 0xed2   :  { %v1835_v23 = vmul.f32 0.03125, %v1825_v1 }
 0xed3   :  { %v1828_v7 = vpop.xlane.xlu1 %1827 }
 0xed4   :  { %v1839_v8 = vsub.f32 %v5255_v60, %v1835_v23  ;;  %v1836_v9 = vmul.f32 0.03125, %v1828_v7  ;;  %v3532_v23 = vld [vmem:[#allocation10 + $0x1] ss:$0 sm:$0xff] }
 0xed5   :  { %v1831_v6 = vpop.xlane.xlu0 %1830 }
 0xed6   :  { %v1840_v10 = vsub.f32 %v5261_v2, %v1836_v9  ;;  %v1837_v11 = vmul.f32 0.03125, %v1831_v6  ;;  %v1843_v15 = vmul.f32 %v1839_v8, %v1839_v8 }
 0xed7   :  { %v1834_v13 = vpop.xlane.xlu1 %1833 }
 0xed8   :  { %v1841_v33 = vsub.f32 %v5258_v14, %v1837_v11  ;;  %v1838_v31 = vmul.f32 0.03125, %v1834_v13  ;;  %v1847_v32 = vsel %vm382_vm1, %v1843_v15, 0.0  ;;  %v1844_v34 = vmul.f32 %v1840_v10, %v1840_v10 }
 0xed9   :  { %1848 = vadd.xlane.f32.xlu0 %v1847_v32 }
 0xeda   :  { %v1842_v35 = vsub.f32 %v5266_v20, %v1838_v31  ;;  %v1850_v36 = vsel %vm382_vm1, %v1844_v34, 0.0  ;;  %v1845_v37 = vmul.f32 %v1841_v33, %v1841_v33 }
 0xedb   :  { %1851 = vadd.xlane.f32.xlu1 %v1850_v36 }
 0xedc   :  { %v1853_v56 = vsel %vm382_vm1, %v1845_v37, 0.0  ;;  %v1846_v38 = vmul.f32 %v1842_v35, %v1842_v35 }
 0xedd   :  { %1854 = vadd.xlane.f32.xlu0 %v1853_v56 }
 0xede   :  { %v1856_v39 = vsel %vm382_vm1, %v1846_v38, 0.0 }
 0xedf   :  { %1857 = vadd.xlane.f32.xlu1 %v1856_v39 }
 0xf66   :  { %v1849_v45 = vpop.xlane.xlu0 %1848 }
 0xf67   :  { %v1859_v47 = vmul.f32 0.03125, %v1849_v45 }
 0xf68   :  { %v1852_v4 = vpop.xlane.xlu1 %1851 }
 0xf69   :  { %v1863_v24 = vadd.f32 1e-06, %v1859_v47  ;;  %v1860_v28 = vmul.f32 0.03125, %v1852_v4 }
 0xf6a   :  { %v1855_v29 = vpop.xlane.xlu0 %1854 }
 0xf6b   :  { %4193 = vrsqrt.f32 %v1863_v24  ;;  %v1864_v41 = vadd.f32 1e-06, %v1860_v28  ;;  %v1861_v55 = vmul.f32 0.03125, %v1855_v29 }
 0xf6c   :  { %v1858_v49 = vpop.xlane.xlu1 %1857 }
 0xf6d   :  { %4195 = vrsqrt.f32 %v1864_v41  ;;  %v1865_v16 = vadd.f32 1e-06, %v1861_v55  ;;  %v1862_v44 = vmul.f32 0.03125, %v1858_v49 }
 0xf6f   :  { %4197 = vrsqrt.f32 %v1865_v16  ;;  %v1866_v3 = vadd.f32 1e-06, %v1862_v44  ;;  %v5337_v44 = vld [vmem:[%s5656_s4] sm:$0xff] }
 0xf71   :  { %4199 = vrsqrt.f32 %v1866_v3 }
 0xf75   :  { %v4194_v22 = vpop.eup %4193 }
 0xf76   :  { %v1871_v27 = vmul.f32 %v4194_v22, %v1839_v8 }
 0xf77   :  { %v4196_v21 = vpop.eup %4195 }
 0xf78   :  { %v1872_v50 = vmul.f32 %v4196_v21, %v1840_v10  ;;  %v1881_v18 = vmul.f32 %v3508_v26, %v1871_v27  ;;  %v5343_v27 = vld [vmem:[%s5656_s4 + $0x10] sm:$0xff] }
 0xf79   :  { %v4198_v51 = vpop.eup %4197 }
 0xf7a   :  { %v1873_v52 = vmul.f32 %v4198_v51, %v1841_v33  ;;  %v1882_v17 = vmul.f32 %v3508_v26, %v1872_v50  ;;  %v1891_v57 = vadd.f32 %v3509_v19, %v1881_v18  ;;  %v5349_v50 = vld [vmem:[%s5656_s4 + $0x8] sm:$0xff] }
 0xf7b   :  { %v4200_v25 = vpop.eup %4199 }
 0xf7c   :  { %v1883_v53 = vmul.f32 %v3508_v26, %v1873_v52  ;;  %v1874_v54 = vmul.f32 %v4200_v25, %v1842_v35  ;;  %v1892_v12 = vadd.f32 %v3509_v19, %v1882_v17 }
 0xf7e   :  { %v1884_v58 = vmul.f32 %v3508_v26, %v1874_v54  ;;  %v1895_v59 = vpack.c.bf16 %v1892_v12, %v1891_v57  ;;  %v1893_v61 = vadd.f32 %v3509_v19, %v1883_v53 }
 0xf80   :  { %3833 = vmatprep.mubr.msk.bf16.mxu0 %vm382_vm1, %v1895_v59  ;;  %3849 = vmatprep.mubr.msk.bf16.mxu1 %vm382_vm1, %v1895_v59  ;;  %v1894_v63 = vadd.f32 %v3509_v19, %v1884_v58  ;;  %v5356_v19 = vld [vmem:[%s5656_s4 + $0x18] sm:$0xff] }
 0xf82   :  { %v1896_v5 = vpack.c.bf16 %v1894_v63, %v1893_v61 }
 0xf84   :  { %3834 = vmatmul.mubr.msk.bf16.vlgmr.msra.gmra.mrb[20].mxu0 %vm382_vm1, %v1896_v5  ;;  %3850 = vmatmul.mubr.msk.bf16.vlgmr.msra.gmra.mrb[44].mxu1 %vm382_vm1, %v1896_v5 }
 0xf85   :  { %3838 = vmatpush3.bf16.msra.mxu0 %v4095_v48  ;;  %3841 = vmatprep.mubr.msk.bf16.mxu0 %vm382_vm1, %v1895_v59 }
 0xf86   :  { %3839 = vmatprep.subr.bf16.mxu0 %v4096_v30 }
 0xf89   :  { %3840 = vmatpush3.bf16.msra.mxu0 %v4096_v30 }
 0xf8c   :  { %3842 = vmatmul.mubr.msk.bf16.vlgmr.msra.gmra.mrb[24].mxu0 %vm382_vm1, %v1896_v5 }
0x1057   :  { %v3835_v62 = vpop.f32.mrb[20].mxu0  ;;  %v3851_v1 = vpop.f32.mrb[44].mxu1 }
0x1058   :  { %v1962_v7 = vpop.f32.mrb[21].mxu0  ;;  %v2110_v8 = vpop.f32.mrb[45].mxu1  ;;  %v1971_v10 = vadd.f32 %v3835_v62, %v3514_v0  ;;  %v2119_v11 = vadd.f32 %v3851_v1, %v3532_v23 }
0x1059   :  { %v3836_v9 = vpop.f32.mrb[22].mxu0  ;;  %v3852_v6 = vpop.f32.mrb[46].mxu1  ;;  %v1963_v32 = vadd.f32 %v3514_v0, %v1962_v7  ;;  %v2111_v34 = vadd.f32 %v3532_v23, %v2110_v8 }
0x105a   :  { %v1974_v15 = vadd.f32 %v3836_v9, %v3514_v0  ;;  %v2122_v13 = vadd.f32 %v3852_v6, %v3532_v23  ;;  %v1965_v33 = vpop.f32.mrb[23].mxu0  ;;  %v2113_v31 = vpop.f32.mrb[47].mxu1 }
0x105b   :  { %v1966_v35 = vadd.f32 %v3514_v0, %v1965_v33  ;;  %v2114_v36 = vadd.f32 %v3532_v23, %v2113_v31 }
0x105c   :  { %v5306_v37 = vpack.c.bf16 %v1974_v15, %v1971_v10  ;;  %v5308_v56 = vpack.c.bf16 %v2122_v13, %v2119_v11 }
0x105d   :  { %v5310_v38 = vpack.c.bf16 %v1966_v35, %v1963_v32  ;;  %v5312_v39 = vpack.c.bf16 %v2114_v36, %v2111_v34 }
0x105f   :  { %v3843_v40 = vpop.f32.mrb[24].mxu0  ;;  %3857 = vmatprep.mubr.msk.bf16.mxu0 %vm686_vm2, %v5310_v38  ;;  %3861 = vmatprep.subr.bf16.mxu1 %v5312_v39 }
0x1060   :  { %v2036_v43 = vpop.f32.mrb[25].mxu0  ;;  %3862 = vmatpush3.bf16.msra.mxu1 %v5312_v39  ;;  %v2045_v48 = vadd.f32 %v3843_v40, %v3523_v42 }
0x1061   :  { %v3844_v46 = vpop.f32.mrb[26].mxu0  ;;  %3863 = vmatprep.subr.bf16.mxu1 %v5308_v56  ;;  %v2037_v4 = vadd.f32 %v3523_v42, %v2036_v43 }
0x1062   :  { %v2048_v45 = vadd.f32 %v3844_v46, %v3523_v42  ;;  %v2039_v47 = vpop.f32.mrb[27].mxu0 }
0x1063   :  { %v2040_v24 = vadd.f32 %v3523_v42, %v2039_v47 }
0x1064   :  { %v5319_v28 = vpack.c.bf16 %v2048_v45, %v2045_v48  ;;  %3864 = vmatpush3.bf16.msra.mxu1 %v5308_v56 }
0x1065   :  { %v5322_v29 = vpack.c.bf16 %v2040_v24, %v2037_v4 }
0x1066   :  { %v2141_v55 = vsel %vm686_vm2, %v5319_v28, 0 }
0x1067   :  { %3970 = vmatprep.subr.msk.bf16.mxu0 %vm686_vm2, %v5322_v29  ;;  %v2138_v41 = vsel %vm686_vm2, %v5322_v29, 0 }
0x1068   :  { %3854 = vmatpush3.bf16.xpose.msra.mxu0 %v2138_v41 }
0x1069   :  { %3971 = vmatprep.subr.msk.bf16.mxu0 %vm686_vm2, %v5319_v28 }
0x1070   :  { %3856 = vmatpush3.bf16.xpose.msra.mxu0 %v2141_v55 }
0x1077   :  { %3858 = vmatmul.mubr.msk.bf16.vlgmr.msra.gmra.mrb[28].mxu0 %vm686_vm2, %v5306_v37 }
0x114a   :  { %v3859_v49 = vpop.f32.mrb[28].mxu0 }
0x114b   :  { %v2177_v16 = vpop.f32.mrb[29].mxu0  ;;  %v2186_v21 = vadd.f32 %v5343_v27, %v3859_v49 }
0x114c   :  { %v2178_v3 = vadd.f32 %v5337_v44, %v2177_v16  ;;  %v3860_v22 = vpop.f32.mrb[30].mxu0 }
0x114d   :  { %v2180_v26 = vpop.f32.mrb[31].mxu0  ;;  %v2189_v52 = vadd.f32 %v5356_v19, %v3860_v22  ;;  %v2198_v25 = vsel %vm382_vm1, %v2186_v21, -inf }
0x114e   :  { %v2181_v18 = vadd.f32 %v5349_v50, %v2180_v26  ;;  %v2192_v51 = vsel %vm382_vm1, %v2178_v3, -inf }
0x114f   :  { %2193 = vmax.xlane.f32.xlu0 %v2192_v51  ;;  %v2201_v53 = vsel %vm382_vm1, %v2189_v52, -inf }
0x1150   :  { %v2195_v17 = vsel %vm382_vm1, %v2181_v18, -inf }
0x1151   :  { %2196 = vmax.xlane.f32.xlu1 %v2195_v17 }
0x1153   :  { %2199 = vmax.xlane.f32.xlu0 %v2198_v25 }
0x1155   :  { %2202 = vmax.xlane.f32.xlu1 %v2201_v53 }
0x11dc   :  { %v2194_v54 = vpop.xlane.xlu0 %2193 }
0x11dd   :  { %v2204_v57 = vsub.f32 %v2178_v3, %v2194_v54 }
0x11de   :  { %v2197_v12 = vpop.xlane.xlu1 %2196 }
0x11df   :  { %v2205_v58 = vsub.f32 %v2181_v18, %v2197_v12  ;;  %v2208_v5 = vmul.f32 1.442695, %v2204_v57 }
0x11e0   :  { %v2200_v59 = vpop.xlane.xlu0 %2199 }
0x11e1   :  { %v2210_v61 = vmul.f32 1.442695, %v2205_v58  ;;  %v2206_v63 = vsub.f32 %v2186_v21, %v2200_v59 }
0x11e2   :  { %v2203_v30 = vpop.xlane.xlu1 %2202 }
0x11e3   :  { %4201 = vpow2.f32 %v2210_v61  ;;  %v2212_v62 = vmul.f32 1.442695, %v2206_v63  ;;  %v2207_v0 = vsub.f32 %v2189_v52, %v2203_v30 }
0x11e5   :  { %4203 = vpow2.f32 %v2212_v62  ;;  %v2214_v1 = vmul.f32 1.442695, %v2207_v0 }
0x11e6   :  { %4205 = vpow2.f32 %v2208_v5 }
0x11e7   :  { %4207 = vpow2.f32 %v2214_v1 }
0x11ed   :  { %v4202_v23 = vpop.eup %4201 }
0x11ee   :  { %v2219_v7 = vsel %vm382_vm1, %v4202_v23, 0.0 }
0x11ef   :  { %v4204_v8 = vpop.eup %4203  ;;  %2220 = vadd.xlane.f32.xlu1 %v2219_v7 }
0x11f0   :  { %v4206_v9 = vpop.eup %4205  ;;  %v2222_v6 = vsel %vm382_vm1, %v4204_v8, 0.0 }
0x11f1   :  { %v4208_v10 = vpop.eup %4207  ;;  %2223 = vadd.xlane.f32.xlu0 %v2222_v6  ;;  %v2216_v15 = vsel %vm382_vm1, %v4206_v9, 0.0 }
0x11f2   :  { %v2225_v11 = vsel %vm382_vm1, %v4208_v10, 0.0 }
0x11f3   :  { %2226 = vadd.xlane.f32.xlu1 %v2225_v11 }
0x11f5   :  { %2217 = vadd.xlane.f32.xlu0 %v2216_v15 }
0x1204   :  { %2303 = vrot.lane.b32.xlu1 %v5319_v28, %s4537_s7 }
0x1208   :  { %2295 = vrot.lane.b32.xlu1 %v5310_v38, %s4537_s7 }
0x120b   :  { %2301 = vrot.lane.b32.xlu0 %v5322_v29, %s4537_s7 }
0x120c   :  { %2297 = vrot.lane.b32.xlu1 %v5306_v37, %s4537_s7 }
0x127c   :  { %v2221_v13 = vpop.xlane.xlu1 %2220 }
0x127d   :  { %4209 = vrcp.f32 %v2221_v13 }
0x127e   :  { %v2224_v33 = vpop.xlane.xlu0 %2223 }
0x1280   :  { %v2227_v31 = vpop.xlane.xlu1 %2226 }
0x1281   :  { %4211 = vrcp.f32 %v2227_v31 }
0x1282   :  { %4213 = vrcp.f32 %v2224_v33  ;;  %v2218_v32 = vpop.xlane.xlu0 %2217 }
0x1283   :  { %4215 = vrcp.f32 %v2218_v32 }
0x1284   :  { %v2304_v46 = vpop.permute.xlu1 %2303 }
0x1285   :  { %v2315_v49 = vsel %vm686_vm2, %v2304_v46, 0 }
0x1286   :  { %v2302_v34 = vpop.permute.xlu0 %2301 }
0x1287   :  { %3972 = vmatprep.subr.msk.bf16.mxu1 %vm686_vm2, %v2302_v34  ;;  %v4210_v35 = vpop.eup %4209  ;;  %v2312_v41 = vsel %vm686_vm2, %v2302_v34, 0 }
0x1288   :  { %v2233_v45 = vmul.f32 %v4210_v35, %v4202_v23  ;;  %v2296_v55 = vpop.permute.xlu1 %2295 }
0x128b   :  { %v4212_v36 = vpop.eup %4211 }
0x128c   :  { %v4214_v40 = vpop.eup %4213  ;;  %v2235_v43 = vmul.f32 %v4212_v36, %v4208_v10  ;;  %v2298_v16 = vpop.permute.xlu1 %2297 }
0x128d   :  { %v4216_v42 = vpop.eup %4215  ;;  %v2234_v47 = vmul.f32 %v4214_v40, %v4204_v8 }
0x128e   :  { %v2232_v48 = vmul.f32 %v4216_v42, %v4206_v9 }
0x128f   :  { %v2237_v24 = vpack.c.bf16 %v2235_v43, %v2234_v47 }
0x1290   :  { %v2236_v4 = vpack.c.bf16 %v2233_v45, %v2232_v48 }
0x1292   :  { %3865 = vmatprep.mubr.msk.bf16.mxu1 %vm382_vm1, %v2236_v4 }
0x1293   :  { %3866 = vmatmul.mubr.msk.bf16.vlgmr.msra.gmra.mrb[48].mxu1 %vm382_vm1, %v2237_v24 }
0x1294   :  { %3870 = vmatpush3.bf16.xpose.msra.mxu1 %v2312_v41  ;;  %3873 = vmatprep.mubr.msk.bf16.mxu1 %vm686_vm2, %v2296_v55 }
0x1295   :  { %3973 = vmatprep.subr.msk.bf16.mxu1 %vm686_vm2, %v2304_v46 }
0x129c   :  { %3872 = vmatpush3.bf16.xpose.msra.mxu1 %v2315_v49 }
0x12a3   :  { %3874 = vmatmul.mubr.msk.bf16.vlgmr.msra.gmra.mrb[52].mxu1 %vm686_vm2, %v2298_v16 }
0x1366   :  { %v5382_v3 = vpop.f32.mrb[48].mxu1 }
0x1367   :  { %v5384_v22 = vpop.f32.mrb[49].mxu1 }
0x1368   :  { %v5386_v26 = vpop.f32.mrb[50].mxu1 }
0x1369   :  { %v5388_v21 = vpop.f32.mrb[51].mxu1 }
0x1376   :  { %v3875_v18 = vpop.f32.mrb[52].mxu1 }
0x1377   :  { %v2351_v51 = vpop.f32.mrb[53].mxu1  ;;  %v2360_v53 = vadd.f32 %v5343_v27, %v3875_v18 }
0x1378   :  { %v2352_v52 = vadd.f32 %v5337_v44, %v2351_v51  ;;  %v3876_v17 = vpop.f32.mrb[54].mxu1 }
0x1379   :  { %v2354_v25 = vpop.f32.mrb[55].mxu1  ;;  %v2363_v58 = vadd.f32 %v5356_v19, %v3876_v17  ;;  %v2372_v59 = vsel %vm382_vm1, %v2360_v53, -inf }
0x137a   :  { %v2355_v54 = vadd.f32 %v5349_v50, %v2354_v25  ;;  %v2366_v57 = vsel %vm382_vm1, %v2352_v52, -inf }
0x137b   :  { %2367 = vmax.xlane.f32.xlu0 %v2366_v57  ;;  %v2375_v61 = vsel %vm382_vm1, %v2363_v58, -inf }
0x137c   :  { %v2369_v12 = vsel %vm382_vm1, %v2355_v54, -inf }
0x137d   :  { %2370 = vmax.xlane.f32.xlu1 %v2369_v12 }
0x137f   :  { %2373 = vmax.xlane.f32.xlu0 %v2372_v59 }
0x1383   :  { %2376 = vmax.xlane.f32.xlu0 %v2375_v61 }
0x138e   :  { %2416 = vrot.lane.b32.xlu1 %v5308_v56, %s4537_s7 }
0x1408   :  { %v2368_v63 = vpop.xlane.xlu0 %2367 }
0x1409   :  { %v2378_v5 = vsub.f32 %v2352_v52, %v2368_v63 }
0x140a   :  { %v2371_v30 = vpop.xlane.xlu1 %2370 }
0x140b   :  { %v2382_v1 = vmul.f32 1.442695, %v2378_v5  ;;  %v2379_v23 = vsub.f32 %v2355_v54, %v2371_v30 }
0x140c   :  { %v2374_v62 = vpop.xlane.xlu0 %2373 }
0x140d   :  { %v2380_v0 = vsub.f32 %v2360_v53, %v2374_v62  ;;  %v2384_v6 = vmul.f32 1.442695, %v2379_v23 }
0x140e   :  { %v2417_v36 = vpop.permute.xlu1 %2416 }
0x140f   :  { %v2386_v7 = vmul.f32 1.442695, %v2380_v0 }
0x1410   :  { %v2377_v8 = vpop.xlane.xlu0 %2376 }
0x1411   :  { %4217 = vpow2.f32 %v2386_v7  ;;  %v2381_v9 = vsub.f32 %v2363_v58, %v2377_v8 }
0x1412   :  { %4219 = vpow2.f32 %v2382_v1 }
0x1413   :  { %v2388_v10 = vmul.f32 1.442695, %v2381_v9 }
0x1415   :  { %4221 = vpow2.f32 %v2388_v10 }
0x1416   :  { %4223 = vpow2.f32 %v2384_v6 }
0x141b   :  { %v4218_v11 = vpop.eup %4217 }
0x141c   :  { %v2396_v15 = vsel %vm382_vm1, %v4218_v11, 0.0  ;;  %v4220_v13 = vpop.eup %4219 }
0x141d   :  { %2397 = vadd.xlane.f32.xlu0 %v2396_v15  ;;  %v2390_v31 = vsel %vm382_vm1, %v4220_v13, 0.0 }
0x141f   :  { %v4222_v33 = vpop.eup %4221 }
0x1420   :  { %v2399_v32 = vsel %vm382_vm1, %v4222_v33, 0.0  ;;  %v4224_v34 = vpop.eup %4223 }
0x1421   :  { %2391 = vadd.xlane.f32.xlu0 %v2390_v31  ;;  %2400 = vadd.xlane.f32.xlu1 %v2399_v32  ;;  %v2393_v35 = vsel %vm382_vm1, %v4224_v34, 0.0 }
0x1425   :  { %2394 = vadd.xlane.f32.xlu1 %v2393_v35 }
0x1436   :  { %2479 = vrot.lane.b32.xlu1 %v5322_v29, %s4538_s17 }
0x1437   :  { %2414 = vrot.lane.b32.xlu0 %v5312_v39, %s4537_s7 }
0x143a   :  { %2481 = vrot.lane.b32.xlu1 %v5319_v28, %s4538_s17 }
0x143b   :  { %2475 = vrot.lane.b32.xlu0 %v5310_v38, %s4538_s17 }
0x143e   :  { %2477 = vrot.lane.b32.xlu1 %v5306_v37, %s4538_s17 }
0x14aa   :  { %v2398_v40 = vpop.xlane.xlu0 %2397 }
0x14ae   :  { %v2401_v42 = vpop.xlane.xlu1 %2400  ;;  %v2392_v43 = vpop.xlane.xlu0 %2391 }
0x14af   :  { %4225 = vrcp.f32 %v2401_v42 }
0x14b0   :  { %4227 = vrcp.f32 %v2392_v43 }
0x14b1   :  { %4229 = vrcp.f32 %v2398_v40 }
0x14b2   :  { %v2395_v46 = vpop.xlane.xlu1 %2394  ;;  %v2415_v48 = vpop.permute.xlu0 %2414 }
0x14b3   :  { %4231 = vrcp.f32 %v2395_v46  ;;  %3877 = vmatprep.subr.bf16.mxu0 %v2415_v48 }
0x14b4   :  { %3878 = vmatpush3.bf16.msra.mxu0 %v2415_v48 }
0x14b5   :  { %3879 = vmatprep.subr.bf16.mxu0 %v2417_v36 }
0x14b6   :  { %v2480_v45 = vpop.permute.xlu1 %2479  ;;  %v2476_v25 = vpop.permute.xlu0 %2475 }
0x14b7   :  { %v2490_v17 = vsel %vm686_vm2, %v2480_v45, 0 }
0x14b8   :  { %3880 = vmatpush3.bf16.msra.mxu0 %v2417_v36 }
0x14b9   :  { %3974 = vmatprep.subr.msk.bf16.mxu0 %vm686_vm2, %v2480_v45  ;;  %v4226_v47 = vpop.eup %4225 }
0x14ba   :  { %v4228_v4 = vpop.eup %4227  ;;  %v2409_v55 = vmul.f32 %v4226_v47, %v4222_v33  ;;  %v2482_v53 = vpop.permute.xlu1 %2481 }
0x14bb   :  { %v4230_v24 = vpop.eup %4229  ;;  %v2406_v49 = vmul.f32 %v4228_v4, %v4220_v13  ;;  %v2493_v54 = vsel %vm686_vm2, %v2482_v53, 0 }
0x14bc   :  { %v2408_v18 = vmul.f32 %v4230_v24, %v4218_v11 }
0x14bd   :  { %v4232_v41 = vpop.eup %4231 }
0x14be   :  { %v2407_v16 = vmul.f32 %v4232_v41, %v4224_v34  ;;  %v2411_v52 = vpack.c.bf16 %v2409_v55, %v2408_v18  ;;  %v2478_v57 = vpop.permute.xlu1 %2477 }
0x14c0   :  { %v2410_v51 = vpack.c.bf16 %v2407_v16, %v2406_v49 }
0x14c2   :  { %3881 = vmatprep.mubr.msk.bf16.mxu0 %vm382_vm1, %v2410_v51 }
0x14c3   :  { %3882 = vmatmul.mubr.msk.bf16.vlgmr.msra.gmra.mrb[32].mxu0 %vm382_vm1, %v2411_v52 }
0x14c4   :  { %3886 = vmatpush3.bf16.xpose.msra.mxu0 %v2490_v17  ;;  %3889 = vmatprep.mubr.msk.bf16.mxu0 %vm686_vm2, %v2476_v25 }
0x14c5   :  { %3975 = vmatprep.subr.msk.bf16.mxu0 %vm686_vm2, %v2482_v53 }
0x14cc   :  { %3888 = vmatpush3.bf16.xpose.msra.mxu0 %v2493_v54 }
0x14d3   :  { %3890 = vmatmul.mubr.msk.bf16.vlgmr.msra.gmra.mrb[36].mxu0 %vm686_vm2, %v2478_v57 }
0x1596   :  { %v5422_v12 = vpop.f32.mrb[32].mxu0 }
0x1597   :  { %v5424_v58 = vpop.f32.mrb[33].mxu0 }
0x1598   :  { %v5426_v59 = vpop.f32.mrb[34].mxu0 }
0x1599   :  { %v4034_v61 = vpack.i.bf16 %v5426_v59, %v5422_v12  ;;  %v5430_v63 = vpop.f32.mrb[35].mxu0 }
0x159a   :  { %v4029_v5 = vpack.i.bf16 %v5430_v63, %v5424_v58 }
0x15a6   :  { %v3891_v30 = vpop.f32.mrb[36].mxu0 }
0x15a7   :  { %v2529_v62 = vpop.f32.mrb[37].mxu0  ;;  %v2538_v7 = vadd.f32 %v5343_v27, %v3891_v30 }
0x15a8   :  { %v2530_v0 = vadd.f32 %v5337_v44, %v2529_v62  ;;  %v3892_v1 = vpop.f32.mrb[38].mxu0 }
0x15a9   :  { %v2532_v23 = vpop.f32.mrb[39].mxu0  ;;  %v2541_v10 = vadd.f32 %v5356_v19, %v3892_v1  ;;  %v2550_v11 = vsel %vm382_vm1, %v2538_v7, -inf }
0x15aa   :  { %v2533_v8 = vadd.f32 %v5349_v50, %v2532_v23  ;;  %v2544_v9 = vsel %vm382_vm1, %v2530_v0, -inf }
0x15ab   :  { %2545 = vmax.xlane.f32.xlu0 %v2544_v9  ;;  %v2553_v15 = vsel %vm382_vm1, %v2541_v10, -inf }
0x15ac   :  { %v2547_v6 = vsel %vm382_vm1, %v2533_v8, -inf }
0x15ad   :  { %2548 = vmax.xlane.f32.xlu1 %v2547_v6 }
0x15af   :  { %2551 = vmax.xlane.f32.xlu0 %v2550_v11 }
0x15b3   :  { %2554 = vmax.xlane.f32.xlu0 %v2553_v15 }
0x15be   :  { %2592 = vrot.lane.b32.xlu1 %v5308_v56, %s4538_s17 }
0x1638   :  { %v2546_v13 = vpop.xlane.xlu0 %2545 }
0x1639   :  { %v2556_v33 = vsub.f32 %v2530_v0, %v2546_v13 }
0x163a   :  { %v2549_v31 = vpop.xlane.xlu1 %2548 }
0x163b   :  { %v2560_v35 = vmul.f32 1.442695, %v2556_v33  ;;  %v2557_v36 = vsub.f32 %v2533_v8, %v2549_v31 }
0x163c   :  { %v2552_v32 = vpop.xlane.xlu0 %2551 }
0x163d   :  { %v2558_v34 = vsub.f32 %v2538_v7, %v2552_v32  ;;  %v2562_v46 = vmul.f32 1.442695, %v2557_v36 }
0x163e   :  { %v2593_v18 = vpop.permute.xlu1 %2592 }
0x163f   :  { %v2564_v40 = vmul.f32 1.442695, %v2558_v34 }
0x1640   :  { %v2555_v42 = vpop.xlane.xlu0 %2554 }
0x1641   :  { %4233 = vpow2.f32 %v2564_v40  ;;  %v2559_v43 = vsub.f32 %v2541_v10, %v2555_v42 }
0x1642   :  { %4235 = vpow2.f32 %v2560_v35 }
0x1643   :  { %v2566_v48 = vmul.f32 1.442695, %v2559_v43 }
0x1645   :  { %4237 = vpow2.f32 %v2566_v48 }
0x1646   :  { %4239 = vpow2.f32 %v2562_v46 }
0x164b   :  { %v4234_v45 = vpop.eup %4233 }
0x164c   :  { %v2574_v47 = vsel %vm382_vm1, %v4234_v45, 0.0  ;;  %v4236_v4 = vpop.eup %4235 }
0x164d   :  { %2575 = vadd.xlane.f32.xlu0 %v2574_v47  ;;  %v2568_v41 = vsel %vm382_vm1, %v4236_v4, 0.0 }
0x164f   :  { %v4238_v24 = vpop.eup %4237 }
0x1650   :  { %v2577_v55 = vsel %vm382_vm1, %v4238_v24, 0.0  ;;  %v4240_v49 = vpop.eup %4239 }
0x1651   :  { %2569 = vadd.xlane.f32.xlu0 %v2568_v41  ;;  %2578 = vadd.xlane.f32.xlu1 %v2577_v55  ;;  %v2571_v16 = vsel %vm382_vm1, %v4240_v49, 0.0 }
0x1655   :  { %2572 = vadd.xlane.f32.xlu1 %v2571_v16 }
0x1666   :  { %2655 = vrot.lane.b32.xlu1 %v5322_v29, %s4539_s0 }
0x1667   :  { %2590 = vrot.lane.b32.xlu0 %v5312_v39, %s4538_s17 }
0x166a   :  { %2657 = vrot.lane.b32.xlu1 %v5319_v28, %s4539_s0 }
0x166b   :  { %2651 = vrot.lane.b32.xlu0 %v5310_v38, %s4539_s0 }
0x166e   :  { %2653 = vrot.lane.b32.xlu1 %v5306_v37, %s4539_s0 }
0x16da   :  { %v2576_v51 = vpop.xlane.xlu0 %2575 }
0x16de   :  { %v2579_v52 = vpop.xlane.xlu1 %2578  ;;  %v2570_v17 = vpop.xlane.xlu0 %2569 }
0x16df   :  { %4241 = vrcp.f32 %v2579_v52 }
0x16e0   :  { %4243 = vrcp.f32 %v2570_v17 }
0x16e1   :  { %4245 = vrcp.f32 %v2576_v51 }
0x16e2   :  { %v2573_v29 = vpop.xlane.xlu1 %2572  ;;  %v2591_v25 = vpop.permute.xlu0 %2590 }
0x16e3   :  { %4247 = vrcp.f32 %v2573_v29  ;;  %3893 = vmatprep.subr.bf16.mxu1 %v2591_v25 }
0x16e4   :  { %3894 = vmatpush3.bf16.msra.mxu1 %v2591_v25 }
0x16e5   :  { %3895 = vmatprep.subr.bf16.mxu1 %v2593_v18 }
0x16e6   :  { %v2656_v28 = vpop.permute.xlu1 %2655  ;;  %v2652_v8 = vpop.permute.xlu0 %2651 }
0x16e7   :  { %v2666_v7 = vsel %vm686_vm2, %v2656_v28, 0 }
0x16e8   :  { %3896 = vmatpush3.bf16.msra.mxu1 %v2593_v18 }
0x16e9   :  { %3976 = vmatprep.subr.msk.bf16.mxu1 %vm686_vm2, %v2656_v28  ;;  %v4242_v38 = vpop.eup %4241 }
0x16ea   :  { %v4244_v53 = vpop.eup %4243  ;;  %v2587_v57 = vmul.f32 %v4242_v38, %v4238_v24  ;;  %v2658_v9 = vpop.permute.xlu1 %2657 }
0x16eb   :  { %v4246_v37 = vpop.eup %4245  ;;  %v2584_v30 = vmul.f32 %v4244_v53, %v4236_v4  ;;  %v2669_v6 = vsel %vm686_vm2, %v2658_v9, 0 }
0x16ec   :  { %v2586_v0 = vmul.f32 %v4246_v37, %v4234_v45 }
0x16ed   :  { %v4248_v54 = vpop.eup %4247 }
0x16ee   :  { %v2585_v62 = vmul.f32 %v4248_v54, %v4240_v49  ;;  %v2589_v23 = vpack.c.bf16 %v2587_v57, %v2586_v0  ;;  %v2654_v10 = vpop.permute.xlu1 %2653 }
0x16f0   :  { %v2588_v1 = vpack.c.bf16 %v2585_v62, %v2584_v30 }
0x16f2   :  { %3897 = vmatprep.mubr.msk.bf16.mxu1 %vm382_vm1, %v2588_v1 }
0x16f3   :  { %3898 = vmatmul.mubr.msk.bf16.vlgmr.msra.gmra.mrb[56].mxu1 %vm382_vm1, %v2589_v23 }
0x16f4   :  { %3902 = vmatpush3.bf16.xpose.msra.mxu1 %v2666_v7  ;;  %3905 = vmatprep.mubr.msk.bf16.mxu1 %vm686_vm2, %v2652_v8 }
0x16f5   :  { %3977 = vmatprep.subr.msk.bf16.mxu1 %vm686_vm2, %v2658_v9 }
0x16fc   :  { %3904 = vmatpush3.bf16.xpose.msra.mxu1 %v2669_v6  ;;  %v4097_v6 = vld [vmem:[%s5619_s12 + $0x10] sm:$0xff]  }
0x1703   :  { %3906 = vmatmul.mubr.msk.bf16.vlgmr.msra.gmra.mrb[60].mxu1 %vm686_vm2, %v2654_v10  ;;  %v4098_v10 = vld [vmem:[%s5619_s12 + $0x18] sm:$0xff]  }
0x17c6   :  { %v3899_v11 = vpop.f32.mrb[56].mxu1 }
0x17c7   :  { %v2636_v15 = vpop.f32.mrb[57].mxu1 }
0x17c8   :  { %v3900_v13 = vpop.f32.mrb[58].mxu1 }
0x17c9   :  { %v4044_v33 = vpack.i.bf16 %v3900_v13, %v3899_v11  ;;  %v2639_v31 = vpop.f32.mrb[59].mxu1 }
0x17ca   :  { %v4039_v32 = vpack.i.bf16 %v2639_v31, %v2636_v15 }
0x17d6   :  { %v3907_v34 = vpop.f32.mrb[60].mxu1 }
0x17d7   :  { %v2705_v35 = vpop.f32.mrb[61].mxu1  ;;  %v2714_v43 = vadd.f32 %v5343_v27, %v3907_v34 }
0x17d8   :  { %v2706_v36 = vadd.f32 %v5337_v44, %v2705_v35  ;;  %v3908_v40 = vpop.f32.mrb[62].mxu1 }
0x17d9   :  { %v2708_v42 = vpop.f32.mrb[63].mxu1  ;;  %v2717_v47 = vadd.f32 %v5356_v19, %v3908_v40  ;;  %v2726_v4 = vsel %vm382_vm1, %v2714_v43, -inf }
0x17da   :  { %v2709_v46 = vadd.f32 %v5349_v50, %v2708_v42  ;;  %v2720_v48 = vsel %vm382_vm1, %v2706_v36, -inf }
0x17db   :  { %2721 = vmax.xlane.f32.xlu0 %v2720_v48  ;;  %v2729_v24 = vsel %vm382_vm1, %v2717_v47, -inf }
0x17dc   :  { %v2723_v45 = vsel %vm382_vm1, %v2709_v46, -inf }
0x17dd   :  { %2724 = vmax.xlane.f32.xlu1 %v2723_v45 }
0x17df   :  { %2727 = vmax.xlane.f32.xlu0 %v2726_v4 }
0x17e3   :  { %2730 = vmax.xlane.f32.xlu0 %v2729_v24 }
0x1868   :  { %v2722_v44 = vpop.xlane.xlu0 %2721 }
0x1869   :  { %v2732_v41 = vsub.f32 %v2706_v36, %v2722_v44 }
0x186a   :  { %v2725_v55 = vpop.xlane.xlu1 %2724 }
0x186b   :  { %v2736_v50 = vmul.f32 1.442695, %v2732_v41  ;;  %v2733_v16 = vsub.f32 %v2709_v46, %v2725_v55 }
0x186c   :  { %v2728_v27 = vpop.xlane.xlu0 %2727 }
0x186d   :  { %v2734_v49 = vsub.f32 %v2714_v43, %v2728_v27  ;;  %v2738_v17 = vmul.f32 1.442695, %v2733_v16 }
0x186f   :  { %v2740_v18 = vmul.f32 1.442695, %v2734_v49 }
0x1870   :  { %v2731_v51 = vpop.xlane.xlu0 %2730 }
0x1871   :  { %4249 = vpow2.f32 %v2740_v18  ;;  %v2735_v52 = vsub.f32 %v2717_v47, %v2731_v51 }
0x1872   :  { %4251 = vpow2.f32 %v2736_v50 }
0x1873   :  { %v2742_v19 = vmul.f32 1.442695, %v2735_v52 }
0x1875   :  { %4253 = vpow2.f32 %v2742_v19 }
0x1876   :  { %4255 = vpow2.f32 %v2738_v17 }
0x187b   :  { %v4250_v29 = vpop.eup %4249 }
0x187c   :  { %v2750_v25 = vsel %vm382_vm1, %v4250_v29, 0.0  ;;  %v4252_v28 = vpop.eup %4251 }
0x187d   :  { %2751 = vadd.xlane.f32.xlu0 %v2750_v25  ;;  %v2744_v53 = vsel %vm382_vm1, %v4252_v28, 0.0 }
0x187f   :  { %v4254_v38 = vpop.eup %4253 }
0x1880   :  { %v2753_v37 = vsel %vm382_vm1, %v4254_v38, 0.0  ;;  %v4256_v54 = vpop.eup %4255 }
0x1881   :  { %2745 = vadd.xlane.f32.xlu0 %v2744_v53  ;;  %2754 = vadd.xlane.f32.xlu1 %v2753_v37  ;;  %v2747_v57 = vsel %vm382_vm1, %v4256_v54, 0.0  ;;  %v3557_v53 = vld [vmem:[#allocation11 + $0x1] ss:$0 sm:$0xff] }
0x1885   :  { %2748 = vadd.xlane.f32.xlu1 %v2747_v57 }
0x1896   :  { %2768 = vrot.lane.b32.xlu1 %v5308_v56, %s4539_s0 }
0x1897   :  { %2766 = vrot.lane.b32.xlu0 %v5312_v39, %s4539_s0 }
0x189a   :  { %4030 = vrot.lane.b32.xlu1 %v4029_v5, %s4540_s11 }
0x189b   :  { %4040 = vrot.lane.b32.xlu0 %v4039_v32, %s4527_s3 }
0x189e   :  { %4035 = vrot.lane.b32.xlu1 %v4034_v61, %s4540_s11 }
0x18a2   :  { %4045 = vrot.lane.b32.xlu1 %v4044_v33, %s4527_s3 }
0x190a   :  { %v2752_v30 = vpop.xlane.xlu0 %2751 }
0x190e   :  { %v2755_v62 = vpop.xlane.xlu1 %2754  ;;  %v2746_v56 = vpop.xlane.xlu0 %2745 }
0x190f   :  { %4257 = vrcp.f32 %v2755_v62 }
0x1910   :  { %4259 = vrcp.f32 %v2746_v56 }
0x1911   :  { %4261 = vrcp.f32 %v2752_v30 }
0x1912   :  { %v2749_v39 = vpop.xlane.xlu1 %2748  ;;  %v2767_v0 = vpop.permute.xlu0 %2766 }
0x1913   :  { %4263 = vrcp.f32 %v2749_v39  ;;  %3909 = vmatprep.subr.bf16.mxu0 %v2767_v0 }
0x1914   :  { %3910 = vmatpush3.bf16.msra.mxu0 %v2767_v0 }
0x1916   :  { %v2769_v58 = vpop.permute.xlu1 %2768  ;;  %v4041_v43 = vpop.permute.xlu0 %4040 }
0x1917   :  { %3911 = vmatprep.subr.bf16.mxu0 %v2769_v58  ;;  %v4043_v4 = vunpack.i.h.bf16 %v4041_v43  ;;  %v4042_v24 = vunpack.i.l.bf16 %v4041_v43  ;;  %v4099_v43 = vld [vmem:[%s5623_s16 + $0x10] sm:$0xff]  }
0x1918   :  { %3912 = vmatpush3.bf16.msra.mxu0 %v2769_v58  ;;  %3925 = vmatprep.subr.bf16.mxu1 %v4099_v43 }
0x1919   :  { %v4258_v63 = vpop.eup %4257  ;;  %3917 = vmatprep.subr.bf16.mxu0 %v4097_v6  ;;  %3926 = vmatpush3.bf16.msra.mxu1 %v4099_v43 }
0x191a   :  { %v4260_v5 = vpop.eup %4259  ;;  %v2763_v61 = vmul.f32 %v4258_v63, %v4254_v38  ;;  %v4031_v34 = vpop.permute.xlu1 %4030 }
0x191b   :  { %v4262_v12 = vpop.eup %4261  ;;  %v2760_v1 = vmul.f32 %v4260_v5, %v4252_v28  ;;  %v4033_v40 = vunpack.i.h.bf16 %v4031_v34  ;;  %v4032_v42 = vunpack.i.l.bf16 %v4031_v34 }
0x191c   :  { %v2762_v7 = vmul.f32 %v4262_v12, %v4250_v29 }
0x191d   :  { %v4264_v59 = vpop.eup %4263  ;;  %v2876_v44 = vsel %vm686_vm2, %v5388_v21, %v4033_v40  ;;  %v2875_v41 = vsel %vm686_vm2, %v5384_v22, %v4032_v42 }
0x191e   :  { %v2761_v23 = vmul.f32 %v4264_v59, %v4256_v54  ;;  %v2765_v9 = vpack.c.bf16 %v2763_v61, %v2762_v7  ;;  %v4036_v35 = vpop.permute.xlu1 %4035  ;;  %v2879_v29 = vsel %vm1435_vm3, %v2875_v41, %v4042_v24 }
0x191f   :  { %v4038_v46 = vunpack.i.h.bf16 %v4036_v35  ;;  %v4037_v48 = vunpack.i.l.bf16 %v4036_v35 }
0x1920   :  { %v2764_v8 = vpack.c.bf16 %v2761_v23, %v2760_v1 }
0x1921   :  { %v2878_v27 = vsel %vm686_vm2, %v5386_v26, %v4038_v46  ;;  %v2877_v49 = vsel %vm686_vm2, %v5382_v3, %v4037_v48  ;;  %v2880_v26 = vsel %vm1435_vm3, %v2876_v44, %v4043_v4  ;;  %v4100_v46 = vld [vmem:[%s5623_s16 + $0x18] sm:$0xff]  }
0x1922   :  { %3913 = vmatprep.mubr.msk.bf16.mxu0 %vm382_vm1, %v2764_v8  ;;  %v4046_v36 = vpop.permute.xlu1 %4045  ;;  %3927 = vmatprep.subr.bf16.mxu1 %v4100_v46 }
0x1923   :  { %3914 = vmatmul.mubr.msk.bf16.vlgmr.msra.gmra.mrb[40].mxu0 %vm382_vm1, %v2765_v9  ;;  %v4048_v45 = vunpack.i.h.bf16 %v4046_v36  ;;  %v4047_v47 = vunpack.i.l.bf16 %v4046_v36  ;;  %3928 = vmatpush3.bf16.msra.mxu1 %v4100_v46 }
0x1924   :  { %3918 = vmatpush3.bf16.msra.mxu0 %v4097_v6 }
0x1925   :  { %3919 = vmatprep.subr.bf16.mxu0 %v4098_v10  ;;  %v2881_v51 = vsel %vm1435_vm3, %v2877_v49, %v4047_v47  ;;  %v2882_v52 = vsel %vm1435_vm3, %v2878_v27, %v4048_v45 }
0x1928   :  { %3920 = vmatpush3.bf16.msra.mxu0 %v4098_v10 }
0x19f6   :  { %v3915_v11 = vpop.f32.mrb[40].mxu0 }
0x19f7   :  { %v2812_v15 = vpop.f32.mrb[41].mxu0 }
0x19f8   :  { %v3916_v13 = vpop.f32.mrb[42].mxu0 }
0x19f9   :  { %v4054_v33 = vpack.i.bf16 %v3916_v13, %v3915_v11  ;;  %v2815_v31 = vpop.f32.mrb[43].mxu0 }
0x19fa   :  { %v4049_v32 = vpack.i.bf16 %v2815_v31, %v2812_v15 }
0x19fb   :  { %4055 = vrot.lane.b32.xlu1 %v4054_v33, %s4541_s25 }
0x19fc   :  { %4050 = vrot.lane.b32.xlu0 %v4049_v32, %s4541_s25 }
0x1a6d   :  { %v4056_v55 = vpop.permute.xlu1 %4055 }
0x1a6e   :  { %v4058_v50 = vunpack.i.h.bf16 %v4056_v55  ;;  %v4057_v16 = vunpack.i.l.bf16 %v4056_v55  ;;  %v4051_v18 = vpop.permute.xlu0 %4050 }
0x1a6f   :  { %v4053_v17 = vunpack.i.h.bf16 %v4051_v18  ;;  %v4052_v19 = vunpack.i.l.bf16 %v4051_v18 }
0x1a70   :  { %v2886_v21 = vsel %vm1440_vm4, %v2882_v52, %v4058_v50  ;;  %v2885_v22 = vsel %vm1440_vm4, %v2881_v51, %v4057_v16  ;;  %v3562_v51 = vld [vmem:[#allocation13 + $0x1] ss:$0 sm:$0xff] }
0x1a71   :  { %v2888_v25 = vpack.c.bf16 %v2886_v21, %v2885_v22  ;;  %v2883_v3 = vsel %vm1440_vm4, %v2879_v29, %v4052_v19  ;;  %v2884_v28 = vsel %vm1440_vm4, %v2880_v26, %v4053_v17  ;;  %v3563_v29 = vld [vmem:[#allocation14 + $0x1] ss:$0 sm:$0xff] }
0x1a72   :  { %v2887_v38 = vpack.c.bf16 %v2884_v28, %v2883_v3 }
0x1a74   :  { %3921 = vmatprep.mubr.msk.bf16.mxu0 %vm382_vm1, %v2887_v38 }
0x1a75   :  { %3922 = vmatmul.mubr.msk.bf16.vlgmr.msra.gmra.mrb[44].mxu0 %vm382_vm1, %v2888_v25 }
0x1b48   :  { %v3923_v37 = vpop.f32.mrb[44].mxu0 }
0x1b49   :  { %v2954_v54 = vpop.f32.mrb[45].mxu0  ;;  %v2963_v57 = vadd.f32 %v3923_v37, %v3557_v53 }
0x1b4a   :  { %v2955_v30 = vadd.f32 %v3557_v53, %v2954_v54  ;;  %v3924_v62 = vpop.f32.mrb[46].mxu0 }
0x1b4b   :  { %v2957_v56 = vpop.f32.mrb[47].mxu0  ;;  %v5524_v58 = vadd.f32 %v2963_v57, %v5258_v14  ;;  %v2966_v63 = vadd.f32 %v3924_v62, %v3557_v53 }
0x1b4c   :  { %v5521_v39 = vadd.f32 %v2955_v30, %v5255_v60  ;;  %v2958_v0 = vadd.f32 %v3557_v53, %v2957_v56 }
0x1b4d   :  { %v5534_v61 = vadd.f32 %v2966_v63, %v5266_v20  ;;  %v2983_v60 = vsel %vm382_vm1, %v5524_v58, 0.0  ;;  %v4102_v63 = vld [vmem:[%s5625_s18 + $0x28] sm:$0xff]  }
0x1b4e   :  { %v5527_v5 = vadd.f32 %v2958_v0, %v5261_v2  ;;  %v2977_v12 = vsel %vm382_vm1, %v5521_v39, 0.0  ;;  %v4101_v0 = vld [vmem:[%s5625_s18 + $0x20] sm:$0xff]  }
0x1b4f   :  { %2978 = vadd.xlane.f32.xlu0 %v2977_v12  ;;  %v2986_v14 = vsel %vm382_vm1, %v5534_v61, 0.0  ;;  %3933 = vmatprep.subr.bf16.mxu0 %v4101_v0  ;;  %v4103_v12 = vld [vmem:[%s5625_s18 + $0x30] sm:$0xff]  }
0x1b50   :  { %v2980_v59 = vsel %vm382_vm1, %v5527_v5, 0.0  ;;  %3934 = vmatpush3.bf16.msra.mxu0 %v4101_v0 }
0x1b51   :  { %2981 = vadd.xlane.f32.xlu1 %v2980_v59  ;;  %3935 = vmatprep.subr.bf16.mxu0 %v4102_v63  ;;  %v4104_v59 = vld [vmem:[%s5625_s18 + $0x38] sm:$0xff]  }
0x1b53   :  { %2984 = vadd.xlane.f32.xlu0 %v2983_v60  ;;  %v3568_v60 = vld [vmem:[#allocation16 + $0x1] ss:$0 sm:$0xff] }
0x1b54   :  { %3936 = vmatpush3.bf16.msra.mxu0 %v4102_v63 }
0x1b55   :  { %3937 = vmatprep.subr.bf16.mxu0 %v4103_v12 }
0x1b57   :  { %2987 = vadd.xlane.f32.xlu0 %v2986_v14 }
0x1b58   :  { %3938 = vmatpush3.bf16.msra.mxu0 %v4103_v12 }
0x1b59   :  { %3939 = vmatprep.subr.bf16.mxu0 %v4104_v59 }
0x1b5c   :  { %3940 = vmatpush3.bf16.msra.mxu0 %v4104_v59 }
0x1bdc   :  { %v2979_v2 = vpop.xlane.xlu0 %2978 }
0x1bdd   :  { %v2989_v1 = vmul.f32 0.03125, %v2979_v2 }
0x1bde   :  { %v2982_v23 = vpop.xlane.xlu1 %2981 }
0x1bdf   :  { %v2993_v7 = vsub.f32 %v5521_v39, %v2989_v1  ;;  %v2990_v8 = vmul.f32 0.03125, %v2982_v23 }
0x1be0   :  { %v2985_v9 = vpop.xlane.xlu0 %2984 }
0x1be1   :  { %v2994_v6 = vsub.f32 %v5527_v5, %v2990_v8  ;;  %v2991_v10 = vmul.f32 0.03125, %v2985_v9  ;;  %v2997_v20 = vmul.f32 %v2993_v7, %v2993_v7 }
0x1be3   :  { %v2995_v11 = vsub.f32 %v5524_v58, %v2991_v10  ;;  %v3001_v15 = vsel %vm382_vm1, %v2997_v20, 0.0  ;;  %v2998_v13 = vmul.f32 %v2994_v6, %v2994_v6 }
0x1be4   :  { %3002 = vadd.xlane.f32.xlu0 %v3001_v15  ;;  %v2988_v33 = vpop.xlane.xlu0 %2987 }
0x1be5   :  { %v2992_v31 = vmul.f32 0.03125, %v2988_v33  ;;  %v3004_v32 = vsel %vm382_vm1, %v2998_v13, 0.0  ;;  %v2999_v34 = vmul.f32 %v2995_v11, %v2995_v11 }
0x1be6   :  { %3005 = vadd.xlane.f32.xlu1 %v3004_v32 }
0x1be7   :  { %v2996_v35 = vsub.f32 %v5534_v61, %v2992_v31  ;;  %v3007_v36 = vsel %vm382_vm1, %v2999_v34, 0.0 }
0x1be8   :  { %3008 = vadd.xlane.f32.xlu0 %v3007_v36 }
0x1be9   :  { %v3000_v40 = vmul.f32 %v2996_v35, %v2996_v35 }
0x1beb   :  { %v3010_v42 = vsel %vm382_vm1, %v3000_v40, 0.0 }
0x1bec   :  { %3011 = vadd.xlane.f32.xlu1 %v3010_v42 }
0x1c71   :  { %v3003_v48 = vpop.xlane.xlu0 %3002 }
0x1c72   :  { %v3013_v45 = vmul.f32 0.03125, %v3003_v48 }
0x1c73   :  { %v3006_v47 = vpop.xlane.xlu1 %3005 }
0x1c74   :  { %v3017_v4 = vadd.f32 1e-06, %v3013_v45  ;;  %v3014_v24 = vmul.f32 0.03125, %v3006_v47 }
0x1c75   :  { %v3009_v44 = vpop.xlane.xlu0 %3008 }
0x1c76   :  { %4265 = vrsqrt.f32 %v3017_v4  ;;  %v3018_v41 = vadd.f32 1e-06, %v3014_v24  ;;  %v3015_v55 = vmul.f32 0.03125, %v3009_v44 }
0x1c78   :  { %4267 = vrsqrt.f32 %v3018_v41  ;;  %v3019_v27 = vadd.f32 1e-06, %v3015_v55 }
0x1c79   :  { %v3012_v49 = vpop.xlane.xlu1 %3011 }
0x1c7a   :  { %4269 = vrsqrt.f32 %v3019_v27  ;;  %v3016_v50 = vmul.f32 0.03125, %v3012_v49 }
0x1c7c   :  { %v3020_v16 = vadd.f32 1e-06, %v3016_v50 }
0x1c7e   :  { %4271 = vrsqrt.f32 %v3020_v16 }
0x1c80   :  { %v4266_v18 = vpop.eup %4265 }
0x1c81   :  { %v3025_v52 = vmul.f32 %v4266_v18, %v2993_v7 }
0x1c82   :  { %v4268_v17 = vpop.eup %4267 }
0x1c83   :  { %v3026_v19 = vmul.f32 %v4268_v17, %v2994_v6  ;;  %v3035_v21 = vmul.f32 %v3562_v51, %v3025_v52 }
0x1c84   :  { %v4270_v22 = vpop.eup %4269 }
0x1c85   :  { %v3027_v26 = vmul.f32 %v4270_v22, %v2995_v11  ;;  %v3036_v25 = vmul.f32 %v3562_v51, %v3026_v19  ;;  %v3045_v3 = vadd.f32 %v3563_v29, %v3035_v21 }
0x1c87   :  { %v3046_v28 = vadd.f32 %v3563_v29, %v3036_v25  ;;  %v3037_v53 = vmul.f32 %v3562_v51, %v3027_v26 }
0x1c88   :  { %v4272_v38 = vpop.eup %4271 }
0x1c89   :  { %v3028_v37 = vmul.f32 %v4272_v38, %v2996_v35  ;;  %v3049_v54 = vpack.c.bf16 %v3046_v28, %v3045_v3  ;;  %v3047_v30 = vadd.f32 %v3563_v29, %v3037_v53  ;;  %v3582_v28 = vld [vmem:[%s5626_s19 + $0x1] ss:$0 sm:$0xff] }
0x1c8b   :  { %v3038_v57 = vmul.f32 %v3562_v51, %v3028_v37  ;;  %3929 = vmatprep.mubr.msk.bf16.mxu1 %vm382_vm1, %v3049_v54 }
0x1c8d   :  { %v3048_v62 = vadd.f32 %v3563_v29, %v3038_v57 }
0x1c8f   :  { %v3050_v56 = vpack.c.bf16 %v3048_v62, %v3047_v30 }
0x1c91   :  { %3930 = vmatmul.mubr.msk.bf16.vlgmr.msra.gmra.mrb[64].mxu1 %vm382_vm1, %v3050_v56 }
0x1d64   :  { %v3931_v14 = vpop.f32.mrb[64].mxu1 }
0x1d65   :  { %v3125_v2 = vadd.f32 %v3931_v14, %v3568_v60  ;;  %v3116_v1 = vpop.f32.mrb[65].mxu1 }
0x1d66   :  { %v3117_v23 = vadd.f32 %v3568_v60, %v3116_v1  ;;  %v3932_v7 = vpop.f32.mrb[66].mxu1 }
0x1d67   :  { %v3133_v8 = vmul.f32 %v3125_v2, %v3125_v2  ;;  %v3128_v9 = vadd.f32 %v3932_v7, %v3568_v60  ;;  %v3119_v6 = vpop.f32.mrb[67].mxu1 }
0x1d68   :  { %v3131_v10 = vmul.f32 %v3117_v23, %v3117_v23  ;;  %v3120_v20 = vadd.f32 %v3568_v60, %v3119_v6 }
0x1d69   :  { %v3137_v11 = vmul.f32 %v3133_v8, %v3125_v2  ;;  %v3134_v15 = vmul.f32 %v3128_v9, %v3128_v9 }
0x1d6a   :  { %v3135_v13 = vmul.f32 %v3131_v10, %v3117_v23  ;;  %v3132_v33 = vmul.f32 %v3120_v20, %v3120_v20 }
0x1d6b   :  { %v3141_v31 = vmul.f32 0.044715, %v3137_v11  ;;  %v3138_v32 = vmul.f32 %v3134_v15, %v3128_v9 }
0x1d6c   :  { %v3139_v34 = vmul.f32 0.044715, %v3135_v13  ;;  %v3136_v35 = vmul.f32 %v3132_v33, %v3120_v20 }
0x1d6d   :  { %v3145_v36 = vadd.f32 %v3141_v31, %v3125_v2  ;;  %v3142_v40 = vmul.f32 0.044715, %v3138_v32 }
0x1d6e   :  { %v3143_v42 = vadd.f32 %v3139_v34, %v3117_v23  ;;  %v3140_v43 = vmul.f32 0.044715, %v3136_v35 }
0x1d6f   :  { %v3149_v46 = vmul.f32 0.7978846, %v3145_v36  ;;  %v3146_v48 = vadd.f32 %v3142_v40, %v3128_v9  ;;  %v4542_v40 = vmov 0.0|0.0  }
0x1d70   :  { %v3147_v45 = vmul.f32 0.7978846, %v3143_v42  ;;  %v3144_v47 = vadd.f32 %v3140_v43, %v3120_v20  ;;  %3956 = vmatprep.subr.bf16.mxu1 %v4542_v40  ;;  %v4544_v42 = vmov 0.0  }
0x1d71   :  { %4273 = vtanh.f32 %v3149_v46  ;;  %v3150_v4 = vmul.f32 0.7978846, %v3146_v48  ;;  %3953 = vmatprep.mubr.msk.f32.mxu1 %vm4543_vm5, %v4544_v42 }
0x1d72   :  { %4275 = vtanh.f32 %v3147_v45  ;;  %v3148_v24 = vmul.f32 0.7978846, %v3144_v47 }
0x1d73   :  { %4277 = vtanh.f32 %v3150_v4 }
0x1d74   :  { %4279 = vtanh.f32 %v3148_v24 }
0x1d7b   :  { %v4274_v44 = vpop.eup %4273 }
0x1d7c   :  { %v4276_v41 = vpop.eup %4275  ;;  %v3157_v55 = vadd.f32 1.0, %v4274_v44 }
0x1d7d   :  { %v4278_v27 = vpop.eup %4277  ;;  %v3155_v49 = vadd.f32 1.0, %v4276_v41 }
0x1d7e   :  { %v4280_v50 = vpop.eup %4279  ;;  %v3161_v16 = vmul.f32 0.5, %v3157_v55  ;;  %v3158_v18 = vadd.f32 1.0, %v4278_v27 }
0x1d7f   :  { %v3159_v51 = vmul.f32 0.5, %v3155_v49  ;;  %v3156_v52 = vadd.f32 1.0, %v4280_v50 }
0x1d80   :  { %v3162_v17 = vmul.f32 0.5, %v3158_v18  ;;  %v3165_v21 = vmul.f32 %v3161_v16, %v3125_v2  ;;  %v3589_v16 = vld [vmem:[%s5627_s20] ss:$0 sm:$0xff] }
0x1d81   :  { %v3160_v19 = vmul.f32 0.5, %v3156_v52  ;;  %v3163_v29 = vmul.f32 %v3159_v51, %v3117_v23 }
0x1d82   :  { %v3166_v22 = vmul.f32 %v3162_v17, %v3128_v9 }
0x1d83   :  { %v3164_v26 = vmul.f32 %v3160_v19, %v3120_v20 }
0x1d84   :  { %v3168_v25 = vpack.c.bf16 %v3166_v22, %v3165_v21  ;;  %v3590_v21 = vld [vmem:[%s5628_s21] ss:$0 sm:$0xff]  ;;  %s4545_s21 = smov [#allocation17]  }
0x1d85   :  { %v3167_v3 = vpack.c.bf16 %v3164_v26, %v3163_v29  ;;  %s3425_s30 = sshll.u32 %s4545_s21, 4  ;;  %s3426_s30 = int_to_ptr.vmem [resolvable:$true] %s3425_s30 }
0x1d86   :  { %s4491_s23 = scalar_lea.vmem %s3426_s30, 32  ;;  %p4496_p3 = scmp.lt.s32.totalorder %s3426_s30, %s3426_s30 }
0x1d87   :  { %3941 = vmatprep.mubr.msk.bf16.mxu0 %vm320_vm0, %v3167_v3  ;;  %p4492_p2 = scmp.ne.s32.totalorder %s3426_s30, %s4491_s23  ;;  %p4497_p4 = scmp.lt.s32.totalorder %s4491_s23, %s4491_s23 }
0x1d88   :  { %3942 = vmatmul.mubr.msk.bf16.vlgmr.msra.gmra.mrb[48].mxu0 %vm320_vm0, %v3168_v25 }
0x1d89   :  { %p4498_p5 = por %p4497_p4, %p4496_p3 }
0x1d8b   :  { %p4499_p6 = pnand %p4498_p5, %p4492_p2 }
0x1e5b   :  { %v3943_v38 = vpop.f32.mrb[48].mxu0 }
0x1e5c   :  { %v3250_v53 = vpop.f32.mrb[49].mxu0  ;;  %v3259_v37 = vadd.f32 %v3943_v38, %v3582_v28 }
0x1e5d   :  { %v3251_v54 = vadd.f32 %v3582_v28, %v3250_v53  ;;  %v3944_v57 = vpop.f32.mrb[50].mxu0 }
0x1e5e   :  { %v3253_v30 = vpop.f32.mrb[51].mxu0  ;;  %v3262_v56 = vadd.f32 %v3944_v57, %v3582_v28  ;;  %v3267_v63 = vadd.f32 %v3259_v37, %v5524_v58 }
0x1e5f   :  { %v3265_v62 = vadd.f32 %v3251_v54, %v5521_v39  ;;  %v3254_v0 = vadd.f32 %v3582_v28, %v3253_v30 }
0x1e60   :  { %v3268_v60 = vadd.f32 %v3262_v56, %v5534_v61  ;;  %v3277_v2 = vsel %vm382_vm1, %v3267_v63, 0.0 }
0x1e61   :  { %v3266_v12 = vadd.f32 %v3254_v0, %v5527_v5  ;;  %v3271_v59 = vsel %vm382_vm1, %v3265_v62, 0.0 }
0x1e62   :  { %3272 = vadd.xlane.f32.xlu0 %v3271_v59  ;;  %v3280_v1 = vsel %vm382_vm1, %v3268_v60, 0.0 }
0x1e63   :  { %v3274_v14 = vsel %vm382_vm1, %v3266_v12, 0.0 }
0x1e64   :  { %3275 = vadd.xlane.f32.xlu1 %v3274_v14 }
0x1e66   :  { %3278 = vadd.xlane.f32.xlu0 %v3277_v2 }
0x1e68   :  { %3281 = vadd.xlane.f32.xlu1 %v3280_v1 }
0x1eef   :  { %v3273_v39 = vpop.xlane.xlu0 %3272 }
0x1ef0   :  { %v3283_v23 = vmul.f32 0.03125, %v3273_v39 }
0x1ef1   :  { %v3276_v7 = vpop.xlane.xlu1 %3275 }
0x1ef2   :  { %v3287_v58 = vsub.f32 %v3265_v62, %v3283_v23  ;;  %v3284_v8 = vmul.f32 0.03125, %v3276_v7  ;;  %v3343_v62 = vld [vmem:[%s5629_s22] sm:$0x3] }
0x1ef3   :  { %v3279_v5 = vpop.xlane.xlu0 %3278 }
0x1ef4   :  { %v3288_v9 = vsub.f32 %v3266_v12, %v3284_v8  ;;  %v3285_v6 = vmul.f32 0.03125, %v3279_v5  ;;  %v3291_v10 = vmul.f32 %v3287_v58, %v3287_v58 }
0x1ef5   :  { %v3282_v20 = vpop.xlane.xlu1 %3281 }
0x1ef6   :  { %v3289_v61 = vsub.f32 %v3267_v63, %v3285_v6  ;;  %v3286_v11 = vmul.f32 0.03125, %v3282_v20  ;;  %v3295_v15 = vsel %vm382_vm1, %v3291_v10, 0.0  ;;  %v3292_v13 = vmul.f32 %v3288_v9, %v3288_v9 }
0x1ef7   :  { %3296 = vadd.xlane.f32.xlu0 %v3295_v15 }
0x1ef8   :  { %v3290_v33 = vsub.f32 %v3268_v60, %v3286_v11  ;;  %v3298_v31 = vsel %vm382_vm1, %v3292_v13, 0.0  ;;  %v3293_v32 = vmul.f32 %v3289_v61, %v3289_v61 }
0x1ef9   :  { %3299 = vadd.xlane.f32.xlu1 %v3298_v31 }
0x1efa   :  { %v3301_v34 = vsel %vm382_vm1, %v3293_v32, 0.0  ;;  %v3294_v35 = vmul.f32 %v3290_v33, %v3290_v33 }
0x1efb   :  { %3302 = vadd.xlane.f32.xlu0 %v3301_v34 }
0x1efc   :  { %v3304_v36 = vsel %vm382_vm1, %v3294_v35, 0.0 }
0x1efd   :  { %3305 = vadd.xlane.f32.xlu1 %v3304_v36 }
0x1f84   :  { %v3297_v43 = vpop.xlane.xlu0 %3296 }
0x1f85   :  { %v3307_v46 = vmul.f32 0.03125, %v3297_v43 }
0x1f86   :  { %v3300_v48 = vpop.xlane.xlu1 %3299 }
0x1f87   :  { %v3311_v45 = vadd.f32 1e-06, %v3307_v46  ;;  %v3308_v47 = vmul.f32 0.03125, %v3300_v48 }
0x1f88   :  { %v3303_v4 = vpop.xlane.xlu0 %3302 }
0x1f89   :  { %4281 = vrsqrt.f32 %v3311_v45  ;;  %v3312_v24 = vadd.f32 1e-06, %v3308_v47  ;;  %v3309_v44 = vmul.f32 0.03125, %v3303_v4 }
0x1f8a   :  { %v3306_v41 = vpop.xlane.xlu1 %3305 }
0x1f8b   :  { %4283 = vrsqrt.f32 %v3312_v24  ;;  %v3313_v55 = vadd.f32 1e-06, %v3309_v44  ;;  %v3310_v27 = vmul.f32 0.03125, %v3306_v41 }
0x1f8d   :  { %4285 = vrsqrt.f32 %v3313_v55  ;;  %v3314_v49 = vadd.f32 1e-06, %v3310_v27 }
0x1f8f   :  { %4287 = vrsqrt.f32 %v3314_v49 }
0x1f93   :  { %v4282_v50 = vpop.eup %4281 }
0x1f94   :  { %v3319_v18 = vmul.f32 %v4282_v50, %v3287_v58 }
0x1f95   :  { %v4284_v51 = vpop.eup %4283 }
0x1f96   :  { %v3320_v52 = vmul.f32 %v4284_v51, %v3288_v9  ;;  %v3329_v17 = vmul.f32 %v3589_v16, %v3319_v18 }
0x1f97   :  { %v4286_v19 = vpop.eup %4285 }
0x1f98   :  { %v3321_v22 = vmul.f32 %v4286_v19, %v3289_v61  ;;  %v3330_v29 = vmul.f32 %v3589_v16, %v3320_v52  ;;  %v3339_v3 = vadd.f32 %v3590_v21, %v3329_v17 }
0x1f99   :  { %v4288_v26 = vpop.eup %4287 }
0x1f9a   :  { %v3322_v25 = vmul.f32 %v4288_v26, %v3290_v33  ;;  %v3340_v28 = vadd.f32 %v3590_v21, %v3330_v29  ;;  %v3331_v38 = vmul.f32 %v3589_v16, %v3321_v22 }
0x1f9c   :  { %v3957_v53 = vpack.c.bf16 %v3340_v28, %v3339_v3  ;;  %v3332_v37 = vmul.f32 %v3589_v16, %v3322_v25  ;;  %v3341_v54 = vadd.f32 %v3590_v21, %v3331_v38 }
0x1f9e   :  { %3958 = vmatpush3.bf16.msra.mxu1 %v3957_v53  ;;  %v3342_v57 = vadd.f32 %v3590_v21, %v3332_v37 }
0x1f9f   :  { %3959 = vmatprep.subr.bf16.mxu1 %v4542_v40 }
0x1fa0   :  { %v3960_v30 = vpack.c.bf16 %v3342_v57, %v3341_v54 }
0x1fa2   :  { %3961 = vmatpush3.bf16.msra.mxu1 %v3960_v30 }
0x1fa5   :  { %3954 = vmatmul.mubr.msk.f32.vlgmr.msra.gmra.mrb[68].mxu1 %vm382_vm1, %v3343_v62 }
0x2078   :  { %v3413_v56 = vpop.f32.mrb[68].mxu1 }
0x2079   :  { %v3955_v0 = vpop.f32.mrb[69].mxu1  ;;  %3418 = vst.msk [vmem:[#allocation17] sm:$0x3] %vm3417_vm6, %v3413_v56 }
0x207a   :  { %4502 = shalt.err (!%p4499_p6)
}
0x207b   :  { %s5657_s2 = sld [smem:[#allocation32_spill]] }
0x2081   :  { %s4503_s22 = scalar_lea.hbm %s5657_s2, 32 }
0x2082   :  { %p4504_p7 = scmp.ne.s32.totalorder %s5657_s2, %s4503_s22  ;;  %p4507_p8 = scmp.lt.u32.totalorder %s4503_s22, %s5657_s2 }
0x2084   :  { %p4509_p9 = pnand %p4507_p8, %p4504_p7 }
0x2086   :  { %4512 = shalt.err (!%p4509_p9)
}
0x2087   :  { %3428 = dma.vmem_to_hbm [thread:$0]  %s3426_s30, 32, %s5657_s2, [#allocation4]  }
0x2088   :  { %4523 = dma.done.wait [#allocation4], 32  }
0x2089   :  { %4524 = vsyncadd [#allocation4], 4294967264 }
0x208a   :  { %3432 = vsyncpa [#allocation3], 1 }
0x208b   :  { %3433 = vsyncpa [#allocation6], 1 }
0x208c   :  { %3434 = vsyncpa [#allocation9], 1 }
0x208d   :  { %3435 = vsyncpa [#allocation12], 1 }
0x208e   :  { %3436 = vsyncpa [#allocation15], 1 }
0x208f   :  { %3437 = vsyncpa [#allocation4], 1 }

</bundles_post_ra>
